<compile_context>
chip_gen: v5e
topology: v5e:2x2
jax: 0.10.0
libtpu: 0.0.40
codegen_flags: <defaults>
</compile_context>

<pallas_src>
import functools

import jax
import jax.numpy as jnp
from jax.experimental import pallas as pl
from jax.experimental.pallas import tpu as pltpu


# ----------------------------- shared math helper -----------------------------

def _layernorm(x, w, b, eps=1e-5):
    # PyTorch nn.LayerNorm: biased variance, eps inside the sqrt.
    mu = jnp.mean(x, axis=-1, keepdims=True)
    var = jnp.mean((x - mu) ** 2, axis=-1, keepdims=True)
    return (x - mu) * jax.lax.rsqrt(var + eps) * w + b


# ------------------------------- Pallas kernel --------------------------------

def encoder_stack_kernel(
    x_ref,              # (TB, S, D) f32   input batch-tile (read at l==0 only)
    wqkv_ref,           # (D, 3D)    bf16  in_proj_weight^T (q-scale folded in)
    bqkv_ref,           # (1, 3D)    f32   in_proj_bias (q-scale folded in)
    wo_ref,             # (D, D)     bf16  out_proj.weight^T
    bo_ref,             # (1, D)     f32
    n1w_ref, n1b_ref,   # (1, D)     f32   LayerNorm1
    w1_ref,             # (D, F)     bf16  linear1.weight^T
    b1_ref,             # (1, F)     f32
    w2_ref,             # (F, D)     bf16  linear2.weight^T
    b2_ref,             # (1, D)     f32
    n2w_ref, n2b_ref,   # (1, D)     f32   LayerNorm2
    wm_ref,             # (D, D)     bf16  memory linear weight^T
    bm_ref,             # (1, D)     f32
    nfw_ref, nfb_ref,   # (1, D)     f32   final LayerNorm
    out_ref,            # (TB, S, D) f32   written at the last layer only
    carry_ref,          # (TB, S, D) bf16  VMEM scratch: inter-layer activation
    *, num_heads, num_layers, apply_final_norm,
):
    l = pl.program_id(1)
    TB, S, D = out_ref.shape
    H = num_heads
    hd = D // H
    M = TB * S
    bf16, f32 = jnp.bfloat16, jnp.float32

    # Load the input activation into the resident bf16 carry once per batch tile.
    @pl.when(l == 0)
    def _():
        carry_ref[...] = x_ref[...].astype(bf16)

    x2 = carry_ref[...].reshape(M, D)                 # (M, D) bf16
    x2_f32 = x2.astype(f32)

    # ---- QKV projection on the full (TB*S) slab (big-M MXU matmul) ----
    qkv = jnp.dot(x2, wqkv_ref[...],
                  preferred_element_type=f32) + bqkv_ref[0]        # (M, 3D)

    # ---- multi-head self-attention, per sequence (block-diagonal), heads batched ----
    ctx_rows = []
    for b in range(TB):                                # static unroll, TB small
        rs = b * S
        qb = qkv[rs:rs + S, 0 * D:1 * D].reshape(S, H, hd)   # 1/sqrt(hd) folded in
        kb = qkv[rs:rs + S, 1 * D:2 * D].reshape(S, H, hd)
        vb = qkv[rs:rs + S, 2 * D:3 * D].reshape(S, H, hd)
        s = jnp.einsum('qhd,khd->hqk', qb.astype(bf16), kb.astype(bf16),
                       preferred_element_type=f32)               # (H, S, S)
        m = jnp.max(s, axis=-1, keepdims=True)
        p = jnp.exp(s - m)
        p = p * pl.reciprocal(jnp.sum(p, axis=-1, keepdims=True), approx=True)
        ctx = jnp.einsum('hqk,khd->qhd', p.astype(bf16), vb.astype(bf16),
                         preferred_element_type=f32)             # (S, H, hd)
        ctx_rows.append(ctx.reshape(S, D))             # heads -> lane concatenation
    ctx_all = jnp.concatenate(ctx_rows, axis=0)        # (M, D)

    attn = jnp.dot(ctx_all.astype(bf16), wo_ref[...],
                   preferred_element_type=f32) + bo_ref[0]         # (M, D)

    # ---- residual + norm1 (post-norm; dropout = identity in eval) ----
    x = _layernorm(x2_f32 + attn, n1w_ref[0], n1b_ref[0])

    # ---- feed-forward: linear2(relu(linear1(x))) ----
    h1 = jnp.dot(x.astype(bf16), w1_ref[...],
                 preferred_element_type=f32) + b1_ref[0]           # (M, F)
    h1 = jnp.maximum(h1, 0.0)
    h2 = jnp.dot(h1.astype(bf16), w2_ref[...],
                 preferred_element_type=f32) + b2_ref[0]           # (M, D)

    # ---- residual + norm2, store into the bf16 carry ----
    x = _layernorm(x + h2, n2w_ref[0], n2b_ref[0])
    carry_ref[...] = x.reshape(TB, S, D).astype(bf16)

    # ---- fused: memory residual branch after layer num_layers-2 ----
    @pl.when(l == num_layers - 2)
    def _():
        y = carry_ref[...].reshape(M, D)               # bf16
        mem = jnp.dot(y, wm_ref[...],
                      preferred_element_type=f32) + bm_ref[0]
        carry_ref[...] = (y.astype(f32) + mem).reshape(TB, S, D).astype(bf16)

    # ---- fused epilogue: (optional) final LayerNorm + f32 output write ----
    @pl.when(l == num_layers - 1)
    def _():
        y = carry_ref[...].astype(f32)
        if apply_final_norm:
            y = _layernorm(y, nfw_ref[0], nfb_ref[0])
        out_ref[...] = y.astype(out_ref.dtype)


# ------------------------------- JAX wrapper -----------------------------------

def _derive_vmem_limit_bytes():
    """Generation-aware VMEM budget: ~80% of physical, capped at 100 MiB."""
    cap = None
    try:
        cap = getattr(pltpu.get_tpu_info(), "vmem_capacity_bytes", None)
    except Exception:
        cap = None
    if not cap or cap <= 0:
        cap = 64 * 1024 * 1024            # conservative fallback (v7x per-TC)
    return max(32 * 1024 * 1024, min(int(cap * 0.8), 100 * 1024 * 1024))


def mem_transformer_encoder_forward(src_sbd, stacked, *, num_heads, num_layers,
                                    batch_tile=2, apply_final_norm=True):
    """src_sbd: (S, B, D) -- PyTorch convention. Returns (S, B, D)."""
    x = jnp.transpose(src_sbd, (1, 0, 2))             # (B, S, D), D on the lane axis
    B, S, D = x.shape
    F = stacked['w1'].shape[-1]
    L = num_layers
    TB = batch_tile
    assert B % TB == 0, "batch must be divisible by batch_tile"
    # NOTE: keep B // TB even (>=2) so the 'parallel' batch axis splits across
    # both TensorCores on v7x.

    def layer_spec(*shape):                            # layer-stacked weight
        zeros = (0,) * len(shape)
        return pl.BlockSpec((None,) + shape, lambda b, l: (l,) + zeros)

    def fixed_spec(*shape):                            # non-stacked small param
        zeros = (0,) * len(shape)
        return pl.BlockSpec(shape, lambda b, l: zeros)

    act_spec = pl.BlockSpec((TB, S, D), lambda b, l: (b, 0, 0))

    in_specs = [
        act_spec,
        layer_spec(D, 3 * D), layer_spec(1, 3 * D),
        layer_spec(D, D), layer_spec(1, D),
        layer_spec(1, D), layer_spec(1, D),
        layer_spec(D, F), layer_spec(1, F),
        layer_spec(F, D), layer_spec(1, D),
        layer_spec(1, D), layer_spec(1, D),
        fixed_spec(D, D), fixed_spec(1, D),
        fixed_spec(1, D), fixed_spec(1, D),
    ]

    kernel = functools.partial(
        encoder_stack_kernel, num_heads=num_heads, num_layers=L,
        apply_final_norm=apply_final_norm)

    out = pl.pallas_call(
        kernel,
        out_shape=jax.ShapeDtypeStruct((B, S, D), x.dtype),
        grid_spec=pltpu.PrefetchScalarGridSpec(
            num_scalar_prefetch=0,
            grid=(B // TB, L),
            in_specs=in_specs,
            out_specs=act_spec,
            scratch_shapes=[pltpu.VMEM((TB, S, D), jnp.bfloat16)],
        ),
        compiler_params=pltpu.CompilerParams(
            dimension_semantics=("parallel", "arbitrary"),
            vmem_limit_bytes=_derive_vmem_limit_bytes(),
        ),
    )(x, stacked['wqkv'], stacked['bqkv'], stacked['wo'], stacked['bo'],
      stacked['n1w'], stacked['n1b'], stacked['w1'], stacked['b1'],
      stacked['w2'], stacked['b2'], stacked['n2w'], stacked['n2b'],
      stacked['wm'], stacked['bm'], stacked['nfw'], stacked['nfb'])

    return jnp.transpose(out, (1, 0, 2))               # back to (S, B, D)


# ------------------------------ parameters -------------------------------------

def init_params(key, num_layers, d_model, dim_ff):
    """Parameters in PyTorch layout/conventions (Linear: y = x @ W^T + b)."""
    f32 = jnp.float32
    layers = []
    for _ in range(num_layers):
        key, k0, k1, k2, k3, k4, k5, k6, k7 = jax.random.split(key, 9)
        layers.append(dict(
            in_proj_w=0.05 * jax.random.normal(k0, (3 * d_model, d_model), f32),
            in_proj_b=0.02 * jax.random.normal(k1, (3 * d_model,), f32),
            out_proj_w=0.05 * jax.random.normal(k2, (d_model, d_model), f32),
            out_proj_b=0.02 * jax.random.normal(k3, (d_model,), f32),
            n1w=jnp.ones((d_model,), f32), n1b=jnp.zeros((d_model,), f32),
            w1=0.05 * jax.random.normal(k4, (dim_ff, d_model), f32),
            b1=0.02 * jax.random.normal(k5, (dim_ff,), f32),
            w2=0.05 * jax.random.normal(k6, (d_model, dim_ff), f32),
            b2=0.02 * jax.random.normal(k7, (d_model,), f32),
            n2w=jnp.ones((d_model,), f32), n2b=jnp.zeros((d_model,), f32),
        ))
    key, km0, km1 = jax.random.split(key, 3)
    memory_params = dict(
        w=0.05 * jax.random.normal(km0, (d_model, d_model), f32),
        b=0.02 * jax.random.normal(km1, (d_model,), f32),
    )
    norm_params = dict(w=jnp.ones((d_model,), f32), b=jnp.zeros((d_model,), f32))
    return layers, memory_params, norm_params


def prepare_stacked_params(layer_params, memory_params, norm_params, num_heads):
    """Pre-transpose weights, fold attention scale into q, cast matmul weights to bf16,
    stack per-layer params along a leading layer axis for the layer grid."""
    d = layer_params[0]['in_proj_w'].shape[1]
    hd = d // num_heads
    scale = 1.0 / (hd ** 0.5)
    bf16, f32 = jnp.bfloat16, jnp.float32

    def prep(p):
        wqkv = p['in_proj_w'].at[:d].multiply(scale)     # fold 1/sqrt(hd) into q rows
        bqkv = p['in_proj_b'].at[:d].multiply(scale)
        return dict(
            wqkv=wqkv.T.astype(bf16),                    # (D, 3D)
            bqkv=bqkv.reshape(1, 3 * d).astype(f32),
            wo=p['out_proj_w'].T.astype(bf16),           # (D, D)
            bo=p['out_proj_b'].reshape(1, d).astype(f32),
            n1w=p['n1w'].reshape(1, d).astype(f32),
            n1b=p['n1b'].reshape(1, d).astype(f32),
            w1=p['w1'].T.astype(bf16),                   # (D, F)
            b1=p['b1'].reshape(1, -1).astype(f32),
            w2=p['w2'].T.astype(bf16),                   # (F, D)
            b2=p['b2'].reshape(1, d).astype(f32),
            n2w=p['n2w'].reshape(1, d).astype(f32),
            n2b=p['n2b'].reshape(1, d).astype(f32),
        )

    per_layer = [prep(p) for p in layer_params]
    stacked = {k: jnp.stack([lp[k] for lp in per_layer], axis=0)
               for k in per_layer[0]}
    stacked['wm'] = memory_params['w'].T.astype(bf16)
    stacked['bm'] = memory_params['b'].reshape(1, d).astype(f32)
    if norm_params is not None:
        stacked['nfw'] = norm_params['w'].reshape(1, d).astype(f32)
        stacked['nfb'] = norm_params['b'].reshape(1, d).astype(f32)
    else:
        stacked['nfw'] = jnp.ones((1, d), f32)
        stacked['nfb'] = jnp.zeros((1, d), f32)
    return stacked


# ------------------------- pure-JAX reference (f32) ----------------------------

def reference_forward(src_sbd, layer_params, memory_params, norm_params, num_heads):
    x = src_sbd.astype(jnp.float32)                    # (S, B, D)
    S, B, D = x.shape
    H = num_heads
    hd = D // H
    L = len(layer_params)
    for i, p in enumerate(layer_params):
        qkv = jnp.einsum('sbd,ed->sbe', x, p['in_proj_w']) + p['in_proj_b']
        q = qkv[..., :D].reshape(S, B, H, hd)
        k = qkv[..., D:2 * D].reshape(S, B, H, hd)
        v = qkv[..., 2 * D:].reshape(S, B, H, hd)
        s = jnp.einsum('qbhd,kbhd->bhqk', q, k) / (hd ** 0.5)
        a = jax.nn.softmax(s, axis=-1)
        ctx = jnp.einsum('bhqk,kbhd->qbhd', a, v).reshape(S, B, D)
        attn = jnp.einsum('sbd,ed->sbe', ctx, p['out_proj_w']) + p['out_proj_b']
        x = _layernorm(x + attn, p['n1w'], p['n1b'])
        h1 = jax.nn.relu(jnp.einsum('sbd,fd->sbf', x, p['w1']) + p['b1'])
        h2 = jnp.einsum('sbf,df->sbd', h1, p['w2']) + p['b2']
        x = _layernorm(x + h2, p['n2w'], p['n2b'])
        if i == L - 2:
            x = x + (jnp.einsum('sbd,ed->sbe', x, memory_params['w'])
                     + memory_params['b'])
    if norm_params is not None:
        x = _layernorm(x, norm_params['w'], norm_params['b'])
    return x


# ----------------------------------- main ---------------------------------------

if __name__ == "__main__":
    # Small demo shapes (production configs should use TB*S >= 256 and head_dim >= 128
    # for full MXU fill; D multiple of 128 keeps activation stores lane-dense).
    S, B, D = 16, 4, 128      # seq len, batch, d_model
    H = 4                     # nhead
    F = 256                   # dim_feedforward
    L = 3                     # num_layers (memory branch fires after layer L-2)
    TB = 2                    # batch tile -> grid batch axis = B/TB = 2 (even, v7x-friendly)

    key = jax.random.PRNGKey(0)
    k_src, k_par = jax.random.split(key)
    src = jax.random.normal(k_src, (S, B, D), jnp.float32)

    layer_params, memory_params, norm_params = init_params(k_par, L, D, F)
    stacked = prepare_stacked_params(layer_params, memory_params, norm_params, H)

    out = mem_transformer_encoder_forward(
        src, stacked, num_heads=H, num_layers=L, batch_tile=TB,
        apply_final_norm=norm_params is not None)
    out = jax.block_until_ready(out)
    assert out.shape == (S, B, D)
    assert bool(jnp.all(jnp.isfinite(out)))

    # Cross-check vs pure-JAX f32 reference. Kernel uses bf16 MXU operands AND a
    # bf16 inter-layer activation carry => loose tolerance.
    ref = reference_forward(src, layer_params, memory_params, norm_params, H)
    max_err = float(jnp.max(jnp.abs(out - ref)))
    assert max_err < 0.15, f"max abs error vs reference: {max_err}"

    print("KERNEL_OK")
</pallas_src>

<mosaic_0001>
module attributes {stable_mosaic.version = 11 : i64} {
  func.func @encoder_stack_kernel(%arg0: i32, %arg1: i32, %arg2: memref<2x16x128xf32, #tpu.memory_space<vmem>>, %arg3: memref<1x128x384xbf16, #tpu.memory_space<vmem>>, %arg4: memref<1x1x384xf32, #tpu.memory_space<vmem>>, %arg5: memref<1x128x128xbf16, #tpu.memory_space<vmem>>, %arg6: memref<1x1x128xf32, #tpu.memory_space<vmem>>, %arg7: memref<1x1x128xf32, #tpu.memory_space<vmem>>, %arg8: memref<1x1x128xf32, #tpu.memory_space<vmem>>, %arg9: memref<1x128x256xbf16, #tpu.memory_space<vmem>>, %arg10: memref<1x1x256xf32, #tpu.memory_space<vmem>>, %arg11: memref<1x256x128xbf16, #tpu.memory_space<vmem>>, %arg12: memref<1x1x128xf32, #tpu.memory_space<vmem>>, %arg13: memref<1x1x128xf32, #tpu.memory_space<vmem>>, %arg14: memref<1x1x128xf32, #tpu.memory_space<vmem>>, %arg15: memref<128x128xbf16, #tpu.memory_space<vmem>>, %arg16: memref<1x128xf32, #tpu.memory_space<vmem>>, %arg17: memref<1x128xf32, #tpu.memory_space<vmem>>, %arg18: memref<1x128xf32, #tpu.memory_space<vmem>>, %arg19: memref<2x16x128xf32, #tpu.memory_space<vmem>>, %arg20: memref<2x16x128xbf16, #tpu.memory_space<vmem>>) attributes {dimension_semantics = [#tpu.dimension_semantics<parallel>, #tpu.dimension_semantics<arbitrary>], iteration_bounds = array<i64: 2, 3>, scalar_prefetch = 0 : i64, scratch_operands = 1 : i64, tpu.core_type = #tpu.core_type<tc>, window_params = [{transform_indices = @transform_0, window_bounds = array<i64: 2, 16, 128>}, {transform_indices = @transform_1, window_bounds = array<i64: 1, 128, 384>}, {transform_indices = @transform_2, window_bounds = array<i64: 1, 1, 384>}, {transform_indices = @transform_3, window_bounds = array<i64: 1, 128, 128>}, {transform_indices = @transform_4, window_bounds = array<i64: 1, 1, 128>}, {transform_indices = @transform_5, window_bounds = array<i64: 1, 1, 128>}, {transform_indices = @transform_6, window_bounds = array<i64: 1, 1, 128>}, {transform_indices = @transform_7, window_bounds = array<i64: 1, 128, 256>}, {transform_indices = @transform_8, window_bounds = array<i64: 1, 1, 256>}, {transform_indices = @transform_9, window_bounds = array<i64: 1, 256, 128>}, {transform_indices = @transform_10, window_bounds = array<i64: 1, 1, 128>}, {transform_indices = @transform_11, window_bounds = array<i64: 1, 1, 128>}, {transform_indices = @transform_12, window_bounds = array<i64: 1, 1, 128>}, {pipeline_mode = #tpu.pipeline_mode<synchronous>, transform_indices = @transform_13, window_bounds = array<i64: 128, 128>}, {pipeline_mode = #tpu.pipeline_mode<synchronous>, transform_indices = @transform_14, window_bounds = array<i64: 1, 128>}, {pipeline_mode = #tpu.pipeline_mode<synchronous>, transform_indices = @transform_15, window_bounds = array<i64: 1, 128>}, {pipeline_mode = #tpu.pipeline_mode<synchronous>, transform_indices = @transform_16, window_bounds = array<i64: 1, 128>}, {transform_indices = @transform_17, window_bounds = array<i64: 2, 16, 128>}]} {
    %c0_i32 = arith.constant 0 : i32
    %0 = arith.cmpi eq, %arg1, %c0_i32 : i32
    %1 = arith.extui %0 : i1 to i32
    %c0_i32_0 = arith.constant 0 : i32
    %2 = arith.cmpi ne, %1, %c0_i32_0 : i32
    scf.if %2 {
      %c0_66 = arith.constant 0 : index
      %c0_67 = arith.constant 0 : index
      %c0_68 = arith.constant 0 : index
      %159 = vector.load %arg2[%c0_66, %c0_67, %c0_68] : memref<2x16x128xf32, #tpu.memory_space<vmem>>, vector<2x16x128xf32>
      %160 = arith.truncf %159 : vector<2x16x128xf32> to vector<2x16x128xbf16>
      %c0_69 = arith.constant 0 : index
      %c0_70 = arith.constant 0 : index
      %c0_71 = arith.constant 0 : index
      %161 = vector.load %arg20[%c0_69, %c0_70, %c0_71] : memref<2x16x128xbf16, #tpu.memory_space<vmem>>, vector<2x16x128xbf16>
      tpu.vector_store %arg20[%c0_69, %c0_70, %c0_71], %160 {strides = array<i32>} : memref<2x16x128xbf16, #tpu.memory_space<vmem>>, vector<2x16x128xbf16>,
    } else {
    }
    %c0 = arith.constant 0 : index
    %c0_1 = arith.constant 0 : index
    %c0_2 = arith.constant 0 : index
    %3 = vector.load %arg20[%c0, %c0_1, %c0_2] : memref<2x16x128xbf16, #tpu.memory_space<vmem>>, vector<2x16x128xbf16>
    %4 = vector.shape_cast %3 : vector<2x16x128xbf16> to vector<32x128xbf16>
    %5 = arith.extf %4 : vector<32x128xbf16> to vector<32x128xf32>
    %c0_3 = arith.constant 0 : index
    %c0_4 = arith.constant 0 : index
    %c0_5 = arith.constant 0 : index
    %6 = vector.load %arg3[%c0_3, %c0_4, %c0_5] : memref<1x128x384xbf16, #tpu.memory_space<vmem>>, vector<1x128x384xbf16>
    %7 = vector.shape_cast %6 : vector<1x128x384xbf16> to vector<128x384xbf16>
    %cst = arith.constant dense<0.000000e+00> : vector<32x384xf32>
    %8 = tpu.matmul %4, %7, %cst {dimension_numbers = #tpu.dot_dimension_numbers<[1], [0], [0], [1], [0, 0, 1, 1], [], []>} : vector<32x128xbf16>, vector<128x384xbf16>, vector<32x384xf32> -> vector<32x384xf32>
    %c0_6 = arith.constant 0 : index
    %c0_7 = arith.constant 0 : index
    %c0_8 = arith.constant 0 : index
    %9 = vector.load %arg4[%c0_6, %c0_7, %c0_8] : memref<1x1x384xf32, #tpu.memory_space<vmem>>, vector<1x1x384xf32>
    %10 = vector.shape_cast %9 : vector<1x1x384xf32> to vector<384xf32>
    %11 = vector.shape_cast %10 : vector<384xf32> to vector<1x384xf32>
    %12 = vector.broadcast %11 : vector<1x384xf32> to vector<32x384xf32>
    %13 = arith.addf %8, %12 : vector<32x384xf32>
    %14 = vector.extract_strided_slice %13 {offsets = [0, 0], sizes = [16, 128], strides = [1, 1]} : vector<32x384xf32> to vector<16x128xf32>
    %15 = vector.shape_cast %14 : vector<16x128xf32> to vector<16x4x32xf32>
    %16 = vector.extract_strided_slice %13 {offsets = [0, 128], sizes = [16, 128], strides = [1, 1]} : vector<32x384xf32> to vector<16x128xf32>
    %17 = vector.shape_cast %16 : vector<16x128xf32> to vector<16x4x32xf32>
    %18 = vector.extract_strided_slice %13 {offsets = [0, 256], sizes = [16, 128], strides = [1, 1]} : vector<32x384xf32> to vector<16x128xf32>
    %19 = vector.shape_cast %18 : vector<16x128xf32> to vector<16x4x32xf32>
    %20 = arith.truncf %15 : vector<16x4x32xf32> to vector<16x4x32xbf16>
    %21 = arith.truncf %17 : vector<16x4x32xf32> to vector<16x4x32xbf16>
    "tpu.trace_start"() <{level = 10 : i32, message = "qhd,khd->hqk"}> : () -> ()
    %cst_9 = arith.constant dense<0.000000e+00> : vector<4x16x16xf32>
    %22 = tpu.matmul %20, %21, %cst_9 {dimension_numbers = #tpu.dot_dimension_numbers<[2], [2], [0], [0], [0, 1, 0, 0, 1, 0], [1], [1]>} : vector<16x4x32xbf16>, vector<16x4x32xbf16>, vector<4x16x16xf32> -> vector<4x16x16xf32>
    "tpu.trace_stop"() : () -> ()
    %cst_10 = arith.constant dense<0xFF800000> : vector<4x16xf32>
    %23 = vector.multi_reduction <maximumf>, %22, %cst_10 [2] : vector<4x16x16xf32> to vector<4x16xf32>
    %24 = vector.shape_cast %23 : vector<4x16xf32> to vector<4x16x1xf32>
    %25 = vector.broadcast %24 : vector<4x16x1xf32> to vector<4x16x16xf32>
    %26 = arith.subf %22, %25 : vector<4x16x16xf32>
    %27 = math.exp %26 : vector<4x16x16xf32>
    %cst_11 = arith.constant dense<0.000000e+00> : vector<4x16xf32>
    %28 = vector.multi_reduction <add>, %27, %cst_11 [2] : vector<4x16x16xf32> to vector<4x16xf32>
    %29 = vector.shape_cast %28 : vector<4x16xf32> to vector<4x16x1xf32>
    %30 = tpu.reciprocal %29 {approx = true} : vector<4x16x1xf32> -> vector<4x16x1xf32>
    %31 = vector.broadcast %30 : vector<4x16x1xf32> to vector<4x16x16xf32>
    %32 = arith.mulf %27, %31 : vector<4x16x16xf32>
    %33 = arith.truncf %32 : vector<4x16x16xf32> to vector<4x16x16xbf16>
    %34 = arith.truncf %19 : vector<16x4x32xf32> to vector<16x4x32xbf16>
    "tpu.trace_start"() <{level = 10 : i32, message = "hqk,khd->qhd"}> : () -> ()
    %cst_12 = arith.constant dense<0.000000e+00> : vector<4x32x16xf32>
    %35 = tpu.matmul %34, %33, %cst_12 {dimension_numbers = #tpu.dot_dimension_numbers<[0], [2], [2], [1], [0, 1, 0, 2, 1, 1], [1], [0]>} : vector<16x4x32xbf16>, vector<4x16x16xbf16>, vector<4x32x16xf32> -> vector<4x32x16xf32>
    %36 = tpu.transpose %35, [2, 0, 1] : vector<4x32x16xf32> -> vector<16x4x32xf32>
    "tpu.trace_stop"() : () -> ()
    %37 = vector.shape_cast %36 : vector<16x4x32xf32> to vector<16x128xf32>
    %38 = vector.extract_strided_slice %13 {offsets = [16, 0], sizes = [16, 128], strides = [1, 1]} : vector<32x384xf32> to vector<16x128xf32>
    %39 = vector.shape_cast %38 : vector<16x128xf32> to vector<16x4x32xf32>
    %40 = vector.extract_strided_slice %13 {offsets = [16, 128], sizes = [16, 128], strides = [1, 1]} : vector<32x384xf32> to vector<16x128xf32>
    %41 = vector.shape_cast %40 : vector<16x128xf32> to vector<16x4x32xf32>
    %42 = vector.extract_strided_slice %13 {offsets = [16, 256], sizes = [16, 128], strides = [1, 1]} : vector<32x384xf32> to vector<16x128xf32>
    %43 = vector.shape_cast %42 : vector<16x128xf32> to vector<16x4x32xf32>
    %44 = arith.truncf %39 : vector<16x4x32xf32> to vector<16x4x32xbf16>
    %45 = arith.truncf %41 : vector<16x4x32xf32> to vector<16x4x32xbf16>
    "tpu.trace_start"() <{level = 10 : i32, message = "qhd,khd->hqk"}> : () -> ()
    %cst_13 = arith.constant dense<0.000000e+00> : vector<4x16x16xf32>
    %46 = tpu.matmul %44, %45, %cst_13 {dimension_numbers = #tpu.dot_dimension_numbers<[2], [2], [0], [0], [0, 1, 0, 0, 1, 0], [1], [1]>} : vector<16x4x32xbf16>, vector<16x4x32xbf16>, vector<4x16x16xf32> -> vector<4x16x16xf32>
    "tpu.trace_stop"() : () -> ()
    %cst_14 = arith.constant dense<0xFF800000> : vector<4x16xf32>
    %47 = vector.multi_reduction <maximumf>, %46, %cst_14 [2] : vector<4x16x16xf32> to vector<4x16xf32>
    %48 = vector.shape_cast %47 : vector<4x16xf32> to vector<4x16x1xf32>
    %49 = vector.broadcast %48 : vector<4x16x1xf32> to vector<4x16x16xf32>
    %50 = arith.subf %46, %49 : vector<4x16x16xf32>
    %51 = math.exp %50 : vector<4x16x16xf32>
    %cst_15 = arith.constant dense<0.000000e+00> : vector<4x16xf32>
    %52 = vector.multi_reduction <add>, %51, %cst_15 [2] : vector<4x16x16xf32> to vector<4x16xf32>
    %53 = vector.shape_cast %52 : vector<4x16xf32> to vector<4x16x1xf32>
    %54 = tpu.reciprocal %53 {approx = true} : vector<4x16x1xf32> -> vector<4x16x1xf32>
    %55 = vector.broadcast %54 : vector<4x16x1xf32> to vector<4x16x16xf32>
    %56 = arith.mulf %51, %55 : vector<4x16x16xf32>
    %57 = arith.truncf %56 : vector<4x16x16xf32> to vector<4x16x16xbf16>
    %58 = arith.truncf %43 : vector<16x4x32xf32> to vector<16x4x32xbf16>
    "tpu.trace_start"() <{level = 10 : i32, message = "hqk,khd->qhd"}> : () -> ()
    %cst_16 = arith.constant dense<0.000000e+00> : vector<4x32x16xf32>
    %59 = tpu.matmul %58, %57, %cst_16 {dimension_numbers = #tpu.dot_dimension_numbers<[0], [2], [2], [1], [0, 1, 0, 2, 1, 1], [1], [0]>} : vector<16x4x32xbf16>, vector<4x16x16xbf16>, vector<4x32x16xf32> -> vector<4x32x16xf32>
    %60 = tpu.transpose %59, [2, 0, 1] : vector<4x32x16xf32> -> vector<16x4x32xf32>
    "tpu.trace_stop"() : () -> ()
    %61 = vector.shape_cast %60 : vector<16x4x32xf32> to vector<16x128xf32>
    %62 = tpu.concatenate %37, %61 in 0 : vector<16x128xf32>, vector<16x128xf32> -> vector<32x128xf32>
    %63 = arith.truncf %62 : vector<32x128xf32> to vector<32x128xbf16>
    %c0_17 = arith.constant 0 : index
    %c0_18 = arith.constant 0 : index
    %c0_19 = arith.constant 0 : index
    %64 = vector.load %arg5[%c0_17, %c0_18, %c0_19] : memref<1x128x128xbf16, #tpu.memory_space<vmem>>, vector<1x128x128xbf16>
    %65 = vector.shape_cast %64 : vector<1x128x128xbf16> to vector<128x128xbf16>
    %cst_20 = arith.constant dense<0.000000e+00> : vector<32x128xf32>
    %66 = tpu.matmul %63, %65, %cst_20 {dimension_numbers = #tpu.dot_dimension_numbers<[1], [0], [0], [1], [0, 0, 1, 1], [], []>} : vector<32x128xbf16>, vector<128x128xbf16>, vector<32x128xf32> -> vector<32x128xf32>
    %c0_21 = arith.constant 0 : index
    %c0_22 = arith.constant 0 : index
    %c0_23 = arith.constant 0 : index
    %67 = vector.load %arg6[%c0_21, %c0_22, %c0_23] : memref<1x1x128xf32, #tpu.memory_space<vmem>>, vector<1x1x128xf32>
    %68 = vector.shape_cast %67 : vector<1x1x128xf32> to vector<128xf32>
    %69 = vector.shape_cast %68 : vector<128xf32> to vector<1x128xf32>
    %70 = vector.broadcast %69 : vector<1x128xf32> to vector<32x128xf32>
    %71 = arith.addf %66, %70 : vector<32x128xf32>
    %72 = arith.addf %5, %71 : vector<32x128xf32>
    %c0_24 = arith.constant 0 : index
    %c0_25 = arith.constant 0 : index
    %c0_26 = arith.constant 0 : index
    %73 = vector.load %arg7[%c0_24, %c0_25, %c0_26] : memref<1x1x128xf32, #tpu.memory_space<vmem>>, vector<1x1x128xf32>
    %74 = vector.shape_cast %73 : vector<1x1x128xf32> to vector<128xf32>
    %c0_27 = arith.constant 0 : index
    %c0_28 = arith.constant 0 : index
    %c0_29 = arith.constant 0 : index
    %75 = vector.load %arg8[%c0_27, %c0_28, %c0_29] : memref<1x1x128xf32, #tpu.memory_space<vmem>>, vector<1x1x128xf32>
    %76 = vector.shape_cast %75 : vector<1x1x128xf32> to vector<128xf32>
    %cst_30 = arith.constant dense<0.000000e+00> : vector<32xf32>
    %77 = vector.multi_reduction <add>, %72, %cst_30 [1] : vector<32x128xf32> to vector<32xf32>
    %78 = vector.shape_cast %77 : vector<32xf32> to vector<32x1xf32>
    %cst_31 = arith.constant 1.280000e+02 : f32
    %79 = vector.broadcast %cst_31 : f32 to vector<32x1xf32>
    %80 = arith.divf %78, %79 : vector<32x1xf32>
    %81 = vector.broadcast %80 : vector<32x1xf32> to vector<32x128xf32>
    %82 = arith.subf %72, %81 : vector<32x128xf32>
    %83 = arith.mulf %82, %82 : vector<32x128xf32>
    %cst_32 = arith.constant dense<0.000000e+00> : vector<32xf32>
    %84 = vector.multi_reduction <add>, %83, %cst_32 [1] : vector<32x128xf32> to vector<32xf32>
    %85 = vector.shape_cast %84 : vector<32xf32> to vector<32x1xf32>
    %cst_33 = arith.constant 1.280000e+02 : f32
    %86 = vector.broadcast %cst_33 : f32 to vector<32x1xf32>
    %87 = arith.divf %85, %86 : vector<32x1xf32>
    %88 = vector.broadcast %80 : vector<32x1xf32> to vector<32x128xf32>
    %89 = arith.subf %72, %88 : vector<32x128xf32>
    %cst_34 = arith.constant 9.99999974E-6 : f32
    %90 = vector.broadcast %cst_34 : f32 to vector<32x1xf32>
    %91 = arith.addf %87, %90 : vector<32x1xf32>
    %92 = math.rsqrt %91 : vector<32x1xf32>
    %93 = vector.broadcast %92 : vector<32x1xf32> to vector<32x128xf32>
    %94 = arith.mulf %89, %93 : vector<32x128xf32>
    %95 = vector.shape_cast %74 : vector<128xf32> to vector<1x128xf32>
    %96 = vector.broadcast %95 : vector<1x128xf32> to vector<32x128xf32>
    %97 = arith.mulf %94, %96 : vector<32x128xf32>
    %98 = vector.shape_cast %76 : vector<128xf32> to vector<1x128xf32>
    %99 = vector.broadcast %98 : vector<1x128xf32> to vector<32x128xf32>
    %100 = arith.addf %97, %99 : vector<32x128xf32>
    %101 = arith.truncf %100 : vector<32x128xf32> to vector<32x128xbf16>
    %c0_35 = arith.constant 0 : index
    %c0_36 = arith.constant 0 : index
    %c0_37 = arith.constant 0 : index
    %102 = vector.load %arg9[%c0_35, %c0_36, %c0_37] : memref<1x128x256xbf16, #tpu.memory_space<vmem>>, vector<1x128x256xbf16>
    %103 = vector.shape_cast %102 : vector<1x128x256xbf16> to vector<128x256xbf16>
    %cst_38 = arith.constant dense<0.000000e+00> : vector<32x256xf32>
    %104 = tpu.matmul %101, %103, %cst_38 {dimension_numbers = #tpu.dot_dimension_numbers<[1], [0], [0], [1], [0, 0, 1, 1], [], []>} : vector<32x128xbf16>, vector<128x256xbf16>, vector<32x256xf32> -> vector<32x256xf32>
    %c0_39 = arith.constant 0 : index
    %c0_40 = arith.constant 0 : index
    %c0_41 = arith.constant 0 : index
    %105 = vector.load %arg10[%c0_39, %c0_40, %c0_41] : memref<1x1x256xf32, #tpu.memory_space<vmem>>, vector<1x1x256xf32>
    %106 = vector.shape_cast %105 : vector<1x1x256xf32> to vector<256xf32>
    %107 = vector.shape_cast %106 : vector<256xf32> to vector<1x256xf32>
    %108 = vector.broadcast %107 : vector<1x256xf32> to vector<32x256xf32>
    %109 = arith.addf %104, %108 : vector<32x256xf32>
    %cst_42 = arith.constant 0.000000e+00 : f32
    %110 = vector.broadcast %cst_42 : f32 to vector<32x256xf32>
    %111 = arith.maximumf %109, %110 : vector<32x256xf32>
    %112 = arith.truncf %111 : vector<32x256xf32> to vector<32x256xbf16>
    %c0_43 = arith.constant 0 : index
    %c0_44 = arith.constant 0 : index
    %c0_45 = arith.constant 0 : index
    %113 = vector.load %arg11[%c0_43, %c0_44, %c0_45] : memref<1x256x128xbf16, #tpu.memory_space<vmem>>, vector<1x256x128xbf16>
    %114 = vector.shape_cast %113 : vector<1x256x128xbf16> to vector<256x128xbf16>
    %cst_46 = arith.constant dense<0.000000e+00> : vector<32x128xf32>
    %115 = tpu.matmul %112, %114, %cst_46 {dimension_numbers = #tpu.dot_dimension_numbers<[1], [0], [0], [1], [0, 0, 1, 1], [], []>} : vector<32x256xbf16>, vector<256x128xbf16>, vector<32x128xf32> -> vector<32x128xf32>
    %c0_47 = arith.constant 0 : index
    %c0_48 = arith.constant 0 : index
    %c0_49 = arith.constant 0 : index
    %116 = vector.load %arg12[%c0_47, %c0_48, %c0_49] : memref<1x1x128xf32, #tpu.memory_space<vmem>>, vector<1x1x128xf32>
    %117 = vector.shape_cast %116 : vector<1x1x128xf32> to vector<128xf32>
    %118 = vector.shape_cast %117 : vector<128xf32> to vector<1x128xf32>
    %119 = vector.broadcast %118 : vector<1x128xf32> to vector<32x128xf32>
    %120 = arith.addf %115, %119 : vector<32x128xf32>
    %121 = arith.addf %100, %120 : vector<32x128xf32>
    %c0_50 = arith.constant 0 : index
    %c0_51 = arith.constant 0 : index
    %c0_52 = arith.constant 0 : index
    %122 = vector.load %arg13[%c0_50, %c0_51, %c0_52] : memref<1x1x128xf32, #tpu.memory_space<vmem>>, vector<1x1x128xf32>
    %123 = vector.shape_cast %122 : vector<1x1x128xf32> to vector<128xf32>
    %c0_53 = arith.constant 0 : index
    %c0_54 = arith.constant 0 : index
    %c0_55 = arith.constant 0 : index
    %124 = vector.load %arg14[%c0_53, %c0_54, %c0_55] : memref<1x1x128xf32, #tpu.memory_space<vmem>>, vector<1x1x128xf32>
    %125 = vector.shape_cast %124 : vector<1x1x128xf32> to vector<128xf32>
    %cst_56 = arith.constant dense<0.000000e+00> : vector<32xf32>
    %126 = vector.multi_reduction <add>, %121, %cst_56 [1] : vector<32x128xf32> to vector<32xf32>
    %127 = vector.shape_cast %126 : vector<32xf32> to vector<32x1xf32>
    %cst_57 = arith.constant 1.280000e+02 : f32
    %128 = vector.broadcast %cst_57 : f32 to vector<32x1xf32>
    %129 = arith.divf %127, %128 : vector<32x1xf32>
    %130 = vector.broadcast %129 : vector<32x1xf32> to vector<32x128xf32>
    %131 = arith.subf %121, %130 : vector<32x128xf32>
    %132 = arith.mulf %131, %131 : vector<32x128xf32>
    %cst_58 = arith.constant dense<0.000000e+00> : vector<32xf32>
    %133 = vector.multi_reduction <add>, %132, %cst_58 [1] : vector<32x128xf32> to vector<32xf32>
    %134 = vector.shape_cast %133 : vector<32xf32> to vector<32x1xf32>
    %cst_59 = arith.constant 1.280000e+02 : f32
    %135 = vector.broadcast %cst_59 : f32 to vector<32x1xf32>
    %136 = arith.divf %134, %135 : vector<32x1xf32>
    %137 = vector.broadcast %129 : vector<32x1xf32> to vector<32x128xf32>
    %138 = arith.subf %121, %137 : vector<32x128xf32>
    %cst_60 = arith.constant 9.99999974E-6 : f32
    %139 = vector.broadcast %cst_60 : f32 to vector<32x1xf32>
    %140 = arith.addf %136, %139 : vector<32x1xf32>
    %141 = math.rsqrt %140 : vector<32x1xf32>
    %142 = vector.broadcast %141 : vector<32x1xf32> to vector<32x128xf32>
    %143 = arith.mulf %138, %142 : vector<32x128xf32>
    %144 = vector.shape_cast %123 : vector<128xf32> to vector<1x128xf32>
    %145 = vector.broadcast %144 : vector<1x128xf32> to vector<32x128xf32>
    %146 = arith.mulf %143, %145 : vector<32x128xf32>
    %147 = vector.shape_cast %125 : vector<128xf32> to vector<1x128xf32>
    %148 = vector.broadcast %147 : vector<1x128xf32> to vector<32x128xf32>
    %149 = arith.addf %146, %148 : vector<32x128xf32>
    %150 = vector.shape_cast %149 : vector<32x128xf32> to vector<2x16x128xf32>
    %151 = arith.truncf %150 : vector<2x16x128xf32> to vector<2x16x128xbf16>
    %c0_61 = arith.constant 0 : index
    %c0_62 = arith.constant 0 : index
    %c0_63 = arith.constant 0 : index
    %152 = vector.load %arg20[%c0_61, %c0_62, %c0_63] : memref<2x16x128xbf16, #tpu.memory_space<vmem>>, vector<2x16x128xbf16>
    tpu.vector_store %arg20[%c0_61, %c0_62, %c0_63], %151 {strides = array<i32>} : memref<2x16x128xbf16, #tpu.memory_space<vmem>>, vector<2x16x128xbf16>,
    %c1_i32 = arith.constant 1 : i32
    %153 = arith.cmpi eq, %arg1, %c1_i32 : i32
    %154 = arith.extui %153 : i1 to i32
    %c0_i32_64 = arith.constant 0 : i32
    %155 = arith.cmpi ne, %154, %c0_i32_64 : i32
    scf.if %155 {
      %c0_66 = arith.constant 0 : index
      %c0_67 = arith.constant 0 : index
      %c0_68 = arith.constant 0 : index
      %159 = vector.load %arg20[%c0_66, %c0_67, %c0_68] : memref<2x16x128xbf16, #tpu.memory_space<vmem>>, vector<2x16x128xbf16>
      %160 = vector.shape_cast %159 : vector<2x16x128xbf16> to vector<32x128xbf16>
      %c0_69 = arith.constant 0 : index
      %c0_70 = arith.constant 0 : index
      %161 = vector.load %arg15[%c0_69, %c0_70] : memref<128x128xbf16, #tpu.memory_space<vmem>>, vector<128x128xbf16>
      %cst_71 = arith.constant dense<0.000000e+00> : vector<32x128xf32>
      %162 = tpu.matmul %160, %161, %cst_71 {dimension_numbers = #tpu.dot_dimension_numbers<[1], [0], [0], [1], [0, 0, 1, 1], [], []>} : vector<32x128xbf16>, vector<128x128xbf16>, vector<32x128xf32> -> vector<32x128xf32>
      %c0_72 = arith.constant 0 : index
      %c0_73 = arith.constant 0 : index
      %163 = vector.load %arg16[%c0_72, %c0_73] : memref<1x128xf32, #tpu.memory_space<vmem>>, vector<1x128xf32>
      %164 = vector.shape_cast %163 : vector<1x128xf32> to vector<128xf32>
      %165 = vector.shape_cast %164 : vector<128xf32> to vector<1x128xf32>
      %166 = vector.broadcast %165 : vector<1x128xf32> to vector<32x128xf32>
      %167 = arith.addf %162, %166 : vector<32x128xf32>
      %168 = arith.extf %160 : vector<32x128xbf16> to vector<32x128xf32>
      %169 = arith.addf %168, %167 : vector<32x128xf32>
      %170 = vector.shape_cast %169 : vector<32x128xf32> to vector<2x16x128xf32>
      %171 = arith.truncf %170 : vector<2x16x128xf32> to vector<2x16x128xbf16>
      %c0_74 = arith.constant 0 : index
      %c0_75 = arith.constant 0 : index
      %c0_76 = arith.constant 0 : index
      %172 = vector.load %arg20[%c0_74, %c0_75, %c0_76] : memref<2x16x128xbf16, #tpu.memory_space<vmem>>, vector<2x16x128xbf16>
      tpu.vector_store %arg20[%c0_74, %c0_75, %c0_76], %171 {strides = array<i32>} : memref<2x16x128xbf16, #tpu.memory_space<vmem>>, vector<2x16x128xbf16>,
    } else {
    }
    %c2_i32 = arith.constant 2 : i32
    %156 = arith.cmpi eq, %arg1, %c2_i32 : i32
    %157 = arith.extui %156 : i1 to i32
    %c0_i32_65 = arith.constant 0 : i32
    %158 = arith.cmpi ne, %157, %c0_i32_65 : i32
    scf.if %158 {
      %c0_66 = arith.constant 0 : index
      %c0_67 = arith.constant 0 : index
      %c0_68 = arith.constant 0 : index
      %159 = vector.load %arg20[%c0_66, %c0_67, %c0_68] : memref<2x16x128xbf16, #tpu.memory_space<vmem>>, vector<2x16x128xbf16>
      %160 = arith.extf %159 : vector<2x16x128xbf16> to vector<2x16x128xf32>
      %c0_69 = arith.constant 0 : index
      %c0_70 = arith.constant 0 : index
      %161 = vector.load %arg17[%c0_69, %c0_70] : memref<1x128xf32, #tpu.memory_space<vmem>>, vector<1x128xf32>
      %162 = vector.shape_cast %161 : vector<1x128xf32> to vector<128xf32>
      %c0_71 = arith.constant 0 : index
      %c0_72 = arith.constant 0 : index
      %163 = vector.load %arg18[%c0_71, %c0_72] : memref<1x128xf32, #tpu.memory_space<vmem>>, vector<1x128xf32>
      %164 = vector.shape_cast %163 : vector<1x128xf32> to vector<128xf32>
      %cst_73 = arith.constant dense<0.000000e+00> : vector<2x16xf32>
      %165 = vector.multi_reduction <add>, %160, %cst_73 [2] : vector<2x16x128xf32> to vector<2x16xf32>
      %166 = vector.shape_cast %165 : vector<2x16xf32> to vector<2x16x1xf32>
      %cst_74 = arith.constant 1.280000e+02 : f32
      %167 = vector.broadcast %cst_74 : f32 to vector<2x16x1xf32>
      %168 = arith.divf %166, %167 : vector<2x16x1xf32>
      %169 = vector.broadcast %168 : vector<2x16x1xf32> to vector<2x16x128xf32>
      %170 = arith.subf %160, %169 : vector<2x16x128xf32>
      %171 = arith.mulf %170, %170 : vector<2x16x128xf32>
      %cst_75 = arith.constant dense<0.000000e+00> : vector<2x16xf32>
      %172 = vector.multi_reduction <add>, %171, %cst_75 [2] : vector<2x16x128xf32> to vector<2x16xf32>
      %173 = vector.shape_cast %172 : vector<2x16xf32> to vector<2x16x1xf32>
      %cst_76 = arith.constant 1.280000e+02 : f32
      %174 = vector.broadcast %cst_76 : f32 to vector<2x16x1xf32>
      %175 = arith.divf %173, %174 : vector<2x16x1xf32>
      %176 = vector.broadcast %168 : vector<2x16x1xf32> to vector<2x16x128xf32>
      %177 = arith.subf %160, %176 : vector<2x16x128xf32>
      %cst_77 = arith.constant 9.99999974E-6 : f32
      %178 = vector.broadcast %cst_77 : f32 to vector<2x16x1xf32>
      %179 = arith.addf %175, %178 : vector<2x16x1xf32>
      %180 = math.rsqrt %179 : vector<2x16x1xf32>
      %181 = vector.broadcast %180 : vector<2x16x1xf32> to vector<2x16x128xf32>
      %182 = arith.mulf %177, %181 : vector<2x16x128xf32>
      %183 = vector.shape_cast %162 : vector<128xf32> to vector<1x1x128xf32>
      %184 = vector.broadcast %183 : vector<1x1x128xf32> to vector<2x16x128xf32>
      %185 = arith.mulf %182, %184 : vector<2x16x128xf32>
      %186 = vector.shape_cast %164 : vector<128xf32> to vector<1x1x128xf32>
      %187 = vector.broadcast %186 : vector<1x1x128xf32> to vector<2x16x128xf32>
      %188 = arith.addf %185, %187 : vector<2x16x128xf32>
      %c0_78 = arith.constant 0 : index
      %c0_79 = arith.constant 0 : index
      %c0_80 = arith.constant 0 : index
      %189 = vector.load %arg19[%c0_78, %c0_79, %c0_80] : memref<2x16x128xf32, #tpu.memory_space<vmem>>, vector<2x16x128xf32>
      tpu.vector_store %arg19[%c0_78, %c0_79, %c0_80], %188 {strides = array<i32>} : memref<2x16x128xf32, #tpu.memory_space<vmem>>, vector<2x16x128xf32>,
    } else {
    }
    return
  }
  func.func @transform_0(%arg0: i32, %arg1: i32) -> (i32, i32, i32) {
    %c0_i32 = arith.constant 0 : i32
    %c0_i32_0 = arith.constant 0 : i32
    %c0_i32_1 = arith.constant 0 : i32
    return %arg0, %c0_i32, %c0_i32_0 : i32, i32, i32
  }
  func.func @transform_1(%arg0: i32, %arg1: i32) -> (i32, i32, i32) {
    %c0_i32 = arith.constant 0 : i32
    %c0_i32_0 = arith.constant 0 : i32
    %c0_i32_1 = arith.constant 0 : i32
    return %arg1, %c0_i32, %c0_i32_0 : i32, i32, i32
  }
  func.func @transform_2(%arg0: i32, %arg1: i32) -> (i32, i32, i32) {
    %c0_i32 = arith.constant 0 : i32
    %c0_i32_0 = arith.constant 0 : i32
    %c0_i32_1 = arith.constant 0 : i32
    return %arg1, %c0_i32, %c0_i32_0 : i32, i32, i32
  }
  func.func @transform_3(%arg0: i32, %arg1: i32) -> (i32, i32, i32) {
    %c0_i32 = arith.constant 0 : i32
    %c0_i32_0 = arith.constant 0 : i32
    %c0_i32_1 = arith.constant 0 : i32
    return %arg1, %c0_i32, %c0_i32_0 : i32, i32, i32
  }
  func.func @transform_4(%arg0: i32, %arg1: i32) -> (i32, i32, i32) {
    %c0_i32 = arith.constant 0 : i32
    %c0_i32_0 = arith.constant 0 : i32
    %c0_i32_1 = arith.constant 0 : i32
    return %arg1, %c0_i32, %c0_i32_0 : i32, i32, i32
  }
  func.func @transform_5(%arg0: i32, %arg1: i32) -> (i32, i32, i32) {
    %c0_i32 = arith.constant 0 : i32
    %c0_i32_0 = arith.constant 0 : i32
    %c0_i32_1 = arith.constant 0 : i32
    return %arg1, %c0_i32, %c0_i32_0 : i32, i32, i32
  }
  func.func @transform_6(%arg0: i32, %arg1: i32) -> (i32, i32, i32) {
    %c0_i32 = arith.constant 0 : i32
    %c0_i32_0 = arith.constant 0 : i32
    %c0_i32_1 = arith.constant 0 : i32
    return %arg1, %c0_i32, %c0_i32_0 : i32, i32, i32
  }
  func.func @transform_7(%arg0: i32, %arg1: i32) -> (i32, i32, i32) {
    %c0_i32 = arith.constant 0 : i32
    %c0_i32_0 = arith.constant 0 : i32
    %c0_i32_1 = arith.constant 0 : i32
    return %arg1, %c0_i32, %c0_i32_0 : i32, i32, i32
  }
  func.func @transform_8(%arg0: i32, %arg1: i32) -> (i32, i32, i32) {
    %c0_i32 = arith.constant 0 : i32
    %c0_i32_0 = arith.constant 0 : i32
    %c0_i32_1 = arith.constant 0 : i32
    return %arg1, %c0_i32, %c0_i32_0 : i32, i32, i32
  }
  func.func @transform_9(%arg0: i32, %arg1: i32) -> (i32, i32, i32) {
    %c0_i32 = arith.constant 0 : i32
    %c0_i32_0 = arith.constant 0 : i32
    %c0_i32_1 = arith.constant 0 : i32
    return %arg1, %c0_i32, %c0_i32_0 : i32, i32, i32
  }
  func.func @transform_10(%arg0: i32, %arg1: i32) -> (i32, i32, i32) {
    %c0_i32 = arith.constant 0 : i32
    %c0_i32_0 = arith.constant 0 : i32
    %c0_i32_1 = arith.constant 0 : i32
    return %arg1, %c0_i32, %c0_i32_0 : i32, i32, i32
  }
  func.func @transform_11(%arg0: i32, %arg1: i32) -> (i32, i32, i32) {
    %c0_i32 = arith.constant 0 : i32
    %c0_i32_0 = arith.constant 0 : i32
    %c0_i32_1 = arith.constant 0 : i32
    return %arg1, %c0_i32, %c0_i32_0 : i32, i32, i32
  }
  func.func @transform_12(%arg0: i32, %arg1: i32) -> (i32, i32, i32) {
    %c0_i32 = arith.constant 0 : i32
    %c0_i32_0 = arith.constant 0 : i32
    %c0_i32_1 = arith.constant 0 : i32
    return %arg1, %c0_i32, %c0_i32_0 : i32, i32, i32
  }
  func.func @transform_13(%arg0: i32, %arg1: i32) -> (i32, i32) {
    %c0_i32 = arith.constant 0 : i32
    %c0_i32_0 = arith.constant 0 : i32
    %c0_i32_1 = arith.constant 0 : i32
    return %c0_i32, %c0_i32_0 : i32, i32
  }
  func.func @transform_14(%arg0: i32, %arg1: i32) -> (i32, i32) {
    %c0_i32 = arith.constant 0 : i32
    %c0_i32_0 = arith.constant 0 : i32
    %c0_i32_1 = arith.constant 0 : i32
    return %c0_i32, %c0_i32_0 : i32, i32
  }
  func.func @transform_15(%arg0: i32, %arg1: i32) -> (i32, i32) {
    %c0_i32 = arith.constant 0 : i32
    %c0_i32_0 = arith.constant 0 : i32
    %c0_i32_1 = arith.constant 0 : i32
    return %c0_i32, %c0_i32_0 : i32, i32
  }
  func.func @transform_16(%arg0: i32, %arg1: i32) -> (i32, i32) {
    %c0_i32 = arith.constant 0 : i32
    %c0_i32_0 = arith.constant 0 : i32
    %c0_i32_1 = arith.constant 0 : i32
    return %c0_i32, %c0_i32_0 : i32, i32
  }
  func.func @transform_17(%arg0: i32, %arg1: i32) -> (i32, i32, i32) {
    %c0_i32 = arith.constant 0 : i32
    %c0_i32_0 = arith.constant 0 : i32
    %c0_i32_1 = arith.constant 0 : i32
    return %arg0, %c0_i32, %c0_i32_0 : i32, i32, i32
  }
}

</mosaic_0001>

<bundles_post_ra>
// kernel: tpu_custom_call.1
= control target key start
LH: loop header
LB: loop body
LE: loop exit
PB: predicated region body
PF: predicated region fallthrough
CT: control target
= control target key end

     0   :  { %s17233_s0 = inlined_call_operand.hbm [shape: f32[4,16,128], index: 0, kind: input, shape index: {}]   ;;  %s17234_s1 = inlined_call_operand.hbm [shape: bf16[3,128,384], index: 1, kind: input, shape index: {}]   ;;  %s17235_s2 = inlined_call_operand.hbm [shape: f32[3,1,384], index: 2, kind: input, shape index: {}]   ;;  %s17236_s3 = inlined_call_operand.hbm [shape: bf16[3,128,128], index: 3, kind: input, shape index: {}]   ;;  %s17237_s4 = inlined_call_operand.hbm [shape: f32[3,1,128], index: 4, kind: input, shape index: {}]   ;;  %s17238_s5 = inlined_call_operand.hbm [shape: f32[3,1,128], index: 5, kind: input, shape index: {}]   ;;  %s17239_s6 = inlined_call_operand.hbm [shape: f32[3,1,128], index: 6, kind: input, shape index: {}]   ;;  %s17240_s7 = inlined_call_operand.hbm [shape: bf16[3,128,256], index: 7, kind: input, shape index: {}]   ;;  %s17241_s8 = inlined_call_operand.vmem [shape: f32[3,1,256], index: 8, kind: input, shape index: {}]   ;;  %s17242_s9 = inlined_call_operand.hbm [shape: bf16[3,256,128], index: 9, kind: input, shape index: {}]   ;;  %s17243_s10 = inlined_call_operand.vmem [shape: f32[3,1,128], index: 10, kind: input, shape index: {}]   ;;  %s17244_s11 = inlined_call_operand.hbm [shape: f32[3,1,128], index: 11, kind: input, shape index: {}]   ;;  %s17245_s12 = inlined_call_operand.hbm [shape: f32[3,1,128], index: 12, kind: input, shape index: {}]   ;;  %s17246_s13 = inlined_call_operand.hbm [shape: bf16[128,128], index: 13, kind: input, shape index: {}]   ;;  %s17247_s14 = inlined_call_operand.vmem [shape: f32[1,128], index: 14, kind: input, shape index: {}]   ;;  %s17248_s15 = inlined_call_operand.vmem [shape: f32[1,128], index: 15, kind: input, shape index: {}]   ;;  %s17249_s16 = inlined_call_operand.vmem [shape: f32[1,128], index: 16, kind: input, shape index: {}]   ;;  %s17250_s17 = inlined_call_operand.hbm [shape: f32[4,16,128], index: 17, kind: output, shape index: {}]  }
   0x1   :  { %17336 = sst [smem:[#allocation87_spill]] %s17233_s0 }
   0x2   :  { %17337 = sst [smem:[#allocation88_spill]] %s17234_s1 }
   0x3   :  { %17338 = sst [smem:[#allocation89_spill]] %s17235_s2 }
   0x4   :  { %17339 = sst [smem:[#allocation90_spill]] %s17236_s3 }
   0x5   :  { %17340 = sst [smem:[#allocation91_spill]] %s17237_s4 }
   0x6   :  { %17341 = sst [smem:[#allocation92_spill]] %s17238_s5 }
   0x7   :  { %17342 = sst [smem:[#allocation93_spill]] %s17239_s6 }
   0x8   :  { %17343 = sst [smem:[#allocation94_spill]] %s17240_s7 }
   0x9   :  { %17344 = sst [smem:[#allocation95_spill]] %s17241_s8 }
   0xa   :  { %17345 = sst [smem:[#allocation96_spill]] %s17242_s9 }
   0xb   :  { %17346 = sst [smem:[#allocation97_spill]] %s17243_s10 }
   0xc   :  { %17347 = sst [smem:[#allocation98_spill]] %s17244_s11 }
   0xd   :  { %17348 = sst [smem:[#allocation99_spill]] %s17245_s12 }
   0xe   :  { %17349 = sst [smem:[#allocation100_spill]] %s17246_s13 }
   0xf   :  { %17350 = sst [smem:[#allocation101_spill]] %s17247_s14 }
  0x10   :  { %17351 = sst [smem:[#allocation102_spill]] %s17248_s15 }
  0x11   :  { %17352 = sst [smem:[#allocation103_spill]] %s17249_s16 }
  0x12   :  { %17353 = sst [smem:[#allocation104_spill]] %s17250_s17 }
  0x13   :  { %22 = vsyncpa [#allocation4], 0 }
  0x14   :  { %24 = vsyncpa [#allocation4 + $0x1], 0 }
  0x15   :  { %25 = vsyncpa [#allocation7], 0 }
  0x16   :  { %27 = vsyncpa [#allocation7 + $0x1], 0 }
  0x17   :  { %28 = vsyncpa [#allocation10], 0 }
  0x18   :  { %30 = vsyncpa [#allocation10 + $0x1], 0 }
  0x19   :  { %31 = vsyncpa [#allocation13], 0 }
  0x1a   :  { %33 = vsyncpa [#allocation13 + $0x1], 0 }
  0x1b   :  { %34 = vsyncpa [#allocation16], 0 }
  0x1c   :  { %36 = vsyncpa [#allocation16 + $0x1], 0 }
  0x1d   :  { %37 = vsyncpa [#allocation19], 0 }
  0x1e   :  { %39 = vsyncpa [#allocation19 + $0x1], 0 }
  0x1f   :  { %40 = vsyncpa [#allocation22], 0 }
  0x20   :  { %41 = vsyncpa [#allocation5], 0 }
  0x21   :  { %43 = vsyncpa [#allocation5 + $0x1], 0  ;;  %s12992_s24 = smov 0   ;;  %s12994_s25 = smov 0  }
  0x22   :  { %s12996_s26 = smov 0   ;;  %s12998_s27 = smov 0  }
  0x23   :  { %s13000_s28 = smov 0   ;;  %s13002_s29 = smov 0  }
  0x24   :  { %s13004_s0 = smov 0   ;;  %s13006_s30 = smov 0  }
  0x25   :  { %s13008_s18 = smov 0   ;;  %s13010_s19 = smov 0  }
  0x26   :  { %s13012_s1 = smov 0  }
  0x27 LB: > { %17354 = sst [smem:[#allocation32_spill]] %s12849_s25  ;;  %p76_p0 = scmp.eq.s32.totalorder %s12885_s1, 0  ;;  %s12885_s1 = sphi %s13012_s1, %s49_s1   ;;  %s12881_s19 = sphi %s13010_s19, %s17661_s19   ;;  %s12877_s18 = sphi %s13008_s18, %s17665_s18   ;;  %s12873_s30 = sphi %s13006_s30, %s17659_s30   ;;  %s12869_s0 = sphi %s13004_s0, %s17664_s0   ;;  %s12865_s29 = sphi %s13002_s29, %s17658_s29   ;;  %s12861_s28 = sphi %s13000_s28, %s17663_s28   ;;  %s12857_s27 = sphi %s12998_s27, %s17662_s27   ;;  %s12853_s26 = sphi %s12996_s26, %s17656_s26   ;;  %s12849_s25 = sphi %s12994_s25, %s17655_s25   ;;  %s12845_s24 = sphi %s12992_s24, %s17654_s24  }
  0x28   : > { %17355 = sst [smem:[#allocation33_spill]] %s12853_s26  ;;  %p101_p1 = scmp.ne.s32.totalorder %s12853_s26, %s12849_s25 }
  0x29   : > { %17356 = sst [smem:[#allocation34_spill]] %s12857_s27  ;;  %p11628_p2 = scmp.lt.s32.totalorder %s12885_s1, 6 }
  0x2a   : > { %17357 = sst [smem:[#allocation35_spill]] %s12865_s29  ;;  %p103_p3 = por %p101_p1, %p76_p0 }
  0x2b   : > { %17358 = sst [smem:[#allocation36_spill]] %s12869_s0  ;;  %s13054_s20 = sand.u32 1, %s12885_s1  }
  0x2c   : > { %17359 = sst [smem:[#allocation37_spill]] %s12873_s30  ;;  %s13057_s21 = sand.u32 1, %s12853_s26  }
  0x2d   : > { %17360 = sst [smem:[#allocation38_spill]] %s12881_s19  ;;  %s11551_s22 = smul.u32 192, %s13057_s21 }
  0x2e   : > { %p13062_p4 = pnand %p11628_p2, %p103_p3  ;;  %s11552_s17 = smul.u32 192, %s12877_s18 }
  0x2f   : > { %s17362_s15 = sld [smem:[#allocation88_spill]]  ;;  %s577_s8 = scalar_lea.vmem [#allocation6], %s11551_s22 }
  0x30   : > { %s585_s10 = sshll.u32 %s577_s8, 4  ;;  %s17257_s12 = scalar_lea.sflag [#allocation7], %s13054_s20  ;;  %s586_s10 = int_to_ptr.vmem [resolvable:$true] %s585_s10 }
  0x31   : > { %s12887_s6 = smov 192   ;;  %s12888_s4 = smov 12  }
  0x32   : > { %s11063_s2 = sshll.u32 %s13057_s21, 6  ;;  %s11419_s26 = sshll.u32 %s12877_s18, 6 }
  0x33   : > { %s17363_s3 = sld [smem:[#allocation90_spill]]  ;;  %s17256_s22 = scalar_lea.sflag [#allocation10], %s13054_s20 }
  0x34   : > { %s17259_s13 = smov 64   ;;  %s17261_s27 = smov 4  }
  0x35   : > { %s582_s14 = scalar_lea.hbm %s17362_s15, %s11552_s17  ;;  %s17364_s5 = sld [smem:[#allocation92_spill]] }
  0x36   : > { %s583_s0 = sshll.u32 %s582_s14, 4  ;;  %s618_s14 = scalar_lea.vmem [#allocation9], %s11063_s2  ;;  %s584_s0 = int_to_ptr.hbm [resolvable:$true] %s583_s0 }
  0x37   : > { %11595 = dma.hbm_to_vmem [thread:$0]  (!%p13062_p4), %s584_s0, 3072, %s586_s10, %s17257_s12, %s12887_s6, %s12887_s6, %s12888_s4  }
  0x38   : > { %s626_s17 = sshll.u32 %s618_s14, 4  ;;  %s17258_s16 = scalar_lea.sflag [#allocation13], %s13054_s20  ;;  %s627_s17 = int_to_ptr.vmem [resolvable:$true] %s626_s17 }
  0x39   : > { %s623_s8 = scalar_lea.hbm %s17363_s3, %s11419_s26  ;;  %s656_s26 = scalar_lea.vmem [#allocation12], %s13057_s21 }
  0x3a   : > { %s624_s30 = sshll.u32 %s623_s8, 4  ;;  %s663_s0 = sshll.u32 %s656_s26, 4  ;;  %s625_s30 = int_to_ptr.hbm [resolvable:$true] %s624_s30  ;;  %s664_s0 = int_to_ptr.vmem [resolvable:$true] %s663_s0 }
  0x3b   : > { %11601 = dma.hbm_to_vmem [thread:$0]  (!%p13062_p4), %s625_s30, 1024, %s627_s17, %s17256_s22, %s17259_s13, %s17259_s13, %s17261_s27  }
  0x3c   : > { %s659_s2 = scalar_lea.hbm %s17364_s5, %s12877_s18  ;;  %s11066_s15 = sshll.u32 %s13057_s21, 7 }
  0x3d   : > { %s661_s10 = sshll.u32 %s659_s2, 4  ;;  %s11420_s8 = sshll.u32 %s12877_s18, 7  ;;  %s662_s10 = int_to_ptr.hbm [resolvable:$true] %s661_s10 }
  0x3e   : > { %11607 = dma.hbm_to_vmem [thread:$0]  (!%p13062_p4), %s662_s10, 16, %s664_s0, %s17258_s16  }
  0x3f   : > { %s17365_s7 = sld [smem:[#allocation94_spill]]  ;;  %s691_s4 = scalar_lea.vmem [#allocation15], %s11066_s15 }
  0x40   : > { %s699_s6 = sshll.u32 %s691_s4, 4  ;;  %s17263_s26 = scalar_lea.sflag [#allocation16], %s13054_s20  ;;  %s700_s6 = int_to_ptr.vmem [resolvable:$true] %s699_s6 }
  0x41   : > { %s17265_s22 = smov 128   ;;  %s17266_s12 = smov 8  }
  0x42   : > { %s17366_s9 = sld [smem:[#allocation96_spill]]  ;;  %s720_s17 = scalar_lea.vmem [#allocation17], %s11066_s15 }
  0x43   : > { %s17367_s11 = sld [smem:[#allocation98_spill]]  ;;  %s17264_s10 = scalar_lea.sflag [#allocation19], %s13054_s20 }
  0x44   : > { %s13129_s15 = sadd.s32 4294967295, %s12885_s1   ;;  %p107_p5 = scmp.ne.s32.totalorder %s12849_s25, %s12845_s24 }
  0x45   : > { %s696_s30 = scalar_lea.hbm %s17365_s7, %s11420_s8  ;;  %p17267_p6 = scmp.eq.s32.totalorder %s13129_s15, 0 }
  0x46   : > { %s697_s2 = sshll.u32 %s696_s30, 4  ;;  %s728_s30 = sshll.u32 %s720_s17, 4  ;;  %s698_s2 = int_to_ptr.hbm [resolvable:$true] %s697_s2  ;;  %s13114_s30 = int_to_ptr.vmem [resolvable:$true] %s728_s30 }
  0x47   : > { %11613 = dma.hbm_to_vmem [thread:$0]  (!%p13062_p4), %s698_s2, 2048, %s700_s6, %s17263_s26, %s17265_s22, %s17265_s22, %s17266_s12  }
  0x48   : > { %s725_s14 = scalar_lea.hbm %s17366_s9, %s11420_s8  ;;  %s747_s2 = scalar_lea.vmem [#allocation18], %s13057_s21 }
  0x49   : > { %s726_s4 = sshll.u32 %s725_s14, 4  ;;  %s750_s27 = scalar_lea.hbm %s17367_s11, %s12877_s18  ;;  %s13116_s4 = int_to_ptr.hbm [resolvable:$true] %s726_s4 }
  0x4a   : > { %s752_s6 = sshll.u32 %s750_s27, 4  ;;  %s754_s26 = sshll.u32 %s747_s2, 4  ;;  %s753_s6 = int_to_ptr.hbm [resolvable:$true] %s752_s6  ;;  %s755_s26 = int_to_ptr.vmem [resolvable:$true] %s754_s26 }
  0x4b   : > { %11619 = dma.hbm_to_vmem [thread:$0]  (!%p13062_p4), %s753_s6, 16, %s755_s26, %s17264_s10  }
  0x4c   : > { %p501_p7 = scmp.eq.s32.totalorder %s13129_s15, 5  ;;  %p11055_p8 = scmp.ge.s32.totalorder %s12885_s1, 1 }
  0x4d   : > { %p514_p9 = scmp.lt.s32.totalorder %s12885_s1, 7  ;;  %p13139_p10 = por %p107_p5, %p17267_p6 }
  0x4e   : > { %s17370_s27 = sld [smem:[#allocation34_spill]]  ;;  %s12893_s14 = smov [#allocation21]  }
  0x4f   : > { %s17368_s13 = scalar_select %p13139_p10, 1, 0 }
  0x50   : > { %p13143_p11 = pnand %p11055_p8, %p514_p9  ;;  %s17372_s26 = sld [smem:[#allocation100_spill]] }
  0x51   : > { %17369 = sst [smem:[#allocation39_spill]] %s17368_s13  ;;  %s527_s17 = sshll.u32 %s12893_s14, 4  ;;  %s528_s17 = int_to_ptr.vmem [resolvable:$true] %s527_s17 }
  0x52   : > { %p11585_p12 = pneg %p13143_p11  ;;  %s17373_s6 = smov 4  }
  0x53   : > { %s17374_s2 = smov 64   ;;  %s17375_s24 = sld [smem:[#allocation33_spill]] }
  0x54   : > { %p11586_p13 = pnand %p11585_p12, %p17267_p6  ;;  %s11054_s8 = sadd.s32 4294967294, %s12885_s1  }
  0x55   : > { %s61_s10 = sadd.s32 1, %s12881_s19  ;;  %s68_s22 = sadd.s32 1, %s12865_s29 }
  0x56   : > { %s525_s0 = sshll.u32 %s17372_s26, 4  ;;  %s58_s26 = sadd.s32 1, %s12877_s18  ;;  %s526_s0 = int_to_ptr.hbm [resolvable:$true] %s525_s0 }
  0x57   : > { %11588 = dma.hbm_to_vmem [thread:$0]  (!%p11586_p13), %s526_s0, 1024, %s528_s17, [#allocation22], %s17374_s2, %s17374_s2, %s17373_s6  }
  0x58   : > { %p59_p1 = scmp.ge.s32.totalorder %s58_s26, 3  ;;  %p75_p3 = scmp.ne.s32.totalorder %s12865_s29, %s12861_s28 }
  0x59   : > { %p81_p5 = scmp.ne.s32.totalorder %s12861_s28, %s17370_s27  ;;  %s94_s12 = sadd.s32 1, %s17375_s24 }
  0x5a   : > { %s17667_s26 = smov (%p59_p1, %s58_s26), 0  ;;  %s17669_s10 = smov (!%p59_p1, %s61_s10), %s12881_s19 }
  0x5b   : > { %17376 = sst [smem:[#allocation40_spill]] %s17667_s26  ;;  %p13173_p8 = por %p76_p0, %p75_p3 }
  0x5c   : > { %p13182_p9 = por %p17267_p6, %p81_p5  ;;  %p63_p12 = scmp.ge.s32.totalorder %s17669_s10, 2 }
  0x5d   : > { %s91_s17 = ssub.s32 %s12877_s18, %s17667_s26  ;;  %p13201_p0 = por %p501_p7, %p75_p3 }
  0x5e   : > { %p92_p13 = scmp.eq.s32.totalorder %s91_s17, 0  ;;  %s17671_s10 = smov (%p63_p12, %s17669_s10), 0 }
  0x5f   : > { %17379 = sst [smem:[#allocation41_spill]] %s17671_s10  ;;  %s65_s3 = ssub.s32 %s12881_s19, %s17671_s10 }
  0x60   : > { %s17673_s24 = smov (!%p92_p13, %s17375_s24), %s94_s12  ;;  %p66_p1 = scmp.eq.s32.totalorder %s65_s3, 0 }
  0x61   : > { %17380 = sst [smem:[#allocation42_spill]] %s17673_s24  ;;  %p507_p6 = scmp.eq.s32.totalorder %s11054_s8, 5 }
  0x62   : > { %s550_s17 = sand.u32 1, %s12865_s29   ;;  %s11418_s7 = sshll.u32 %s12881_s19, 5 }
  0x63   : > { %s13208_s9 = scalar_select %p66_p1, %s12865_s29, %s68_s22  }
  0x64   : > { %p13213_p12 = por %p507_p6, %p81_p5  ;;  %s11058_s11 = sshll.u32 %s550_s17, 5 }
  0x65   : > { %17382 = sst [smem:[#allocation43_spill]] %s13208_s9  ;;  %s554_s3 = scalar_lea.vmem [#allocation3], %s11058_s11 }
  0x66   : > { %s17384_s24 = sld [smem:[#allocation87_spill]]  ;;  %s563_s8 = sshll.u32 %s554_s3, 4  ;;  %s564_s8 = int_to_ptr.vmem [resolvable:$true] %s563_s8 }
  0x67   : > { %p11590_p6 = pnand %p11628_p2, %p13173_p8  ;;  %s11553_s22 = smul.u32 3, %s13057_s21 }
  0x68   : > { %s11554_s27 = smul.u32 3, %s12877_s18  ;;  %s551_s19 = scalar_lea.sflag [#allocation4], %s550_s17 }
  0x69   : > { %s17385_s9 = smov 8   ;;  %s17386_s10 = smov 128  }
  0x6a   : > { %s599_s3 = scalar_lea.vmem [#allocation8], %s11553_s22  ;;  %s17388_s29 = scalar_lea.sflag [#allocation7], %s13054_s20 }
  0x6b   : > { %s607_s0 = sshll.u32 %s599_s3, 4  ;;  %s608_s0 = int_to_ptr.vmem [resolvable:$true] %s607_s0 }
  0x6c   : > { %s560_s13 = scalar_lea.hbm %s17384_s24, %s11418_s7  ;;  %s17387_s24 = sld [smem:[#allocation89_spill]] }
  0x6d   : > { %s561_s25 = sshll.u32 %s560_s13, 4  ;;  %s17395_s7 = scalar_lea.sflag [#allocation19], %s13054_s20  ;;  %s562_s25 = int_to_ptr.hbm [resolvable:$true] %s561_s25 }
  0x6e   : > { %11592 = dma.hbm_to_vmem [thread:$0]  (!%p11590_p6), %s562_s25, 512, %s564_s8, %s551_s19, %s17386_s10, %s17386_s10, %s17385_s9  }
  0x6f   : > { %s17389_s19 = sld [smem:[#allocation91_spill]]  ;;  %s639_s8 = scalar_lea.vmem [#allocation11], %s13057_s21 }
  0x70   : > { %s646_s22 = sshll.u32 %s639_s8, 4  ;;  %s17390_s10 = scalar_lea.sflag [#allocation10], %s13054_s20  ;;  %s647_s22 = int_to_ptr.vmem [resolvable:$true] %s646_s22 }
  0x71   : > { %s17393_s9 = scalar_lea.sflag [#allocation16], %s13054_s20 }
  0x72   : > { %s603_s11 = scalar_lea.hbm %s17387_s24, %s11554_s27  ;;  %s17391_s24 = sld [smem:[#allocation93_spill]] }
  0x73   : > { %s605_s26 = sshll.u32 %s603_s11, 4  ;;  %s673_s11 = scalar_lea.vmem [#allocation14], %s13057_s21  ;;  %s606_s26 = int_to_ptr.hbm [resolvable:$true] %s605_s26 }
  0x74   : > { %11598 = dma.hbm_to_vmem [thread:$0]  (!%p13062_p4), %s606_s26, 48, %s608_s0, %s17388_s29  }
  0x75   : > { %s642_s17 = scalar_lea.hbm %s17389_s19, %s12877_s18  ;;  %s680_s26 = sshll.u32 %s673_s11, 4  ;;  %s681_s26 = int_to_ptr.vmem [resolvable:$true] %s680_s26 }
  0x76   : > { %s644_s27 = sshll.u32 %s642_s17, 4  ;;  %s17392_s0 = scalar_lea.sflag [#allocation13], %s13054_s20  ;;  %s645_s27 = int_to_ptr.hbm [resolvable:$true] %s644_s27 }
  0x77   : > { %11604 = dma.hbm_to_vmem [thread:$0]  (!%p13062_p4), %s645_s27, 16, %s647_s22, %s17390_s10  }
  0x78   : > { %s676_s29 = scalar_lea.hbm %s17391_s24, %s12877_s18  ;;  %s17394_s17 = sld [smem:[#allocation99_spill]] }
  0x79   : > { %s678_s3 = sshll.u32 %s676_s29, 4  ;;  %s764_s22 = scalar_lea.vmem [#allocation20], %s13057_s21  ;;  %s679_s3 = int_to_ptr.hbm [resolvable:$true] %s678_s3 }
  0x7a   : > { %11610 = dma.hbm_to_vmem [thread:$0]  (!%p13062_p4), %s679_s3, 16, %s681_s26, %s17392_s0  }
  0x7b   : > { %11616 = dma.hbm_to_vmem [thread:$0]  (!%p13062_p4), %s13116_s4, 2048, %s13114_s30, %s17393_s9, %s17374_s2, %s17374_s2, %s17373_s6  }
  0x7c   : > { %s771_s27 = sshll.u32 %s764_s22, 4  ;;  %780 = sbr.rel (%p13143_p11) target bundleno = 5038 (0x13ae), region = 88  ;;  %s772_s27 = int_to_ptr.vmem [resolvable:$true] %s771_s27 }
  0x7e   : > { %s767_s8 = scalar_lea.hbm %s17394_s17, %s12877_s18 }
  0x7f   : > { %s769_s10 = sshll.u32 %s767_s8, 4  ;;  %s770_s10 = int_to_ptr.hbm [resolvable:$true] %s769_s10 }
  0x80   : > { %11622 = dma.hbm_to_vmem [thread:$0]  (!%p13062_p4), %s770_s10, 16, %s772_s27, %s17395_s7  }
  0x81   : > { %s13275_s13 = sand.u32 1, %s12861_s28  }
  0x82   : > { %s11073_s30 = sshll.u32 %s13275_s13, 5  ;;  %s783_s4 = scalar_lea.sflag [#allocation4], %s13275_s13 }
  0x83   : > { %s13281_s21 = scalar_lea.vmem [#allocation3], %s11073_s30 }
  0x84   : > { %12812 = dma.done.wait (%p13182_p9), %s783_s4, 512  }
  0x85   : > { %12814 = vsyncadd (%p13182_p9), %s783_s4, 4294966784  ;;  %s17396_s20 = sld [smem:[#allocation32_spill]]  ;;  %s13288_s16 = sand.u32 1, %s13129_s15  }
  0x86   : > { %s793_s24 = scalar_lea.sflag [#allocation7], %s13288_s16 }
  0x8b   : > { %s13291_s6 = sand.u32 1, %s17396_s20  }
  0x8c   : > { %s11555_s2 = smul.u32 192, %s13291_s6 }
  0x8e   : > { %s13295_s29 = scalar_lea.vmem [#allocation6], %s11555_s2 }
  0x8f   : > { %12816 = dma.done.wait (%p13139_p10), %s793_s24, 3120  }
  0x90   : > { %12818 = vsyncadd (%p13139_p10), %s793_s24, 4294964176  ;;  %s11556_s14 = smul.u32 3, %s13291_s6  ;;  %s11074_s11 = sshll.u32 %s13291_s6, 6 }
  0x91   : > { %s813_s3 = scalar_lea.sflag [#allocation10], %s13288_s16  ;;  %s13306_s0 = scalar_lea.vmem [#allocation9], %s11074_s11 }
  0x92   : > { %s13303_s26 = scalar_lea.vmem [#allocation8], %s11556_s14 }
  0x93   : > { %12820 = dma.done.wait (%p13139_p10), %s813_s3, 1040  }
  0x94   : > { %12822 = vsyncadd (%p13139_p10), %s813_s3, 4294966256  ;;  %s825_s9 = scalar_lea.vmem [#allocation11], %s13291_s6  ;;  %s832_s25 = scalar_lea.sflag [#allocation13], %s13288_s16 }
  0x95   : > { %s834_s19 = scalar_lea.vmem [#allocation12], %s13291_s6 }
  0x96   : > { %12824 = dma.done.wait (%p13139_p10), %s832_s25, 32  }
  0x97   : > { %12826 = vsyncadd (%p13139_p10), %s832_s25, 4294967264  ;;  %s11075_s17 = sshll.u32 %s13291_s6, 7  ;;  %s843_s8 = scalar_lea.vmem [#allocation14], %s13291_s6 }
  0x98   : > { %s850_s22 = scalar_lea.sflag [#allocation16], %s13288_s16  ;;  %s13322_s27 = scalar_lea.vmem [#allocation15], %s11075_s17 }
  0x99   : > { %12828 = dma.done.wait (%p13139_p10), %s850_s22, 4096  }
  0x9a   : > { %12830 = vsyncadd (%p13139_p10), %s850_s22, 4294963200  ;;  %s13328_s10 = scalar_lea.vmem [#allocation17], %s11075_s17  ;;  %s870_s7 = scalar_lea.sflag [#allocation19], %s13288_s16 }
  0x9b   : > { %s872_s4 = scalar_lea.vmem [#allocation18], %s13291_s6 }
  0x9c   : > { %12832 = dma.done.wait (%p13139_p10), %s870_s7, 32  }
  0x9d   : > { %12834 = vsyncadd (%p13139_p10), %s870_s7, 4294967264  ;;  %s881_s20 = scalar_lea.vmem [#allocation20], %s13291_s6  ;;  %p17398_p2 = scmp.eq.s32.totalorder %s13129_s15, 0 }
  0x9f   : > { %12836 = dma.done.wait (%p17398_p2), [#allocation22], 1024   ;;  %p17399_p4 = pmov %p17398_p2 }
  0xa0   : > { %s17400_s2 = sld [smem:[#allocation36_spill]]  ;;  %s13357_s15 = scalar_lea.vmem [#allocation23], %s11073_s30 }
  0xa1   : > { %12838 = vsyncadd (%p17399_p4), [#allocation22], 4294966272  ;;  %s17401_s11 = sld [smem:[#allocation97_spill]] }
  0xa2   : > { %s17402_s22 = sld [smem:[#allocation95_spill]] }
  0xa6   : > { %p991_p7 = scmp.lt.s32.totalorder %s17400_s2, 2  ;;  %p11080_p10 = scmp.ne.s32.totalorder %s17400_s2, 0 }
  0xa8   : > { %s13343_s24 = scalar_select %p991_p7, %s17400_s2, 2 }
  0xa9   : > { %1003 = sbr.rel (%p11080_p10) target bundleno = 179 (0xb3), region = 140 }
  0xaa   : > { %s11079_s16 = sshll.u32 %s13343_s24, 1  ;;  %s997_s3 = scalar_lea.vmem %s17401_s11, %s13343_s24 }
  0xab   : > { %s13353_s7 = scalar_lea.vmem %s17402_s22, %s11079_s16 }
  0xae   : > { %v1004_v0 = vld [vmem:[%s13281_s21] sm:$0xff]  ;;  %v1005_v1 = vld [vmem:[%s13281_s21 + $0x8] sm:$0xff]  ;;  %v1006_v2 = vld [vmem:[%s13281_s21 + $0x10] sm:$0xff] }
  0xaf   : > { %v11503_v3 = vpack.c.bf16 %v1005_v1, %v1004_v0  ;;  %v1007_v4 = vld [vmem:[%s13281_s21 + $0x18] sm:$0xff] }
  0xb0   : > { %v11508_v5 = vpack.c.bf16 %v1007_v4, %v1006_v2 }
  0xb1   : > { %11504 = vst [vmem:[#allocation2] sm:$0xff] %v11503_v3  }
  0xb2   : > { %11538 = vst [vmem:[#allocation2 + $0x8] sm:$0xff] %v11508_v5  }
  0xb3 PF: > { %v11175_v6 = vld [vmem:[%s13295_s29 + $0xa8] sm:$0xf]  ;;  %v11446_v7 = vld [vmem:[%s13295_s29 + $0xb0] sm:$0xf0]  ;;  %v11445_v8 = vld [vmem:[%s13295_s29 + $0xac] sm:$0xf] }
  0xb4   : > { %v11176_v9 = vor.u32 %v11446_v7, %v11175_v6  ;;  %v11177_v10 = vld [vmem:[%s13295_s29 + $0xb4] sm:$0xf0]  ;;  %v11163_v11 = vld [vmem:[%s13295_s29 + $0x90] sm:$0xf]  ;;  %v11443_v12 = vld [vmem:[%s13295_s29 + $0x98] sm:$0xf0] }
  0xb5   : > { %v11180_v13 = vor.u32 %v11445_v8, %v11177_v10  ;;  %v11442_v14 = vld [vmem:[%s13295_s29 + $0x94] sm:$0xf]  ;;  %v11165_v15 = vld [vmem:[%s13295_s29 + $0x9c] sm:$0xf0]  ;;  %v11164_v16 = vor.u32 %v11443_v12, %v11163_v11  ;;  %v11151_v17 = vld [vmem:[%s13295_s29 + $0x78] sm:$0xf] }
  0xb6   : > { %1204 = vmatpush.bf16.msra.mxu0 %v11176_v9  ;;  %v11168_v18 = vor.u32 %v11442_v14, %v11165_v15  ;;  %v11440_v19 = vld [vmem:[%s13295_s29 + $0x80] sm:$0xf0]  ;;  %v11183_v20 = vld [vmem:[%s13295_s29 + $0xb0] sm:$0xf]  ;;  %v11447_v21 = vld [vmem:[%s13295_s29 + $0xb8] sm:$0xf0] }
  0xb7   : > { %1223 = vmatpush.bf16.msra.mxu1 %v11180_v13  ;;  %v11439_v22 = vld [vmem:[%s13295_s29 + $0x7c] sm:$0xf]  ;;  %v11153_v23 = vld [vmem:[%s13295_s29 + $0x84] sm:$0xf0]  ;;  %v11184_v24 = vor.u32 %v11447_v21, %v11183_v20  ;;  %v11171_v25 = vld [vmem:[%s13295_s29 + $0x98] sm:$0xf]  ;;  %v11152_v27 = vor.u32 %v11440_v19, %v11151_v17 }
  0xb8   : > { %v11444_v26 = vld [vmem:[%s13295_s29 + $0xa0] sm:$0xf0]  ;;  %v11139_v28 = vld [vmem:[%s13295_s29 + $0x60] sm:$0xf]  ;;  %v11156_v30 = vor.u32 %v11439_v22, %v11153_v23  ;;  %v11437_v31 = vld [vmem:[%s13295_s29 + $0x68] sm:$0xf0] }
  0xb9   : > { %1242 = vmatpush.bf16.msra.mxu2 %v11184_v24  ;;  %v11172_v29 = vor.u32 %v11444_v26, %v11171_v25  ;;  %v11159_v32 = vld [vmem:[%s13295_s29 + $0x80] sm:$0xf]  ;;  %v11441_v33 = vld [vmem:[%s13295_s29 + $0x88] sm:$0xf0]  ;;  %v11436_v34 = vld [vmem:[%s13295_s29 + $0x64] sm:$0xf]  ;;  %v11140_v36 = vor.u32 %v11437_v31, %v11139_v28 }
  0xba   : > { %1205 = vmatpush.bf16.msra.mxu0 %v11164_v16  ;;  %v11141_v35 = vld [vmem:[%s13295_s29 + $0x6c] sm:$0xf0]  ;;  %v11127_v37 = vld [vmem:[%s13295_s29 + $0x48] sm:$0xf]  ;;  %v11160_v38 = vor.u32 %v11441_v33, %v11159_v32  ;;  %v11434_v40 = vld [vmem:[%s13295_s29 + $0x50] sm:$0xf0] }
  0xbb   : > { %1224 = vmatpush.bf16.msra.mxu1 %v11168_v18  ;;  %v11144_v39 = vor.u32 %v11436_v34, %v11141_v35  ;;  %v11147_v41 = vld [vmem:[%s13295_s29 + $0x68] sm:$0xf]  ;;  %v11438_v42 = vld [vmem:[%s13295_s29 + $0x70] sm:$0xf0]  ;;  %v11433_v43 = vld [vmem:[%s13295_s29 + $0x4c] sm:$0xf]  ;;  %v11128_v47 = vor.u32 %v11434_v40, %v11127_v37 }
  0xbc   : > { %v11129_v44 = vld [vmem:[%s13295_s29 + $0x54] sm:$0xf0]  ;;  %v11115_v45 = vld [vmem:[%s13295_s29 + $0x30] sm:$0xf]  ;;  %v11431_v46 = vld [vmem:[%s13295_s29 + $0x38] sm:$0xf0]  ;;  %v11148_v50 = vor.u32 %v11438_v42, %v11147_v41 }
  0xbd   : > { %1243 = vmatpush.bf16.msra.mxu2 %v11172_v29  ;;  %v11430_v48 = vld [vmem:[%s13295_s29 + $0x34] sm:$0xf]  ;;  %v11117_v49 = vld [vmem:[%s13295_s29 + $0x3c] sm:$0xf0]  ;;  %v11135_v51 = vld [vmem:[%s13295_s29 + $0x50] sm:$0xf]  ;;  %v11132_v52 = vor.u32 %v11433_v43, %v11129_v44  ;;  %v11116_v54 = vor.u32 %v11431_v46, %v11115_v45 }
  0xbe   : > { %1206 = vmatpush.bf16.msra.mxu0 %v11152_v27  ;;  %v11435_v53 = vld [vmem:[%s13295_s29 + $0x58] sm:$0xf0]  ;;  %v11103_v55 = vld [vmem:[%s13295_s29 + $0x18] sm:$0xf]  ;;  %v11120_v57 = vor.u32 %v11430_v48, %v11117_v49  ;;  %v11428_v58 = vld [vmem:[%s13295_s29 + $0x20] sm:$0xf0] }
  0xbf   : > { %1225 = vmatpush.bf16.msra.mxu1 %v11156_v30  ;;  %v11136_v56 = vor.u32 %v11435_v53, %v11135_v51  ;;  %v11123_v59 = vld [vmem:[%s13295_s29 + $0x38] sm:$0xf]  ;;  %v11432_v60 = vld [vmem:[%s13295_s29 + $0x40] sm:$0xf0]  ;;  %v11427_v61 = vld [vmem:[%s13295_s29 + $0x1c] sm:$0xf]  ;;  %v11104_v63 = vor.u32 %v11428_v58, %v11103_v55 }
  0xc0   : > { %v11105_v62 = vld [vmem:[%s13295_s29 + $0x24] sm:$0xf0]  ;;  %v11091_v0 = vld [vmem:[%s13295_s29] sm:$0xf]  ;;  %v11124_v1 = vor.u32 %v11432_v60, %v11123_v59  ;;  %v11425_v3 = vld [vmem:[%s13295_s29 + $0x8] sm:$0xf0] }
  0xc1   : > { %1244 = vmatpush.bf16.msra.mxu2 %v11160_v38  ;;  %v11108_v2 = vor.u32 %v11427_v61, %v11105_v62  ;;  %v11111_v4 = vld [vmem:[%s13295_s29 + $0x20] sm:$0xf]  ;;  %v11429_v5 = vld [vmem:[%s13295_s29 + $0x28] sm:$0xf0]  ;;  %v11424_v6 = vld [vmem:[%s13295_s29 + $0x4] sm:$0xf]  ;;  %v11092_v8 = vor.u32 %v11425_v3, %v11091_v0 }
  0xc2   : > { %1207 = vmatpush.bf16.msra.mxu0 %v11140_v36  ;;  %v11093_v7 = vld [vmem:[%s13295_s29 + $0xc] sm:$0xf0]  ;;  %v11112_v9 = vor.u32 %v11429_v5, %v11111_v4  ;;  %v11099_v11 = vld [vmem:[%s13295_s29 + $0x8] sm:$0xf]  ;;  %v11426_v12 = vld [vmem:[%s13295_s29 + $0x10] sm:$0xf0] }
  0xc3   : > { %1226 = vmatpush.bf16.msra.mxu1 %v11144_v39  ;;  %v11096_v10 = vor.u32 %v11424_v6, %v11093_v7  ;;  %v11422_v13 = vld [vmem:[#allocation2] sm:$0xff]  ;;  %v11100_v14 = vor.u32 %v11426_v12, %v11099_v11  ;;  %v11423_v15 = vld [vmem:[#allocation2 + $0x8] sm:$0xff]  ;;  %v1056_v18 = vld [vmem:[%s13303_s26] sm:$0x7]  ;;  %s12894_s30 = smov 32   ;;  %s12895_s21 = smov 96  }
  0xc4   : > { %v1059_v19 = vperm.slane %v1056_v18, 1  ;;  %v13413_v20 = vperm.slane %v1056_v18, 0  ;;  %s12896_s29 = smov 64   ;;  %v13429_v30 = vperm.slane %v1056_v18, 2  ;;  %vm1282_vm0 = vcmask 1047556   ;;  %s17646_s6 = sld [smem:[#allocation36_spill]] }
  0xc5   : > { %1245 = vmatpush.bf16.msra.mxu2 %v11148_v50  ;;  %v12898_v62 = vmov 1934713408   ;;  %vm3334_vm1 = vcmask 261120   ;;  %vm3412_vm2 = vcmask 130048   ;;  %vm5559_vm3 = vcmask 523264  }
  0xc6   : > { %1208 = vmatpush.bf16.msra.mxu0 %v11128_v47  ;;  %17403 = vst [vmem:[#allocation44_spill] sm:$0xff] %v13413_v20  ;;  %v12897_v47 = vmov 1983009808   ;;  %vm5562_vm4 = vcmask 785408  }
  0xc7   : > { %1227 = vmatpush.bf16.msra.mxu1 %v11132_v52  ;;  %17406 = vst [vmem:[#allocation47_spill] sm:$0xff] %v13429_v30  ;;  %v1287_v48 = vunpack.c.l.s4 %v12897_v47 }
  0xc9   : > { %1246 = vmatpush.bf16.msra.mxu2 %v11136_v56  ;;  %v13468_v53 = vunpack.c.0.s8 %v1287_v48 }
  0xca   : > { %1209 = vmatpush.bf16.msra.mxu0 %v11116_v54  ;;  %p11369_p11 = scmp.ne.s32.totalorder %s17646_s6, 1 }
  0xcb   : > { %1228 = vmatpush.bf16.msra.mxu1 %v11120_v57 }
  0xcd   : > { %1247 = vmatpush.bf16.msra.mxu2 %v11124_v1 }
  0xce   : > { %1210 = vmatpush.bf16.msra.mxu0 %v11104_v63  ;;  %v1311_v63 = vunpack.c.l.s4 %v12898_v62 }
  0xcf   : > { %1229 = vmatpush.bf16.msra.mxu1 %v11108_v2 }
  0xd0   : > { %v13487_v6 = vunpack.c.0.s8 %v1311_v63 }
  0xd1   : > { %1248 = vmatpush.bf16.msra.mxu2 %v11112_v9 }
  0xd2   : > { %1211 = vmatpush.bf16.msra.mxu0 %v11092_v8 }
  0xd3   : > { %1230 = vmatpush.bf16.msra.mxu1 %v11096_v10 }
  0xd5   : > { %1212 = vmatmul.bf16.vlgmr.msra.gmra.mxu0 %v11422_v13  ;;  %1249 = vmatpush.bf16.msra.mxu2 %v11100_v14 }
  0xd6   : > { %1231 = vmatmul.bf16.vlgmr.msra.gmra.mxu1 %v11422_v13 }
  0xd8   : > { %1250 = vmatmul.bf16.vlgmr.msra.gmra.mxu2 %v11422_v13 }
  0xe5   : > { %1217 = vmatmul.bf16.gmra.mxu0 %v11423_v15 }
  0xe6   : > { %1236 = vmatmul.bf16.gmra.mxu1 %v11423_v15 }
  0xe8   : > { %1255 = vmatmul.bf16.gmra.mxu2 %v11423_v15 }
 0x152   : > { %v1213_v16 = vpop.f32.mrf.mxu0 }
 0x153   : > { %v1232_v17 = vpop.f32.mrf.mxu1  ;;  %v13416_v23 = vadd.f32 %v1213_v16, %v13413_v20 }
 0x154   : > { %v1233_v21 = vadd.f32 %v1232_v17, %v1059_v19 }
 0x155   : > { %17404 = vst [vmem:[#allocation45_spill] sm:$0xff] %v13416_v23 }
 0x156   : > { %v1416_v51 = vrot.slane %v1233_v21, 4 }
 0x15a   : > { %v1215_v22 = vpop.f32.mrf.mxu0 }
 0x15b   : > { %v13419_v24 = vadd.f32 %v1215_v22, %v13413_v20  ;;  %v1234_v25 = vpop.f32.mrf.mxu1  ;;  %v1251_v27 = vpop.f32.mrf.mxu2 }
 0x15c   : > { %v13421_v26 = vadd.f32 %v1234_v25, %v1059_v19  ;;  %v13432_v32 = vadd.f32 %v1251_v27, %v13429_v30 }
 0x15d   : > { %17405 = vst [vmem:[#allocation46_spill] sm:$0xff] %v13419_v24  ;;  %v11746_v28 = vpack.i.bf16 %v13419_v24, %v13416_v23 }
 0x15e   : > { %v11756_v29 = vpack.i.bf16 %v13421_v26, %v1233_v21  ;;  %v1472_v9 = vrot.slane %v13421_v26, 4 }
 0x15f   : > { %11747 = vrot.lane.b32.xlu1 %v11746_v28, %s12894_s30  ;;  %11737 = vrot.lane.b32.xlu0 %v11746_v28, %s12895_s21 }
 0x160   : > { %11757 = vrot.lane.b32.xlu2 %v11756_v29, %s12896_s29 }
 0x163   : > { %v1253_v31 = vpop.f32.mrf.mxu2  ;;  %v1237_v35 = vpop.f32.mrf.mxu1 }
 0x164   : > { %v13437_v33 = vadd.f32 %v1253_v31, %v13429_v30  ;;  %v13445_v37 = vadd.f32 %v1237_v35, %v1059_v19 }
 0x166   : > { %v11771_v34 = vpack.i.bf16 %v13437_v33, %v13432_v32  ;;  %17407 = vst [vmem:[#allocation48_spill] sm:$0xff] %v13445_v37 }
 0x167   : > { %11752 = vrot.lane.b32.xlu1 %v11756_v29, %s12895_s21  ;;  %11742 = vrot.lane.b32.xlu0 %v11746_v28, %s12896_s29 }
 0x168   : > { %11762 = vrot.lane.b32.xlu2 %v11756_v29, %s12894_s30 }
 0x16b   : > { %v1239_v36 = vpop.f32.mrf.mxu1 }
 0x16c   : > { %v13447_v38 = vadd.f32 %v1239_v36, %v1059_v19 }
 0x16e   : > { %17408 = vst [vmem:[#allocation49_spill] sm:$0xff] %v13447_v38  ;;  %v13451_v39 = vpack.i.bf16 %v13447_v38, %v13445_v37 }
 0x16f   : > { %11772 = vrot.lane.b32.xlu1 %v11771_v34, %s12896_s29  ;;  %11767 = vrot.lane.b32.xlu0 %v11771_v34, %s12895_s21 }
 0x170   : > { %11777 = vrot.lane.b32.xlu2 %v11771_v34, %s12894_s30 }
 0x178   : > { %11782 = vrot.lane.b32.xlu2 %v13451_v39, %s12895_s21 }
 0x1ba   : > { %v13457_v41 = vpop.permute.xlu2 %11757 }
 0x1bb   : > { %v11759_v44 = vunpack.i.l.bf16 %v13457_v41  ;;  %v11760_v4 = vunpack.i.h.bf16 %v13457_v41 }
 0x1bd   : > { %v1414_v49 = vrot.slane %v11759_v44, 4  ;;  %v1417_v55 = vsel %vm1282_vm0, %v11759_v44, %v1416_v51  ;;  %v1473_v11 = vsel %vm1282_vm0, %v11760_v4, %v1472_v9  ;;  %v1604_v9 = vrot.slane %v13437_v33, 4 }
 0x1be   : > { %v1425_v61 = vperm.slane %v1417_v55, %v13468_v53 }
 0x1bf   : > { %v1415_v54 = vsel %vm1282_vm0, %v1414_v49, %v1233_v21  ;;  %v1481_v21 = vperm.slane %v1473_v11, %v13468_v53 }
 0x1c0   : > { %v13477_v60 = vperm.slane %v1415_v54, %v13468_v53  ;;  %v1452_v3 = vrot.slane %v1425_v61, 4 }
 0x1c1   : > { %v1508_v55 = vrot.slane %v1481_v21, 4 }
 0x1c2   : > { %v13464_v45 = vpop.permute.xlu2 %11762  ;;  %v1440_v2 = vrot.slane %v13477_v60, 4 }
 0x1c3   : > { %v11764_v50 = vunpack.i.l.bf16 %v13464_v45  ;;  %v11765_v19 = vunpack.i.h.bf16 %v13464_v45 }
 0x1c5   : > { %v1426_v56 = vrot.slane %v11764_v50, 4 }
 0x1ca   : > { %v13500_v13 = vpop.permute.xlu2 %11777 }
 0x1cb   : > { %v11780_v22 = vunpack.i.h.bf16 %v13500_v13 }
 0x1cd   : > { %v1614_v51 = vrot.slane %v11780_v22, 4 }
 0x1d1   : > { %v13455_v40 = vpop.permute.xlu1 %11747  ;;  %v13459_v42 = vpop.permute.xlu0 %11737 }
 0x1d2   : > { %17409 = vst [vmem:[#allocation50_spill] sm:$0xff] %v13455_v40 }
 0x1d3   : > { %17410 = vst [vmem:[#allocation51_spill] sm:$0xff] %v13459_v42 }
 0x1d9   : > { %v13461_v43 = vpop.permute.xlu1 %11752  ;;  %v13472_v57 = vpop.permute.xlu0 %11742 }
 0x1da   : > { %v11754_v46 = vunpack.i.l.bf16 %v13461_v43  ;;  %17411 = vst [vmem:[#allocation52_spill] sm:$0xff] %v13472_v57  ;;  %v11755_v5 = vunpack.i.h.bf16 %v13461_v43 }
 0x1dc   : > { %v1428_v52 = vrot.slane %v11754_v46, 4  ;;  %v1427_v58 = vsel %vm1282_vm0, %v1426_v56, %v11754_v46  ;;  %v1484_v12 = vrot.slane %v11755_v5, 4 }
 0x1dd   : > { %v13481_v0 = vperm.slane %v1427_v58, %v13468_v53 }
 0x1de   : > { %v1429_v59 = vsel %vm1282_vm0, %v11764_v50, %v1428_v52  ;;  %v1485_v28 = vsel %vm1282_vm0, %v11765_v19, %v1484_v12 }
 0x1df   : > { %v1437_v1 = vperm.slane %v1429_v59, %v13468_v53  ;;  %v1441_v7 = vsel %vm1282_vm0, %v13481_v0, %v1440_v2  ;;  %v1493_v50 = vperm.slane %v1485_v28, %v13468_v53  ;;  %v11779_v2 = vunpack.i.l.bf16 %v13500_v13 }
 0x1e0   : > { %v1449_v14 = vperm.slane %v1441_v7, %v13487_v6 }
 0x1e1   : > { %v1453_v8 = vsel %vm1282_vm0, %v1437_v1, %v1452_v3  ;;  %v13493_v10 = vpop.permute.xlu0 %11767  ;;  %v13504_v16 = vpop.permute.xlu1 %11772  ;;  %v1450_v18 = vrot.slane %v1437_v1, 4  ;;  %v13527_v3 = vsel %vm1282_vm0, %v1493_v50, %v1508_v55  ;;  %v1506_v13 = vrot.slane %v1493_v50, 4 }
 0x1e2   : > { %v1461_v15 = vperm.slane %v1453_v8, %v13487_v6  ;;  %v11770_v17 = vunpack.i.h.bf16 %v13493_v10  ;;  %v1464_v25 = vrot.slane %v1449_v14, 4  ;;  %v11775_v29 = vunpack.i.h.bf16 %v13504_v16 }
 0x1e3   : > { %v11769_v31 = vunpack.i.l.bf16 %v13493_v10  ;;  %v1451_v34 = vsel %vm1282_vm0, %v1450_v18, %v1425_v61  ;;  %v1676_v47 = vpack.c.bf16 %v1449_v14, %v1449_v14  ;;  %v11774_v12 = vunpack.i.l.bf16 %v13504_v16 }
 0x1e4   : > { %v1468_v27 = vrot.slane %v1461_v15, 4  ;;  %v1616_v35 = vrot.slane %v11770_v17, 4  ;;  %v1465_v36 = vsel %vm1282_vm0, 0.0, %v1464_v25  ;;  %v1457_v46 = vperm.slane %v1451_v34, %v13487_v6 }
 0x1e5   : > { %v1677_v48 = vpack.c.bf16 %v1465_v36, %v1465_v36  ;;  %v1680_v52 = vpack.c.bf16 %v1461_v15, %v1461_v15  ;;  %v1602_v56 = vrot.slane %v11775_v29, 4  ;;  %v1615_v58 = vsel %vm1282_vm0, %v1614_v51, %v11770_v17 }
 0x1e6   : > { %v1469_v44 = vsel %vm1282_vm0, 0.0, %v1468_v27  ;;  %v1466_v54 = vrot.slane %v1457_v46, 4  ;;  %v1617_v59 = vsel %vm1282_vm0, %v11780_v22, %v1616_v35  ;;  %v1560_v61 = vrot.slane %v11769_v31, 4 }
 0x1e7   : > { %v1681_v49 = vpack.c.bf16 %v1469_v44, %v1469_v44  ;;  %11796 = vxpose.binary.xlu1.c.b16.start.end [1/2] (short) (narrow) %v1677_v48, %v1676_v47, 32  ;;  %v1678_v63 = vpack.c.bf16 %v1457_v46, %v1457_v46  ;;  %v13530_v7 = vperm.slane %v1615_v58, %v13468_v53  ;;  %v1548_v15 = vrot.slane %v13432_v32, 4 }
 0x1e8   : > { %v1467_v62 = vsel %vm1282_vm0, 0.0, %v1466_v54  ;;  %v13533_v8 = vperm.slane %v1617_v59, %v13468_v53  ;;  %v1603_v11 = vsel %vm1282_vm0, %v1602_v56, %v13437_v33  ;;  %v1561_v14 = vsel %vm1282_vm0, %v11779_v2, %v1560_v61 }
 0x1e9   : > { %11786 = vxpose.binary.xlu0.c.b16.start.end [1/2] (short) (narrow) %v1681_v49, %v1680_v52, 32  ;;  %v1679_v1 = vpack.c.bf16 %v1467_v62, %v1467_v62  ;;  %v1605_v17 = vsel %vm1282_vm0, %v11775_v29, %v1604_v9  ;;  %v13543_v18 = vperm.slane %v1603_v11, %v13468_v53  ;;  %v1626_v22 = vrot.slane %v13530_v7, 4 }
 0x1ea   : > { %v1638_v25 = vrot.slane %v13533_v8, 4  ;;  %v1569_v27 = vperm.slane %v1561_v14, %v13468_v53  ;;  %v1549_v33 = vsel %vm1282_vm0, %v11774_v12, %v1548_v15  ;;  %v13550_v16 = vsel %vm1282_vm0, %v1506_v13, %v1481_v21 }
 0x1eb   : > { %11801 = vxpose.binary.xlu2.c.b16.start.end [1/2] (short) (narrow) %v1679_v1, %v1678_v63, 32  ;;  %v13553_v28 = vperm.slane %v1605_v17, %v13468_v53  ;;  %v1557_v34 = vperm.slane %v1549_v33, %v13468_v53  ;;  %v13558_v35 = vsel %vm1282_vm0, %v1626_v22, %v13543_v18  ;;  %v1438_v44 = vrot.slane %v13481_v0, 4 }
 0x1ec   : > { %v1582_v29 = vrot.slane %v1569_v27, 4  ;;  %v1546_v63 = vrot.slane %v11774_v12, 4  ;;  %v1470_v11 = vrot.slane %v11760_v4, 4  ;;  %v1482_v15 = vrot.slane %v11765_v19, 4 }
 0x1ed   : > { %v13562_v36 = vsel %vm1282_vm0, %v1638_v25, %v13553_v28  ;;  %v1584_v46 = vrot.slane %v1557_v34, 4  ;;  %v1439_v47 = vsel %vm1282_vm0, %v1438_v44, %v13477_v60  ;;  %v1558_v41 = vrot.slane %v11779_v2, 4 }
 0x1ee   : > { %v1583_v21 = vsel %vm1282_vm0, %v1582_v29, %v1557_v34  ;;  %v1445_v49 = vperm.slane %v1439_v47, %v13487_v6  ;;  %v1547_v14 = vsel %vm1282_vm0, %v1546_v63, %v13432_v32  ;;  %v1471_v13 = vsel %vm1282_vm0, %v1470_v11, %v13421_v26 }
 0x1ef   : > { %v1589_v48 = vperm.slane %v1583_v21, %v13487_v6  ;;  %v1585_v50 = vsel %vm1282_vm0, %v1569_v27, %v1584_v46  ;;  %v1483_v17 = vsel %vm1282_vm0, %v1482_v15, %v11755_v5  ;;  %v1553_v12 = vperm.slane %v1547_v14, %v13468_v53 }
 0x1f0   : > { %v1593_v52 = vperm.slane %v1585_v50, %v13487_v6  ;;  %v1462_v54 = vrot.slane %v1445_v49, 4  ;;  %v1674_v61 = vpack.c.bf16 %v1445_v49, %v1445_v49  ;;  %v1477_v22 = vperm.slane %v1471_v13, %v13468_v53 }
 0x1f1   : > { %v1598_v51 = vrot.slane %v1589_v48, 4  ;;  %v3513_v58 = vpack.c.bf16 %v1589_v48, %v1589_v48  ;;  %v1489_v4 = vperm.slane %v1483_v17, %v13468_v53  ;;  %v1559_v32 = vsel %vm1282_vm0, %v1558_v41, %v11769_v31 }
 0x1f2   : > { %v1600_v56 = vrot.slane %v1593_v52, 4  ;;  %v1463_v0 = vsel %vm1282_vm0, 0.0, %v1462_v54  ;;  %v3515_v1 = vpack.c.bf16 %v1593_v52, %v1593_v52  ;;  %v1572_v25 = vrot.slane %v1553_v12, 4 }
 0x1f3   : > { %v1599_v55 = vsel %vm1282_vm0, 0.0, %v1598_v51  ;;  %v1675_v62 = vpack.c.bf16 %v1463_v0, %v1463_v0  ;;  %v1496_v26 = vrot.slane %v1477_v22, 4  ;;  %v1565_v45 = vperm.slane %v1559_v32, %v13468_v53 }
 0x1f4   : > { %v3514_v59 = vpack.c.bf16 %v1599_v55, %v1599_v55  ;;  %v1601_v60 = vsel %vm1282_vm0, 0.0, %v1600_v56  ;;  %v1517_v2 = vperm.slane %v13527_v3, %v13487_v6  ;;  %v1628_v51 = vrot.slane %v13543_v18, 4 }
 0x1f5   : > { %v3516_v9 = vpack.c.bf16 %v1601_v60, %v1601_v60  ;;  %v1497_v19 = vsel %vm1282_vm0, %v1489_v4, %v1496_v26  ;;  %v1573_v43 = vsel %vm1282_vm0, %v1565_v45, %v1572_v25  ;;  %v1570_v3 = vrot.slane %v1565_v45, 4 }
 0x1f6   : > { %v1505_v5 = vperm.slane %v1497_v19, %v13487_v6  ;;  %v1581_v27 = vperm.slane %v1573_v43, %v13487_v6  ;;  %v1524_v31 = vrot.slane %v1517_v2, 4  ;;  %v1688_v49 = vpack.c.bf16 %v1517_v2, %v1517_v2 }
 0x1f7   : > { %v1629_v52 = vsel %vm1282_vm0, %v13530_v7, %v1628_v51  ;;  %v1513_v55 = vperm.slane %v13550_v16, %v13487_v6  ;;  %v1571_v56 = vsel %vm1282_vm0, %v1570_v3, %v1553_v12  ;;  %v1640_v14 = vrot.slane %v13553_v28, 4 }
 0x1f8   : > { %v1520_v33 = vrot.slane %v1505_v5, 4  ;;  %v1596_v34 = vrot.slane %v1581_v27, 4  ;;  %v1684_v44 = vpack.c.bf16 %v1505_v5, %v1505_v5  ;;  %v3511_v21 = vpack.c.bf16 %v1581_v27, %v1581_v27  ;;  %v13624_v27 = vpop.permute.xlu2 %11782 }
 0x1f9   : > { %v1525_v48 = vsel %vm1282_vm0, 0.0, %v1524_v31  ;;  %v1637_v54 = vperm.slane %v1629_v52, %v13487_v6  ;;  %v1494_v13 = vrot.slane %v1489_v4, 4  ;;  %v1641_v15 = vsel %vm1282_vm0, %v13533_v8, %v1640_v14  ;;  %17412 = vst [vmem:[#allocation53_spill] sm:$0xff] %v13624_v27 }
 0x1fa   : > { %v1521_v10 = vsel %vm1282_vm0, 0.0, %v1520_v33  ;;  %v1597_v29 = vsel %vm1282_vm0, 0.0, %v1596_v34  ;;  %v1689_v50 = vpack.c.bf16 %v1525_v48, %v1525_v48  ;;  %v1649_v17 = vperm.slane %v1641_v15, %v13487_v6 }
 0x1fb   : > { %v1685_v46 = vpack.c.bf16 %v1521_v10, %v1521_v10  ;;  %v3512_v47 = vpack.c.bf16 %v1597_v29, %v1597_v29  ;;  %v1652_v0 = vrot.slane %v1637_v54, 4  ;;  %v3519_v60 = vpack.c.bf16 %v1637_v54, %v1637_v54 }
 0x1fc   : > { %v1495_v12 = vsel %vm1282_vm0, %v1494_v13, %v1477_v22  ;;  %v1656_v32 = vrot.slane %v1649_v17, 4  ;;  %v3523_v45 = vpack.c.bf16 %v1649_v17, %v1649_v17  ;;  %v1633_v8 = vperm.slane %v13558_v35, %v13487_v6 }
 0x1fd   : > { %v1501_v41 = vperm.slane %v1495_v12, %v13487_v6 }
 0x1fe   : > { %v1657_v26 = vsel %vm1282_vm0, 0.0, %v1656_v32  ;;  %v1650_v5 = vrot.slane %v1633_v8, 4  ;;  %v3517_v33 = vpack.c.bf16 %v1633_v8, %v1633_v8 }
 0x1ff   : > { %v1518_v25 = vrot.slane %v1501_v41, 4  ;;  %v3524_v19 = vpack.c.bf16 %v1657_v26, %v1657_v26  ;;  %v1682_v28 = vpack.c.bf16 %v1501_v41, %v1501_v41 }
 0x200   : > { %v1651_v22 = vsel %vm1282_vm0, 0.0, %v1650_v5 }
 0x201   : > { %v1519_v43 = vsel %vm1282_vm0, 0.0, %v1518_v25  ;;  %v3518_v2 = vpack.c.bf16 %v1651_v22, %v1651_v22 }
 0x202   : > { %v1683_v4 = vpack.c.bf16 %v1519_v43, %v1519_v43 }
 0x207   : > { %11826 = vxpose.binary.xlu1.c.b16.start.end [1/2] (short) (narrow) %v3514_v59, %v3513_v58, 32  ;;  %v1577_v58 = vperm.slane %v1571_v56, %v13487_v6  ;;  %v1522_v59 = vrot.slane %v1513_v55, 4 }
 0x209   : > { %11791 = vxpose.binary.xlu0.c.b16.start.end [1/2] (short) (narrow) %v1675_v62, %v1674_v61, 32  ;;  %v1653_v61 = vsel %vm1282_vm0, 0.0, %v1652_v0  ;;  %v1594_v62 = vrot.slane %v1577_v58, 4  ;;  %v1523_v18 = vsel %vm1282_vm0, 0.0, %v1522_v59  ;;  %v3509_v16 = vpack.c.bf16 %v1577_v58, %v1577_v58 }
 0x20a   : > { %v3520_v63 = vpack.c.bf16 %v1653_v61, %v1653_v61  ;;  %v1687_v7 = vpack.c.bf16 %v1523_v18, %v1523_v18 }
 0x20b   : > { %11806 = vxpose.binary.xlu2.c.b16.start.end [1/2] (short) (narrow) %v3516_v9, %v3515_v1, 32  ;;  %v1686_v1 = vpack.c.bf16 %v1513_v55, %v1513_v55  ;;  %v1595_v9 = vsel %vm1282_vm0, 0.0, %v1594_v62 }
 0x20c   : > { %v3510_v11 = vpack.c.bf16 %v1595_v9, %v1595_v9 }
 0x227   : > { %11836 = vxpose.binary.xlu1.c.b16.start.end [1/2] (short) (narrow) %v1685_v46, %v1684_v44, 32 }
 0x229   : > { %11821 = vxpose.binary.xlu0.c.b16.start.end [1/2] (short) (narrow) %v3512_v47, %v3511_v21, 32 }
 0x22b   : > { %11811 = vxpose.binary.xlu2.c.b16.start.end [1/2] (short) (narrow) %v1689_v50, %v1688_v49, 32 }
 0x247   : > { %11856 = vxpose.binary.xlu1.c.b16.start.end [1/2] (short) (narrow) %v3520_v63, %v3519_v60, 32 }
 0x249   : > { %11841 = vxpose.binary.xlu0.c.b16.start.end [1/2] (short) (narrow) %v1687_v7, %v1686_v1, 32 }
 0x24b   : > { %11816 = vxpose.binary.xlu2.c.b16.start.end [1/2] (short) (narrow) %v3510_v11, %v3509_v16, 32 }
 0x269   : > { %11846 = vxpose.binary.xlu0.c.b16.start.end [1/2] (short) (narrow) %v3524_v19, %v3523_v45, 32 }
 0x26b   : > { %11831 = vxpose.binary.xlu2.c.b16.start.end [1/2] (short) (narrow) %v1683_v4, %v1682_v28, 32 }
 0x289   : > { %11851 = vxpose.binary.xlu0.c.b16.start.end [1/2] (short) (narrow) %v3518_v2, %v3517_v33, 32 }
 0x28c   : > { %v11802_v34 = vpop.trf.xlu2 }
 0x28d   : > { %v2051_v61 = vrot.slane %v11802_v34, 4 }
 0x293   : > { %v11797_v10 = vpop.trf.xlu1 }
 0x294   : > { %v2065_v31 = vrot.slane %v11797_v10, 4  ;;  %v13626_v29 = vpop.trf.xlu2 }
 0x295   : > { %v11787_v44 = vpop.trf.xlu0 }
 0x296   : > { %v2063_v46 = vrot.slane %v11787_v44, 4  ;;  %v2066_v21 = vsel %vm1282_vm0, %v11787_v44, %v2065_v31 }
 0x297   : > { %v2074_v18 = vperm.slane %v2066_v21, %v13468_v53 }
 0x298   : > { %v2064_v47 = vsel %vm1282_vm0, %v2063_v46, %v11797_v10 }
 0x299   : > { %v2070_v59 = vperm.slane %v2064_v47, %v13468_v53  ;;  %v2111_v14 = vrot.slane %v2074_v18, 4 }
 0x29b   : > { %v13630_v35 = vpop.trf.xlu1  ;;  %v2099_v9 = vrot.slane %v2070_v59, 4 }
 0x29c   : > { %v11804_v48 = vpop.trf.xlu2 }
 0x29d   : > { %v13632_v49 = vpop.trf.xlu0  ;;  %v2275_v28 = vrot.slane %v11804_v48, 4 }
 0x2a3   : > { %v11799_v50 = vpop.trf.xlu1 }
 0x2a4   : > { %v2289_v51 = vrot.slane %v11799_v50, 4  ;;  %v13634_v3 = vpop.trf.xlu2 }
 0x2a5   : > { %v11789_v52 = vpop.trf.xlu0 }
 0x2a6   : > { %v2287_v54 = vrot.slane %v11789_v52, 4  ;;  %v2290_v55 = vsel %vm1282_vm0, %v11789_v52, %v2289_v51 }
 0x2a7   : > { %v2298_v4 = vperm.slane %v2290_v55, %v13468_v53 }
 0x2a8   : > { %v2288_v56 = vsel %vm1282_vm0, %v2287_v54, %v11799_v50 }
 0x2a9   : > { %v2294_v43 = vperm.slane %v2288_v56, %v13468_v53  ;;  %v2335_v44 = vrot.slane %v2298_v4, 4 }
 0x2ab   : > { %v13641_v62 = vpop.trf.xlu1  ;;  %v2323_v2 = vrot.slane %v2294_v43, 4 }
 0x2ac   : > { %v11807_v0 = vpop.trf.xlu2 }
 0x2ad   : > { %v13638_v58 = vpop.trf.xlu0 }
 0x2b3   : > { %v11827_v19 = vpop.trf.xlu1 }
 0x2b4   : > { %v13644_v60 = vpop.trf.xlu2 }
 0x2b5   : > { %v11792_v63 = vpop.trf.xlu0 }
 0x2b6   : > { %v2052_v1 = vsel %vm1282_vm0, %v2051_v61, %v11792_v63  ;;  %v2053_v7 = vrot.slane %v11792_v63, 4 }
 0x2b7   : > { %v2058_v16 = vperm.slane %v2052_v1, %v13468_v53 }
 0x2b8   : > { %v2054_v11 = vsel %vm1282_vm0, %v11802_v34, %v2053_v7 }
 0x2b9   : > { %v2062_v13 = vperm.slane %v2054_v11, %v13468_v53  ;;  %v13651_v15 = vsel %vm1282_vm0, %v2099_v9, %v2058_v16  ;;  %v2101_v17 = vrot.slane %v2058_v16, 4 }
 0x2bb   : > { %v13654_v12 = vsel %vm1282_vm0, %v2070_v59, %v2101_v17  ;;  %v2113_v41 = vrot.slane %v2062_v13, 4  ;;  %v13657_v32 = vsel %vm1282_vm0, %v2111_v14, %v2062_v13  ;;  %v13670_v10 = vpop.trf.xlu1  ;;  %v3793_v59 = vrot.slane %v11807_v0, 4 }
 0x2bc   : > { %v11809_v25 = vpop.trf.xlu2 }
 0x2bd   : > { %v13659_v26 = vpop.trf.xlu0  ;;  %v13662_v45 = vsel %vm1282_vm0, %v2074_v18, %v2113_v41  ;;  %v4017_v14 = vrot.slane %v11809_v25, 4 }
 0x2c3   : > { %v13690_v56 = vpop.trf.xlu1 }
 0x2c4   : > { %v13666_v8 = vpop.trf.xlu2 }
 0x2c5   : > { %v11794_v5 = vpop.trf.xlu0 }
 0x2c6   : > { %v2276_v22 = vsel %vm1282_vm0, %v2275_v28, %v11794_v5  ;;  %v2277_v33 = vrot.slane %v11794_v5, 4  ;;  %v3781_v5 = vrot.slane %v11827_v19, 4 }
 0x2c7   : > { %v2282_v34 = vperm.slane %v2276_v22, %v13468_v53  ;;  %v2163_v22 = vrot.slane %v13626_v29, 4 }
 0x2c8   : > { %v2278_v31 = vsel %vm1282_vm0, %v11804_v48, %v2277_v33  ;;  %v2177_v33 = vrot.slane %v13630_v35, 4 }
 0x2c9   : > { %v2286_v46 = vperm.slane %v2278_v31, %v13468_v53  ;;  %v13675_v21 = vsel %vm1282_vm0, %v2323_v2, %v2282_v34  ;;  %v2325_v47 = vrot.slane %v2282_v34, 4 }
 0x2cb   : > { %v13678_v50 = vsel %vm1282_vm0, %v2294_v43, %v2325_v47  ;;  %v13681_v51 = vsel %vm1282_vm0, %v2335_v44, %v2286_v46  ;;  %v2337_v52 = vrot.slane %v2286_v46, 4  ;;  %v13696_v9 = vpop.trf.xlu1  ;;  %v2175_v44 = vrot.slane %v13632_v49, 4 }
 0x2cc   : > { %v13683_v54 = vpop.trf.xlu2  ;;  %17413 = vst [vmem:[#allocation54_spill] sm:$0xff] %v13696_v9  ;;  %v2165_v46 = vrot.slane %v13659_v26, 4 }
 0x2cd   : > { %v13685_v55 = vpop.trf.xlu0  ;;  %v13688_v48 = vsel %vm1282_vm0, %v2298_v4, %v2337_v52  ;;  %v2176_v30 = vsel %vm1282_vm0, %v2175_v44, %v13630_v35 }
 0x2d3   : > { %v13705_v28 = vpop.trf.xlu1 }
 0x2d4   : > { %v13692_v61 = vpop.trf.xlu2 }
 0x2d5   : > { %v11822_v18 = vpop.trf.xlu0 }
 0x2d6   : > { %v3794_v63 = vsel %vm1282_vm0, %v3793_v59, %v11822_v18  ;;  %v3795_v1 = vrot.slane %v11822_v18, 4 }
 0x2d8   : > { %v3796_v7 = vsel %vm1282_vm0, %v11807_v0, %v3795_v1  ;;  %v3800_v0 = vperm.slane %v3794_v63, %v13468_v53  ;;  %v2399_v63 = vrot.slane %v13638_v58, 4  ;;  %v2164_v1 = vsel %vm1282_vm0, %v2163_v22, %v13659_v26 }
 0x2d9   : > { %v3804_v2 = vperm.slane %v3796_v7, %v13468_v53  ;;  %v2166_v26 = vsel %vm1282_vm0, %v13626_v29, %v2165_v46  ;;  %v2170_v35 = vperm.slane %v2164_v1, %v13468_v53 }
 0x2da   : > { %v3829_v59 = vrot.slane %v3800_v0, 4 }
 0x2dc   : > { %v13698_v16 = vpop.trf.xlu2 }
 0x2dd   : > { %v13700_v11 = vpop.trf.xlu0 }
 0x2e4   : > { %v13702_v13 = vpop.trf.xlu2 }
 0x2e5   : > { %v11824_v17 = vpop.trf.xlu0 }
 0x2e6   : > { %v4018_v41 = vsel %vm1282_vm0, %v4017_v14, %v11824_v17  ;;  %v4019_v43 = vrot.slane %v11824_v17, 4  ;;  %v3841_v14 = vrot.slane %v3804_v2, 4  ;;  %v13723_v17 = vpop.trf.xlu1 }
 0x2e8   : > { %v4020_v4 = vsel %vm1282_vm0, %v11809_v25, %v4019_v43  ;;  %v2401_v25 = vrot.slane %v13641_v62, 4 }
 0x2ec   : > { %v11817_v34 = vpop.trf.xlu2 }
 0x2ed   : > { %v13712_v31 = vpop.trf.xlu0  ;;  %v3782_v47 = vsel %vm1282_vm0, %v3781_v5, %v11817_v34  ;;  %v3783_v52 = vrot.slane %v11817_v34, 4 }
 0x2ee   : > { %v3788_v18 = vperm.slane %v3782_v47, %v13468_v53  ;;  %v2178_v47 = vsel %vm1282_vm0, %v13632_v49, %v2177_v33  ;;  %v2182_v49 = vperm.slane %v2176_v30, %v13468_v53  ;;  %v2174_v33 = vperm.slane %v2166_v26, %v13468_v53  ;;  %v13771_v26 = vpop.trf.xlu1 }
 0x2ef   : > { %v3784_v7 = vsel %vm1282_vm0, %v11827_v19, %v3783_v52  ;;  %v2402_v19 = vsel %vm1282_vm0, %v13638_v58, %v2401_v25  ;;  %v2186_v44 = vperm.slane %v2178_v47, %v13468_v53  ;;  %v13764_v30 = vperm.slane %v13651_v15, %v13487_v6 }
 0x2f0   : > { %v3792_v43 = vperm.slane %v3784_v7, %v13468_v53  ;;  %v13727_v5 = vsel %vm1282_vm0, %v3829_v59, %v3788_v18  ;;  %v3831_v34 = vrot.slane %v3788_v18, 4  ;;  %v2400_v18 = vsel %vm1282_vm0, %v2399_v63, %v13641_v62 }
 0x2f1   : > { %17414 = vst [vmem:[#allocation55_spill] sm:$0xff] %v13727_v5  ;;  %v13757_v46 = vperm.slane %v2402_v19, %v13468_v53  ;;  %v13760_v62 = vperm.slane %v2400_v18, %v13468_v53  ;;  %v2213_v25 = vrot.slane %v2170_v35, 4  ;;  %v2211_v63 = vrot.slane %v2182_v49, 4 }
 0x2f2   : > { %v13738_v22 = vsel %vm1282_vm0, %v3800_v0, %v3831_v34  ;;  %v13741_v52 = vsel %vm1282_vm0, %v3841_v14, %v3792_v43  ;;  %v3843_v59 = vrot.slane %v3792_v43, 4  ;;  %v2223_v1 = vrot.slane %v2186_v44, 4 }
 0x2f3   : > { %17415 = vst [vmem:[#allocation56_spill] sm:$0xff] %v13738_v22  ;;  %v2387_v7 = vrot.slane %v13634_v3, 4  ;;  %v4005_v43 = vrot.slane %v13690_v56, 4  ;;  %v2435_v34 = vrot.slane %v13760_v62, 4  ;;  %v2212_v47 = vsel %vm1282_vm0, %v2211_v63, %v2170_v35 }
 0x2f4   : > { %17416 = vst [vmem:[#allocation57_spill] sm:$0xff] %v13741_v52  ;;  %v13749_v29 = vsel %vm1282_vm0, %v3804_v2, %v3843_v59  ;;  %v13751_v58 = vpop.trf.xlu2  ;;  %v2225_v2 = vrot.slane %v2174_v33, 4  ;;  %v4024_v19 = vperm.slane %v4018_v41, %v13468_v53  ;;  %v2389_v59 = vrot.slane %v13685_v55, 4 }
 0x2f5   : > { %17417 = vst [vmem:[#allocation58_spill] sm:$0xff] %v13749_v29  ;;  %v13753_v0 = vpop.trf.xlu0  ;;  %v13778_v18 = vperm.slane %v13654_v12, %v13487_v6  ;;  %v2214_v14 = vsel %vm1282_vm0, %v2182_v49, %v2213_v25  ;;  %v2224_v20 = vsel %vm1282_vm0, %v2223_v1, %v2174_v33  ;;  %v2388_v24 = vsel %vm1282_vm0, %v2387_v7, %v13685_v55 }
 0x2f6   : > { %v4028_v35 = vperm.slane %v4020_v4, %v13468_v53  ;;  %v2226_v41 = vsel %vm1282_vm0, %v2186_v44, %v2225_v2  ;;  %v13788_v15 = vperm.slane %v13657_v32, %v13487_v6  ;;  %v13791_v23 = vperm.slane %v2212_v47, %v13487_v6 }
 0x2f7   : > { %v13798_v55 = vperm.slane %v13662_v45, %v13487_v6  ;;  %v4053_v4 = vrot.slane %v4024_v19, 4  ;;  %v13802_v44 = vperm.slane %v2214_v14, %v13487_v6  ;;  %v13805_v32 = vperm.slane %v2224_v20, %v13487_v6 }
 0x2f8   : > { %v2390_v2 = vsel %vm1282_vm0, %v13634_v3, %v2389_v59  ;;  %v2394_v1 = vperm.slane %v2388_v24, %v13468_v53  ;;  %v13813_v45 = vperm.slane %v2226_v41, %v13487_v6  ;;  %v13821_v20 = vperm.slane %v13675_v21, %v13487_v6 }
 0x2f9   : > { %v2199_v24 = vrot.slane %v13692_v61, 4  ;;  %v17425_v52 = vrot.slane %v13778_v18, 4 }
 0x2fa   : > { %v2436_v21 = vsel %vm1282_vm0, %v2435_v34, %v2394_v1  ;;  %v2437_v3 = vrot.slane %v2394_v1, 4  ;;  %v2311_v34 = vrot.slane %v13698_v16, 4 }
 0x2fc   : > { %v11819_v63 = vpop.trf.xlu2 }
 0x2fd   : > { %v4006_v12 = vsel %vm1282_vm0, %v4005_v43, %v11819_v63  ;;  %v4007_v49 = vrot.slane %v11819_v63, 4  ;;  %v13794_v25 = vpop.trf.xlu0  ;;  %v4065_v43 = vrot.slane %v4028_v35, 4 }
 0x2fe   : > { %v4012_v33 = vperm.slane %v4006_v12, %v13468_v53 }
 0x2ff   : > { %v4008_v7 = vsel %vm1282_vm0, %v13690_v56, %v4007_v49  ;;  %v2089_v56 = vrot.slane %v13705_v28, 4 }
 0x300   : > { %v4016_v47 = vperm.slane %v4008_v7, %v13468_v53  ;;  %v13817_v14 = vsel %vm1282_vm0, %v4053_v4, %v4012_v33  ;;  %v4055_v63 = vrot.slane %v4012_v33, 4  ;;  %v13834_v4 = vperm.slane %v2390_v2, %v13468_v53 }
 0x301   : > { %17418 = vst [vmem:[#allocation59_spill] sm:$0xff] %v13817_v14  ;;  %v2087_v2 = vrot.slane %v13683_v54, 4  ;;  %v13851_v7 = vperm.slane %v13681_v51, %v13487_v6  ;;  %v13854_v33 = vperm.slane %v2436_v21, %v13487_v6  ;;  %v17423_v51 = vrot.slane %v13757_v46, 4 }
 0x302   : > { %v13827_v59 = vsel %vm1282_vm0, %v4024_v19, %v4055_v63  ;;  %v13830_v41 = vsel %vm1282_vm0, %v4065_v43, %v4016_v47  ;;  %v4067_v12 = vrot.slane %v4016_v47, 4  ;;  %v2201_v19 = vrot.slane %v13723_v17, 4  ;;  %v11840_v63 = vpop.trf.xlu1 }
 0x303   : > { %17419 = vst [vmem:[#allocation60_spill] sm:$0xff] %v13827_v59  ;;  %v2088_v1 = vsel %vm1282_vm0, %v2087_v2, %v13705_v28  ;;  %v2425_v49 = vrot.slane %v11840_v63, 4  ;;  %v2448_v21 = vsel %vm1282_vm0, %v17423_v51, %v13834_v4  ;;  %v2090_v57 = vsel %vm1282_vm0, %v13683_v54, %v2089_v56 }
 0x304   : > { %17420 = vst [vmem:[#allocation61_spill] sm:$0xff] %v13830_v41  ;;  %v13842_v43 = vsel %vm1282_vm0, %v4028_v35, %v4067_v12  ;;  %v13844_v47 = vpop.trf.xlu2  ;;  %v2313_v35 = vrot.slane %v13771_v26, 4  ;;  %v13860_v12 = vperm.slane %v13678_v50, %v13487_v6  ;;  %v2200_v50 = vsel %vm1282_vm0, %v2199_v24, %v13723_v17 }
 0x305   : > { %17421 = vst [vmem:[#allocation62_spill] sm:$0xff] %v13842_v43  ;;  %v13865_v42 = vpop.trf.xlu0  ;;  %v2202_v40 = vsel %vm1282_vm0, %v13692_v61, %v2201_v19  ;;  %v2423_v28 = vrot.slane %v13702_v13, 4  ;;  %v2312_v2 = vsel %vm1282_vm0, %v2311_v34, %v13771_v26  ;;  %v2075_v41 = vrot.slane %v13753_v0, 4 }
 0x306   : > { %17422 = vst [vmem:[#allocation63_spill] sm:$0xff] %v13844_v47  ;;  %v2438_v51 = vsel %vm1282_vm0, %v13760_v62, %v2437_v3  ;;  %v2094_v54 = vperm.slane %v2088_v1, %v13468_v53  ;;  %v2314_v17 = vsel %vm1282_vm0, %v13698_v16, %v2313_v35  ;;  %v13889_v61 = vperm.slane %v2448_v21, %v13487_v6 }
 0x307   : > { %v2424_v24 = vsel %vm1282_vm0, %v2423_v28, %v11840_v63  ;;  %v2098_v56 = vperm.slane %v2090_v57, %v13468_v53  ;;  %v13893_v26 = vperm.slane %v2200_v50, %v13468_v53  ;;  %v13896_v19 = vperm.slane %v2202_v40, %v13468_v53 }
 0x308   : > { %v2426_v62 = vsel %vm1282_vm0, %v13702_v13, %v2425_v49  ;;  %v13902_v16 = vperm.slane %v2312_v2, %v13468_v53  ;;  %v13906_v35 = vperm.slane %v2438_v51, %v13487_v6  ;;  %v13909_v57 = vperm.slane %v2314_v17, %v13468_v53 }
 0x309   : > { %v13912_v40 = vperm.slane %v2424_v24, %v13468_v53  ;;  %v2123_v49 = vrot.slane %v2094_v54, 4  ;;  %v13916_v21 = vperm.slane %v2426_v62, %v13468_v53  ;;  %v2135_v2 = vrot.slane %v2098_v56, 4 }
 0x30a   : > { %v2235_v51 = vrot.slane %v13893_v26, 4  ;;  %v2247_v17 = vrot.slane %v13896_v19, 4  ;;  %v2187_v34 = vrot.slane %v13794_v25, 4  ;;  %v2299_v14 = vrot.slane %v13865_v42, 4 }
 0x30c   : > { %v11832_v63 = vpop.trf.xlu2 }
 0x30d   : > { %v2076_v1 = vsel %vm1282_vm0, %v2075_v41, %v11832_v63  ;;  %v2077_v13 = vrot.slane %v11832_v63, 4  ;;  %v13931_v47 = vpop.trf.xlu0 }
 0x30e   : > { %v2082_v50 = vperm.slane %v2076_v1, %v13468_v53 }
 0x30f   : > { %v2078_v24 = vsel %vm1282_vm0, %v13753_v0, %v2077_v13 }
 0x310   : > { %v2086_v41 = vperm.slane %v2078_v24, %v13468_v53  ;;  %v2124_v63 = vsel %vm1282_vm0, %v2123_v49, %v2082_v50  ;;  %v2125_v62 = vrot.slane %v2082_v50, 4  ;;  %v17424_v50 = vrot.slane %v13764_v30, 4 }
 0x311   : > { %v2130_v28 = vperm.slane %v2124_v63, %v13487_v6 }
 0x312   : > { %v2126_v0 = vsel %vm1282_vm0, %v2094_v54, %v2125_v62  ;;  %v2136_v13 = vsel %vm1282_vm0, %v2135_v2, %v2086_v41  ;;  %v2137_v24 = vrot.slane %v2086_v41, 4 }
 0x313   : > { %v2134_v49 = vperm.slane %v2126_v0, %v13487_v6  ;;  %v2150_v59 = vsel %vm1282_vm0, %v2130_v28, %v17424_v50  ;;  %v2147_v1 = vrot.slane %v2130_v28, 4  ;;  %v13941_v63 = vperm.slane %v2136_v13, %v13487_v6 }
 0x314   : > { %v11833_v3 = vpop.trf.xlu2  ;;  %v2511_v29 = vshrl.u32 %v2150_v59, 16  ;;  %v2138_v54 = vsel %vm1282_vm0, %v2098_v56, %v2137_v24 }
 0x315   : > { %v2188_v2 = vsel %vm1282_vm0, %v2187_v34, %v11833_v3  ;;  %v2189_v41 = vrot.slane %v11833_v3, 4  ;;  %v2148_v62 = vsel %vm1282_vm0, %v2147_v1, %v13764_v30  ;;  %v2151_v0 = vrot.slane %v2134_v49, 4 }
 0x316   : > { %v2194_v28 = vperm.slane %v2188_v2, %v13468_v53  ;;  %v2503_v50 = vshrl.u32 %v2148_v62, 16  ;;  %v2146_v13 = vperm.slane %v2138_v54, %v13487_v6  ;;  %v13954_v22 = vsel %vm1282_vm0, %v2134_v49, %v17425_v52 }
 0x317   : > { %v2190_v56 = vsel %vm1282_vm0, %v13794_v25, %v2189_v41  ;;  %v2152_v3 = vsel %vm1282_vm0, %v2151_v0, %v13778_v18  ;;  %v2527_v34 = vshrl.u32 %v13954_v22, 16  ;;  %v2155_v30 = vrot.slane %v13941_v63, 4 }
 0x318   : > { %v2198_v1 = vperm.slane %v2190_v56, %v13468_v53  ;;  %v2236_v24 = vsel %vm1282_vm0, %v2235_v51, %v2194_v28  ;;  %v2237_v54 = vrot.slane %v2194_v28, 4  ;;  %v2519_v2 = vshrl.u32 %v2152_v3, 16 }
 0x319   : > { %v2242_v43 = vperm.slane %v2236_v24, %v13487_v6  ;;  %v17426_v52 = vrot.slane %v13798_v55, 4  ;;  %v2159_v25 = vrot.slane %v2146_v13, 4  ;;  %v13972_v18 = vsel %vm1282_vm0, %v2155_v30, %v13788_v15 }
 0x31a   : > { %v2238_v41 = vsel %vm1282_vm0, %v13893_v26, %v2237_v54  ;;  %v2249_v0 = vrot.slane %v2198_v1, 4  ;;  %v2248_v28 = vsel %vm1282_vm0, %v2247_v17, %v2198_v1  ;;  %v17427_v56 = vrot.slane %v13791_v23, 4 }
 0x31b   : > { %v13968_v49 = vsel %vm1282_vm0, %v2146_v13, %v17426_v52  ;;  %v2259_v5 = vrot.slane %v2242_v43, 4  ;;  %v2246_v52 = vperm.slane %v2238_v41, %v13487_v6  ;;  %v13984_v13 = vsel %vm1282_vm0, %v2159_v25, %v13798_v55 }
 0x31c   : > { %v2559_v51 = vshrl.u32 %v13968_v49, 16  ;;  %v2262_v24 = vsel %vm1282_vm0, %v2242_v43, %v17427_v56  ;;  %v11834_v30 = vpop.trf.xlu2  ;;  %v2250_v26 = vsel %vm1282_vm0, %v13896_v19, %v2249_v0  ;;  %v2551_v54 = vshrl.u32 %v13984_v13, 16 }
 0x31d   : > { %v2509_v9 = vpack.i.b16 %v2262_v24, %v2150_v59  ;;  %v2512_v38 = vshrl.u32 %v2262_v24, 16  ;;  %v2300_v17 = vsel %vm1282_vm0, %v2299_v14, %v11834_v30  ;;  %v2301_v1 = vrot.slane %v11834_v30, 4 }
 0x31e   : > { %v2260_v43 = vsel %vm1282_vm0, %v2259_v5, %v13791_v23  ;;  %v2263_v56 = vrot.slane %v2246_v52, 4  ;;  %v2306_v41 = vperm.slane %v2300_v17, %v13468_v53  ;;  %v2258_v0 = vperm.slane %v2250_v26, %v13487_v6 }
 0x31f   : > { %v2513_v37 = vpack.i.b16 %v2512_v38, %v2511_v29  ;;  %v2501_v55 = vpack.i.b16 %v2260_v43, %v2148_v62  ;;  %v2504_v25 = vshrl.u32 %v2260_v43, 16  ;;  %v2302_v59 = vsel %vm1282_vm0, %v13865_v42, %v2301_v1 }
 0x320   : > { %v2264_v19 = vsel %vm1282_vm0, %v2263_v56, %v13802_v44  ;;  %v17428_v14 = vrot.slane %v13802_v44, 4  ;;  %v2310_v23 = vperm.slane %v2302_v59, %v13468_v53  ;;  %v17429_v5 = vrot.slane %v13902_v16, 4 }
 0x321   : > { %v2349_v29 = vrot.slane %v2306_v41, 4  ;;  %11861 = vxpose.binary.xlu0.c.b16.start.end [1/2] (short) (narrow) %v2513_v37, %v2509_v9, 16  ;;  %v2505_v62 = vpack.i.b16 %v2504_v25, %v2503_v50  ;;  %v2517_v30 = vpack.i.b16 %v2264_v19, %v2152_v3  ;;  %v2520_v17 = vshrl.u32 %v2264_v19, 16 }
 0x322   : > { %v14001_v24 = vsel %vm1282_vm0, %v2246_v52, %v17428_v14  ;;  %v2348_v38 = vsel %vm1282_vm0, %v17429_v5, %v2306_v41  ;;  %v17430_v26 = vrot.slane %v13813_v45, 4  ;;  %v2361_v1 = vrot.slane %v2310_v23, 4 }
 0x323   : > { %v2354_v42 = vperm.slane %v2348_v38, %v13487_v6  ;;  %v2350_v52 = vsel %vm1282_vm0, %v13902_v16, %v2349_v29  ;;  %11864 = vxpose.binary.xlu1.c.b16.start.end [1/2] (short) (narrow) %v2505_v62, %v2501_v55, 16  ;;  %v2521_v37 = vpack.i.b16 %v2520_v17, %v2519_v2  ;;  %v2528_v50 = vshrl.u32 %v14001_v24, 16 }
 0x324   : > { %v2274_v44 = vsel %vm1282_vm0, %v2258_v0, %v17430_v26  ;;  %v14015_v41 = vperm.slane %v2350_v52, %v13487_v6  ;;  %v2525_v9 = vpack.i.b16 %v14001_v24, %v13954_v22  ;;  %v11835_v3 = vpop.trf.xlu2  ;;  %v2271_v59 = vrot.slane %v2258_v0, 4 }
 0x325   : > { %v2557_v43 = vpack.i.b16 %v2274_v44, %v13968_v49  ;;  %v2560_v56 = vshrl.u32 %v2274_v44, 16  ;;  %v2254_v19 = vperm.slane %v2248_v28, %v13487_v6  ;;  %v2535_v16 = vshrl.u32 %v13972_v18, 16  ;;  %11876 = vxpose.binary.xlu2.c.b16.start.end [1/2] (short) (narrow) %v2521_v37, %v2517_v30, 16 }
 0x326   : > { %v17431_v49 = vrot.slane %v13931_v47, 4  ;;  %v2413_v14 = vrot.slane %v11835_v3, 4  ;;  %v2529_v5 = vpack.i.b16 %v2528_v50, %v2527_v34  ;;  %v17432_v2 = vrot.slane %v13788_v15, 4 }
 0x327   : > { %v2561_v25 = vpack.i.b16 %v2560_v56, %v2559_v51  ;;  %v2272_v28 = vsel %vm1282_vm0, %v2271_v59, %v13813_v45  ;;  %v2267_v0 = vrot.slane %v2254_v19, 4  ;;  %v17433_v24 = vrot.slane %v13805_v32, 4 }
 0x328   : > { %v2412_v55 = vsel %vm1282_vm0, %v17431_v49, %v11835_v3  ;;  %v14029_v22 = vsel %vm1282_vm0, %v13941_v63, %v17432_v2  ;;  %v2414_v34 = vsel %vm1282_vm0, %v13931_v47, %v2413_v14  ;;  %v2549_v15 = vpack.i.b16 %v2272_v28, %v13984_v13 }
 0x329   : > { %v2418_v51 = vperm.slane %v2412_v55, %v13468_v53  ;;  %v14037_v38 = vsel %vm1282_vm0, %v2254_v19, %v17433_v24  ;;  %v2552_v29 = vshrl.u32 %v2272_v28, 16  ;;  %v2422_v62 = vperm.slane %v2414_v34, %v13468_v53 }
 0x32a   : > { %v2541_v63 = vpack.i.b16 %v14037_v38, %v14029_v22  ;;  %v17434_v30 = vrot.slane %v13912_v40, 4  ;;  %v14050_v26 = vsel %vm1282_vm0, %v2267_v0, %v13805_v32  ;;  %v2543_v52 = vshrl.u32 %v14029_v22, 16 }
 0x32b   : > { %v2461_v17 = vrot.slane %v2418_v51, 4  ;;  %v2553_v44 = vpack.i.b16 %v2552_v29, %v2551_v54  ;;  %v2533_v47 = vpack.i.b16 %v14050_v26, %v13972_v18  ;;  %v2536_v13 = vshrl.u32 %v14050_v26, 16 }
 0x32c   : > { %v2460_v45 = vsel %vm1282_vm0, %v17434_v30, %v2418_v51  ;;  %v2473_v37 = vrot.slane %v2422_v62, 4  ;;  %v2544_v50 = vshrl.u32 %v14037_v38, 16  ;;  %v17435_v3 = vrot.slane %v13821_v20, 4 }
 0x32d   : > { %v2462_v56 = vsel %vm1282_vm0, %v13912_v40, %v2461_v17  ;;  %v14064_v32 = vpack.i.b16 %v2536_v13, %v2535_v16  ;;  %v2466_v54 = vperm.slane %v2460_v45, %v13487_v6  ;;  %v17436_v49 = vrot.slane %v13909_v57, 4 }
 0x32e   : > { %v14062_v59 = vsel %vm1282_vm0, %v2354_v42, %v17435_v3  ;;  %v14071_v14 = vpack.i.b16 %v2544_v50, %v2543_v52  ;;  %v17437_v2 = vrot.slane %v13916_v21, 4  ;;  %v2371_v28 = vrot.slane %v2354_v42, 4 }
 0x32f   : > { %v2575_v19 = vshrl.u32 %v14062_v59, 16  ;;  %v2360_v55 = vsel %vm1282_vm0, %v17436_v49, %v2310_v23  ;;  %v17438_v16 = vrot.slane %v13854_v33, 4  ;;  %v2483_v34 = vrot.slane %v2466_v54, 4 }
 0x330   : > { %v2366_v40 = vperm.slane %v2360_v55, %v13487_v6  ;;  %v2472_v51 = vsel %vm1282_vm0, %v17437_v2, %v2422_v62  ;;  %v2362_v23 = vsel %vm1282_vm0, %v13909_v57, %v2361_v1  ;;  %v17439_v45 = vrot.slane %v13851_v7, 4 }
 0x331   : > { %v14080_v0 = vsel %vm1282_vm0, %v2466_v54, %v17438_v16  ;;  %v2478_v24 = vperm.slane %v2472_v51, %v13487_v6  ;;  %v14095_v62 = vsel %vm1282_vm0, %v2371_v28, %v13821_v20  ;;  %v17440_v17 = vrot.slane %v13889_v61, 4  ;;  %11873 = vxpose.binary.xlu0.c.b16.start.end [1/2] (short) (narrow) %v2561_v25, %v2557_v43, 16 }
 0x332   : > { %v2573_v29 = vpack.i.b16 %v14080_v0, %v14062_v59  ;;  %v2576_v30 = vshrl.u32 %v14080_v0, 16  ;;  %v14091_v42 = vsel %vm1282_vm0, %v2366_v40, %v17439_v45  ;;  %v2484_v1 = vsel %vm1282_vm0, %v2483_v34, %v13854_v33 }
 0x333   : > { %v2494_v13 = vsel %vm1282_vm0, %v2478_v24, %v17440_v17  ;;  %v2607_v57 = vshrl.u32 %v14091_v42, 16  ;;  %v2567_v52 = vshrl.u32 %v14095_v62, 16  ;;  %v2565_v54 = vpack.i.b16 %v2484_v1, %v14095_v62  ;;  %11867 = vxpose.binary.xlu1.c.b16.start.end [1/2] (short) (narrow) %v2529_v5, %v2525_v9, 16 }
 0x334   : > { %v2577_v50 = vpack.i.b16 %v2576_v30, %v2575_v19  ;;  %v2605_v3 = vpack.i.b16 %v2494_v13, %v14091_v42  ;;  %v2608_v59 = vshrl.u32 %v2494_v13, 16  ;;  %v2568_v20 = vshrl.u32 %v2484_v1, 16 }
 0x335   : > { %v2370_v49 = vperm.slane %v2362_v23, %v13487_v6  ;;  %v2474_v55 = vsel %vm1282_vm0, %v13916_v21, %v2473_v37  ;;  %v2375_v2 = vrot.slane %v14015_v41, 4  ;;  %v2470_v43 = vperm.slane %v2462_v56, %v13487_v6  ;;  %11882 = vxpose.binary.xlu2.c.b16.start.end [1/2] (short) (narrow) %v2553_v44, %v2549_v15, 16 }
 0x336   : > { %v2609_v51 = vpack.i.b16 %v2608_v59, %v2607_v57  ;;  %v2482_v33 = vperm.slane %v2474_v55, %v13487_v6  ;;  %v2379_v25 = vrot.slane %v2366_v40, 4  ;;  %v2569_v19 = vpack.i.b16 %v2568_v20, %v2567_v52 }
 0x337   : > { %v17441_v28 = vrot.slane %v13834_v4, 4  ;;  %v2376_v0 = vsel %vm1282_vm0, %v2375_v2, %v13860_v12  ;;  %v2377_v21 = vrot.slane %v13860_v12, 4  ;;  %v2383_v37 = vrot.slane %v2370_v49, 4 }
 0x338   : > { %v2487_v34 = vrot.slane %v2470_v43, 4  ;;  %v2489_v9 = vrot.slane %v13906_v35, 4  ;;  %v2346_v5 = vperm.slane %v13688_v48, %v13487_v6  ;;  %v2495_v56 = vrot.slane %v2482_v33, 4 }
 0x339   : > { %v2450_v16 = vsel %vm1282_vm0, %v13757_v46, %v17441_v28  ;;  %v2378_v4 = vsel %vm1282_vm0, %v14015_v41, %v2377_v21  ;;  %v2380_v12 = vsel %vm1282_vm0, %v2379_v25, %v13851_v7  ;;  %v2583_v45 = vshrl.u32 %v2376_v0, 16 }
 0x33a   : > { %v2458_v40 = vperm.slane %v2450_v16, %v13487_v6  ;;  %v2488_v46 = vsel %vm1282_vm0, %v2487_v34, %v13906_v35  ;;  %v2490_v23 = vsel %vm1282_vm0, %v2470_v43, %v2489_v9  ;;  %v2591_v42 = vshrl.u32 %v2378_v4, 16 }
 0x33b   : > { %v2581_v30 = vpack.i.b16 %v2488_v46, %v2376_v0  ;;  %v2584_v15 = vshrl.u32 %v2488_v46, 16  ;;  %v2589_v44 = vpack.i.b16 %v2490_v23, %v2378_v4  ;;  %v2592_v48 = vshrl.u32 %v2490_v23, 16 }
 0x33c   : > { %v2491_v62 = vrot.slane %v2478_v24, 4  ;;  %v14131_v17 = vsel %vm1282_vm0, %v2383_v37, %v2346_v5  ;;  %v14134_v13 = vsel %vm1282_vm0, %v2495_v56, %v2458_v40  ;;  %v2599_v24 = vshrl.u32 %v2380_v12, 16 }
 0x33d   : > { %v2585_v41 = vpack.i.b16 %v2584_v15, %v2583_v45  ;;  %v2615_v35 = vshrl.u32 %v14131_v17, 16  ;;  %v2593_v57 = vpack.i.b16 %v2592_v48, %v2591_v42  ;;  %v2613_v1 = vpack.i.b16 %v14134_v13, %v14131_v17 }
 0x33e   : > { %v2492_v7 = vsel %vm1282_vm0, %v2491_v62, %v13889_v61  ;;  %v2616_v52 = vshrl.u32 %v14134_v13, 16  ;;  %v2497_v61 = vrot.slane %v2458_v40, 4  ;;  %v2385_v43 = vrot.slane %v2346_v5, 4 }
 0x33f   : > { %v2597_v59 = vpack.i.b16 %v2492_v7, %v2380_v12  ;;  %v2600_v20 = vshrl.u32 %v2492_v7, 16  ;;  %v1645_v22 = vperm.slane %v13562_v36, %v13487_v6 }
 0x340   : > { %v14142_v55 = vpack.i.b16 %v2616_v52, %v2615_v35  ;;  %v2498_v25 = vsel %vm1282_vm0, %v2482_v33, %v2497_v61  ;;  %v2386_v28 = vsel %vm1282_vm0, %v2370_v49, %v2385_v43 }
 0x341   : > { %v2601_v2 = vpack.i.b16 %v2600_v20, %v2599_v24  ;;  %11879 = vxpose.binary.xlu0.c.b16.start.end [1/2] (short) (narrow) %v14064_v32, %v2533_v47, 16  ;;  %v2624_v16 = vshrl.u32 %v2498_v25, 16  ;;  %v2623_v0 = vshrl.u32 %v2386_v28, 16  ;;  %v2621_v21 = vpack.i.b16 %v2498_v25, %v2386_v28  ;;  %v14157_v32 = vpop.trf.xlu0 }
 0x342   : > { %v1654_v38 = vrot.slane %v1645_v22, 4  ;;  %v3521_v26 = vpack.c.bf16 %v1645_v22, %v1645_v22 }
 0x343   : > { %11870 = vxpose.binary.xlu1.c.b16.start.end [1/2] (short) (narrow) %v14071_v14, %v2541_v63, 16  ;;  %v2625_v18 = vpack.i.b16 %v2624_v16, %v2623_v0 }
 0x344   : > { %v1655_v63 = vsel %vm1282_vm0, 0.0, %v1654_v38 }
 0x345   : > { %11885 = vxpose.binary.xlu2.c.b16.start.end [1/2] (short) (narrow) %v2577_v50, %v2573_v29, 16  ;;  %v3522_v47 = vpack.c.bf16 %v1655_v63, %v1655_v63  ;;  %v14161_v29 = vpop.trf.xlu1 }
 0x349   : > { %v14159_v14 = vpop.trf.xlu0 }
 0x351   : > { %11894 = vxpose.binary.xlu0.c.b16.start.end [1/2] (short) (narrow) %v2609_v51, %v2605_v3, 16  ;;  %v11849_v50 = vpop.trf.xlu0  ;;  %v14163_v3 = vpop.trf.xlu1 }
 0x352   : > { %v4041_v49 = vrot.slane %v11849_v50, 4 }
 0x353   : > { %11888 = vxpose.binary.xlu1.c.b16.start.end [1/2] (short) (narrow) %v2569_v19, %v2565_v54, 16 }
 0x355   : > { %11897 = vxpose.binary.xlu2.c.b16.start.end [1/2] (short) (narrow) %v2625_v18, %v2621_v21, 16 }
 0x359   : > { %v14165_v54 = vpop.trf.xlu0  ;;  %v11859_v51 = vpop.trf.xlu1 }
 0x35a   : > { %v14170_v33 = vsel %vm1282_vm0, %v4041_v49, %v11859_v51  ;;  %v4043_v19 = vrot.slane %v11859_v51, 4  ;;  %v3907_v49 = vrot.slane %v13700_v11, 4 }
 0x35c   : > { %v14173_v37 = vsel %vm1282_vm0, %v11849_v50, %v4043_v19  ;;  %v3905_v50 = vrot.slane %v13644_v60, 4 }
 0x35e   : > { %v3906_v19 = vsel %vm1282_vm0, %v3905_v50, %v13700_v11  ;;  %v17292_v11 = vunpack.i.h.bf16 %v13624_v27 }
 0x361   : > { %11900 = vxpose.binary.xlu0.c.b16.start.end [1/2] (short) (narrow) %v2585_v41, %v2581_v30, 16  ;;  %v14167_v36 = vpop.trf.xlu0  ;;  %v14181_v5 = vpop.trf.xlu1 }
 0x363   : > { %11891 = vxpose.binary.xlu1.c.b16.start.end [1/2] (short) (narrow) %v2593_v57, %v2589_v44, 16 }
 0x365   : > { %11903 = vxpose.binary.xlu2.c.b16.start.end [1/2] (short) (narrow) %v2601_v2, %v2597_v59, 16 }
 0x369   : > { %v14175_v34 = vpop.trf.xlu0 }
 0x371   : > { %v14179_v9 = vpop.trf.xlu0 }
 0x375   : > { %11906 = vxpose.binary.xlu2.c.b16.start.end [1/2] (short) (narrow) %v3522_v47, %v3521_v26, 32 }
 0x379   : > { %v14183_v4 = vpop.trf.xlu0 }
 0x3bd   : > { %11923 = vrot.lane.b32.xlu1 %v13451_v39, %s12896_s29 }
 0x3c6   : > { %v11877_v56 = vpop.trf.xlu2 }
 0x3c7   : > { %v3139_v40 = vrot.slane %v11877_v56, 4  ;;  %v3895_v56 = vrot.slane %v13751_v58, 4 }
 0x3cd   : > { %v11862_v30 = vpop.trf.xlu0 }
 0x3ce   : > { %v14185_v46 = vpop.trf.xlu2 }
 0x3cf   : > { %11915 = vrot.lane.b32.xlu0 %v13451_v39, %s12894_s30  ;;  %v11865_v23 = vpop.trf.xlu1 }
 0x3d0   : > { %v3140_v12 = vsel %vm1282_vm0, %v3139_v40, %v11865_v23  ;;  %v4131_v40 = vrot.slane %v13712_v31, 4 }
 0x3d1   : > { %v3144_v57 = vperm.slane %v3140_v12, %v13468_v53  ;;  %v4129_v12 = vrot.slane %v13666_v8, 4 }
 0x3d5   : > { %v14194_v44 = vpop.trf.xlu0 }
 0x3d6   : > { %v14190_v45 = vpop.trf.xlu2 }
 0x3d7   : > { %v14192_v15 = vpop.trf.xlu1 }
 0x3dd   : > { %v14197_v35 = vpop.trf.xlu0 }
 0x3de   : > { %v11884_v42 = vpop.trf.xlu2 }
 0x3df   : > { %v11868_v48 = vpop.trf.xlu1  ;;  %v3191_v18 = vrot.slane %v11884_v42, 4 }
 0x3e0   : > { %v3145_v62 = vrot.slane %v11868_v48, 4  ;;  %v3817_v48 = vrot.slane %v14157_v32, 4 }
 0x3e2   : > { %v3146_v41 = vsel %vm1282_vm0, %v3145_v62, %v11862_v30  ;;  %v3908_v30 = vsel %vm1282_vm0, %v13644_v60, %v3907_v49  ;;  %v3896_v60 = vsel %vm1282_vm0, %v13670_v10, %v3895_v56 }
 0x3e3   : > { %v3150_v39 = vperm.slane %v3146_v41, %v13468_v53  ;;  %v3912_v41 = vperm.slane %v3906_v19, %v13468_v53  ;;  %v17455_v19 = vld [vmem:[#allocation55_spill] sm:$0xff] }
 0x3e4   : > { %v3836_v56 = vperm.slane %v17455_v19, %v13487_v6 }
 0x3e5   : > { %v3163_v7 = vrot.slane %v3150_v39, 4  ;;  %v11875_v20 = vpop.trf.xlu0  ;;  %v4130_v39 = vsel %vm1282_vm0, %v4129_v12, %v13712_v31  ;;  %v17456_v12 = vld [vmem:[#allocation56_spill] sm:$0xff] }
 0x3e6   : > { %v14201_v52 = vpop.trf.xlu2  ;;  %v3197_v43 = vrot.slane %v11875_v20, 4  ;;  %v3916_v20 = vperm.slane %v3908_v30, %v13468_v53  ;;  %v14266_v31 = vperm.slane %v4130_v39, %v13468_v53  ;;  %v14288_v30 = vperm.slane %v17456_v12, %v13487_v6 }
 0x3e7   : > { %17442 = vst [vmem:[#allocation64_spill] sm:$0xff] %v14201_v52  ;;  %v14204_v59 = vsel %vm1282_vm0, %v3163_v7, %v3144_v57  ;;  %v14206_v24 = vpop.trf.xlu1 }
 0x3ed   : > { %v14216_v25 = vpop.trf.xlu0 }
 0x3ee   : > { %v14208_v2 = vpop.trf.xlu2 }
 0x3ef   : > { %17443 = vst [vmem:[#allocation65_spill] sm:$0xff] %v14208_v2  ;;  %v14210_v61 = vpop.trf.xlu1  ;;  %v17462_v2 = vld [vmem:[#allocation63_spill] sm:$0xff] }
 0x3f2   : > { %11927 = vxpose.binary.xlu1.c.b16.start.end [1/2] (short) (narrow) %v14142_v55, %v2613_v1, 16  ;;  %v3893_v1 = vrot.slane %v13670_v10, 4  ;;  %v3904_v10 = vperm.slane %v3896_v60, %v13468_v53 }
 0x3f4   : > { %v3894_v51 = vsel %vm1282_vm0, %v3893_v1, %v13751_v58  ;;  %v17293_v58 = vunpack.i.l.bf16 %v13624_v27  ;;  %v17453_v1 = vld [vmem:[#allocation54_spill] sm:$0xff] }
 0x3f5   : > { %v11881_v63 = vpop.trf.xlu0  ;;  %v3900_v42 = vperm.slane %v3894_v51, %v13468_v53  ;;  %v4117_v50 = vrot.slane %v17453_v1, 4  ;;  %v3953_v51 = vrot.slane %v3916_v20, 4 }
 0x3f6   : > { %v14218_v28 = vpop.trf.xlu2  ;;  %v3192_v26 = vsel %vm1282_vm0, %v3191_v18, %v11881_v63  ;;  %v17450_v18 = vld [vmem:[#allocation48_spill] sm:$0xff]  ;;  %v17451_v63 = vld [vmem:[#allocation49_spill] sm:$0xff] }
 0x3f7   : > { %17444 = vst [vmem:[#allocation66_spill] sm:$0xff] %v14218_v28  ;;  %v11872_v16 = vpop.trf.xlu1  ;;  %v3196_v17 = vperm.slane %v3192_v26, %v13468_v53 }
 0x3f8   : > { %v3198_v0 = vsel %vm1282_vm0, %v3197_v43, %v11872_v16  ;;  %v4132_v43 = vsel %vm1282_vm0, %v13666_v8, %v4131_v40  ;;  %v14272_v8 = vrot.slane %v17292_v11, 4 }
 0x3f9   : > { %v3202_v21 = vperm.slane %v3198_v0, %v13468_v53  ;;  %v3943_v0 = vrot.slane %v3900_v42, 4  ;;  %v14280_v49 = vperm.slane %v4132_v43, %v13468_v53  ;;  %v17458_v43 = vld [vmem:[#allocation58_spill] sm:$0xff] }
 0x3fa   : > { %v14298_v11 = vperm.slane %v17458_v43, %v13487_v6  ;;  %v3954_v43 = vsel %vm1282_vm0, %v3953_v51, %v3904_v10 }
 0x3fb   : > { %v3209_v38 = vrot.slane %v3202_v21, 4  ;;  %v3818_v21 = vsel %vm1282_vm0, %v3817_v48, %v14161_v29  ;;  %17454 = vst [vmem:[#allocation49_spill] sm:$0xff] %v14280_v49  ;;  %v17457_v48 = vld [vmem:[#allocation57_spill] sm:$0xff]  ;;  %v3944_v60 = vsel %vm1282_vm0, %v3912_v41, %v3943_v0  ;;  %v14325_v51 = vperm.slane %v3954_v43, %v13487_v6 }
 0x3fc   : > { %v14292_v39 = vperm.slane %v17457_v48, %v13487_v6  ;;  %v3931_v48 = vrot.slane %v14163_v3, 4  ;;  %v14310_v26 = vperm.slane %v3944_v60, %v13487_v6 }
 0x3fd   : > { %v14225_v13 = vsel %vm1282_vm0, %v3209_v38, %v3196_v17  ;;  %v14230_v47 = vpop.trf.xlu0  ;;  %v3941_v38 = vrot.slane %v3912_v41, 4  ;;  %v14276_v17 = vrot.slane %v17293_v58, 4 }
 0x3fe   : > { %v11899_v22 = vpop.trf.xlu2  ;;  %17446 = vst [vmem:[#allocation68_spill] sm:$0xff] %v14230_v47  ;;  %v14363_v47 = vsel %vm1282_vm0, %v4117_v50, %v17462_v2 }
 0x3ff   : > { %v3277_v23 = vrot.slane %v11899_v22, 4  ;;  %v14245_v62 = vpop.trf.xlu1  ;;  %17452 = vst [vmem:[#allocation48_spill] sm:$0xff] %v14276_v17  ;;  %v3942_v40 = vsel %vm1282_vm0, %v3941_v38, %v3900_v42  ;;  %v3955_v38 = vrot.slane %v3904_v10, 4  ;;  %v3879_v42 = vrot.slane %v3836_v56, 4 }
 0x400   : > { %17447 = vst [vmem:[#allocation69_spill] sm:$0xff] %v14245_v62  ;;  %v14304_v58 = vperm.slane %v3942_v40, %v13487_v6  ;;  %v3883_v40 = vrot.slane %v14288_v30, 4  ;;  %v4048_v62 = vperm.slane %v14170_v33, %v13468_v53  ;;  %v3157_v33 = vrot.slane %v14197_v35, 4 }
 0x401   : > { %v3151_v35 = vrot.slane %v14190_v45, 4 }
 0x405   : > { %v11896_v7 = vpop.trf.xlu0 }
 0x406   : > { %v14228_v55 = vpop.trf.xlu2  ;;  %v14260_v16 = vsel %vm1282_vm0, %v3277_v23, %v11896_v7  ;;  %v3824_v23 = vperm.slane %v3818_v21, %v13468_v53  ;;  %v3929_v7 = vrot.slane %v14159_v14, 4  ;;  %v3819_v21 = vrot.slane %v14161_v29, 4 }
 0x407   : > { %17445 = vst [vmem:[#allocation67_spill] sm:$0xff] %v14228_v55  ;;  %v14307_v0 = vpop.trf.xlu1 }
 0x408   : > { %17449 = vst [vmem:[#allocation71_spill] sm:$0xff] %v14260_v16  ;;  %v3853_v22 = vrot.slane %v3824_v23, 4  ;;  %v3930_v29 = vsel %vm1282_vm0, %v3929_v7, %v14163_v3  ;;  %v3956_v16 = vsel %vm1282_vm0, %v3916_v20, %v3955_v38  ;;  %v3820_v60 = vsel %vm1282_vm0, %v14157_v32, %v3819_v21  ;;  %v17460_v21 = vld [vmem:[#allocation59_spill] sm:$0xff] }
 0x409   : > { %17459 = vst [vmem:[#allocation54_spill] sm:$0xff] %v14307_v0  ;;  %v3932_v3 = vsel %vm1282_vm0, %v14159_v14, %v3931_v48  ;;  %v3807_v7 = vrot.slane %v14167_v36, 4  ;;  %v14339_v43 = vperm.slane %v3820_v60, %v13468_v53  ;;  %v17461_v48 = vld [vmem:[#allocation62_spill] sm:$0xff] }
 0x40e   : > { %v14248_v57 = vpop.trf.xlu2 }
 0x40f   : > { %17448 = vst [vmem:[#allocation70_spill] sm:$0xff] %v14248_v57  ;;  %v3936_v57 = vperm.slane %v3930_v29, %v13468_v53  ;;  %v14347_v29 = vperm.slane %v17461_v48, %v13487_v6  ;;  %v4052_v48 = vperm.slane %v14173_v37, %v13468_v53 }
 0x416   : > { %v11907_v19 = vpop.trf.xlu2 }
 0x417   : > { %v3805_v41 = vrot.slane %v11907_v19, 4  ;;  %v3808_v60 = vsel %vm1282_vm0, %v11907_v19, %v3807_v7 }
 0x419   : > { %v3806_v12 = vsel %vm1282_vm0, %v3805_v41, %v14167_v36  ;;  %v3991_v41 = vrot.slane %v14304_v58, 4  ;;  %v14343_v36 = vperm.slane %v3956_v16, %v13487_v6  ;;  %v3965_v16 = vrot.slane %v3936_v57, 4 }
 0x41a   : > { %v3812_v55 = vperm.slane %v3806_v12, %v13468_v53  ;;  %v14336_v12 = vperm.slane %v17460_v21, %v13487_v6 }
 0x41c   : > { %v3855_v20 = vrot.slane %v3812_v55, 4  ;;  %v3854_v38 = vsel %vm1282_vm0, %v3853_v22, %v3812_v55  ;;  %v14350_v55 = vperm.slane %v3932_v3, %v13468_v53  ;;  %v3919_v22 = vrot.slane %v14175_v34, 4 }
 0x41d   : > { %v3860_v14 = vperm.slane %v3854_v38, %v13487_v6 }
 0x41e   : > { %v3856_v21 = vsel %vm1282_vm0, %v3824_v23, %v3855_v20  ;;  %v11908_v32 = vpop.trf.xlu2  ;;  %v3865_v23 = vrot.slane %v14339_v43, 4  ;;  %v3816_v20 = vperm.slane %v3808_v60, %v13468_v53  ;;  %v3977_v50 = vrot.slane %v14350_v55, 4 }
 0x41f   : > { %v3917_v10 = vrot.slane %v11908_v32, 4  ;;  %v3880_v38 = vsel %vm1282_vm0, %v3860_v14, %v3879_v42  ;;  %v3877_v0 = vrot.slane %v3860_v14, 4  ;;  %v3864_v3 = vperm.slane %v3856_v21, %v13487_v6  ;;  %v14368_v42 = vpop.trf.xlu1 }
 0x420   : > { %17463 = vst [vmem:[#allocation55_spill] sm:$0xff] %v14368_v42  ;;  %v3920_v37 = vsel %vm1282_vm0, %v11908_v32, %v3919_v22  ;;  %v4031_v21 = vrot.slane %v14179_v9, 4  ;;  %v3185_v60 = vrot.slane %v14206_v24, 4  ;;  %v4241_v24 = vshrl.u32 %v3880_v38, 16 }
 0x421   : > { %v3918_v19 = vsel %vm1282_vm0, %v3917_v10, %v14175_v34  ;;  %v3878_v7 = vsel %vm1282_vm0, %v3877_v0, %v3836_v56  ;;  %v3881_v52 = vrot.slane %v3864_v3, 4  ;;  %v14378_v28 = vsel %vm1282_vm0, %v3864_v3, %v3883_v40 }
 0x422   : > { %v3924_v14 = vperm.slane %v3918_v19, %v13468_v53  ;;  %v4077_v34 = vrot.slane %v4048_v62, 4  ;;  %v4089_v10 = vrot.slane %v4052_v48, 4  ;;  %v3928_v0 = vperm.slane %v3920_v37, %v13468_v53 }
 0x423   : > { %v3882_v22 = vsel %vm1282_vm0, %v3881_v52, %v14288_v30  ;;  %v3158_v40 = vsel %vm1282_vm0, %v3157_v33, %v14210_v61  ;;  %v3866_v3 = vsel %vm1282_vm0, %v3865_v23, %v3816_v20 }
 0x424   : > { %v3967_v42 = vrot.slane %v3924_v14, 4  ;;  %v3966_v56 = vsel %vm1282_vm0, %v3965_v16, %v3924_v14  ;;  %v3867_v16 = vrot.slane %v3816_v20, 4  ;;  %v3979_v27 = vrot.slane %v3928_v0, 4 }
 0x425   : > { %v3972_v32 = vperm.slane %v3966_v56, %v13487_v6 }
 0x426   : > { %v3968_v19 = vsel %vm1282_vm0, %v3936_v57, %v3967_v42  ;;  %v11909_v49 = vpop.trf.xlu2 }
 0x427   : > { %v14392_v45 = vperm.slane %v3968_v19, %v13487_v6  ;;  %v4029_v37 = vrot.slane %v11909_v49, 4  ;;  %v4032_v14 = vsel %vm1282_vm0, %v11909_v49, %v4031_v21  ;;  %v3992_v52 = vsel %vm1282_vm0, %v3972_v32, %v3991_v41  ;;  %v14406_v21 = vpop.trf.xlu1 }
 0x428   : > { %v4040_v56 = vperm.slane %v4032_v14, %v13468_v53  ;;  %v3989_v30 = vrot.slane %v3972_v32, 4  ;;  %v4242_v23 = vshrl.u32 %v3992_v52, 16  ;;  %v4239_v41 = vpack.i.b16 %v3992_v52, %v3880_v38 }
 0x429   : > { %v4030_v61 = vsel %vm1282_vm0, %v4029_v37, %v14179_v9  ;;  %v3993_v57 = vrot.slane %v14392_v45, 4  ;;  %v4233_v19 = vshrl.u32 %v3878_v7, 16 }
 0x42a   : > { %v4036_v42 = vperm.slane %v4030_v61, %v13468_v53  ;;  %v14402_v33 = vsel %vm1282_vm0, %v4089_v10, %v4040_v56  ;;  %v4091_v20 = vrot.slane %v4040_v56, 4  ;;  %v3990_v49 = vsel %vm1282_vm0, %v3989_v30, %v14304_v58  ;;  %v14414_v61 = vpop.trf.xlu0 }
 0x42b   : > { %v4243_v32 = vpack.i.b16 %v4242_v23, %v4241_v24  ;;  %v4234_v14 = vshrl.u32 %v3990_v49, 16  ;;  %v3994_v10 = vsel %vm1282_vm0, %v3993_v57, %v14310_v26  ;;  %v4119_v56 = vrot.slane %v17462_v2, 4 }
 0x42c   : > { %v14409_v9 = vsel %vm1282_vm0, %v4077_v34, %v4036_v42  ;;  %v4079_v37 = vrot.slane %v4036_v42, 4  ;;  %v4092_v17 = vsel %vm1282_vm0, %v4052_v48, %v4091_v20  ;;  %v3868_v58 = vsel %vm1282_vm0, %v14339_v43, %v3867_v16 }
 0x42d   : > { %11911 = vxpose.binary.xlu2.c.b16.start.end [1/2] (short) (narrow) %v4243_v32, %v4239_v41, 16  ;;  %v4231_v38 = vpack.i.b16 %v3990_v49, %v3878_v7  ;;  %v4235_v52 = vpack.i.b16 %v4234_v14, %v4233_v19  ;;  %v3980_v34 = vsel %vm1282_vm0, %v14350_v55, %v3979_v27  ;;  %v4249_v48 = vshrl.u32 %v3882_v22, 16 }
 0x42e   : > { %v14422_v24 = vsel %vm1282_vm0, %v4048_v62, %v4079_v37  ;;  %v4250_v30 = vshrl.u32 %v3994_v10, 16  ;;  %v3179_v23 = vrot.slane %v14185_v46, 4  ;;  %v3186_v57 = vsel %vm1282_vm0, %v3185_v60, %v14194_v44 }
 0x42f   : > { %v3162_v2 = vperm.slane %v3158_v40, %v13468_v53  ;;  %v3978_v43 = vsel %vm1282_vm0, %v3977_v50, %v3928_v0  ;;  %11930 = vxpose.binary.xlu1.c.b16.start.end [1/2] (short) (narrow) %v4235_v52, %v4231_v38, 16  ;;  %v14431_v7 = vperm.slane %v14363_v47, %v13468_v53  ;;  %v3999_v50 = vrot.slane %v14325_v51, 4  ;;  %v17464_v0 = vld [vmem:[#allocation60_spill] sm:$0xff] }
 0x430   : > { %v3152_v27 = vsel %vm1282_vm0, %v3151_v35, %v14216_v25  ;;  %v4247_v62 = vpack.i.b16 %v3994_v10, %v3882_v22  ;;  %v4251_v55 = vpack.i.b16 %v4250_v30, %v4249_v48  ;;  %v14436_v16 = vperm.slane %v3866_v3, %v13487_v6  ;;  %v17465_v22 = vld [vmem:[#allocation61_spill] sm:$0xff]  ;;  %v11924_v10 = vpop.permute.xlu1 %11923 }
 0x431   : > { %v14439_v46 = vperm.slane %v3868_v58, %v13487_v6  ;;  %v14442_v44 = vperm.slane %v3980_v34, %v13487_v6  ;;  %v14447_v47 = vperm.slane %v17464_v0, %v13487_v6  ;;  %v3190_v60 = vperm.slane %v3186_v57, %v13468_v53 }
 0x432   : > { %v14451_v25 = vperm.slane %v3978_v43, %v13487_v6  ;;  %11919 = vxpose.binary.xlu0.c.b16.start.end [1/2] (short) (narrow) %v4251_v55, %v4247_v62, 16  ;;  %v4003_v35 = vrot.slane %v14343_v36, 4  ;;  %v14456_v40 = vperm.slane %v17465_v22, %v13487_v6  ;;  %v3180_v3 = vsel %vm1282_vm0, %v3179_v23, %v14192_v15  ;;  %v14489_v48 = vpop.trf.xlu0 }
 0x433   : > { %v3169_v42 = vrot.slane %v3162_v2, 4  ;;  %v3156_v20 = vperm.slane %v3152_v27, %v13468_v53  ;;  %v4115_v41 = vrot.slane %v14347_v29, 4  ;;  %v14465_v32 = vsel %vm1282_vm0, %v17453_v1, %v4119_v56 }
 0x434   : > { %17466 = vst [vmem:[#allocation56_spill] sm:$0xff] %v14456_v40  ;;  %v17467_v19 = vrot.slane %v14266_v31, 4  ;;  %v17468_v15 = vrot.slane %v14298_v11, 4  ;;  %v14480_v38 = vsel %vm1282_vm0, %v14442_v44, %v4003_v35  ;;  %v17469_v1 = vrot.slane %v14292_v39, 4 }
 0x435   : > { %v3184_v52 = vperm.slane %v3180_v3, %v13468_v53  ;;  %v3203_v34 = vrot.slane %v3190_v60, 4  ;;  %v17471_v30 = vrot.slane %v14310_v26, 4  ;;  %v14497_v57 = vsel %vm1282_vm0, %v14451_v25, %v3999_v50 }
 0x436   : > { %v4166_v14 = vsel %vm1282_vm0, %v17467_v19, %v14431_v7  ;;  %v14476_v58 = vsel %vm1282_vm0, %v14439_v46, %v17468_v15  ;;  %v14486_v56 = vsel %vm1282_vm0, %v14436_v16, %v17469_v1  ;;  %17472 = vst [vmem:[#allocation58_spill] sm:$0xff] %v14497_v57  ;;  %v4153_v2 = vrot.slane %v14165_v54, 4 }
 0x437   : > { %17470 = vst [vmem:[#allocation57_spill] sm:$0xff] %v14486_v56  ;;  %v3996_v23 = vsel %vm1282_vm0, %v14392_v45, %v17471_v30  ;;  %v4155_v43 = vrot.slane %v14181_v5, 4  ;;  %v3170_v27 = vsel %vm1282_vm0, %v3169_v42, %v3156_v20  ;;  %v14503_v62 = vperm.slane %v4092_v17, %v13487_v6  ;;  %v11910_v20 = vpop.trf.xlu2 }
 0x438   : > { %v11925_v55 = vunpack.i.l.bf16 %v11924_v10  ;;  %v4289_v0 = vshrl.u32 %v14476_v58, 16  ;;  %v4273_v45 = vshrl.u32 %v14486_v56, 16  ;;  %v4258_v60 = vshrl.u32 %v3996_v23, 16 }
 0x439   : > { %v4290_v50 = vshrl.u32 %v14480_v38, 16  ;;  %v4274_v22 = vshrl.u32 %v14497_v57, 16  ;;  %v3204_v3 = vsel %vm1282_vm0, %v3203_v34, %v3184_v52  ;;  %v3174_v17 = vperm.slane %v3170_v27, %v13487_v6 }
 0x43a   : > { %v3214_v42 = vperm.slane %v14225_v13, %v13487_v6  ;;  %v4257_v19 = vshrl.u32 %v14378_v28, 16  ;;  %v11926_v15 = vunpack.i.h.bf16 %v11924_v10  ;;  %v14524_v35 = vsel %vm1282_vm0, %v14503_v62, %v4115_v41 }
 0x43b   : > { %v14518_v1 = vpack.i.b16 %v4290_v50, %v4289_v0  ;;  %v14520_v30 = vpack.i.b16 %v4274_v22, %v4273_v45  ;;  %17474 = vst [vmem:[#allocation62_spill] sm:$0xff] %v14524_v35  ;;  %v14527_v26 = vperm.slane %v4166_v14, %v13487_v6  ;;  %v4154_v52 = vsel %vm1282_vm0, %v4153_v2, %v14181_v5 }
 0x43c   : > { %v4156_v13 = vsel %vm1282_vm0, %v14165_v54, %v4155_v43  ;;  %v4143_v34 = vrot.slane %v14183_v4, 4  ;;  %v4141_v10 = vrot.slane %v11910_v20, 4  ;;  %v17475_v27 = vrot.slane %v17450_v18, 4 }
 0x43d   : > { %17473 = vst [vmem:[#allocation59_spill] sm:$0xff] %v14520_v30  ;;  %v4255_v45 = vpack.i.b16 %v3996_v23, %v14378_v28  ;;  %v4259_v41 = vpack.i.b16 %v4258_v60, %v4257_v19  ;;  %v3168_v14 = vperm.slane %v14204_v59, %v13487_v6  ;;  %v3175_v50 = vrot.slane %v3174_v17, 4 }
 0x43e   : > { %v5720_v0 = vsel %vm1282_vm0, %v11925_v55, %v17475_v27  ;;  %v3208_v22 = vperm.slane %v3204_v3, %v13487_v6  ;;  %v3215_v5 = vrot.slane %v3214_v42, 4  ;;  %v14542_v2 = vperm.slane %v4154_v52, %v13468_v53 }
 0x43f   : > { %v14545_v54 = vperm.slane %v4156_v13, %v13468_v53  ;;  %v17477_v43 = vrot.slane %v17451_v63, 4  ;;  %v5717_v49 = vrot.slane %v11925_v55, 4  ;;  %11933 = vxpose.binary.xlu1.c.b16.start.end [1/2] (short) (narrow) %v4259_v41, %v4255_v45, 16  ;;  %v5728_v28 = vperm.slane %v5720_v0, %v13468_v53 }
 0x440   : > { %v14552_v59 = vsel %vm1282_vm0, %v3175_v50, %v3168_v14  ;;  %v3177_v60 = vrot.slane %v3168_v14, 4  ;;  %v14555_v3 = vsel %vm1282_vm0, %v3215_v5, %v3208_v22  ;;  %v3217_v13 = vrot.slane %v3208_v22, 4 }
 0x441   : > { %17476 = vst [vmem:[#allocation63_spill] sm:$0xff] %v14545_v54  ;;  %v5776_v27 = vsel %vm1282_vm0, %v11926_v15, %v17477_v43  ;;  %v11916_v23 = vpop.permute.xlu0 %11915  ;;  %v4142_v55 = vsel %vm1282_vm0, %v4141_v10, %v14183_v4  ;;  %v4144_v45 = vsel %vm1282_vm0, %v11910_v20, %v4143_v34  ;;  %v5773_v0 = vrot.slane %v11926_v15, 4  ;;  %v17478_v43 = vld [vmem:[#allocation48_spill] sm:$0xff]  ;;  %v17479_v34 = vld [vmem:[#allocation53_spill] sm:$0xff] }
 0x442   : > { %v11918_v19 = vunpack.i.h.bf16 %v11916_v23  ;;  %v11917_v52 = vunpack.i.l.bf16 %v11916_v23  ;;  %v5784_v41 = vperm.slane %v5776_v27, %v13468_v53  ;;  %v5718_v14 = vsel %vm1282_vm0, %v5717_v49, %v17450_v18 }
 0x443   : > { %v3303_v4 = vshrl.u32 %v14552_v59, 16  ;;  %v3304_v20 = vshrl.u32 %v14555_v3, 16  ;;  %v5755_v15 = vrot.slane %v5728_v28, 4  ;;  %v17480_v10 = vunpack.i.l.bf16 %v17479_v34 }
 0x444   : > { %v5788_v50 = vsel %vm1282_vm0, %v11918_v19, %v14272_v8  ;;  %v5729_v5 = vrot.slane %v11917_v52, 4  ;;  %v5732_v22 = vsel %vm1282_vm0, %v11917_v52, %v17478_v43  ;;  %v14577_v49 = vsel %vm1282_vm0, %v3174_v17, %v3177_v60 }
 0x445   : > { %v5796_v23 = vperm.slane %v5788_v50, %v13468_v53  ;;  %v5740_v37 = vperm.slane %v5732_v22, %v13468_v53  ;;  %v14580_v8 = vsel %vm1282_vm0, %v3214_v42, %v3217_v13  ;;  %v5811_v27 = vrot.slane %v5784_v41, 4 }
 0x446   : > { %v5730_v18 = vsel %vm1282_vm0, %v5729_v5, %v17480_v10  ;;  %v14584_v35 = vpack.i.b16 %v3304_v20, %v3303_v4  ;;  %v3311_v5 = vshrl.u32 %v14577_v49, 16  ;;  %v5724_v17 = vperm.slane %v5718_v14, %v13468_v53 }
 0x447   : > { %v5809_v52 = vrot.slane %v5796_v23, 4  ;;  %v5736_v50 = vperm.slane %v5730_v18, %v13468_v53  ;;  %v5753_v43 = vrot.slane %v5740_v37, 4  ;;  %v5756_v22 = vsel %vm1282_vm0, %v5740_v37, %v5755_v15 }
 0x448   : > { %v5764_v60 = vperm.slane %v5756_v22, %v13487_v6  ;;  %v3312_v18 = vshrl.u32 %v14580_v8, 16  ;;  %v14598_v4 = vsel %vm1282_vm0, %v5796_v23, %v5811_v27  ;;  %v4189_v20 = vrot.slane %v14542_v2, 4 }
 0x449   : > { %v5754_v42 = vsel %vm1282_vm0, %v5753_v43, %v5728_v28  ;;  %v5741_v13 = vrot.slane %v5736_v50, 4  ;;  %v14595_v37 = vsel %vm1282_vm0, %v5809_v52, %v5784_v41  ;;  %v4148_v15 = vperm.slane %v4142_v55, %v13468_v53 }
 0x44a   : > { %v5760_v10 = vperm.slane %v5754_v42, %v13487_v6  ;;  %v5771_v14 = vrot.slane %v5764_v60, 4  ;;  %v5785_v30 = vrot.slane %v11918_v19, 4  ;;  %v14604_v42 = vpack.i.b16 %v3312_v18, %v3311_v5 }
 0x44b   : > { %v5742_v22 = vsel %vm1282_vm0, %v5741_v13, %v5724_v17  ;;  %v4201_v56 = vrot.slane %v14545_v54, 4  ;;  %v14608_v41 = vperm.slane %v4144_v45, %v13468_v53  ;;  %v5774_v23 = vsel %vm1282_vm0, %v5773_v0, %v17451_v63 }
 0x44c   : > { %v5769_v28 = vrot.slane %v5760_v10, 4  ;;  %v5748_v43 = vperm.slane %v5742_v22, %v13487_v6  ;;  %v5772_v27 = vsel %vm1282_vm0, 0.0, %v5771_v14  ;;  %v5983_v55 = vpack.c.bf16 %v5764_v60, %v5764_v60 }
 0x44d   : > { %v5984_v52 = vpack.c.bf16 %v5772_v27, %v5772_v27  ;;  %v4190_v57 = vsel %vm1282_vm0, %v4189_v20, %v4148_v15  ;;  %v4191_v22 = vrot.slane %v4148_v15, 4  ;;  %v5981_v5 = vpack.c.bf16 %v5760_v10, %v5760_v10 }
 0x44e   : > { %v5770_v13 = vsel %vm1282_vm0, 0.0, %v5769_v28  ;;  %v5765_v19 = vrot.slane %v5748_v43, 4  ;;  %v14617_v54 = vperm.slane %v14409_v9, %v13487_v6  ;;  %v4113_v45 = vrot.slane %v14503_v62, 4 }
 0x44f   : > { %v5982_v18 = vpack.c.bf16 %v5770_v13, %v5770_v13  ;;  %v17481_v63 = vunpack.i.h.bf16 %v17479_v34  ;;  %11946 = vxpose.binary.xlu0.c.b16.start.end [1/2] (short) (narrow) %v5984_v52, %v5983_v55, 32  ;;  %v14625_v14 = vperm.slane %v5774_v23, %v13468_v53  ;;  %v5743_v20 = vrot.slane %v5724_v17, 4 }
 0x450   : > { %v5766_v60 = vsel %vm1282_vm0, 0.0, %v5765_v19  ;;  %v5977_v10 = vpack.c.bf16 %v5748_v43, %v5748_v43  ;;  %v14629_v9 = vperm.slane %v14465_v32, %v13468_v53  ;;  %v17482_v62 = vrot.slane %v14431_v7, 4 }
 0x451   : > { %v5786_v0 = vsel %vm1282_vm0, %v5785_v30, %v17481_v63  ;;  %11936 = vxpose.binary.xlu1.c.b16.start.end [1/2] (short) (narrow) %v5982_v18, %v5981_v5, 32  ;;  %v5978_v15 = vpack.c.bf16 %v5766_v60, %v5766_v60  ;;  %v14636_v30 = vperm.slane %v4190_v57, %v13487_v6  ;;  %v4215_v17 = vrot.slane %v14527_v26, 4  ;;  %v17491_v5 = vld [vmem:[#allocation49_spill] sm:$0xff] }
 0x452   : > { %v4168_v34 = vsel %vm1282_vm0, %v14266_v31, %v17482_v62  ;;  %v4202_v28 = vsel %vm1282_vm0, %v4201_v56, %v14608_v41  ;;  %v4192_v43 = vsel %vm1282_vm0, %v14542_v2, %v4191_v22  ;;  %v14644_v23 = vperm.slane %v5786_v0, %v13468_v53 }
 0x453   : > { %11941 = vxpose.binary.xlu2.c.b16.start.end [1/2] (short) (narrow) %v5978_v15, %v5977_v10, 32  ;;  %v14647_v7 = vsel %vm1282_vm0, %v5736_v50, %v5743_v20  ;;  %v3885_v31 = vrot.slane %v14436_v16, 4  ;;  %v3997_v32 = vrot.slane %v14451_v25, 4  ;;  %v14653_v57 = vsel %vm1282_vm0, %v4113_v45, %v14347_v29  ;;  %v17508_v10 = vld [vmem:[#allocation51_spill] sm:$0xff] }
 0x454   : > { %17483 = vst [vmem:[#allocation60_spill] sm:$0xff] %v14647_v7  ;;  %v17485_v56 = vrot.slane %v14336_v12, 4  ;;  %v14662_v27 = vperm.slane %v4168_v34, %v13487_v6  ;;  %v4001_v50 = vrot.slane %v14442_v44, 4  ;;  %v14667_v16 = vperm.slane %v14402_v33, %v13487_v6 }
 0x455   : > { %17484 = vst [vmem:[#allocation61_spill] sm:$0xff] %v14653_v57  ;;  %v5799_v25 = vrot.slane %v14625_v14, 4  ;;  %v14672_v29 = vperm.slane %v14422_v24, %v13487_v6  ;;  %v14675_v55 = vperm.slane %v4192_v43, %v13487_v6  ;;  %v14678_v52 = vperm.slane %v4202_v28, %v13487_v6 }
 0x456   : > { %v14659_v2 = vsel %vm1282_vm0, %v14617_v54, %v17485_v56  ;;  %17487 = vst [vmem:[#allocation53_spill] sm:$0xff] %v14667_v16  ;;  %v14682_v13 = vsel %vm1282_vm0, %v14636_v30, %v4215_v17  ;;  %v4107_v22 = vrot.slane %v14447_v47, 4  ;;  %v17492_v18 = vrot.slane %v17491_v5, 4 }
 0x457   : > { %17486 = vst [vmem:[#allocation48_spill] sm:$0xff] %v14659_v2  ;;  %v4305_v44 = vshrl.u32 %v14659_v2, 16  ;;  %v4306_v19 = vshrl.u32 %v14682_v13, 16  ;;  %v14690_v24 = vsel %vm1282_vm0, %v14644_v23, %v5799_v25  ;;  %v14699_v63 = vsel %vm1282_vm0, %v3885_v31, %v14292_v39 }
 0x458   : > { %17488 = vst [vmem:[#allocation72_spill] sm:$0xff] %v14678_v52  ;;  %v4178_v45 = vsel %vm1282_vm0, %v17492_v18, %v14629_v9  ;;  %v14703_v0 = vsel %vm1282_vm0, %v3997_v32, %v14325_v51  ;;  %v4109_v60 = vrot.slane %v14667_v16, 4  ;;  %v4219_v15 = vrot.slane %v14662_v27, 4 }
 0x459   : > { %17489 = vst [vmem:[#allocation73_spill] sm:$0xff] %v14682_v13  ;;  %v14706_v20 = vpack.i.b16 %v4306_v19, %v4305_v44  ;;  %v4221_v62 = vrot.slane %v14678_v52, 4  ;;  %v4265_v34 = vshrl.u32 %v14699_v63, 16  ;;  %v4266_v39 = vshrl.u32 %v14703_v0, 16 }
 0x45a   : > { %17490 = vst [vmem:[#allocation74_spill] sm:$0xff] %v14690_v24  ;;  %v14716_v28 = vsel %vm1282_vm0, %v14672_v29, %v4107_v22  ;;  %v14719_v51 = vperm.slane %v4178_v45, %v13487_v6  ;;  %v14723_v17 = vsel %vm1282_vm0, %v14675_v55, %v4219_v15  ;;  %v3889_v43 = vrot.slane %v14439_v46, 4 }
 0x45b   : > { %17493 = vst [vmem:[#allocation49_spill] sm:$0xff] %v14699_v63  ;;  %v14728_v31 = vsel %vm1282_vm0, %v4001_v50, %v14343_v36  ;;  %v14730_v32 = vpack.i.b16 %v4266_v39, %v4265_v34  ;;  %v4321_v25 = vshrl.u32 %v14716_v28, 16  ;;  %v4322_v44 = vshrl.u32 %v14723_v17, 16  ;;  %v17507_v50 = vld [vmem:[#allocation52_spill] sm:$0xff] }
 0x45c   : > { %17494 = vst [vmem:[#allocation75_spill] sm:$0xff] %v14703_v0  ;;  %v14738_v19 = vsel %vm1282_vm0, %v3889_v43, %v14298_v11  ;;  %v4282_v22 = vshrl.u32 %v14728_v31, 16  ;;  %v14743_v46 = vsel %vm1282_vm0, %v4109_v60, %v14456_v40  ;;  %v14752_v45 = vsel %vm1282_vm0, %v4221_v62, %v14719_v51  ;;  %v17506_v43 = vld [vmem:[#allocation50_spill] sm:$0xff]  ;;  %v17514_v40 = vld [vmem:[#allocation68_spill] sm:$0xff] }
 0x45d   : > { %17495 = vst [vmem:[#allocation76_spill] sm:$0xff] %v14706_v20  ;;  %v14745_v36 = vpack.i.b16 %v4322_v44, %v4321_v25  ;;  %v4281_v18 = vshrl.u32 %v14738_v19, 16  ;;  %v4329_v15 = vshrl.u32 %v14743_v46, 16  ;;  %v4330_v34 = vshrl.u32 %v14752_v45, 16 }
 0x45e   : > { %17496 = vst [vmem:[#allocation77_spill] sm:$0xff] %v14716_v28  ;;  %v11750_v25 = vunpack.i.h.bf16 %v17506_v43  ;;  %v11749_v44 = vunpack.i.l.bf16 %v17506_v43  ;;  %v11744_v56 = vunpack.i.l.bf16 %v17507_v50  ;;  %v11740_v62 = vunpack.i.h.bf16 %v17508_v10 }
 0x45f   : > { %17497 = vst [vmem:[#allocation78_spill] sm:$0xff] %v14723_v17  ;;  %v14758_v60 = vpack.i.b16 %v4282_v22, %v4281_v18  ;;  %v14760_v39 = vpack.i.b16 %v4330_v34, %v4329_v15  ;;  %v11739_v33 = vunpack.i.l.bf16 %v17508_v10  ;;  %v11745_v11 = vunpack.i.h.bf16 %v17507_v50  ;;  %v17510_v22 = vld [vmem:[#allocation46_spill] sm:$0xff] }
 0x460   : > { %17498 = vst [vmem:[#allocation79_spill] sm:$0xff] %v14728_v31  ;;  %v1350_v31 = vrot.slane %v11750_v25, 4  ;;  %v1340_v18 = vrot.slane %v17510_v22, 4  ;;  %v1281_v15 = vrot.slane %v11744_v56, 4  ;;  %v1352_v34 = vrot.slane %v11740_v62, 4 }
 0x461   : > { %17499 = vst [vmem:[#allocation80_spill] sm:$0xff] %v14730_v32 }
 0x462   : > { %17500 = vst [vmem:[#allocation81_spill] sm:$0xff] %v14738_v19  ;;  %v17509_v19 = vld [vmem:[#allocation45_spill] sm:$0xff]  ;;  %v1341_v43 = vsel %vm1282_vm0, %v11745_v11, %v1340_v18  ;;  %v1351_v28 = vsel %vm1282_vm0, %v1350_v31, %v11740_v62  ;;  %v1353_v17 = vsel %vm1282_vm0, %v11750_v25, %v1352_v34 }
 0x463   : > { %17501 = vst [vmem:[#allocation82_spill] sm:$0xff] %v14743_v46  ;;  %v1284_v46 = vrot.slane %v17509_v19, 4  ;;  %v1283_v50 = vsel %vm1282_vm0, %v1281_v15, %v17509_v19  ;;  %v1349_v63 = vperm.slane %v1341_v43, %v13468_v53 }
 0x464   : > { %17502 = vst [vmem:[#allocation83_spill] sm:$0xff] %v14745_v36  ;;  %v1289_v31 = vperm.slane %v1283_v50, %v13468_v53 }
 0x465   : > { %17503 = vst [vmem:[#allocation84_spill] sm:$0xff] %v14752_v45  ;;  %v1294_v45 = vrot.slane %v11749_v44, 4  ;;  %v1285_v36 = vsel %vm1282_vm0, %v11744_v56, %v1284_v46  ;;  %v1361_v46 = vperm.slane %v1353_v17, %v13468_v53 }
 0x466   : > { %17504 = vst [vmem:[#allocation85_spill] sm:$0xff] %v14758_v60  ;;  %v1338_v60 = vrot.slane %v11745_v11, 4  ;;  %v1293_v0 = vperm.slane %v1285_v36, %v13468_v53  ;;  %v1308_v62 = vrot.slane %v1289_v31, 4 }
 0x467   : > { %17505 = vst [vmem:[#allocation86_spill] sm:$0xff] %v14760_v39  ;;  %v1296_v39 = vrot.slane %v11739_v33, 4  ;;  %v1295_v10 = vsel %vm1282_vm0, %v1294_v45, %v11739_v33  ;;  %v1357_v33 = vperm.slane %v1351_v28, %v13468_v53  ;;  %v1374_v18 = vrot.slane %v1361_v46, 4 }
 0x468   : > { %v1339_v11 = vsel %vm1282_vm0, %v1338_v60, %v17510_v22  ;;  %v1301_v56 = vperm.slane %v1295_v10, %v13468_v53  ;;  %v1320_v25 = vrot.slane %v1293_v0, 4 }
 0x469   : > { %v1297_v32 = vsel %vm1282_vm0, %v11749_v44, %v1296_v39  ;;  %v1345_v45 = vperm.slane %v1339_v11, %v13468_v53  ;;  %v1376_v39 = vrot.slane %v1349_v63, 4  ;;  %v1362_v36 = vrot.slane %v1357_v33, 4 }
 0x46a   : > { %v1305_v19 = vperm.slane %v1297_v32, %v13468_v53  ;;  %v1306_v44 = vrot.slane %v1301_v56, 4  ;;  %v1309_v32 = vsel %vm1282_vm0, %v1301_v56, %v1308_v62  ;;  %v1375_v10 = vsel %vm1282_vm0, %v1374_v18, %v1349_v63 }
 0x46b   : > { %v1364_v60 = vrot.slane %v1345_v45, 4  ;;  %v1377_v28 = vsel %vm1282_vm0, %v1361_v46, %v1376_v39  ;;  %v1363_v43 = vsel %vm1282_vm0, %v1362_v36, %v1345_v45  ;;  %v14803_v46 = vperm.slane %v1309_v32, %v13487_v6 }
 0x46c   : > { %v1318_v15 = vrot.slane %v1305_v19, 4  ;;  %v1307_v22 = vsel %vm1282_vm0, %v1306_v44, %v1289_v31  ;;  %v1321_v34 = vsel %vm1282_vm0, %v1305_v19, %v1320_v25  ;;  %v1385_v24 = vperm.slane %v1377_v28, %v13487_v6 }
 0x46d   : > { %v14796_v50 = vperm.slane %v1307_v22, %v13487_v6  ;;  %v1329_v11 = vperm.slane %v1321_v34, %v13487_v6  ;;  %v1365_v19 = vsel %vm1282_vm0, %v1357_v33, %v1364_v60  ;;  %v1381_v56 = vperm.slane %v1375_v10, %v13487_v6 }
 0x46e   : > { %v1319_v17 = vsel %vm1282_vm0, %v1318_v15, %v1293_v0  ;;  %v14806_v0 = vperm.slane %v1363_v43, %v13487_v6  ;;  %v14811_v39 = vperm.slane %v1365_v19, %v13487_v6  ;;  %v1392_v25 = vrot.slane %v1385_v24, 4  ;;  %v17511_v43 = vld [vmem:[#allocation55_spill] sm:$0xff] }
 0x46f   : > { %v1325_v31 = vperm.slane %v1319_v17, %v13487_v6  ;;  %v1330_v63 = vrot.slane %v14796_v50, 4  ;;  %v1336_v45 = vrot.slane %v1329_v11, 4  ;;  %v1332_v62 = vrot.slane %v14803_v46, 4 }
 0x470   : > { %v1386_v33 = vrot.slane %v14806_v0, 4  ;;  %v1390_v36 = vrot.slane %v1381_v56, 4  ;;  %v1388_v60 = vrot.slane %v14811_v39, 4  ;;  %v1393_v22 = vsel %vm1282_vm0, 0.0, %v1392_v25 }
 0x471   : > { %v1334_v44 = vrot.slane %v1325_v31, 4  ;;  %v1331_v18 = vsel %vm1282_vm0, 0.0, %v1330_v63  ;;  %v1337_v15 = vsel %vm1282_vm0, 0.0, %v1336_v45  ;;  %v1333_v28 = vsel %vm1282_vm0, 0.0, %v1332_v62 }
 0x472   : > { %v14822_v17 = vsel %vm1282_vm0, 0.0, %v1386_v33  ;;  %v1391_v32 = vsel %vm1282_vm0, 0.0, %v1390_v36  ;;  %v3225_v10 = vrot.slane %v17511_v43, 4  ;;  %v1658_v19 = vpack.c.bf16 %v14796_v50, %v14796_v50 }
 0x473   : > { %v1335_v34 = vsel %vm1282_vm0, 0.0, %v1334_v44  ;;  %v1659_v63 = vpack.c.bf16 %v1331_v18, %v1331_v18  ;;  %v1665_v45 = vpack.c.bf16 %v1337_v15, %v1337_v15  ;;  %v1673_v20 = vpack.c.bf16 %v1393_v22, %v1393_v22  ;;  %v17512_v44 = vld [vmem:[#allocation66_spill] sm:$0xff]  ;;  %v17513_v18 = vld [vmem:[#allocation64_spill] sm:$0xff] }
 0x474   : > { %v1389_v2 = vsel %vm1282_vm0, 0.0, %v1388_v60  ;;  %v1660_v25 = vpack.c.bf16 %v14803_v46, %v14803_v46  ;;  %v3237_v62 = vrot.slane %v17512_v44, 4  ;;  %v3265_v33 = vrot.slane %v14406_v21, 4 }
 0x475   : > { %v1661_v13 = vpack.c.bf16 %v1333_v28, %v1333_v28  ;;  %v1662_v57 = vpack.c.bf16 %v1325_v31, %v1325_v31  ;;  %v1663_v36 = vpack.c.bf16 %v1335_v34, %v1335_v34  ;;  %v1664_v7 = vpack.c.bf16 %v1329_v11, %v1329_v11  ;;  %v17515_v31 = vld [vmem:[#allocation65_spill] sm:$0xff] }
 0x476   : > { %v1666_v43 = vpack.c.bf16 %v14806_v0, %v14806_v0  ;;  %v1672_v50 = vpack.c.bf16 %v1385_v24, %v1385_v24  ;;  %v3226_v15 = vsel %vm1282_vm0, %v3225_v10, %v17513_v18  ;;  %v3219_v60 = vrot.slane %v14414_v61, 4 }
 0x477   : > { %v1669_v22 = vpack.c.bf16 %v1389_v2, %v1389_v2  ;;  %v1670_v16 = vpack.c.bf16 %v1381_v56, %v1381_v56  ;;  %v1717_v46 = vrot.slane %v1665_v45, 4  ;;  %v1757_v52 = vrot.slane %v1673_v20, 4 }
 0x478   : > { %v1671_v44 = vpack.c.bf16 %v1391_v32, %v1391_v32  ;;  %v3238_v21 = vsel %vm1282_vm0, %v3237_v62, %v17514_v40  ;;  %v3266_v11 = vsel %vm1282_vm0, %v3265_v33, %v17515_v31  ;;  %v3259_v34 = vrot.slane %v14489_v48, 4  ;;  %v17516_v32 = vld [vmem:[#allocation69_spill] sm:$0xff] }
 0x479   : > { %v1667_v24 = vpack.c.bf16 %v14822_v17, %v14822_v17  ;;  %v1697_v0 = vrot.slane %v1664_v7, 4  ;;  %v1711_v28 = vrot.slane %v1663_v36, 4  ;;  %v3230_v61 = vperm.slane %v3226_v15, %v13468_v53  ;;  %v17517_v36 = vld [vmem:[#allocation54_spill] sm:$0xff] }
 0x47a   : > { %v1668_v2 = vpack.c.bf16 %v14811_v39, %v14811_v39  ;;  %v1690_v20 = vrot.slane %v1662_v57, 4  ;;  %v1737_v56 = vrot.slane %v1672_v50, 4  ;;  %v3220_v40 = vsel %vm1282_vm0, %v3219_v60, %v17516_v32  ;;  %v17519_v32 = vld [vmem:[#allocation71_spill] sm:$0xff] }
 0x47b   : > { %v3242_v10 = vperm.slane %v3238_v21, %v13468_v53  ;;  %v3270_v45 = vperm.slane %v3266_v11, %v13468_v53  ;;  %v1718_v62 = vsel %vm1282_vm0, %v1717_v46, %v1661_v13  ;;  %v1758_v7 = vsel %vm1282_vm0, %v1757_v52, %v1669_v22  ;;  %v17518_v21 = vld [vmem:[#allocation67_spill] sm:$0xff] }
 0x47c   : > { %v1731_v17 = vrot.slane %v1670_v16, 4  ;;  %v1751_v33 = vrot.slane %v1671_v44, 4  ;;  %v3260_v18 = vsel %vm1282_vm0, %v3259_v34, %v17517_v36  ;;  %v3243_v57 = vrot.slane %v3230_v61, 4 }
 0x47d   : > { %v3224_v50 = vperm.slane %v3220_v40, %v13468_v53  ;;  %v1698_v15 = vsel %vm1282_vm0, %v1697_v0, %v1660_v25  ;;  %v1712_v60 = vsel %vm1282_vm0, %v1711_v28, %v1659_v63  ;;  %v1722_v13 = vperm.slane %v1718_v62, %v13468_v53 }
 0x47e   : > { %v1738_v52 = vsel %vm1282_vm0, %v1737_v56, %v1668_v2  ;;  %v1762_v16 = vperm.slane %v1758_v7, %v13468_v53  ;;  %v3249_v22 = vrot.slane %v3242_v10, 4  ;;  %v3283_v46 = vrot.slane %v3270_v45, 4 }
 0x47f   : > { %v3264_v44 = vperm.slane %v3260_v18, %v13468_v53  ;;  %v1702_v34 = vperm.slane %v1698_v15, %v13468_v53  ;;  %v3244_v25 = vsel %vm1282_vm0, %v3243_v57, %v3224_v50  ;;  %v1742_v0 = vperm.slane %v1738_v52, %v13468_v53  ;;  %v17520_v57 = vld [vmem:[#allocation70_spill] sm:$0xff] }
 0x480   : > { %v1692_v28 = vsel %vm1282_vm0, %v1690_v20, %v1658_v19  ;;  %v1716_v61 = vperm.slane %v1712_v60, %v13468_v53  ;;  %v1723_v2 = vrot.slane %v1722_v13, 4  ;;  %v1752_v56 = vsel %vm1282_vm0, %v1751_v33, %v1667_v24 }
 0x481   : > { %v3282_v40 = vperm.slane %v17519_v32, %v13468_v53  ;;  %v3284_v45 = vsel %vm1282_vm0, %v3283_v46, %v3264_v44  ;;  %v1763_v62 = vrot.slane %v1762_v16, 4  ;;  %v3248_v36 = vperm.slane %v3244_v25, %v13487_v6 }
 0x482   : > { %v1703_v19 = vrot.slane %v1702_v34, 4  ;;  %v1743_v20 = vrot.slane %v1742_v0, 4  ;;  %v3288_v33 = vperm.slane %v3284_v45, %v13487_v6  ;;  %v1696_v50 = vperm.slane %v1692_v28, %v13468_v53 }
 0x483   : > { %v1724_v15 = vsel %vm1282_vm0, %v1723_v2, %v1716_v61  ;;  %v3257_v13 = vrot.slane %v3248_v36, 4 }
 0x484   : > { %v1704_v52 = vsel %vm1282_vm0, %v1703_v19, %v1696_v50 }
 0x49e   : > { %v11928_v48 = vpop.trf.xlu1 }
 0x49f   : > { %v3231_v39 = vrot.slane %v11928_v48, 4  ;;  %v1732_v48 = vsel %vm1282_vm0, %v1731_v17, %v1666_v43  ;;  %v3289_v43 = vrot.slane %v3282_v40, 4 }
 0x4a0   : > { %v1736_v60 = vperm.slane %v1732_v48, %v13468_v53 }
 0x4a1   : > { %v3232_v31 = vsel %vm1282_vm0, %v3231_v39, %v17518_v21  ;;  %v1756_v39 = vperm.slane %v1752_v56, %v13468_v53 }
 0x4a2   : > { %v3236_v11 = vperm.slane %v3232_v31, %v13468_v53  ;;  %v1744_v46 = vsel %vm1282_vm0, %v1743_v20, %v1736_v60 }
 0x4a3   : > { %v1764_v21 = vsel %vm1282_vm0, %v1763_v62, %v1756_v39  ;;  %v1748_v61 = vperm.slane %v1744_v46, %v13487_v6 }
 0x4a4   : > { %v3250_v63 = vsel %vm1282_vm0, %v3249_v22, %v3236_v11  ;;  %v1728_v22 = vperm.slane %v1724_v15, %v13487_v6  ;;  %v3297_v11 = vrot.slane %v3288_v33, 4  ;;  %v1768_v34 = vperm.slane %v1764_v21, %v13487_v6 }
 0x4a5   : > { %v3254_v18 = vperm.slane %v3250_v63, %v13487_v6  ;;  %v1708_v63 = vperm.slane %v1704_v52, %v13487_v6  ;;  %v17522_v21 = vpack.i.b16 %v14580_v8, %v14577_v49 }
 0x4a6   : > { %v11929_v10 = vpop.trf.xlu1  ;;  %v1785_v48 = vpack.i.b16 %v1768_v34, %v1748_v61  ;;  %v1787_v50 = vshrl.u32 %v1768_v34, 16  ;;  %v1769_v52 = vrot.slane %v1768_v34, 4 }
 0x4a7   : > { %v3271_v7 = vrot.slane %v11929_v10, 4  ;;  %v3255_v31 = vrot.slane %v3254_v18, 4  ;;  %v3258_v25 = vsel %vm1282_vm0, %v3254_v18, %v3257_v13  ;;  %v1773_v45 = vpack.i.b16 %v1728_v22, %v1708_v63 }
 0x4a8   : > { %v3327_v32 = vshrl.u32 %v3258_v25, 16  ;;  %v1774_v15 = vshrl.u32 %v1708_v63, 16  ;;  %v1729_v13 = vrot.slane %v1728_v22, 4 }
 0x4a9   : > { %v3272_v24 = vsel %vm1282_vm0, %v3271_v7, %v17520_v57  ;;  %v3256_v0 = vsel %vm1282_vm0, %v3255_v31, %v3248_v36  ;;  %v3331_v39 = vunpack.c.l.b16 %v1773_v45  ;;  %v3332_v36 = vunpack.c.l.b16 %v1785_v48 }
 0x4aa   : > { %v3276_v17 = vperm.slane %v3272_v24, %v13468_v53  ;;  %v3319_v7 = vshrl.u32 %v3256_v0, 16  ;;  %v17521_v57 = vpack.i.b16 %v14555_v3, %v14552_v59  ;;  %v1730_v46 = vsel %vm1282_vm0, 0, %v1729_v13 }
 0x4ab   : > { %v3333_v24 = vpack.c.b16 %v3332_v36, %v3331_v39 }
 0x4ac   : > { %v3290_v16 = vsel %vm1282_vm0, %v3289_v43, %v3276_v17  ;;  %v1786_v43 = vshrl.u32 %v1748_v61, 16 }
 0x4ad   : > { %v3294_v44 = vperm.slane %v3290_v16, %v13487_v6  ;;  %v1709_v16 = vrot.slane %v1708_v63, 4  ;;  %v1781_v63 = vshrl.u32 %v1730_v46, 16 }
 0x4ae   : > { %v1788_v60 = vpack.i.b16 %v1787_v50, %v1786_v43 }
 0x4af   : > { %v3295_v28 = vrot.slane %v3294_v44, 4  ;;  %v3298_v2 = vsel %vm1282_vm0, %v3294_v44, %v3297_v11  ;;  %v1770_v44 = vsel %vm1282_vm0, 0, %v1769_v52  ;;  %v1710_v11 = vsel %vm1282_vm0, 0, %v1709_v16 }
 0x4b0   : > { %v3325_v56 = vpack.i.b16 %v3298_v2, %v3258_v25  ;;  %v3328_v40 = vshrl.u32 %v3298_v2, 16  ;;  %v3353_v3 = vunpack.c.l.b16 %v1788_v60  ;;  %v1779_v8 = vpack.i.b16 %v1730_v46, %v1710_v11 }
 0x4b1   : > { %v3296_v10 = vsel %vm1282_vm0, %v3295_v28, %v3288_v33  ;;  %v1775_v33 = vshrl.u32 %v1728_v22, 16  ;;  %v1793_v28 = vshrl.u32 %v1770_v44, 16 }
 0x4b2   : > { %v3317_v62 = vpack.i.b16 %v3296_v10, %v3256_v0  ;;  %v3320_v19 = vshrl.u32 %v3296_v10, 16  ;;  %v3329_v18 = vpack.i.b16 %v3328_v40, %v3327_v32  ;;  %v3372_v0 = vunpack.c.l.b16 %v1779_v8 }
 0x4b3   : > { %v1776_v17 = vpack.i.b16 %v1775_v33, %v1774_v15 }
 0x4b4   : > { %3344 = vmatpush.bf16.msra.mxu3 %v3317_v62  ;;  %v3321_v20 = vpack.i.b16 %v3320_v19, %v3319_v7 }
 0x4b5   : > { %v3352_v59 = vunpack.c.l.b16 %v1776_v17 }
 0x4b7   : > { %v3354_v31 = vpack.c.b16 %v3353_v3, %v3352_v59 }
 0x4b8   : > { %3345 = vmatpush.bf16.msra.mxu3 %v17521_v57 }
 0x4bb   : > { %11185 = vmatmul.msk.bf16.vlgmr.msra.gmra.mxu3 %vm3334_vm1, %v3333_v24 }
 0x4bc   : > { %3364 = vmatpush.bf16.msrb.mxu3 %v3321_v20 }
 0x4c0   : > { %3365 = vmatpush.bf16.msrb.mxu3 %v14584_v35  ;;  %v1749_v35 = vrot.slane %v1748_v61, 4  ;;  %v1780_v61 = vshrl.u32 %v1710_v11, 16 }
 0x4c2   : > { %v1750_v49 = vsel %vm1282_vm0, 0, %v1749_v35 }
 0x4c3   : > { %v1791_v25 = vpack.i.b16 %v1770_v44, %v1750_v49  ;;  %v1792_v2 = vshrl.u32 %v1750_v49, 16 }
 0x4c4   : > { %3384 = vmatpush.bf16.msra.mxu3 %v3325_v56  ;;  %v1782_v56 = vpack.i.b16 %v1781_v63, %v1780_v61 }
 0x4c5   : > { %v3373_v22 = vunpack.c.l.b16 %v1791_v25  ;;  %v1794_v32 = vpack.i.b16 %v1793_v28, %v1792_v2 }
 0x4c6   : > { %v3392_v40 = vunpack.c.l.b16 %v1782_v56 }
 0x4c7   : > { %v3374_v34 = vpack.c.b16 %v3373_v22, %v3372_v0  ;;  %v3393_v10 = vunpack.c.l.b16 %v1794_v32 }
 0x4c8   : > { %3385 = vmatpush.bf16.msra.mxu3 %v17522_v21 }
 0x4cb   : > { %11186 = vmatmul.msk.bf16.vlgmr.msrb.gmra.mxu3 %vm3334_vm1, %v3354_v31  ;;  %v5797_v31 = vrot.slane %v14644_v23, 4 }
 0x4cc   : > { %3404 = vmatpush.bf16.msrb.mxu3 %v3329_v18 }
 0x4cd   : > { %v5798_v11 = vsel %vm1282_vm0, %v5797_v31, %v14625_v14 }
 0x4ce   : > { %v11912_v24 = vpop.trf.xlu2  ;;  %v5804_v23 = vperm.slane %v5798_v11, %v13487_v6 }
 0x4d0   : > { %3405 = vmatpush.bf16.msrb.mxu3 %v14604_v42  ;;  %v3394_v42 = vpack.c.b16 %v3393_v10, %v3392_v40  ;;  %v5821_v32 = vrot.slane %v5804_v23, 4 }
 0x4d6   : > { %v11913_v59 = vpop.trf.xlu2 }
 0x4db   : > { %11187 = vmatmul.msk.bf16.vlgmr.msra.gmra.mxu3 %vm3334_vm1, %v3374_v34  ;;  %v11931_v39 = vpop.trf.xlu1 }
 0x4de   : > { %v11920_v33 = vpop.trf.xlu0 }
 0x4df   : > { %v4869_v43 = vrot.slane %v11920_v33, 4 }
 0x4e1   : > { %v4870_v60 = vsel %vm1282_vm0, %v4869_v43, %v11931_v39 }
 0x4e2   : > { %v4874_v52 = vperm.slane %v4870_v60, %v13468_v53 }
 0x4e3   : > { %v11932_v57 = vpop.trf.xlu1 }
 0x4e6   : > { %v11921_v16 = vpop.trf.xlu0 }
 0x4e7   : > { %v4909_v46 = vrot.slane %v11921_v16, 4 }
 0x4e9   : > { %v4910_v25 = vsel %vm1282_vm0, %v4909_v46, %v11932_v57  ;;  %v5985_v57 = vpack.c.bf16 %v5804_v23, %v5804_v23 }
 0x4ea   : > { %v4914_v63 = vperm.slane %v4910_v25, %v13468_v53 }
 0x4eb   : > { %11188 = vmatmul.msk.bf16.vlgmr.msrb.gmra.mxu3 %vm3334_vm1, %v3394_v42  ;;  %v11934_v17 = vpop.trf.xlu1  ;;  %v1218_v42 = vpop.f32.mrf.mxu0 }
 0x4ec   : > { %v4875_v21 = vrot.slane %v11934_v17, 4  ;;  %v17523_v17 = vld [vmem:[#allocation44_spill] sm:$0xff] }
 0x4ed   : > { %v14972_v60 = vadd.f32 %v1218_v42, %v17523_v17 }
 0x4ee   : > { %v4876_v3 = vsel %vm1282_vm0, %v4875_v21, %v11912_v24 }
 0x4ef   : > { %v4880_v35 = vperm.slane %v4876_v3, %v13468_v53  ;;  %17524 = vst [vmem:[#allocation50_spill] sm:$0xff] %v14972_v60 }
 0x4f1   : > { %v4893_v44 = vrot.slane %v4880_v35, 4 }
 0x4f3   : > { %v11935_v49 = vpop.trf.xlu1  ;;  %v14946_v8 = vsel %vm1282_vm0, %v4893_v44, %v4874_v52  ;;  %v1220_v43 = vpop.f32.mrf.mxu0 }
 0x4f4   : > { %v4915_v0 = vrot.slane %v11935_v49, 4  ;;  %v11942_v61 = vpop.trf.xlu2  ;;  %v14975_v21 = vadd.f32 %v1220_v43, %v17523_v17 }
 0x4f5   : > { %v6355_v2 = vrot.slane %v11942_v61, 4 }
 0x4f6   : > { %v4916_v22 = vsel %vm1282_vm0, %v4915_v0, %v11913_v59  ;;  %17525 = vst [vmem:[#allocation52_spill] sm:$0xff] %v14975_v21  ;;  %v14983_v31 = vpack.i.bf16 %v14975_v21, %v14972_v60 }
 0x4f7   : > { %v4920_v28 = vperm.slane %v4916_v22, %v13468_v53 }
 0x4f9   : > { %v4933_v56 = vrot.slane %v4920_v28, 4 }
 0x4fb   : > { %v14958_v10 = vsel %vm1282_vm0, %v4933_v56, %v4914_v63  ;;  %v14979_v3 = vpop.trf.xlu0 }
 0x4fd   : > { %v11937_v40 = vpop.trf.xlu1 }
 0x503   : > { %v14989_v35 = vpop.trf.xlu0 }
 0x505   : > { %v14967_v33 = vpop.trf.xlu1 }
 0x50b   : > { %v14997_v0 = vpop.trf.xlu0 }
 0x50d   : > { %v14977_v59 = vpop.trf.xlu1 }
 0x513   : > { %v14999_v23 = vpop.trf.xlu0 }
 0x515   : > { %v11940_v16 = vpop.trf.xlu1 }
 0x516   : > { %v6689_v46 = vrot.slane %v11940_v16, 4 }
 0x53e   : > { %v14916_v45 = vpop.f32.mrf.mxu3 }
 0x53f   : > { %v3413_v48 = vsel %vm3412_vm2, %v14916_v45, -inf }
 0x540   : > { %3414 = vmax.xlane.f32.xlu0 %v3413_v48  ;;  %v6353_v48 = vrot.slane %v11937_v40, 4 }
 0x542   : > { %v14965_v39 = vsel %vm1282_vm0, %v6353_v48, %v11942_v61 }
 0x546   : > { %v14920_v62 = vpop.f32.mrf.mxu3 }
 0x547   : > { %v3416_v7 = vsel %vm3412_vm2, %v14920_v62, -inf }
 0x548   : > { %3417 = vmax.xlane.f32.xlu1 %v3416_v7  ;;  %v14961_v7 = vsel %vm1282_vm0, %v11937_v40, %v6355_v2 }
 0x54e   : > { %v14924_v19 = vpop.f32.mrf.mxu3 }
 0x54f   : > { %v3419_v18 = vsel %vm3412_vm2, %v14924_v19, -inf }
 0x550   : > { %3420 = vmax.xlane.f32.xlu2 %v3419_v18  ;;  %v5822_v18 = vsel %vm1282_vm0, 0.0, %v5821_v32 }
 0x551   : > { %v5986_v24 = vpack.c.bf16 %v5822_v18, %v5822_v18 }
 0x556   : > { %v14928_v20 = vpop.f32.mrf.mxu3 }
 0x55e   : > { %v14930_v36 = vpop.f32.mrf.mxu3 }
 0x566   : > { %v14932_v50 = vpop.f32.mrf.mxu3 }
 0x567   : > { %v3428_v15 = vsel %vm3412_vm2, %v14932_v50, -inf }
 0x568   : > { %3429 = vmax.xlane.f32.xlu0 %v3428_v15  ;;  %v14969_v15 = vpop.trf.xlu2 }
 0x56e   : > { %v14939_v13 = vpop.f32.mrf.mxu3 }
 0x570   : > { %v14985_v52 = vpop.trf.xlu2 }
 0x576   : > { %v14951_v34 = vpop.f32.mrf.mxu3 }
 0x577   : > { %v3434_v14 = vsel %vm3412_vm2, %v14951_v34, -inf }
 0x578   : > { %3435 = vmax.xlane.f32.xlu2 %v3434_v14  ;;  %v11945_v44 = vpop.trf.xlu2 }
 0x579   : > { %v14992_v11 = vsel %vm1282_vm0, %v6689_v46, %v11945_v44  ;;  %v6691_v49 = vrot.slane %v11945_v44, 4  ;;  %v3431_v46 = vsel %vm3412_vm2, %v14939_v13, -inf  ;;  %v5816_v44 = vperm.slane %v14595_v37, %v13487_v6 }
 0x57b   : > { %v14995_v25 = vsel %vm1282_vm0, %v11940_v16, %v6691_v49  ;;  %v3425_v16 = vsel %vm3412_vm2, %v14930_v36, -inf }
 0x582   : > { %11951 = vxpose.binary.xlu1.c.b16.start.end [1/2] (short) (narrow) %v5986_v24, %v5985_v57, 32 }
 0x590   : > { %11962 = vrot.lane.b32.xlu2 %v14983_v31, %s12896_s29 }
 0x5b3   : > { %v3415_v22 = vpop.xlane.xlu0 %3414 }
 0x5b4   : > { %v3437_v63 = vsub.f32 %v14916_v45, %v3415_v22  ;;  %v5825_v22 = vrot.slane %v5816_v44, 4 }
 0x5b6   : > { %v3445_v28 = vmul.f32 1.442695, %v3437_v63 }
 0x5b8   : > { %12286 = vpow2.f32 %v3445_v28  ;;  %v5989_v28 = vpack.c.bf16 %v5816_v44, %v5816_v44 }
 0x5bb   : > { %v3418_v43 = vpop.xlane.xlu1 %3417 }
 0x5bc   : > { %v3438_v17 = vsub.f32 %v14920_v62, %v3418_v43  ;;  %v5826_v62 = vsel %vm1282_vm0, 0.0, %v5825_v22  ;;  %v17528_v43 = vld [vmem:[#allocation57_spill] sm:$0xff]  ;;  %v4105_v22 = vrot.slane %v14672_v29, 4 }
 0x5be   : > { %v15002_v61 = vpop.eup %12286 }
 0x5bf   : > { %v3461_v14 = vsel %vm3412_vm2, %v15002_v61, 0.0 }
 0x5c0   : > { %3462 = vadd.xlane.f32.xlu0 %v3461_v14  ;;  %v5990_v14 = vpack.c.bf16 %v5826_v62, %v5826_v62 }
 0x5c3   : > { %v3421_v2 = vpop.xlane.xlu2 %3420 }
 0x5c4   : > { %v3439_v56 = vsub.f32 %v14924_v19, %v3421_v2  ;;  %v3422_v19 = vsel %vm3412_vm2, %v14928_v20, -inf  ;;  %v5820_v2 = vperm.slane %v14598_v4, %v13487_v6 }
 0x5c6   : > { %v3449_v32 = vmul.f32 1.442695, %v3439_v56  ;;  %v5827_v56 = vrot.slane %v5820_v2, 4  ;;  %v5991_v37 = vpack.c.bf16 %v5820_v2, %v5820_v2 }
 0x5c8   : > { %12288 = vpow2.f32 %v3449_v32  ;;  %v5828_v32 = vsel %vm1282_vm0, 0.0, %v5827_v56 }
 0x5ce   : > { %v15007_v40 = vpop.eup %12288 }
 0x5cf   : > { %v3467_v42 = vsel %vm3412_vm2, %v15007_v40, 0.0 }
 0x5d0   : > { %3468 = vadd.xlane.f32.xlu2 %v3467_v42  ;;  %v5992_v42 = vpack.c.bf16 %v5828_v32, %v5828_v32 }
 0x5db   : > { %v3430_v45 = vpop.xlane.xlu0 %3429 }
 0x5dc   : > { %v3442_v48 = vsub.f32 %v14932_v50, %v3430_v45  ;;  %v3447_v50 = vmul.f32 1.442695, %v3438_v17 }
 0x5de   : > { %v3455_v18 = vmul.f32 1.442695, %v3442_v48 }
 0x5e0   : > { %12290 = vpow2.f32 %v3455_v18  ;;  %v17526_v18 = vpack.i.b16 %v14480_v38, %v14476_v58  ;;  %v4106_v38 = vsel %vm1282_vm0, %v4105_v22, %v14447_v47 }
 0x5e1   : > { %12292 = vpow2.f32 %v3447_v50  ;;  %v4217_v50 = vrot.slane %v14675_v55, 4 }
 0x5e3   : > { %v4218_v58 = vsel %vm1282_vm0, %v4217_v50, %v14662_v27 }
 0x5e4   : > { %v4311_v56 = vpack.i.b16 %v4218_v58, %v4106_v38 }
 0x5e6   : > { %v15012_v57 = vpop.eup %12290 }
 0x5e7   : > { %v3476_v24 = vsel %vm3412_vm2, %v15012_v57, 0.0  ;;  %v15025_v49 = vpop.eup %12292 }
 0x5e8   : > { %3477 = vadd.xlane.f32.xlu2 %v3476_v24  ;;  %v3464_v63 = vsel %vm3412_vm2, %v15025_v49, 0.0 }
 0x5eb   : > { %v3436_v62 = vpop.xlane.xlu2 %3435 }
 0x5ec   : > { %v3444_v55 = vsub.f32 %v14951_v34, %v3436_v62 }
 0x5ee   : > { %v3459_v47 = vmul.f32 1.442695, %v3444_v55 }
 0x5f2   : > { %3423 = vmax.xlane.f32.xlu1 %v3422_v19  ;;  %v17527_v19 = vld [vmem:[#allocation58_spill] sm:$0xff] }
 0x5f3   : > { %v17529_v17 = vpack.i.b16 %v17527_v19, %v17528_v43 }
 0x5fa   : > { %3426 = vmax.xlane.f32.xlu1 %v3425_v16  ;;  %v17530_v16 = vld [vmem:[#allocation59_spill] sm:$0xff] }
 0x602   : > { %3432 = vmax.xlane.f32.xlu1 %v3431_v46 }
 0x60a   : > { %3465 = vadd.xlane.f32.xlu1 %v3464_v63 }
 0x611   : > { %11966 = vxpose.binary.xlu2.c.b16.start.end [1/2] (short) (narrow) %v5990_v14, %v5989_v28, 32  ;;  %v4313_v14 = vshrl.u32 %v4106_v38, 16 }
 0x623   : > { %11957 = vrot.lane.b32.xlu1 %v14983_v31, %s12895_s21 }
 0x62e   : > { %v15035_v45 = vpop.trf.xlu1 }
 0x631   : > { %11971 = vxpose.binary.xlu2.c.b16.start.end [1/2] (short) (narrow) %v5992_v42, %v5991_v37, 32  ;;  %v4213_v37 = vrot.slane %v14636_v30, 4 }
 0x633   : > { %v3463_v42 = vpop.xlane.xlu0 %3462  ;;  %v4214_v19 = vsel %vm1282_vm0, %v4213_v37, %v14527_v26 }
 0x636   : > { %v15037_v48 = vpop.trf.xlu1 }
 0x63e   : > { %v15043_v24 = vpop.trf.xlu1 }
 0x646   : > { %v15045_v4 = vpop.trf.xlu1 }
 0x651   : > { %11994 = vxpose.binary.xlu2.c.b16.start.end [1/2] (short) (narrow) %v14518_v1, %v17526_v18, 16  ;;  %v4314_v1 = vshrl.u32 %v4218_v58, 16 }
 0x661   : > { %12006 = vxpose.binary.xlu2.c.b16.start.end [1/2] (short) (narrow) %v17530_v16, %v17529_v17, 16  ;;  %v4298_v16 = vshrl.u32 %v4214_v19, 16 }
 0x665   : > { %v3424_v46 = vpop.xlane.xlu1 %3423 }
 0x666   : > { %v3440_v44 = vsub.f32 %v14928_v20, %v3424_v46  ;;  %v4315_v20 = vpack.i.b16 %v4314_v1, %v4313_v14 }
 0x668   : > { %v3451_v63 = vmul.f32 1.442695, %v3440_v44 }
 0x66a   : > { %12294 = vpow2.f32 %v3451_v63 }
 0x66d   : > { %v3427_v28 = vpop.xlane.xlu1 %3426 }
 0x66e   : > { %v3441_v2 = vsub.f32 %v14930_v36, %v3427_v28  ;;  %v4101_v36 = vrot.slane %v14617_v54, 4 }
 0x670   : > { %v15060_v32 = vpop.eup %12294  ;;  %v3453_v29 = vmul.f32 1.442695, %v3441_v2  ;;  %v4102_v17 = vsel %vm1282_vm0, %v4101_v36, %v14336_v12 }
 0x671   : > { %12015 = vxpose.binary.xlu2.c.b16.start.end [1/2] (short) (narrow) %v4315_v20, %v4311_v56, 16  ;;  %v3470_v27 = vsel %vm3412_vm2, %v15060_v32, 0.0  ;;  %v4297_v46 = vshrl.u32 %v4102_v17, 16  ;;  %v4295_v44 = vpack.i.b16 %v4214_v19, %v4102_v17  ;;  %v17533_v17 = vld [vmem:[#allocation56_spill] sm:$0xff] }
 0x672   : > { %12296 = vpow2.f32 %v3453_v29  ;;  %3471 = vadd.xlane.f32.xlu0 %v3470_v27  ;;  %v17531_v29 = vld [vmem:[#allocation63_spill] sm:$0xff] }
 0x673   : > { %12298 = vpow2.f32 %v3459_v47  ;;  %v4299_v22 = vpack.i.b16 %v4298_v16, %v4297_v46  ;;  %v4111_v16 = vrot.slane %v17533_v17, 4 }
 0x674   : > { %12300 = vrcp.f32 %v3463_v42 }
 0x675   : > { %v3433_v18 = vpop.xlane.xlu1 %3432 }
 0x676   : > { %v3443_v55 = vsub.f32 %v14939_v13, %v3433_v18  ;;  %v17532_v18 = vld [vmem:[#allocation62_spill] sm:$0xff] }
 0x677   : > { %v4353_v36 = vshrl.u32 %v17532_v18, 16 }
 0x678   : > { %v15066_v34 = vpop.eup %12296  ;;  %v3457_v56 = vmul.f32 1.442695, %v3443_v55 }
 0x679   : > { %v3473_v43 = vsel %vm3412_vm2, %v15066_v34, 0.0  ;;  %v15074_v30 = vpop.eup %12298 }
 0x67a   : > { %3474 = vadd.xlane.f32.xlu1 %v3473_v43  ;;  %v12301_v54 = vpop.eup %12300  ;;  %v3482_v26 = vsel %vm3412_vm2, %v15074_v30, 0.0  ;;  %v4223_v43 = vrot.slane %v14719_v51, 4 }
 0x67b   : > { %v3493_v63 = vmul.f32 %v12301_v54, %v15002_v61  ;;  %v4179_v61 = vrot.slane %v14629_v9, 4  ;;  %v17535_v54 = vld [vmem:[#allocation53_spill] sm:$0xff] }
 0x67d   : > { %v3466_v50 = vpop.xlane.xlu1 %3465  ;;  %v3501_v12 = vpack.c.bf16 %v3493_v63, %v3493_v63  ;;  %v4180_v20 = vsel %vm1282_vm0, %v17491_v5, %v4179_v61  ;;  %v17538_v61 = vld [vmem:[#allocation61_spill] sm:$0xff] }
 0x67e   : > { %12302 = vrcp.f32 %v3466_v50  ;;  %v4188_v47 = vperm.slane %v4180_v20, %v13487_v6  ;;  %v17534_v50 = vld [vmem:[#allocation72_spill] sm:$0xff] }
 0x67f   : > { %v5055_v62 = vunpack.c.l.b16 %v3501_v12  ;;  %12304 = vpow2.f32 %v3457_v56  ;;  %v4224_v46 = vsel %vm1282_vm0, %v17534_v50, %v4223_v43  ;;  %v17544_v43 = vld [vmem:[#allocation74_spill] sm:$0xff] }
 0x680   : > { %v4227_v9 = vrot.slane %v4188_v47, 4  ;;  %v5808_v17 = vperm.slane %v17544_v43, %v13487_v6  ;;  %v17555_v43 = vld [vmem:[#allocation81_spill] sm:$0xff] }
 0x681   : > { %12024 = vxpose.binary.xlu2.c.b16.start.end [1/2] (short) (narrow) %v4299_v22, %v4295_v44, 16  ;;  %v4112_v44 = vsel %vm1282_vm0, %v17535_v54, %v4111_v16  ;;  %v4338_v22 = vshrl.u32 %v4224_v46, 16 }
 0x682   : > { %3483 = vadd.xlane.f32.xlu1 %v3482_v26  ;;  %v4337_v26 = vshrl.u32 %v4112_v44, 16  ;;  %v4335_v63 = vpack.i.b16 %v4224_v46, %v4112_v44 }
 0x684   : > { %v12303_v58 = vpop.eup %12302 }
 0x685   : > { %v3494_v38 = vmul.f32 %v12303_v58, %v15025_v49  ;;  %v4203_v49 = vrot.slane %v14608_v41, 4  ;;  %v4339_v58 = vpack.i.b16 %v4338_v22, %v4337_v26  ;;  %v5823_v22 = vrot.slane %v5808_v17, 4 }
 0x686   : > { %11977 = vrot.lane.b32.xlu0 %v14983_v31, %s12894_s30  ;;  %v15088_v31 = vpop.eup %12304 }
 0x687   : > { %v3502_v1 = vpack.c.bf16 %v3494_v38, %v3494_v38  ;;  %v4204_v27 = vsel %vm1282_vm0, %v17531_v29, %v4203_v49  ;;  %v3479_v13 = vsel %vm3412_vm2, %v15088_v31, 0.0  ;;  %v17536_v38 = vld [vmem:[#allocation60_spill] sm:$0xff]  ;;  %v4345_v49 = vshrl.u32 %v17538_v61, 16 }
 0x688   : > { %v4212_v37 = vperm.slane %v4204_v27, %v13487_v6  ;;  %v5752_v12 = vperm.slane %v17536_v38, %v13487_v6 }
 0x689   : > { %v5056_v28 = vunpack.c.l.b16 %v3502_v1 }
 0x68a   : > { %v4228_v42 = vsel %vm1282_vm0, %v4212_v37, %v4227_v9  ;;  %v4225_v1 = vrot.slane %v4212_v37, 4  ;;  %v5979_v55 = vpack.c.bf16 %v5752_v12, %v5752_v12 }
 0x68b   : > { %v5057_v14 = vpack.c.b16 %v5056_v28, %v5055_v62  ;;  %v4354_v41 = vshrl.u32 %v4228_v42, 16  ;;  %v4351_v5 = vpack.i.b16 %v4228_v42, %v17532_v18  ;;  %v5767_v62 = vrot.slane %v5752_v12, 4  ;;  %v15107_v28 = vpop.permute.xlu2 %11962  ;;  %v17540_v18 = vld [vmem:[#allocation73_spill] sm:$0xff] }
 0x68c   : > { %17537 = vst [vmem:[#allocation51_spill] sm:$0xff] %v15107_v28  ;;  %v4226_v51 = vsel %vm1282_vm0, %v4225_v1, %v4188_v47  ;;  %v5824_v12 = vsel %vm1282_vm0, 0.0, %v5823_v22 }
 0x68d   : > { %v5065_v2 = vsel %vm3412_vm2, %v5057_v14, 0  ;;  %v4355_v19 = vpack.i.b16 %v4354_v41, %v4353_v36  ;;  %v5768_v14 = vsel %vm1282_vm0, 0.0, %v5767_v62  ;;  %v4343_v20 = vpack.i.b16 %v4226_v51, %v17538_v61  ;;  %v17541_v36 = vld [vmem:[#allocation48_spill] sm:$0xff]  ;;  %v17545_v61 = vld [vmem:[#allocation75_spill] sm:$0xff] }
 0x68e   : > { %5074 = vmatpush.bf16.xpose.msrb.mxu0 %v5065_v2  ;;  %11542 = vmatpush.bf16.xpose.msrb.mxu1 %v5065_v2  ;;  %v4346_v2 = vshrl.u32 %v4226_v51, 16  ;;  %v5980_v56 = vpack.c.bf16 %v5768_v14, %v5768_v14  ;;  %v5988_v14 = vpack.c.bf16 %v5824_v12, %v5824_v12 }
 0x690   : > { %v4347_v29 = vpack.i.b16 %v4346_v2, %v4345_v49  ;;  %v17546_v49 = vld [vmem:[#allocation49_spill] sm:$0xff] }
 0x693   : > { %v3469_v27 = vpop.xlane.xlu2 %3468 }
 0x694   : > { %12306 = vrcp.f32 %v3469_v27 }
 0x695   : > { %v15113_v37 = vpop.permute.xlu1 %11957 }
 0x696   : > { %17539 = vst [vmem:[#allocation45_spill] sm:$0xff] %v15113_v37 }
 0x69a   : > { %v12307_v9 = vpop.eup %12306 }
 0x69b   : > { %v3478_v42 = vpop.xlane.xlu2 %3477  ;;  %v3495_v47 = vmul.f32 %v12307_v9, %v15007_v40  ;;  %v17550_v9 = vld [vmem:[#allocation77_spill] sm:$0xff] }
 0x69d   : > { %v3503_v46 = vpack.c.bf16 %v3495_v47, %v3495_v47 }
 0x69f   : > { %v5088_v26 = vunpack.c.l.b16 %v3503_v46 }
 0x6b0   : > { %3480 = vadd.xlane.f32.xlu0 %v3479_v13 }
 0x6bc   : > { %11991 = vxpose.binary.xlu1.c.b16.start.end [1/2] (short) (narrow) %v4355_v19, %v4351_v5, 16  ;;  %v17542_v5 = vpack.i.b16 %v17540_v18, %v17541_v36  ;;  %v17543_v19 = vld [vmem:[#allocation76_spill] sm:$0xff] }
 0x6cc   : > { %12000 = vxpose.binary.xlu1.c.b16.start.end [1/2] (short) (narrow) %v4339_v58, %v4335_v63, 16 }
 0x6d9   : > { %11981 = vxpose.binary.xlu0.c.b16.start.end [1/2] (short) (narrow) %v5980_v56, %v5979_v55, 32 }
 0x6dc   : > { %12003 = vxpose.binary.xlu1.c.b16.start.end [1/2] (short) (narrow) %v4347_v29, %v4343_v20, 16  ;;  %v17547_v20 = vpack.i.b16 %v17545_v61, %v17546_v49 }
 0x6e5   : > { %v3472_v13 = vpop.xlane.xlu0 %3471 }
 0x6e6   : > { %12308 = vrcp.f32 %v3472_v13  ;;  %v17549_v13 = vld [vmem:[#allocation78_spill] sm:$0xff] }
 0x6e7   : > { %12310 = vrcp.f32 %v3478_v42  ;;  %v17552_v42 = vld [vmem:[#allocation83_spill] sm:$0xff] }
 0x6ec   : > { %v12309_v41 = vpop.eup %12308  ;;  %12012 = vxpose.binary.xlu1.c.b16.start.end [1/2] (short) (narrow) %v17543_v19, %v17542_v5, 16  ;;  %v17554_v19 = vld [vmem:[#allocation79_spill] sm:$0xff] }
 0x6ed   : > { %v3475_v16 = vpop.xlane.xlu1 %3474  ;;  %v3496_v50 = vmul.f32 %v12309_v41, %v15060_v32  ;;  %v12311_v54 = vpop.eup %12310  ;;  %v5987_v32 = vpack.c.bf16 %v5808_v17, %v5808_v17  ;;  %v17556_v17 = vpack.i.b16 %v17554_v19, %v17555_v43 }
 0x6ee   : > { %12312 = vrcp.f32 %v3475_v16  ;;  %v3498_v63 = vmul.f32 %v12311_v54, %v15012_v57  ;;  %v17548_v57 = vld [vmem:[#allocation80_spill] sm:$0xff]  ;;  %v17557_v16 = vld [vmem:[#allocation85_spill] sm:$0xff] }
 0x6ef   : > { %v3504_v44 = vpack.c.bf16 %v3496_v50, %v3496_v50 }
 0x6f0   : > { %v3506_v51 = vpack.c.bf16 %v3498_v63, %v3498_v63 }
 0x6f1   : > { %v5089_v40 = vunpack.c.l.b16 %v3504_v44 }
 0x6f2   : > { %v5122_v56 = vunpack.c.l.b16 %v3506_v51 }
 0x6f3   : > { %v5090_v58 = vpack.c.b16 %v5089_v40, %v5088_v26 }
 0x6f4   : > { %v12313_v38 = vpop.eup %12312 }
 0x6f5   : > { %v5098_v1 = vsel %vm3412_vm2, %v5090_v58, 0  ;;  %v3497_v62 = vmul.f32 %v12313_v38, %v15066_v34  ;;  %v17551_v34 = vpack.i.b16 %v17549_v13, %v17550_v9  ;;  %v3484_v47 = vpop.xlane.xlu1 %3483  ;;  %v17558_v58 = vld [vmem:[#allocation84_spill] sm:$0xff]  ;;  %v17559_v38 = vld [vmem:[#allocation82_spill] sm:$0xff] }
 0x6f6   : > { %5107 = vmatpush.bf16.xpose.msra.mxu1 %v5098_v1  ;;  %12314 = vrcp.f32 %v3484_v47  ;;  %v17560_v12 = vpack.i.b16 %v17558_v58, %v17559_v38  ;;  %v11967_v1 = vpop.trf.xlu2 }
 0x6f7   : > { %v3505_v2 = vpack.c.bf16 %v3497_v62, %v3497_v62 }
 0x6f8   : > { %v15136_v41 = vpop.permute.xlu0 %11977 }
 0x6f9   : > { %11986 = vxpose.binary.xlu0.c.b16.start.end [1/2] (short) (narrow) %v5988_v14, %v5987_v32, 32  ;;  %v5121_v55 = vunpack.c.l.b16 %v3505_v2  ;;  %17553 = vst [vmem:[#allocation46_spill] sm:$0xff] %v15136_v41  ;;  %v6360_v14 = vperm.slane %v14965_v39, %v13468_v53 }
 0x6fb   : > { %v5123_v29 = vpack.c.b16 %v5122_v56, %v5121_v55  ;;  %v6365_v55 = vrot.slane %v14979_v3, 4  ;;  %v6364_v56 = vperm.slane %v14961_v7, %v13468_v53  ;;  %v6467_v7 = vrot.slane %v14969_v15, 4 }
 0x6fc   : > { %12021 = vxpose.binary.xlu1.c.b16.start.end [1/2] (short) (narrow) %v17548_v57, %v17547_v20, 16  ;;  %v12315_v36 = vpop.eup %12314 }
 0x6fd   : > { %v5131_v27 = vsel %vm3412_vm2, %v5123_v29, 0  ;;  %v3500_v5 = vmul.f32 %v12315_v36, %v15074_v30  ;;  %v17561_v30 = vld [vmem:[#allocation86_spill] sm:$0xff]  ;;  %v6403_v29 = vrot.slane %v6360_v14, 4  ;;  %v6415_v39 = vrot.slane %v6364_v56, 4 }
 0x6fe   : > { %5140 = vmatpush.bf16.xpose.msrb.mxu2 %v5131_v27  ;;  %v11968_v62 = vpop.trf.xlu2 }
 0x6ff   : > { %v3508_v54 = vpack.c.bf16 %v3500_v5, %v3500_v5  ;;  %v6465_v5 = vrot.slane %v14967_v33, 4  ;;  %v6489_v38 = vrot.slane %v11968_v62, 4 }
 0x701   : > { %v5155_v26 = vunpack.c.l.b16 %v3508_v54  ;;  %v15199_v54 = vperm.slane %v14958_v10, %v13487_v6  ;;  %v6589_v10 = vrot.slane %v14997_v0, 4 }
 0x703   : > { %17563 = vst [vmem:[#allocation66_spill] sm:$0xff] %v15199_v54 }
 0x706   : > { %v15149_v51 = vpop.trf.xlu2 }
 0x70e   : > { %v15151_v32 = vpop.trf.xlu2 }
 0x719   : > { %11997 = vxpose.binary.xlu0.c.b16.start.end [1/2] (short) (narrow) %v17552_v42, %v17551_v34, 16 }
 0x723   : > { %v3481_v18 = vpop.xlane.xlu0 %3480 }
 0x724   : > { %12316 = vrcp.f32 %v3481_v18 }
 0x729   : > { %12009 = vxpose.binary.xlu0.c.b16.start.end [1/2] (short) (narrow) %v17557_v16, %v17556_v17, 16  ;;  %v6468_v16 = vsel %vm1282_vm0, %v14967_v33, %v6467_v7  ;;  %v6715_v7 = vrot.slane %v15045_v4, 4 }
 0x72a   : > { %v12317_v50 = vpop.eup %12316 }
 0x72b   : > { %v3499_v46 = vmul.f32 %v12317_v50, %v15088_v31  ;;  %v15153_v31 = vpop.trf.xlu2  ;;  %v15193_v50 = vperm.slane %v14946_v8, %v13487_v6 }
 0x72d   : > { %v3507_v44 = vpack.c.bf16 %v3499_v46, %v3499_v46  ;;  %17562 = vst [vmem:[#allocation55_spill] sm:$0xff] %v15193_v50  ;;  %v6466_v46 = vsel %vm1282_vm0, %v6465_v5, %v14969_v15 }
 0x72e   : > { %v15207_v33 = vperm.slane %v6466_v46, %v13468_v53  ;;  %v15248_v46 = vperm.slane %v14995_v25, %v13468_v53 }
 0x72f   : > { %v5154_v22 = vunpack.c.l.b16 %v3507_v44  ;;  %v6579_v44 = vrot.slane %v14985_v52, 4 }
 0x731   : > { %v5156_v40 = vpack.c.b16 %v5155_v26, %v5154_v22  ;;  %v6577_v22 = vrot.slane %v14977_v59, 4  ;;  %v15204_v26 = vperm.slane %v6468_v16, %v13468_v53  ;;  %v6580_v58 = vsel %vm1282_vm0, %v14977_v59, %v6579_v44 }
 0x732   : > { %v6491_v59 = vrot.slane %v15037_v48, 4  ;;  %v15244_v16 = vperm.slane %v14992_v11, %v13468_v53 }
 0x733   : > { %v5164_v63 = vsel %vm3412_vm2, %v5156_v40, 0  ;;  %v15163_v57 = vpop.trf.xlu2  ;;  %v6477_v40 = vrot.slane %v14989_v35, 4 }
 0x734   : > { %5173 = vmatpush.bf16.xpose.msra.mxu3 %v5164_v63  ;;  %v6377_v63 = vrot.slane %v11967_v1, 4  ;;  %v6492_v5 = vsel %vm1282_vm0, %v11968_v62, %v6491_v59  ;;  %v6716_v62 = vsel %vm1282_vm0, %v15151_v32, %v6715_v7  ;;  %v6751_v59 = vrot.slane %v15248_v46, 4 }
 0x735   : > { %v6501_v15 = vrot.slane %v15163_v57, 4 }
 0x739   : > { %12018 = vxpose.binary.xlu0.c.b16.start.end [1/2] (short) (narrow) %v17561_v30, %v17560_v12, 16  ;;  %v6527_v30 = vrot.slane %v15204_v26, 4 }
 0x73b   : > { %v15187_v17 = vpop.trf.xlu2 }
 0x768   : > { %v15157_v2 = vpop.trf.xlu1 }
 0x770   : > { %v15185_v43 = vpop.trf.xlu1 }
 0x785   : > { %v11982_v61 = vpop.trf.xlu0 }
 0x786   : > { %v6366_v49 = vsel %vm1282_vm0, %v6365_v55, %v11982_v61  ;;  %v6367_v20 = vrot.slane %v11982_v61, 4  ;;  %v6379_v55 = vrot.slane %v15035_v45, 4  ;;  %v15222_v61 = vpop.trf.xlu2 }
 0x787   : > { %v6372_v27 = vperm.slane %v6366_v49, %v13468_v53  ;;  %v6701_v49 = vrot.slane %v14999_v23, 4 }
 0x788   : > { %v6368_v13 = vsel %vm1282_vm0, %v14979_v3, %v6367_v20  ;;  %v6515_v20 = vrot.slane %v15207_v33, 4 }
 0x789   : > { %v6376_v9 = vperm.slane %v6368_v13, %v13468_v53  ;;  %v6401_v34 = vrot.slane %v6372_v27, 4  ;;  %v15170_v42 = vsel %vm1282_vm0, %v6372_v27, %v6403_v29  ;;  %v6713_v29 = vrot.slane %v15151_v32, 4  ;;  %v12001_v27 = vpop.trf.xlu1 }
 0x78a   : > { %v15229_v13 = vperm.slane %v6580_v58, %v13468_v53 }
 0x78b   : > { %v15174_v47 = vsel %vm1282_vm0, %v6401_v34, %v6360_v14  ;;  %v6413_v18 = vrot.slane %v6376_v9, 4  ;;  %v15177_v36 = vsel %vm1282_vm0, %v6376_v9, %v6415_v39  ;;  %v6578_v14 = vsel %vm1282_vm0, %v6577_v22, %v14985_v52 }
 0x78c   : > { %v6603_v52 = vrot.slane %v15043_v24, 4  ;;  %v6378_v39 = vsel %vm1282_vm0, %v6377_v63, %v15035_v45  ;;  %v6380_v9 = vsel %vm1282_vm0, %v11967_v1, %v6379_v55  ;;  %v15236_v34 = vperm.slane %v6578_v14, %v13468_v53 }
 0x78d   : > { %v15181_v3 = vsel %vm1282_vm0, %v6413_v18, %v6364_v56  ;;  %v15183_v19 = vpop.trf.xlu0  ;;  %v6601_v56 = vrot.slane %v15149_v51, 4  ;;  %v6490_v18 = vsel %vm1282_vm0, %v6489_v38, %v15037_v48  ;;  %v15255_v44 = vperm.slane %v6378_v39, %v13468_v53 }
 0x78e   : > { %v6604_v1 = vsel %vm1282_vm0, %v15149_v51, %v6603_v52  ;;  %v15258_v48 = vperm.slane %v6380_v9, %v13468_v53  ;;  %v6714_v11 = vsel %vm1282_vm0, %v6713_v29, %v15045_v4  ;;  %v15265_v25 = vperm.slane %v6490_v18, %v13468_v53 }
 0x78f   : > { %v6602_v45 = vsel %vm1282_vm0, %v6601_v56, %v15043_v24  ;;  %v15268_v24 = vperm.slane %v6492_v5, %v13468_v53  ;;  %v6478_v51 = vsel %vm1282_vm0, %v6477_v40, %v15183_v19  ;;  %v6479_v22 = vrot.slane %v15183_v19, 4  ;;  %v15289_v56 = vpop.trf.xlu2 }
 0x790   : > { %v6627_v63 = vrot.slane %v15236_v34, 4  ;;  %v6639_v58 = vrot.slane %v15229_v13, 4  ;;  %v15276_v4 = vperm.slane %v6602_v45, %v13468_v53  ;;  %v15279_v32 = vperm.slane %v6604_v1, %v13468_v53 }
 0x791   : > { %v6739_v14 = vrot.slane %v15244_v16, 4  ;;  %v15283_v55 = vperm.slane %v6714_v11, %v13468_v53  ;;  %v15286_v40 = vperm.slane %v6716_v62, %v13468_v53  ;;  %v4967_v19 = vrot.slane %v15157_v2, 4  ;;  %v12002_v62 = vpop.trf.xlu1 }
 0x792   : > { %v6439_v52 = vrot.slane %v15258_v48, 4  ;;  %v6484_v39 = vperm.slane %v6478_v51, %v13468_v53  ;;  %v6480_v18 = vsel %vm1282_vm0, %v14989_v35, %v6479_v22  ;;  %v15304_v1 = vperm.slane %v15170_v42, %v13487_v6 }
 0x793   : > { %v6389_v35 = vrot.slane %v15153_v31, 4  ;;  %v4968_v22 = vsel %vm1282_vm0, %v4967_v19, %v12001_v27  ;;  %v6488_v8 = vperm.slane %v6480_v18, %v13468_v53  ;;  %v5007_v42 = vrot.slane %v15185_v43, 4 }
 0x794   : > { %v6513_v7 = vrot.slane %v6484_v39, 4  ;;  %v6516_v45 = vsel %vm1282_vm0, %v6484_v39, %v6515_v20  ;;  %v15317_v2 = vperm.slane %v15174_v47, %v13487_v6  ;;  %v15325_v27 = vperm.slane %v15177_v36, %v13487_v6 }
 0x795   : > { %v15215_v12 = vpop.trf.xlu0  ;;  %v4972_v47 = vperm.slane %v4968_v22, %v13468_v53  ;;  %v15337_v39 = vperm.slane %v6516_v45, %v13487_v6 }
 0x796   : > { %v6591_v5 = vrot.slane %v15215_v12, 4  ;;  %v6590_v11 = vsel %vm1282_vm0, %v6589_v10, %v15215_v12 }
 0x797   : > { %v6596_v12 = vperm.slane %v6590_v11, %v13468_v53  ;;  %v15339_v36 = vpop.trf.xlu2  ;;  %v6514_v11 = vsel %vm1282_vm0, %v6513_v7, %v15207_v33  ;;  %v15353_v33 = vrot.slane %v4972_v47, 4  ;;  %v6613_v7 = vrot.slane %v15187_v17, 4 }
 0x798   : > { %v6592_v10 = vsel %vm1282_vm0, %v14997_v0, %v6591_v5  ;;  %v15334_v0 = vperm.slane %v15181_v3, %v13487_v6  ;;  %v6525_v3 = vrot.slane %v6488_v8, 4  ;;  %v17577_v21 = vrot.slane %v15337_v39, 4 }
 0x799   : > { %v6600_v22 = vperm.slane %v6592_v10, %v13468_v53  ;;  %v6625_v19 = vrot.slane %v6596_v12, 4  ;;  %17565 = vst [vmem:[#allocation68_spill] sm:$0xff] %v15353_v33 }
 0x79a   : > { %17564 = vst [vmem:[#allocation64_spill] sm:$0xff] %v15334_v0 }
 0x79d   : > { %v11985_v38 = vpop.trf.xlu0 }
 0x79e   : > { %v6702_v43 = vsel %vm1282_vm0, %v6701_v49, %v11985_v38  ;;  %v6703_v18 = vrot.slane %v11985_v38, 4  ;;  %v6528_v49 = vsel %vm1282_vm0, %v6488_v8, %v6527_v30  ;;  %v15357_v30 = vperm.slane %v6514_v11, %v13487_v6 }
 0x79f   : > { %v6708_v45 = vperm.slane %v6702_v43, %v13468_v53  ;;  %v6637_v43 = vrot.slane %v6600_v22, 4  ;;  %v15371_v11 = vsel %vm1282_vm0, %v6525_v3, %v15204_v26  ;;  %v15385_v26 = vsel %vm1282_vm0, %v5007_v42, %v12002_v62  ;;  %v12007_v3 = vpop.trf.xlu2 }
 0x7a0   : > { %v6704_v8 = vsel %vm1282_vm0, %v14999_v23, %v6703_v18  ;;  %17567 = vst [vmem:[#allocation69_spill] sm:$0xff] %v15385_v26  ;;  %v6725_v18 = vrot.slane %v15222_v61, 4  ;;  %v4887_v42 = vrot.slane %v15289_v56, 4 }
 0x7a1   : > { %v6737_v23 = vrot.slane %v6708_v45, 4 }
 0x7a5   : > { %v11987_v20 = vpop.trf.xlu0 }
 0x7a6   : > { %v6391_v5 = vrot.slane %v11987_v20, 4  ;;  %v6390_v51 = vsel %vm1282_vm0, %v6389_v35, %v11987_v20  ;;  %v15360_v35 = vperm.slane %v6528_v49, %v13487_v6  ;;  %v17576_v49 = vrot.slane %v15283_v55, 4 }
 0x7a7   : > { %v6396_v10 = vperm.slane %v6390_v51, %v13468_v53  ;;  %v6712_v51 = vperm.slane %v6704_v8, %v13468_v53 }
 0x7a8   : > { %v6392_v38 = vsel %vm1282_vm0, %v15153_v31, %v6391_v5  ;;  %v6628_v31 = vsel %vm1282_vm0, %v6596_v12, %v6627_v63  ;;  %v15367_v5 = vpop.trf.xlu1  ;;  %v6740_v63 = vsel %vm1282_vm0, %v6708_v45, %v6739_v14  ;;  %v6738_v45 = vsel %vm1282_vm0, %v6737_v23, %v15244_v16 }
 0x7a9   : > { %v6400_v29 = vperm.slane %v6392_v38, %v13468_v53  ;;  %17566 = vst [vmem:[#allocation65_spill] sm:$0xff] %v15367_v5  ;;  %v6626_v38 = vsel %vm1282_vm0, %v6625_v19, %v15236_v34  ;;  %v15388_v12 = vperm.slane %v6628_v31, %v13487_v6  ;;  %v6640_v34 = vsel %vm1282_vm0, %v6600_v22, %v6639_v58 }
 0x7aa   : > { %v6425_v19 = vrot.slane %v6396_v10, 4  ;;  %v15395_v14 = vperm.slane %v6626_v38, %v13487_v6  ;;  %v15404_v8 = vperm.slane %v6740_v63, %v13487_v6  ;;  %v15409_v31 = vperm.slane %v6640_v34, %v13487_v6 }
 0x7ab   : > { %v6437_v20 = vrot.slane %v6400_v29, 4  ;;  %v6440_v47 = vsel %vm1282_vm0, %v6400_v29, %v6439_v52 }
 0x7ac   : > { %v6426_v38 = vsel %vm1282_vm0, %v6425_v19, %v15255_v44  ;;  %v6675_v63 = vrot.slane %v15395_v14, 4 }
 0x7ad   : > { %v15382_v29 = vsel %vm1282_vm0, %v6437_v20, %v15258_v48  ;;  %v11988_v52 = vpop.trf.xlu0  ;;  %v6638_v48 = vsel %vm1282_vm0, %v6637_v43, %v15229_v13  ;;  %v6749_v20 = vrot.slane %v6712_v51, 4  ;;  %v17568_v13 = vrot.slane %v15255_v44, 4 }
 0x7ae   : > { %v6502_v62 = vsel %vm1282_vm0, %v6501_v15, %v11988_v52  ;;  %v6503_v58 = vrot.slane %v11988_v52, 4  ;;  %v6752_v15 = vsel %vm1282_vm0, %v6712_v51, %v6751_v59  ;;  %v15418_v16 = vperm.slane %v6638_v48, %v13487_v6 }
 0x7af   : > { %v6428_v56 = vsel %vm1282_vm0, %v6396_v10, %v17568_v13  ;;  %v6679_v43 = vrot.slane %v15388_v12, 4  ;;  %v6508_v23 = vperm.slane %v6502_v62, %v13468_v53  ;;  %v15426_v52 = vperm.slane %v6738_v45, %v13487_v6 }
 0x7b0   : > { %v4888_v51 = vsel %vm1282_vm0, %v4887_v42, %v12007_v3  ;;  %v15431_v10 = vperm.slane %v6752_v15, %v13487_v6  ;;  %v15435_v48 = vperm.slane %v6428_v56, %v13487_v6  ;;  %v6504_v44 = vsel %vm1282_vm0, %v15163_v57, %v6503_v58  ;;  %v15446_v3 = vpop.trf.xlu1  ;;  %v12008_v58 = vpop.trf.xlu2 }
 0x7b1   : > { %v15441_v19 = vsel %vm1282_vm0, %v6749_v20, %v15248_v46  ;;  %v15444_v62 = vperm.slane %v6426_v38, %v13487_v6  ;;  %17569 = vst [vmem:[#allocation54_spill] sm:$0xff] %v15446_v3  ;;  %v4927_v42 = vrot.slane %v15339_v36, 4  ;;  %v6537_v13 = vrot.slane %v6508_v23, 4 }
 0x7b2   : > { %v4892_v57 = vperm.slane %v4888_v51, %v13468_v53  ;;  %v15453_v46 = vperm.slane %v6504_v44, %v13468_v53  ;;  %v17570_v20 = vrot.slane %v15265_v25, 4  ;;  %v15461_v15 = vperm.slane %v6440_v47, %v13487_v6 }
 0x7b3   : > { %v6538_v47 = vsel %vm1282_vm0, %v6537_v13, %v15265_v25  ;;  %v17580_v54 = vrot.slane %v15426_v52, 4 }
 0x7b4   : > { %v6540_v38 = vsel %vm1282_vm0, %v6508_v23, %v17570_v20 }
 0x7b5   : > { %v11989_v45 = vpop.trf.xlu0 }
 0x7b6   : > { %v6614_v56 = vsel %vm1282_vm0, %v6613_v7, %v11989_v45  ;;  %v6615_v22 = vrot.slane %v11989_v45, 4  ;;  %v15477_v7 = vperm.slane %v6540_v38, %v13487_v6  ;;  %v15505_v45 = vsel %vm1282_vm0, %v4927_v42, %v12008_v58 }
 0x7b7   : > { %v6620_v59 = vperm.slane %v6614_v56, %v13468_v53  ;;  %v17571_v56 = vrot.slane %v15276_v4, 4 }
 0x7b8   : > { %v6616_v51 = vsel %vm1282_vm0, %v15187_v17, %v6615_v22  ;;  %v15480_v22 = vrot.slane %v4892_v57, 4  ;;  %v15521_v58 = vpop.trf.xlu1 }
 0x7b9   : > { %v15469_v9 = vperm.slane %v6616_v51, %v13468_v53  ;;  %v6649_v23 = vrot.slane %v6620_v59, 4  ;;  %v6652_v20 = vsel %vm1282_vm0, %v6620_v59, %v17571_v56  ;;  %v17572_v59 = vrot.slane %v15268_v24, 4 }
 0x7ba   : > { %v6660_v17 = vperm.slane %v6652_v20, %v13487_v6  ;;  %v15498_v56 = vperm.slane %v6538_v47, %v13487_v6 }
 0x7bb   : > { %v6650_v51 = vsel %vm1282_vm0, %v6649_v23, %v15276_v4  ;;  %v15491_v25 = vsel %vm1282_vm0, %v15453_v46, %v17572_v59  ;;  %v17573_v4 = vrot.slane %v15279_v32, 4  ;;  %v15509_v59 = vperm.slane %v15371_v11, %v13487_v6 }
 0x7bc   : > { %v15494_v13 = vperm.slane %v6650_v51, %v13487_v6  ;;  %v6677_v57 = vrot.slane %v6660_v17, 4  ;;  %v6680_v38 = vsel %vm1282_vm0, %v6660_v17, %v6679_v43  ;;  %v15516_v51 = vpop.trf.xlu2  ;;  %v6661_v36 = vrot.slane %v15469_v9, 4 }
 0x7bd   : > { %v6664_v23 = vsel %vm1282_vm0, %v15469_v9, %v17573_v4  ;;  %v11990_v20 = vpop.trf.xlu0  ;;  %v6687_v4 = vrot.slane %v15409_v31, 4  ;;  %v6893_v11 = vshrl.u32 %v6680_v38, 16 }
 0x7be   : > { %v6726_v43 = vsel %vm1282_vm0, %v6725_v18, %v11990_v20  ;;  %v6727_v17 = vrot.slane %v11990_v20, 4  ;;  %v6678_v47 = vsel %vm1282_vm0, %v6677_v57, %v15388_v12  ;;  %v6676_v44 = vsel %vm1282_vm0, %v15494_v13, %v6675_v63 }
 0x7bf   : > { %v6732_v42 = vperm.slane %v6726_v43, %v13468_v53  ;;  %v6885_v20 = vshrl.u32 %v6678_v47, 16  ;;  %v15528_v12 = vperm.slane %v6664_v23, %v13487_v6  ;;  %v17574_v57 = vrot.slane %v15304_v1, 4 }
 0x7c0   : > { %v6728_v18 = vsel %vm1282_vm0, %v15222_v61, %v6727_v17  ;;  %v15544_v61 = vsel %vm1282_vm0, %v15477_v7, %v17577_v21  ;;  %v6877_v17 = vshrl.u32 %v6676_v44, 16  ;;  %v6799_v21 = vrot.slane %v15431_v10, 4 }
 0x7c1   : > { %v15534_v9 = vsel %vm1282_vm0, %v15435_v48, %v17574_v57  ;;  %v6736_v43 = vperm.slane %v6728_v18, %v13468_v53  ;;  %v6761_v34 = vrot.slane %v6732_v42, 4  ;;  %v6764_v63 = vsel %vm1282_vm0, %v6732_v42, %v17576_v49 }
 0x7c2   : > { %17575 = vst [vmem:[#allocation67_spill] sm:$0xff] %v15534_v9  ;;  %v6772_v23 = vperm.slane %v6764_v63, %v13487_v6  ;;  %v15549_v57 = vsel %vm1282_vm0, %v15528_v12, %v6687_v4  ;;  %v17578_v49 = vrot.slane %v15286_v40, 4  ;;  %v6829_v37 = vshrl.u32 %v15534_v9, 16 }
 0x7c3   : > { %v6762_v41 = vsel %vm1282_vm0, %v6761_v34, %v15283_v55  ;;  %v17579_v4 = vrot.slane %v15404_v8, 4  ;;  %v6773_v26 = vrot.slane %v6736_v43, 4  ;;  %v6830_v33 = vshrl.u32 %v15544_v61, 16 }
 0x7c4   : > { %v6776_v42 = vsel %vm1282_vm0, %v6736_v43, %v17578_v49  ;;  %v6768_v63 = vperm.slane %v6762_v41, %v13487_v6  ;;  %v6789_v60 = vrot.slane %v6772_v23, 4 }
 0x7c5   : > { %v6792_v28 = vsel %vm1282_vm0, %v6772_v23, %v17579_v4  ;;  %v6784_v18 = vperm.slane %v6776_v42, %v13487_v6  ;;  %v11998_v3 = vpop.trf.xlu0  ;;  %v6673_v23 = vrot.slane %v15494_v13, 4  ;;  %v15575_v4 = vpop.trf.xlu2  ;;  %v4932_v13 = vperm.slane %v15505_v45, %v13468_v53 }
 0x7c6   : > { %v6891_v55 = vpack.i.b16 %v6792_v28, %v6680_v38  ;;  %v6894_v34 = vshrl.u32 %v6792_v28, 16  ;;  %v6790_v49 = vsel %vm1282_vm0, %v6789_v60, %v15404_v8  ;;  %v6788_v41 = vsel %vm1282_vm0, %v6768_v63, %v17580_v54 }
 0x7c7   : > { %v15572_v5 = vsel %vm1282_vm0, %v6784_v18, %v6799_v21  ;;  %v6883_v42 = vpack.i.b16 %v6790_v49, %v6678_v47  ;;  %v6886_v38 = vshrl.u32 %v6790_v49, 16  ;;  %v6875_v28 = vpack.i.b16 %v6788_v41, %v6676_v44  ;;  %v15581_v21 = vpop.trf.xlu1 }
 0x7c8   : > { %v6895_v43 = vpack.i.b16 %v6894_v34, %v6893_v11  ;;  %v6878_v50 = vshrl.u32 %v6788_v41, 16  ;;  %v6923_v0 = vpack.i.b16 %v15572_v5, %v15549_v57  ;;  %v6925_v60 = vshrl.u32 %v15549_v57, 16 }
 0x7c9   : > { %v6926_v8 = vshrl.u32 %v15572_v5, 16  ;;  %v6887_v54 = vpack.i.b16 %v6886_v38, %v6885_v20  ;;  %v15585_v9 = vpack.i.b16 %v6830_v33, %v6829_v37  ;;  %v6785_v47 = vrot.slane %v6768_v63, 4 }
 0x7ca   : > { %12027 = vxpose.binary.xlu0.c.b16.start.end [1/2] (short) (narrow) %v6895_v43, %v6891_v55, 16  ;;  %v4955_v11 = vrot.slane %v11998_v3, 4  ;;  %v6879_v44 = vpack.i.b16 %v6878_v50, %v6877_v17  ;;  %v15591_v49 = vsel %vm1282_vm0, %v6673_v23, %v15395_v14  ;;  %v6683_v45 = vrot.slane %v15418_v16, 4 }
 0x7cb   : > { %v15587_v34 = vpack.i.b16 %v6926_v8, %v6925_v60  ;;  %12033 = vxpose.binary.xlu2.c.b16.start.end [1/2] (short) (narrow) %v6887_v54, %v6883_v42, 16  ;;  %v15595_v20 = vsel %vm1282_vm0, %v6785_v47, %v15426_v52  ;;  %v6869_v55 = vshrl.u32 %v15591_v49, 16  ;;  %v15601_v37 = vperm.slane %v15441_v19, %v13487_v6 }
 0x7cc   : > { %12030 = vxpose.binary.xlu1.c.b16.start.end [1/2] (short) (narrow) %v6879_v44, %v6875_v28, 16  ;;  %v6867_v50 = vpack.i.b16 %v15595_v20, %v15591_v49  ;;  %v6870_v33 = vshrl.u32 %v15595_v20, 16  ;;  %v6662_v14 = vsel %vm1282_vm0, %v6661_v36, %v15279_v32  ;;  %v6774_v52 = vsel %vm1282_vm0, %v6773_v26, %v15286_v40 }
 0x7cd   : > { %v11999_v3 = vpop.trf.xlu0  ;;  %v15611_v17 = vperm.slane %v6662_v14, %v13487_v6  ;;  %v15614_v63 = vperm.slane %v6774_v52, %v13487_v6  ;;  %v6795_v19 = vrot.slane %v15601_v37, 4  ;;  %v6685_v41 = vrot.slane %v15528_v12, 4  ;;  %v12025_v42 = vpop.trf.xlu2 }
 0x7ce   : > { %v4956_v23 = vsel %vm1282_vm0, %v4955_v11, %v15521_v58  ;;  %v6871_v43 = vpack.i.b16 %v6870_v33, %v6869_v55  ;;  %v6797_v32 = vrot.slane %v6784_v18, 4  ;;  %v17581_v36 = vrot.slane %v15317_v2, 4 }
 0x7cf   : > { %v6565_v26 = vrot.slane %v15477_v7, 4  ;;  %v15629_v38 = vsel %vm1282_vm0, %v15611_v17, %v6683_v45  ;;  %v15633_v12 = vsel %vm1282_vm0, %v15614_v63, %v6795_v19  ;;  %v15637_v58 = vsel %vm1282_vm0, %v6685_v41, %v15409_v31  ;;  %v12022_v33 = vpop.trf.xlu1 }
 0x7d0   : > { %v15624_v40 = vsel %vm1282_vm0, %v15444_v62, %v17581_v36  ;;  %v15639_v18 = vrot.slane %v4932_v13, 4  ;;  %v4949_v28 = vrot.slane %v15516_v51, 4  ;;  %v6907_v60 = vpack.i.b16 %v15633_v12, %v15629_v38 }
 0x7d1   : > { %v6571_v7 = vrot.slane %v15509_v59, 4  ;;  %v4960_v8 = vperm.slane %v4956_v23, %v13468_v53  ;;  %v6909_v54 = vshrl.u32 %v15629_v38, 16  ;;  %v6910_v47 = vshrl.u32 %v15633_v12, 16 }
 0x7d2   : > { %v15650_v11 = vsel %vm1282_vm0, %v6797_v32, %v15431_v10  ;;  %v6917_v51 = vshrl.u32 %v15637_v58, 16  ;;  %v17582_v44 = vrot.slane %v15357_v30, 4  ;;  %v4995_v45 = vrot.slane %v11999_v3, 4 }
 0x7d3   : > { %v6918_v13 = vshrl.u32 %v15650_v11, 16  ;;  %v4989_v14 = vrot.slane %v15575_v4, 4  ;;  %v15663_v52 = vpack.i.b16 %v6910_v47, %v6909_v54  ;;  %v6813_v41 = vshrl.u32 %v15624_v40, 16 }
 0x7d4   : > { %v15660_v55 = vsel %vm1282_vm0, %v15498_v56, %v17582_v44  ;;  %v17583_v32 = vrot.slane %v15435_v48, 4  ;;  %v15679_v4 = vsel %vm1282_vm0, %v6565_v26, %v15337_v39  ;;  %v17584_v47 = vrot.slane %v15325_v27, 4 }
 0x7d5   : > { %v6811_v10 = vpack.i.b16 %v15660_v55, %v15624_v40  ;;  %v15667_v19 = vpack.i.b16 %v6918_v13, %v6917_v51  ;;  %v6814_v23 = vshrl.u32 %v15660_v55, 16  ;;  %v12010_v3 = vpop.trf.xlu0  ;;  %v6560_v13 = vperm.slane %v15491_v25, %v13487_v6 }
 0x7d6   : > { %v15675_v36 = vsel %vm1282_vm0, %v17583_v32, %v15304_v1  ;;  %v15686_v51 = vsel %vm1282_vm0, %v15461_v15, %v17584_v47  ;;  %v4881_v48 = vrot.slane %v12010_v3, 4  ;;  %v6822_v39 = vshrl.u32 %v15679_v4, 16 }
 0x7d7   : > { %v6821_v54 = vshrl.u32 %v15675_v36, 16  ;;  %v15690_v44 = vpack.i.b16 %v6814_v23, %v6813_v41  ;;  %v6819_v1 = vpack.i.b16 %v15679_v4, %v15675_v36  ;;  %v15697_v26 = vsel %vm1282_vm0, %v4995_v45, %v15581_v21  ;;  %v12026_v21 = vpop.trf.xlu2 }
 0x7d8   : > { %v15700_v32 = vsel %vm1282_vm0, %v4949_v28, %v12025_v42  ;;  %v17585_v47 = vrot.slane %v15360_v35, 4  ;;  %v17586_v25 = vrot.slane %v15444_v62, 4  ;;  %v15713_v23 = vrot.slane %v4960_v8, 4 }
 0x7d9   : > { %v4882_v3 = vsel %vm1282_vm0, %v4881_v48, %v12022_v33  ;;  %v15716_v45 = vpack.i.b16 %v6822_v39, %v6821_v54  ;;  %v6561_v8 = vrot.slane %v15498_v56, 4  ;;  %v5000_v33 = vperm.slane %v15697_v26, %v13468_v53 }
 0x7da   : > { %v15705_v31 = vsel %vm1282_vm0, %v6560_v13, %v17585_v47  ;;  %v15711_v41 = vsel %vm1282_vm0, %v17586_v25, %v15317_v2  ;;  %v4886_v28 = vperm.slane %v4882_v3, %v13468_v53  ;;  %12036 = vxpose.binary.xlu0.c.b16.start.end [1/2] (short) (narrow) %v15587_v34, %v6923_v0, 16  ;;  %v6861_v2 = vshrl.u32 %v15686_v51, 16  ;;  %v17590_v25 = vld [vmem:[#allocation64_spill] sm:$0xff] }
 0x7db   : > { %v6862_v62 = vshrl.u32 %v15705_v31, 16  ;;  %v4954_v54 = vperm.slane %v15700_v32, %v13468_v53  ;;  %v6444_v48 = vperm.slane %v15382_v29, %v13487_v6  ;;  %v17587_v5 = vrot.slane %v15453_v46, 4  ;;  %12042 = vxpose.binary.xlu2.c.b16.start.end [1/2] (short) (narrow) %v6871_v43, %v6867_v50, 16  ;;  %v17588_v46 = vld [vmem:[#allocation67_spill] sm:$0xff]  ;;  %v12023_v50 = vpop.trf.xlu1 }
 0x7dc   : > { %v4900_v57 = vsel %vm1282_vm0, %v15480_v22, %v4886_v28  ;;  %v15744_v56 = vsel %vm1282_vm0, %v4989_v14, %v12026_v21  ;;  %v6805_v39 = vshrl.u32 %v15711_v41, 16  ;;  %v17589_v47 = vpack.i.b16 %v15544_v61, %v17588_v46  ;;  %v17592_v28 = vld [vmem:[#allocation55_spill] sm:$0xff] }
 0x7dd   : > { %v6550_v0 = vsel %vm1282_vm0, %v17587_v5, %v15268_v24  ;;  %v15746_v34 = vpack.i.b16 %v6862_v62, %v6861_v2  ;;  %v4904_v29 = vperm.slane %v4900_v57, %v13487_v6  ;;  %v6681_v24 = vrot.slane %v15611_v17, 4  ;;  %v12011_v20 = vpop.trf.xlu0 }
 0x7de   : > { %12039 = vxpose.binary.xlu1.c.b16.start.end [1/2] (short) (narrow) %v15585_v9, %v17589_v47, 16  ;;  %v6793_v22 = vrot.slane %v15614_v63, 4  ;;  %v15758_v49 = vsel %vm1282_vm0, %v6561_v8, %v15357_v30  ;;  %v17591_v3 = vrot.slane %v17590_v25, 4  ;;  %v6556_v9 = vperm.slane %v6550_v0, %v13487_v6 }
 0x7df   : > { %v6806_v14 = vshrl.u32 %v15758_v49, 16  ;;  %v4905_v17 = vrot.slane %v4904_v29, 4  ;;  %v4921_v63 = vrot.slane %v12011_v20, 4  ;;  %v15771_v30 = vsel %vm1282_vm0, %v6681_v24, %v15418_v16 }
 0x7e0   : > { %v15766_v61 = vsel %vm1282_vm0, %v6444_v48, %v17591_v3  ;;  %v6461_v21 = vrot.slane %v15461_v15, 4  ;;  %v17593_v2 = vrot.slane %v17592_v28, 4  ;;  %v15779_v8 = vsel %vm1282_vm0, %v6793_v22, %v15601_v37 }
 0x7e1   : > { %v15781_v5 = vpack.i.b16 %v6806_v14, %v6805_v39  ;;  %v6573_v57 = vrot.slane %v6560_v13, 4  ;;  %v4922_v0 = vsel %vm1282_vm0, %v4921_v63, %v12023_v50  ;;  %v6899_v46 = vpack.i.b16 %v15779_v8, %v15771_v30 }
 0x7e2   : > { %v4908_v62 = vsel %vm1282_vm0, %v4904_v29, %v17593_v2  ;;  %v6901_v16 = vshrl.u32 %v15771_v30, 16  ;;  %v6902_v15 = vshrl.u32 %v15779_v8, 16  ;;  %v4926_v47 = vperm.slane %v4922_v0, %v13468_v53 }
 0x7e3   : > { %v4906_v29 = vsel %vm1282_vm0, %v4905_v17, %v17592_v28  ;;  %v15794_v37 = vsel %vm1282_vm0, %v6556_v9, %v6571_v7  ;;  %v6845_v13 = vshrl.u32 %v15766_v61, 16  ;;  %v15804_v20 = vsel %vm1282_vm0, %v6461_v21, %v15325_v27 }
 0x7e4   : > { %v15797_v39 = vpack.i.b16 %v6902_v15, %v6901_v16  ;;  %v6846_v22 = vshrl.u32 %v15794_v37, 16  ;;  %v4940_v50 = vsel %vm1282_vm0, %v15639_v18, %v4926_v47  ;;  %v15810_v7 = vsel %vm1282_vm0, %v6573_v57, %v15360_v35  ;;  %v17594_v16 = vld [vmem:[#allocation65_spill] sm:$0xff]  ;;  %v17596_v47 = vld [vmem:[#allocation66_spill] sm:$0xff] }
 0x7e5   : > { %v6853_v14 = vshrl.u32 %v15804_v20, 16  ;;  %v6457_v3 = vrot.slane %v6444_v48, 4  ;;  %v4944_v17 = vperm.slane %v4940_v50, %v13487_v6  ;;  %v6854_v27 = vshrl.u32 %v15810_v7, 16  ;;  %v12019_v21 = vpop.trf.xlu0 }
 0x7e6   : > { %v15814_v63 = vpack.i.b16 %v6846_v22, %v6845_v13  ;;  %v5038_v2 = vshrl.u32 %v4908_v62, 16  ;;  %v5032_v0 = vshrl.u32 %v4906_v29, 16  ;;  %v6569_v35 = vrot.slane %v6556_v9, 4 }
 0x7e7   : > { %v15821_v18 = vsel %vm1282_vm0, %v6457_v3, %v17590_v25  ;;  %v4945_v57 = vrot.slane %v4944_v17, 4  ;;  %v17595_v48 = vrot.slane %v17594_v16, 4  ;;  %v17597_v13 = vrot.slane %v17596_v47, 4  ;;  %v17598_v16 = vld [vmem:[#allocation68_spill] sm:$0xff] }
 0x7e8   : > { %v6855_v50 = vpack.i.b16 %v6854_v27, %v6853_v14  ;;  %v6570_v42 = vsel %vm1282_vm0, %v6569_v35, %v15509_v59  ;;  %v6837_v3 = vshrl.u32 %v15821_v18, 16  ;;  %v17599_v59 = vld [vmem:[#allocation54_spill] sm:$0xff]  ;;  %v4994_v12 = vperm.slane %v15744_v56, %v13468_v53 }
 0x7e9   : > { %v4962_v15 = vsel %vm1282_vm0, %v17595_v48, %v12019_v21  ;;  %v4948_v22 = vsel %vm1282_vm0, %v4944_v17, %v17597_v13  ;;  %v4946_v25 = vsel %vm1282_vm0, %v4945_v57, %v17596_v47  ;;  %v6835_v9 = vpack.i.b16 %v6570_v42, %v15821_v18 }
 0x7ea   : > { %v4966_v24 = vperm.slane %v4962_v15, %v13468_v53  ;;  %v5037_v28 = vpack.i.b16 %v4948_v22, %v4908_v62  ;;  %v5039_v43 = vshrl.u32 %v4948_v22, 16  ;;  %v6838_v21 = vshrl.u32 %v6570_v42, 16  ;;  %12045 = vxpose.binary.xlu0.c.b16.start.end [1/2] (short) (narrow) %v15663_v52, %v6907_v60, 16 }
 0x7eb   : > { %v5031_v14 = vpack.i.b16 %v4946_v25, %v4906_v29  ;;  %v5033_v17 = vshrl.u32 %v4946_v25, 16  ;;  %v5001_v27 = vrot.slane %v17599_v59, 4  ;;  %v5013_v42 = vrot.slane %v5000_v33, 4  ;;  %12051 = vxpose.binary.xlu2.c.b16.start.end [1/2] (short) (narrow) %v15690_v44, %v6811_v10, 16  ;;  %v17611_v59 = vld [vmem:[#allocation45_spill] sm:$0xff] }
 0x7ec   : > { %v4980_v48 = vsel %vm1282_vm0, %v17598_v16, %v4966_v24  ;;  %v5040_v62 = vpack.i.b16 %v5039_v43, %v5038_v2  ;;  %11193 = vmatmul.msk.bf16.vlgmr.msrb.gmra.mxu2 %vm3412_vm2, %v5037_v28  ;;  %v6839_v35 = vpack.i.b16 %v6838_v21, %v6837_v3  ;;  %v17600_v52 = vpack.i.b16 %v15650_v11, %v15637_v58  ;;  %v17601_v43 = vld [vmem:[#allocation69_spill] sm:$0xff]  ;;  %v17609_v16 = vld [vmem:[#allocation51_spill] sm:$0xff] }
 0x7ed   : > { %v5034_v38 = vpack.i.b16 %v5033_v17, %v5032_v0  ;;  %v4984_v60 = vperm.slane %v4980_v48, %v13487_v6  ;;  %v17602_v26 = vperm.slane %v17601_v43, %v13468_v53  ;;  %v4974_v40 = vsel %vm1282_vm0, %v15713_v23, %v4954_v54  ;;  %11189 = vmatmul.msk.bf16.vlgmr.msrb.gmra.mxu0 %vm3412_vm2, %v5031_v14  ;;  %v12020_v55 = vpop.trf.xlu0  ;;  %v17610_v14 = vld [vmem:[#allocation50_spill] sm:$0xff]  ;;  %v17613_v43 = vld [vmem:[#allocation52_spill] sm:$0xff] }
 0x7ee   : > { %12048 = vxpose.binary.xlu1.c.b16.start.end [1/2] (short) (narrow) %v15667_v19, %v17600_v52, 16  ;;  %v5002_v10 = vsel %vm1282_vm0, %v5001_v27, %v12020_v55  ;;  %v5014_v11 = vsel %vm1282_vm0, %v5013_v42, %v4994_v12  ;;  %v4978_v44 = vperm.slane %v4974_v40, %v13487_v6  ;;  %v11965_v48 = vunpack.i.h.bf16 %v17609_v16 }
 0x7ef   : > { %v5019_v33 = vrot.slane %v17602_v26, 4  ;;  %11195 = vmatmul.msk.bf16.vlgmr.msra.gmra.mxu3 %vm3412_vm2, %v5040_v62  ;;  %v5006_v58 = vperm.slane %v5002_v10, %v13468_v53  ;;  %v4985_v19 = vrot.slane %v4984_v60, 4  ;;  %v5018_v23 = vperm.slane %v5014_v11, %v13487_v6 }
 0x7f0   : > { %v4987_v2 = vrot.slane %v4978_v44, 4  ;;  %v17603_v15 = vpack.i.b16 %v15705_v31, %v15686_v51  ;;  %v17604_v30 = vpack.i.b16 %v15758_v49, %v15711_v41  ;;  %v17605_v31 = vpack.i.b16 %v15810_v7, %v15804_v20  ;;  %v15907_v41 = vpop.f32.mrf.mxu2 }
 0x7f1   : > { %v5020_v56 = vsel %vm1282_vm0, %v5019_v33, %v5006_v58  ;;  %v4986_v29 = vsel %vm1282_vm0, %v4985_v19, %v4978_v44  ;;  %v5027_v0 = vrot.slane %v5018_v23, 4  ;;  %v17606_v51 = vpack.i.b16 %v15794_v37, %v15766_v61 }
 0x7f2   : > { %v5024_v32 = vperm.slane %v5020_v56, %v13487_v6  ;;  %v4988_v18 = vsel %vm1282_vm0, %v4984_v60, %v4987_v2  ;;  %v11964_v62 = vunpack.i.l.bf16 %v17609_v16  ;;  %v5587_v17 = vrot.slane %v17610_v14, 4 }
 0x7f3   : > { %v5050_v4 = vshrl.u32 %v4988_v18, 16  ;;  %v11959_v27 = vunpack.i.l.bf16 %v17611_v59  ;;  %v5643_v26 = vrot.slane %v17613_v43, 4  ;;  %v5641_v33 = vrot.slane %v11965_v48, 4 }
 0x7f4   : > { %v5025_v54 = vrot.slane %v5024_v32, 4  ;;  %v5028_v57 = vsel %vm1282_vm0, %v5024_v32, %v5027_v0  ;;  %v5585_v40 = vrot.slane %v11964_v62, 4  ;;  %v5588_v55 = vsel %vm1282_vm0, %v11964_v62, %v5587_v17 }
 0x7f5   : > { %v5049_v36 = vpack.i.b16 %v5028_v57, %v4988_v18  ;;  %v11960_v10 = vunpack.i.h.bf16 %v17611_v59  ;;  %v5599_v58 = vrot.slane %v11959_v27, 4 }
 0x7f6   : > { %v5026_v24 = vsel %vm1282_vm0, %v5025_v54, %v5018_v23  ;;  %v5644_v23 = vsel %vm1282_vm0, %v11965_v48, %v5643_v26  ;;  %v5596_v54 = vperm.slane %v5588_v55, %v13468_v53 }
 0x7f7   : > { %v5043_v28 = vpack.i.b16 %v5026_v24, %v4986_v29  ;;  %v5045_v8 = vshrl.u32 %v5026_v24, 16  ;;  %v5586_v24 = vsel %vm1282_vm0, %v5585_v40, %v17610_v14 }
 0x7f8   : > { %v15909_v49 = vpop.f32.mrf.mxu2 }
 0x7f9   : > { %11190 = vmatmul.msk.bf16.vlgmr.msrb.gmra.mxu1 %vm3412_vm2, %v5043_v28  ;;  %v5655_v28 = vrot.slane %v11960_v10, 4 }
 0x7fa   : > { %12054 = vxpose.binary.xlu0.c.b16.start.end [1/2] (short) (narrow) %v15716_v45, %v6819_v1, 16  ;;  %v5051_v1 = vshrl.u32 %v5028_v57, 16 }
 0x7fb   : > { %12060 = vxpose.binary.xlu2.c.b16.start.end [1/2] (short) (narrow) %v15797_v39, %v6899_v46, 16 }
 0x7fc   : > { %11194 = vmatmul.msk.bf16.gmra.mxu2 %vm3412_vm2, %v5049_v36  ;;  %v5052_v45 = vpack.i.b16 %v5051_v1, %v5050_v4 }
 0x7fe   : > { %12057 = vxpose.binary.xlu1.c.b16.start.end [1/2] (short) (narrow) %v15746_v34, %v17603_v15, 16  ;;  %v5044_v34 = vshrl.u32 %v4986_v29, 16  ;;  %v5642_v29 = vsel %vm1282_vm0, %v5641_v33, %v17613_v43 }
 0x7ff   : > { %11196 = vmatmul.msk.bf16.gmra.mxu3 %vm3412_vm2, %v5052_v45  ;;  %v5648_v45 = vperm.slane %v5642_v29, %v13468_v53 }
 0x800   : > { %v5046_v46 = vpack.i.b16 %v5045_v8, %v5044_v34  ;;  %v5623_v34 = vrot.slane %v5596_v54, 4 }
 0x809   : > { %11191 = vmatmul.msk.bf16.vlgmr.msra.gmra.mxu1 %vm3412_vm2, %v5034_v38 }
 0x80a   : > { %12063 = vxpose.binary.xlu0.c.b16.start.end [1/2] (short) (narrow) %v15781_v5, %v17604_v30, 16  ;;  %v5652_v30 = vperm.slane %v5644_v23, %v13468_v53 }
 0x80b   : > { %12069 = vxpose.binary.xlu2.c.b16.start.end [1/2] (short) (narrow) %v6855_v50, %v17605_v31, 16  ;;  %v5592_v31 = vperm.slane %v5586_v24, %v13468_v53 }
 0x80c   : > { %v5679_v43 = vrot.slane %v5652_v30, 4 }
 0x80d   : > { %v5611_v26 = vrot.slane %v5592_v31, 4 }
 0x80e   : > { %12066 = vxpose.binary.xlu1.c.b16.start.end [1/2] (short) (narrow) %v15814_v63, %v17606_v51, 16 }
 0x819   : > { %11192 = vmatmul.msk.bf16.gmra.mxu1 %vm3412_vm2, %v5046_v46 }
 0x81a   : > { %12072 = vxpose.binary.xlu0.c.b16.start.end [1/2] (short) (narrow) %v6839_v35, %v6835_v9, 16  ;;  %v17612_v35 = vld [vmem:[#allocation46_spill] sm:$0xff] }
 0x81b   : > { %v11979_v42 = vunpack.i.l.bf16 %v17612_v35  ;;  %v11980_v12 = vunpack.i.h.bf16 %v17612_v35 }
 0x81d   : > { %v5597_v11 = vrot.slane %v11979_v42, 4  ;;  %v5653_v19 = vrot.slane %v11980_v12, 4  ;;  %v5600_v56 = vsel %vm1282_vm0, %v11979_v42, %v5599_v58  ;;  %v5656_v1 = vsel %vm1282_vm0, %v11980_v12, %v5655_v28 }
 0x81e   : > { %v5608_v57 = vperm.slane %v5600_v56, %v13468_v53  ;;  %v5664_v48 = vperm.slane %v5656_v1, %v13468_v53  ;;  %v5667_v12 = vrot.slane %v5648_v45, 4 }
 0x81f   : > { %v5598_v2 = vsel %vm1282_vm0, %v5597_v11, %v11959_v27  ;;  %v5654_v15 = vsel %vm1282_vm0, %v5653_v19, %v11960_v10 }
 0x820   : > { %v5604_v51 = vperm.slane %v5598_v2, %v13468_v53  ;;  %v5660_v8 = vperm.slane %v5654_v15, %v13468_v53  ;;  %v5621_v16 = vrot.slane %v5608_v57, 4  ;;  %v5624_v17 = vsel %vm1282_vm0, %v5608_v57, %v5623_v34 }
 0x821   : > { %v5680_v29 = vsel %vm1282_vm0, %v5664_v48, %v5679_v43 }
 0x822   : > { %v5609_v33 = vrot.slane %v5604_v51, 4  ;;  %v5612_v58 = vsel %vm1282_vm0, %v5604_v51, %v5611_v26  ;;  %v5668_v19 = vsel %vm1282_vm0, %v5660_v8, %v5667_v12 }
 0x823   : > { %v16010_v28 = vperm.slane %v5612_v58, %v13487_v6  ;;  %v16019_v57 = vperm.slane %v5668_v19, %v13487_v6 }
 0x824   : > { %v5610_v23 = vsel %vm1282_vm0, %v5609_v33, %v5592_v31 }
 0x825   : > { %v5635_v58 = vrot.slane %v16010_v28, 4 }
 0x86a   : > { %v15913_v39 = vpop.f32.mrf.mxu0 }
 0x86c   : > { %v15911_v5 = vpop.trf.xlu2 }
 0x86d   : > { %v7521_v59 = vrot.slane %v15911_v5, 4  ;;  %v5622_v5 = vsel %vm1282_vm0, %v5621_v16, %v5596_v54 }
 0x86e   : > { %v16013_v2 = vperm.slane %v5622_v5, %v13487_v6 }
 0x86f   : > { %v15915_v20 = vpop.f32.mrf.mxu2 }
 0x872   : > { %v15937_v3 = vpop.f32.mrf.mxu3 }
 0x874   : > { %v15919_v37 = vpop.trf.xlu2 }
 0x875   : > { %v7561_v40 = vrot.slane %v15919_v37, 4 }
 0x876   : > { %v15921_v7 = vpop.trf.xlu0  ;;  %v15923_v63 = vpop.f32.mrf.mxu1 }
 0x877   : > { %17607 = vst [vmem:[#allocation71_spill] sm:$0xff] %v15923_v63  ;;  %v7527_v46 = vrot.slane %v15921_v7, 4  ;;  %v15984_v62 = vpop.f32.mrf.mxu2  ;;  %v5665_v7 = vrot.slane %v5660_v8, 4  ;;  %v16027_v8 = vperm.slane %v5610_v23, %v13487_v6 }
 0x878   : > { %v15925_v47 = vpop.trf.xlu1 }
 0x879   : > { %v7528_v55 = vsel %vm1282_vm0, %v7527_v46, %v15925_v47 }
 0x87a   : > { %v15966_v0 = vpop.f32.mrf.mxu3  ;;  %v7532_v54 = vperm.slane %v7528_v55, %v13468_v53 }
 0x87c   : > { %v15927_v13 = vpop.trf.xlu2 }
 0x87d   : > { %v7522_v56 = vsel %vm1282_vm0, %v7521_v59, %v15927_v13  ;;  %v5666_v13 = vsel %vm1282_vm0, %v5665_v7, %v5648_v45 }
 0x87e   : > { %v15929_v22 = vpop.trf.xlu0  ;;  %v15931_v50 = vpop.f32.mrf.mxu1  ;;  %v7526_v1 = vperm.slane %v7522_v56, %v13468_v53 }
 0x87f   : > { %17608 = vst [vmem:[#allocation70_spill] sm:$0xff] %v15931_v50  ;;  %v7567_v27 = vrot.slane %v15929_v22, 4  ;;  %v15998_v22 = vperm.slane %v5624_v17, %v13487_v6  ;;  %v16024_v34 = vpop.f32.mrf.mxu2 }
 0x880   : > { %v15933_v25 = vpop.trf.xlu1  ;;  %17614 = vst [vmem:[#allocation44_spill] sm:$0xff] %v16024_v34 }
 0x881   : > { %v7568_v37 = vsel %vm1282_vm0, %v7567_v27, %v15933_v25 }
 0x882   : > { %v7572_v31 = vperm.slane %v7568_v37, %v13468_v53  ;;  %v5691_v37 = vrot.slane %v16019_v57, 4 }
 0x884   : > { %v15935_v9 = vpop.trf.xlu2 }
 0x885   : > { %v7562_v25 = vsel %vm1282_vm0, %v7561_v40, %v15935_v9  ;;  %v7585_v40 = vrot.slane %v7572_v31, 4 }
 0x886   : > { %v12037_v21 = vpop.trf.xlu0  ;;  %v15944_v38 = vpop.f32.mrf.mxu1 }
 0x887   : > { %v7539_v35 = vrot.slane %v12037_v21, 4  ;;  %v5677_v21 = vrot.slane %v5664_v48, 4  ;;  %v7545_v48 = vrot.slane %v7532_v54, 4 }
 0x889   : > { %v5678_v15 = vsel %vm1282_vm0, %v5677_v21, %v5652_v30  ;;  %v7566_v30 = vperm.slane %v7562_v25, %v13468_v53  ;;  %v7546_v7 = vsel %vm1282_vm0, %v7545_v48, %v7526_v1  ;;  %v5637_v21 = vrot.slane %v16013_v2, 4 }
 0x88a   : > { %v15949_v52 = vpop.trf.xlu1  ;;  %v16064_v56 = vperm.slane %v5678_v15, %v13487_v6 }
 0x88b   : > { %v7586_v19 = vsel %vm1282_vm0, %v7585_v40, %v7566_v30  ;;  %v5692_v30 = vsel %vm1282_vm0, 0.0, %v5691_v37 }
 0x88c   : > { %v15954_v44 = vpop.trf.xlu2  ;;  %v7590_v15 = vperm.slane %v7586_v19, %v13487_v6 }
 0x88e   : > { %v15957_v32 = vpop.trf.xlu0  ;;  %v15968_v18 = vpop.f32.mrf.mxu1 }
 0x88f   : > { %v7579_v45 = vrot.slane %v15957_v32, 4  ;;  %v17617_v32 = vld [vmem:[#allocation47_spill] sm:$0xff] }
 0x890   : > { %v16044_v12 = vadd.f32 %v15907_v41, %v17617_v32  ;;  %v16051_v33 = vadd.f32 %v15909_v49, %v17617_v32  ;;  %v5639_v41 = vrot.slane %v15998_v22, 4 }
 0x892   : > { %v15974_v4 = vpop.trf.xlu1  ;;  %v5640_v25 = vsel %vm1282_vm0, 0.0, %v5639_v41 }
 0x893   : > { %v5968_v37 = vpack.c.bf16 %v5640_v25, %v5640_v25 }
 0x894   : > { %v15986_v14 = vpop.trf.xlu2 }
 0x896   : > { %v12046_v42 = vpop.trf.xlu0  ;;  %v16035_v27 = vpop.f32.mrf.mxu1 }
 0x897   : > { %v7540_v10 = vsel %vm1282_vm0, %v7539_v35, %v12046_v42  ;;  %17615 = vst [vmem:[#allocation58_spill] sm:$0xff] %v16035_v27  ;;  %v16037_v35 = vpop.f32.mrf.mxu3  ;;  %v16040_v42 = vperm.slane %v5680_v29, %v13487_v6  ;;  %v5633_v29 = vrot.slane %v16027_v8, 4 }
 0x898   : > { %v7544_v24 = vperm.slane %v7540_v10, %v13468_v53  ;;  %17616 = vst [vmem:[#allocation57_spill] sm:$0xff] %v16037_v35 }
 0x899   : > { %v5695_v54 = vrot.slane %v16040_v42, 4  ;;  %v5634_v32 = vsel %vm1282_vm0, 0.0, %v5633_v29 }
 0x89a   : > { %v12049_v11 = vpop.trf.xlu1  ;;  %v7551_v17 = vrot.slane %v7544_v24, 4 }
 0x89b   : > { %v7533_v47 = vrot.slane %v12049_v11, 4  ;;  %v16059_v11 = vperm.slane %v5666_v13, %v13487_v6  ;;  %v16073_v13 = vpack.i.bf16 %v16051_v33, %v16044_v12 }
 0x89c   : > { %v12061_v51 = vpop.trf.xlu2 }
 0x89d   : > { %v7534_v46 = vsel %vm1282_vm0, %v7533_v47, %v12061_v51  ;;  %v7550_v47 = vperm.slane %v7546_v7, %v13487_v6  ;;  %v5636_v51 = vsel %vm1282_vm0, 0.0, %v5635_v58  ;;  %12086 = vrot.lane.b32.xlu0 %v16073_v13, %s12896_s29  ;;  %12076 = vrot.lane.b32.xlu1 %v16073_v13, %s12895_s21  ;;  %v5689_v48 = vrot.slane %v16059_v11, 4 }
 0x89e   : > { %v12047_v9 = vpop.trf.xlu0  ;;  %v7538_v59 = vperm.slane %v7534_v46, %v13468_v53  ;;  %v5696_v7 = vsel %vm1282_vm0, 0.0, %v5695_v54  ;;  %v7599_v58 = vrot.slane %v7590_v15, 4  ;;  %v5964_v19 = vpack.c.bf16 %v5636_v51, %v5636_v51  ;;  %12081 = vrot.lane.b32.xlu2 %v16073_v13, %s12894_s30 }
 0x89f   : > { %v7580_v43 = vsel %vm1282_vm0, %v7579_v45, %v12047_v9  ;;  %v5638_v45 = vsel %vm1282_vm0, 0.0, %v5637_v21  ;;  %v5963_v21 = vpack.c.bf16 %v16010_v28, %v16010_v28  ;;  %v5976_v29 = vpack.c.bf16 %v5696_v7, %v5696_v7 }
 0x8a0   : > { %v7552_v55 = vsel %vm1282_vm0, %v7551_v17, %v7538_v59  ;;  %v7584_v49 = vperm.slane %v7580_v43, %v13468_v53  ;;  %v7559_v17 = vrot.slane %v7550_v47, 4  ;;  %v5693_v43 = vrot.slane %v16064_v56, 4 }
 0x8a1   : > { %v7556_v23 = vperm.slane %v7552_v55, %v13487_v6  ;;  %v5975_v28 = vpack.c.bf16 %v16040_v42, %v16040_v42  ;;  %v6059_v16 = vrot.slane %v5976_v29, 4  ;;  %v5961_v42 = vpack.c.bf16 %v16027_v8, %v16027_v8 }
 0x8a2   : > { %v12050_v10 = vpop.trf.xlu1  ;;  %v7591_v46 = vrot.slane %v7584_v49, 4  ;;  %v5965_v49 = vpack.c.bf16 %v16013_v2, %v16013_v2 }
 0x8a3   : > { %v7573_v5 = vrot.slane %v12050_v10, 4  ;;  %v7557_v59 = vrot.slane %v7556_v23, 4  ;;  %v5967_v10 = vpack.c.bf16 %v15998_v22, %v15998_v22  ;;  %v5694_v22 = vsel %vm1282_vm0, 0.0, %v5693_v43 }
 0x8a4   : > { %v12062_v24 = vpop.trf.xlu2  ;;  %v6019_v43 = vrot.slane %v5968_v37, 4 }
 0x8a5   : > { %v7574_v1 = vsel %vm1282_vm0, %v7573_v5, %v12062_v24  ;;  %v7560_v5 = vsel %vm1282_vm0, %v7556_v23, %v7559_v17  ;;  %v5966_v23 = vpack.c.bf16 %v5638_v45, %v5638_v45  ;;  %v5999_v51 = vrot.slane %v5967_v10, 4 }
 0x8a6   : > { %v16078_v31 = vpop.trf.xlu0  ;;  %v7578_v9 = vperm.slane %v7574_v1, %v13468_v53  ;;  %v7558_v1 = vsel %vm1282_vm0, %v7557_v59, %v7550_v47  ;;  %v5972_v47 = vpack.c.bf16 %v5692_v30, %v5692_v30  ;;  %v5974_v59 = vpack.c.bf16 %v5694_v22, %v5694_v22 }
 0x8a7   : > { %v5962_v10 = vpack.c.bf16 %v5634_v32, %v5634_v32  ;;  %v5971_v30 = vpack.c.bf16 %v16019_v57, %v16019_v57  ;;  %v6000_v37 = vsel %vm1282_vm0, %v5999_v51, %v5963_v21  ;;  %v6013_v29 = vrot.slane %v5966_v23, 4 }
 0x8a8   : > { %v7592_v40 = vsel %vm1282_vm0, %v7591_v46, %v7578_v9  ;;  %v7629_v9 = vshrl.u32 %v7560_v5, 16  ;;  %v6020_v22 = vsel %vm1282_vm0, %v6019_v43, %v5964_v19  ;;  %v6060_v8 = vsel %vm1282_vm0, %v6059_v16, %v5972_v47 }
 0x8a9   : > { %v7596_v41 = vperm.slane %v7592_v40, %v13487_v6  ;;  %v6014_v21 = vsel %vm1282_vm0, %v6013_v29, %v5962_v10  ;;  %v6064_v19 = vperm.slane %v6060_v8, %v13468_v53 }
 0x8aa   : > { %v16093_v55 = vpop.trf.xlu1 }
 0x8ab   : > { %v7597_v54 = vrot.slane %v7596_v41, 4  ;;  %v7600_v24 = vsel %vm1282_vm0, %v7596_v41, %v7599_v58  ;;  %v7621_v58 = vshrl.u32 %v7558_v1, 16  ;;  %v7459_v13 = vrot.slane %v16093_v55, 4 }
 0x8ac   : > { %v7627_v46 = vpack.i.b16 %v7600_v24, %v7560_v5  ;;  %v7630_v40 = vshrl.u32 %v7600_v24, 16  ;;  %v5690_v5 = vsel %vm1282_vm0, 0.0, %v5689_v48  ;;  %v6039_v48 = vrot.slane %v5975_v28, 4 }
 0x8ad   : > { %v7598_v2 = vsel %vm1282_vm0, %v7597_v54, %v7590_v15  ;;  %v5973_v15 = vpack.c.bf16 %v16064_v56, %v16064_v56  ;;  %v5993_v54 = vrot.slane %v5965_v49, 4  ;;  %v5969_v56 = vpack.c.bf16 %v16059_v11, %v16059_v11 }
 0x8ae   : > { %v16108_v17 = vpop.trf.xlu0  ;;  %7685 = vmatpush.bf16.msra.mxu2 %v7627_v46  ;;  %v7619_v25 = vpack.i.b16 %v7598_v2, %v7558_v1  ;;  %v7631_v7 = vpack.i.b16 %v7630_v40, %v7629_v9  ;;  %v7622_v41 = vshrl.u32 %v7598_v2, 16  ;;  %v5970_v1 = vpack.c.bf16 %v5690_v5, %v5690_v5 }
 0x8af   : > { %v6053_v46 = vrot.slane %v5974_v59, 4  ;;  %v5994_v32 = vsel %vm1282_vm0, %v5993_v54, %v5961_v42  ;;  %v6004_v49 = vperm.slane %v6000_v37, %v13468_v53  ;;  %v6033_v9 = vrot.slane %v5973_v15, 4  ;;  %v12070_v42 = vpop.trf.xlu2 }
 0x8b0   : > { %7645 = vmatpush.bf16.msra.mxu0 %v7619_v25  ;;  %7705 = vmatpush.bf16.msrb.mxu3 %v7631_v7  ;;  %v7623_v45 = vpack.i.b16 %v7622_v41, %v7621_v58  ;;  %v6024_v40 = vperm.slane %v6020_v22, %v13468_v53  ;;  %v6040_v23 = vsel %vm1282_vm0, %v6039_v48, %v5971_v30  ;;  %v6065_v41 = vrot.slane %v6064_v19, 4 }
 0x8b1   : > { %v6054_v28 = vsel %vm1282_vm0, %v6053_v46, %v5970_v1  ;;  %v5998_v16 = vperm.slane %v5994_v32, %v13468_v53  ;;  %v6005_v51 = vrot.slane %v6004_v49, 4  ;;  %v6018_v11 = vperm.slane %v6014_v21, %v13468_v53 }
 0x8b2   : > { %v16116_v24 = vpop.trf.xlu1  ;;  %7665 = vmatpush.bf16.msrb.mxu1 %v7623_v45  ;;  %v6044_v2 = vperm.slane %v6040_v23, %v13468_v53  ;;  %v6025_v25 = vrot.slane %v6024_v40, 4  ;;  %v6034_v7 = vsel %vm1282_vm0, %v6033_v9, %v5969_v56  ;;  %v6058_v58 = vperm.slane %v6054_v28, %v13468_v53 }
 0x8b3   : > { %v7447_v59 = vrot.slane %v15949_v52, 4  ;;  %v6038_v43 = vperm.slane %v6034_v7, %v13468_v53  ;;  %v6006_v10 = vsel %vm1282_vm0, %v6005_v51, %v5998_v16  ;;  %v7487_v15 = vrot.slane %v15974_v4, 4 }
 0x8b4   : > { %v6045_v5 = vrot.slane %v6044_v2, 4  ;;  %v6026_v54 = vsel %vm1282_vm0, %v6025_v25, %v6018_v11  ;;  %v6066_v30 = vsel %vm1282_vm0, %v6065_v41, %v6058_v58  ;;  %v7441_v52 = vrot.slane %v16078_v31, 4 }
 0x8b5   : > { %v7448_v37 = vsel %vm1282_vm0, %v7447_v59, %v15954_v44  ;;  %v16151_v48 = vperm.slane %v6006_v10, %v13487_v6  ;;  %v16154_v1 = vperm.slane %v6026_v54, %v13487_v6  ;;  %v16158_v55 = vperm.slane %v6066_v30, %v13487_v6 }
 0x8b6   : > { %v12064_v57 = vpop.trf.xlu0  ;;  %v6046_v4 = vsel %vm1282_vm0, %v6045_v5, %v6038_v43  ;;  %v7488_v22 = vsel %vm1282_vm0, %v7487_v15, %v15986_v14  ;;  %v7481_v44 = vrot.slane %v16108_v17, 4  ;;  %v7453_v46 = vrot.slane %v12070_v42, 4 }
 0x8b7   : > { %v7442_v31 = vsel %vm1282_vm0, %v7441_v52, %v12064_v57  ;;  %v7452_v8 = vperm.slane %v7448_v37, %v13468_v53  ;;  %v7492_v49 = vperm.slane %v7488_v22, %v13468_v53  ;;  %v6011_v23 = vrot.slane %v16151_v48, 4  ;;  %v12071_v25 = vpop.trf.xlu2 }
 0x8b8   : > { %v7446_v9 = vperm.slane %v7442_v31, %v13468_v53  ;;  %v6050_v14 = vperm.slane %v6046_v4, %v13487_v6  ;;  %v7499_v17 = vrot.slane %v16116_v24, 4  ;;  %v6031_v19 = vrot.slane %v16154_v1, 4 }
 0x8b9   : > { %v6071_v28 = vrot.slane %v16158_v55, 4  ;;  %v7465_v16 = vrot.slane %v7452_v8, 4  ;;  %v7505_v58 = vrot.slane %v7492_v49, 4  ;;  %v7493_v59 = vrot.slane %v12071_v25, 4 }
 0x8ba   : > { %v12067_v47 = vpop.trf.xlu1  ;;  %v6012_v43 = vsel %vm1282_vm0, 0, %v6011_v23  ;;  %v6032_v5 = vsel %vm1282_vm0, 0, %v6031_v19  ;;  %v6076_v54 = vshrl.u32 %v16151_v48, 16  ;;  %v6088_v4 = vshrl.u32 %v6050_v14, 16 }
 0x8bb   : > { %v7460_v29 = vsel %vm1282_vm0, %v7459_v13, %v12067_v47  ;;  %v7466_v41 = vsel %vm1282_vm0, %v7465_v16, %v7446_v9  ;;  %v6051_v47 = vrot.slane %v6050_v14, 4  ;;  %v6072_v10 = vsel %vm1282_vm0, 0, %v6071_v28 }
 0x8bc   : > { %v7464_v56 = vperm.slane %v7460_v29, %v13468_v53  ;;  %v7470_v15 = vperm.slane %v7466_v41, %v13487_v6  ;;  %v6082_v52 = vshrl.u32 %v6012_v43, 16  ;;  %v6083_v29 = vshrl.u32 %v6032_v5, 16 }
 0x8bd   : > { %v6052_v37 = vsel %vm1282_vm0, 0, %v6051_v47  ;;  %v6095_v31 = vshrl.u32 %v6072_v10, 16  ;;  %v6089_v23 = vshrl.u32 %v16158_v55, 16  ;;  %v6087_v19 = vpack.i.b16 %v16158_v55, %v6050_v14 }
 0x8be   : > { %v12065_v45 = vpop.trf.xlu0  ;;  %v7471_v51 = vrot.slane %v7464_v56, 4  ;;  %v6093_v49 = vpack.i.b16 %v6072_v10, %v6052_v37  ;;  %v7479_v9 = vrot.slane %v7470_v15, 4  ;;  %v6084_v28 = vpack.i.b16 %v6083_v29, %v6082_v52 }
 0x8bf   : > { %v7482_v32 = vsel %vm1282_vm0, %v7481_v44, %v12065_v45 }
 0x8c0   : > { %v7486_v11 = vperm.slane %v7482_v32, %v13468_v53  ;;  %v6081_v32 = vpack.i.b16 %v6032_v5, %v6012_v43  ;;  %v7634_v5 = vunpack.c.l.b16 %v6087_v19 }
 0x8c2   : > { %v12068_v21 = vpop.trf.xlu1  ;;  %v7506_v45 = vsel %vm1282_vm0, %v7505_v58, %v7486_v11  ;;  %v7673_v25 = vunpack.c.l.b16 %v6081_v32 }
 0x8c3   : > { %v7500_v7 = vsel %vm1282_vm0, %v7499_v17, %v12068_v21  ;;  %v7510_v22 = vperm.slane %v7506_v45, %v13487_v6  ;;  %v7693_v45 = vunpack.c.l.b16 %v6084_v28 }
 0x8c4   : > { %v7504_v42 = vperm.slane %v7500_v7, %v13468_v53  ;;  %v7674_v7 = vunpack.c.l.b16 %v6093_v49 }
 0x8c5   : > { %v7519_v11 = vrot.slane %v7510_v22, 4 }
 0x8c6   : > { %v12073_v40 = vpop.trf.xlu0  ;;  %v7511_v8 = vrot.slane %v7504_v42, 4 }
 0x8c7   : > { %v7454_v57 = vsel %vm1282_vm0, %v7453_v46, %v12073_v40  ;;  %v6077_v46 = vshrl.u32 %v16154_v1, 16  ;;  %v6094_v40 = vshrl.u32 %v6052_v37, 16  ;;  %v7675_v37 = vpack.c.b16 %v7674_v7, %v7673_v25 }
 0x8c8   : > { %v7458_v2 = vperm.slane %v7454_v57, %v13468_v53  ;;  %v6075_v57 = vpack.i.b16 %v16154_v1, %v16151_v48 }
 0x8c9   : > { %v6078_v58 = vpack.i.b16 %v6077_v46, %v6076_v54  ;;  %v16209_v46 = vpop.f32.mrf.mxu3 }
 0x8ca   : > { %v7472_v24 = vsel %vm1282_vm0, %v7471_v51, %v7458_v2  ;;  %v6096_v2 = vpack.i.b16 %v6095_v31, %v6094_v40  ;;  %v7633_v55 = vunpack.c.l.b16 %v6075_v57  ;;  %v16207_v31 = vpop.f32.mrf.mxu2  ;;  %17619 = vst [vmem:[#allocation63_spill] sm:$0xff] %v16209_v46 }
 0x8cb   : > { %v7476_v13 = vperm.slane %v7472_v24, %v13487_v6  ;;  %v7653_v52 = vunpack.c.l.b16 %v6078_v58  ;;  %17618 = vst [vmem:[#allocation59_spill] sm:$0xff] %v16207_v31 }
 0x8cc   : > { %v7694_v42 = vunpack.c.l.b16 %v6096_v2 }
 0x8cd   : > { %v7477_v21 = vrot.slane %v7476_v13, 4  ;;  %v7480_v51 = vsel %vm1282_vm0, %v7476_v13, %v7479_v9  ;;  %v16213_v9 = vpop.f32.mrf.mxu0 }
 0x8ce   : > { %v12074_v30 = vpop.trf.xlu0  ;;  %v7613_v48 = vshrl.u32 %v7480_v51, 16 }
 0x8cf   : > { %v7494_v44 = vsel %vm1282_vm0, %v7493_v59, %v12074_v30  ;;  %v7478_v24 = vsel %vm1282_vm0, %v7477_v21, %v7470_v15  ;;  %v6090_v59 = vpack.i.b16 %v6089_v23, %v6088_v4  ;;  %v7635_v4 = vpack.c.b16 %v7634_v5, %v7633_v55  ;;  %v16215_v21 = vpop.f32.mrf.mxu1 }
 0x8d0   : > { %v7498_v56 = vperm.slane %v7494_v44, %v13468_v53  ;;  %v7605_v30 = vshrl.u32 %v7478_v24, 16  ;;  %v7695_v44 = vpack.c.b16 %v7694_v42, %v7693_v45  ;;  %17620 = vst [vmem:[#allocation62_spill] sm:$0xff] %v16215_v21 }
 0x8d1   : > { %v7654_v29 = vunpack.c.l.b16 %v6090_v59 }
 0x8d2   : > { %v7512_v17 = vsel %vm1282_vm0, %v7511_v8, %v7498_v56 }
 0x8d3   : > { %v7516_v16 = vperm.slane %v7512_v17, %v13487_v6 }
 0x8d5   : > { %v7520_v41 = vsel %vm1282_vm0, %v7516_v16, %v7519_v11  ;;  %v7517_v47 = vrot.slane %v7516_v16, 4 }
 0x8d6   : > { %v7611_v43 = vpack.i.b16 %v7520_v41, %v7480_v51  ;;  %v7614_v1 = vshrl.u32 %v7520_v41, 16 }
 0x8d7   : > { %v7518_v14 = vsel %vm1282_vm0, %v7517_v47, %v7510_v22  ;;  %v7655_v22 = vpack.c.b16 %v7654_v29, %v7653_v52 }
 0x8d8   : > { %7686 = vmatpush.bf16.msra.mxu2 %v7611_v43  ;;  %v7603_v10 = vpack.i.b16 %v7518_v14, %v7478_v24  ;;  %v7615_v13 = vpack.i.b16 %v7614_v1, %v7613_v48  ;;  %v7606_v54 = vshrl.u32 %v7518_v14, 16 }
 0x8da   : > { %7646 = vmatpush.bf16.msra.mxu0 %v7603_v10  ;;  %7706 = vmatpush.bf16.msrb.mxu3 %v7615_v13  ;;  %v7607_v15 = vpack.i.b16 %v7606_v54, %v7605_v30 }
 0x8db   : > { %11199 = vmatmul.msk.bf16.vlgmr.msra.gmra.mxu2 %vm3334_vm1, %v7675_v37 }
 0x8dc   : > { %7666 = vmatpush.bf16.msrb.mxu1 %v7607_v15 }
 0x8dd   : > { %11197 = vmatmul.msk.bf16.vlgmr.msra.gmra.mxu0 %vm3334_vm1, %v7635_v4  ;;  %11200 = vmatmul.msk.bf16.vlgmr.msrb.gmra.mxu3 %vm3334_vm1, %v7695_v44 }
 0x8df   : > { %11198 = vmatmul.msk.bf16.vlgmr.msrb.gmra.mxu1 %vm3334_vm1, %v7655_v22 }
 0x8f8   : > { %v16227_v24 = vpop.permute.xlu2 %12081 }
 0x90f   : > { %v16223_v58 = vpop.permute.xlu1 %12076  ;;  %v16225_v41 = vpop.permute.xlu0 %12086 }
 0x95a   : > { %v7648_v19 = vpop.f32.mrf.mxu0 }
 0x95b   : > { %v7713_v51 = vsel %vm3412_vm2, %v7648_v19, -inf }
 0x95c   : > { %v7668_v28 = vpop.f32.mrf.mxu1 }
 0x95d   : > { %v7719_v16 = vsel %vm3412_vm2, %v7668_v28, -inf }
 0x95e   : > { %v7688_v8 = vpop.f32.mrf.mxu2 }
 0x95f   : > { %v7725_v56 = vsel %vm3412_vm2, %v7688_v8, -inf }
 0x960   : > { %v7708_v32 = vpop.f32.mrf.mxu3  ;;  %7726 = vmax.xlane.f32.xlu1 %v7725_v56 }
 0x961   : > { %v7731_v49 = vsel %vm3412_vm2, %v7708_v32, -inf }
 0x962   : > { %7732 = vmax.xlane.f32.xlu0 %v7731_v49  ;;  %v7650_v11 = vpop.f32.mrf.mxu0 }
 0x963   : > { %v7716_v2 = vsel %vm3412_vm2, %v7650_v11, -inf }
 0x964   : > { %v7670_v25 = vpop.f32.mrf.mxu1 }
 0x965   : > { %v7722_v7 = vsel %vm3412_vm2, %v7670_v25, -inf }
 0x966   : > { %v7690_v40 = vpop.f32.mrf.mxu2 }
 0x967   : > { %v7728_v23 = vsel %vm3412_vm2, %v7690_v40, -inf }
 0x968   : > { %v7710_v17 = vpop.f32.mrf.mxu3  ;;  %7729 = vmax.xlane.f32.xlu2 %v7728_v23  ;;  %v12088_v23 = vunpack.i.l.bf16 %v16225_v41 }
 0x969   : > { %v7734_v57 = vsel %vm3412_vm2, %v7710_v17, -inf }
 0x96a   : > { %7735 = vmax.xlane.f32.xlu1 %v7734_v57 }
 0x970   : > { %7720 = vmax.xlane.f32.xlu2 %v7719_v16 }
 0x972   : > { %7714 = vmax.xlane.f32.xlu1 %v7713_v51 }
 0x97a   : > { %7717 = vmax.xlane.f32.xlu1 %v7716_v2 }
 0x982   : > { %7723 = vmax.xlane.f32.xlu1 %v7722_v7 }
 0x9d3   : > { %v7727_v47 = vpop.xlane.xlu1 %7726 }
 0x9d4   : > { %v7741_v59 = vsub.f32 %v7688_v8, %v7727_v47 }
 0x9d5   : > { %v7733_v43 = vpop.xlane.xlu0 %7732 }
 0x9d6   : > { %v7753_v48 = vmul.f32 1.442695, %v7741_v59  ;;  %v7743_v1 = vsub.f32 %v7708_v32, %v7733_v43  ;;  %v5851_v32 = vrot.slane %v16044_v12, 4  ;;  %v12083_v43 = vunpack.i.l.bf16 %v16227_v24 }
 0x9d8   : > { %12318 = vpow2.f32 %v7753_v48  ;;  %v7757_v55 = vmul.f32 1.442695, %v7743_v1  ;;  %v5852_v16 = vsel %vm1282_vm0, %v12088_v23, %v5851_v32  ;;  %v5849_v32 = vrot.slane %v12088_v23, 4 }
 0x9d9   : > { %v5860_v59 = vperm.slane %v5852_v16, %v13468_v53 }
 0x9da   : > { %12320 = vpow2.f32 %v7757_v55 }
 0x9db   : > { %v7730_v14 = vpop.xlane.xlu2 %7729 }
 0x9dc   : > { %v7742_v5 = vsub.f32 %v7690_v40, %v7730_v14  ;;  %v5887_v14 = vrot.slane %v5860_v59, 4 }
 0x9dd   : > { %v7736_v45 = vpop.xlane.xlu1 %7735 }
 0x9de   : > { %v16229_v42 = vpop.eup %12318  ;;  %v7755_v10 = vmul.f32 1.442695, %v7742_v5  ;;  %v7744_v13 = vsub.f32 %v7710_v17, %v7736_v45  ;;  %v12078_v17 = vunpack.i.l.bf16 %v16223_v58 }
 0x9df   : > { %v7773_v30 = vsel %vm3412_vm2, %v16229_v42, 0.0 }
 0x9e0   : > { %v16233_v54 = vpop.eup %12320  ;;  %12322 = vpow2.f32 %v7755_v10  ;;  %v7759_v37 = vmul.f32 1.442695, %v7744_v13  ;;  %7774 = vadd.xlane.f32.xlu1 %v7773_v30  ;;  %v5863_v47 = vrot.slane %v12078_v17, 4 }
 0x9e1   : > { %v7779_v52 = vsel %vm3412_vm2, %v16233_v54, 0.0 }
 0x9e2   : > { %12324 = vpow2.f32 %v7759_v37  ;;  %7780 = vadd.xlane.f32.xlu0 %v7779_v52 }
 0x9e3   : > { %v7721_v49 = vpop.xlane.xlu2 %7720 }
 0x9e4   : > { %v7739_v51 = vsub.f32 %v7668_v28, %v7721_v49  ;;  %v5850_v49 = vsel %vm1282_vm0, %v5849_v32, %v16044_v12 }
 0x9e5   : > { %v7715_v29 = vpop.xlane.xlu1 %7714 }
 0x9e6   : > { %v16237_v15 = vpop.eup %12322  ;;  %v7737_v4 = vsub.f32 %v7648_v19, %v7715_v29  ;;  %v7749_v48 = vmul.f32 1.442695, %v7739_v51 }
 0x9e7   : > { %v7776_v44 = vsel %vm3412_vm2, %v16237_v15, 0.0 }
 0x9e8   : > { %v16241_v22 = vpop.eup %12324  ;;  %v7745_v8 = vmul.f32 1.442695, %v7737_v4  ;;  %7777 = vadd.xlane.f32.xlu2 %v7776_v44 }
 0x9e9   : > { %v7782_v56 = vsel %vm3412_vm2, %v16241_v22, 0.0 }
 0x9ea   : > { %12326 = vpow2.f32 %v7745_v8  ;;  %7783 = vadd.xlane.f32.xlu1 %v7782_v56 }
 0x9ed   : > { %v7718_v40 = vpop.xlane.xlu1 %7717 }
 0x9ee   : > { %v7738_v57 = vsub.f32 %v7650_v11, %v7718_v40  ;;  %v5864_v11 = vsel %vm1282_vm0, %v12083_v43, %v5863_v47  ;;  %v5861_v40 = vrot.slane %v12083_v43, 4 }
 0x9ef   : > { %v5872_v45 = vperm.slane %v5864_v11, %v13468_v53 }
 0x9f0   : > { %v16248_v19 = vpop.eup %12326  ;;  %v7747_v2 = vmul.f32 1.442695, %v7738_v57  ;;  %v5856_v57 = vperm.slane %v5850_v49, %v13468_v53  ;;  %v5862_v16 = vsel %vm1282_vm0, %v5861_v40, %v12078_v17  ;;  %v12089_v17 = vunpack.i.h.bf16 %v16225_v41 }
 0x9f1   : > { %v7761_v7 = vsel %vm3412_vm2, %v16248_v19, 0.0  ;;  %v5888_v13 = vsel %vm1282_vm0, %v5872_v45, %v5887_v14 }
 0x9f2   : > { %12328 = vpow2.f32 %v7747_v2  ;;  %7762 = vadd.xlane.f32.xlu1 %v7761_v7  ;;  %v5896_v37 = vperm.slane %v5888_v13, %v13487_v6  ;;  %v5875_v51 = vrot.slane %v5856_v57, 4  ;;  %v5885_v2 = vrot.slane %v5872_v45, 4 }
 0x9f3   : > { %12330 = vpow2.f32 %v7749_v48  ;;  %v5868_v7 = vperm.slane %v5862_v16, %v13468_v53 }
 0x9f4   : > { %v5903_v4 = vrot.slane %v5896_v37, 4  ;;  %v7815_v8 = vpack.c.bf16 %v5896_v37, %v5896_v37  ;;  %v5886_v48 = vsel %vm1282_vm0, %v5885_v2, %v5860_v59  ;;  %v5905_v59 = vrot.slane %v12089_v17, 4 }
 0x9f5   : > { %v7724_v1 = vpop.xlane.xlu1 %7723  ;;  %v5876_v47 = vsel %vm1282_vm0, %v5868_v7, %v5875_v51  ;;  %v5892_v23 = vperm.slane %v5886_v48, %v13487_v6  ;;  %v5873_v14 = vrot.slane %v5868_v7, 4 }
 0x9f6   : > { %v7740_v55 = vsub.f32 %v7670_v25, %v7724_v1  ;;  %v5904_v44 = vsel %vm1282_vm0, 0.0, %v5903_v4  ;;  %v5884_v1 = vperm.slane %v5876_v47, %v13487_v6  ;;  %v12084_v4 = vunpack.i.h.bf16 %v16227_v24 }
 0x9f7   : > { %v7816_v56 = vpack.c.bf16 %v5904_v44, %v5904_v44  ;;  %v7813_v13 = vpack.c.bf16 %v5892_v23, %v5892_v23  ;;  %v5906_v41 = vsel %vm1282_vm0, %v5905_v59, %v16051_v33 }
 0x9f8   : > { %v16256_v5 = vpop.eup %12328  ;;  %v7751_v28 = vmul.f32 1.442695, %v7740_v55  ;;  %v5899_v11 = vrot.slane %v5884_v1, 4  ;;  %v5901_v55 = vrot.slane %v5892_v23, 4  ;;  %v7811_v45 = vpack.c.bf16 %v5884_v1, %v5884_v1 }
 0x9f9   : > { %v7764_v10 = vsel %vm3412_vm2, %v16256_v5, 0.0  ;;  %v16262_v30 = vpop.eup %12330  ;;  %v5912_v32 = vperm.slane %v5906_v41, %v13468_v53 }
 0x9fa   : > { %12332 = vpow2.f32 %v7751_v28  ;;  %7765 = vadd.xlane.f32.xlu1 %v7764_v10  ;;  %v7767_v29 = vsel %vm3412_vm2, %v16262_v30, 0.0  ;;  %v5900_v12 = vsel %vm1282_vm0, 0.0, %v5899_v11  ;;  %v5902_v43 = vsel %vm1282_vm0, 0.0, %v5901_v55 }
 0x9fb   : > { %v12079_v28 = vunpack.i.h.bf16 %v16223_v58  ;;  %v7812_v10 = vpack.c.bf16 %v5900_v12, %v5900_v12  ;;  %v7814_v37 = vpack.c.bf16 %v5902_v43, %v5902_v43  ;;  %v5931_v24 = vrot.slane %v5912_v32, 4 }
 0xa00   : > { %v16265_v52 = vpop.eup %12332 }
 0xa01   : > { %v7770_v25 = vsel %vm3412_vm2, %v16265_v52, 0.0 }
 0xa02   : > { %7771 = vadd.xlane.f32.xlu2 %v7770_v25  ;;  %7768 = vadd.xlane.f32.xlu1 %v7767_v29  ;;  %v5874_v25 = vsel %vm1282_vm0, %v5873_v14, %v5856_v57  ;;  %v5919_v29 = vrot.slane %v12079_v28, 4 }
 0xa03   : > { %v5880_v44 = vperm.slane %v5874_v25, %v13487_v6 }
 0xa04   : > { %v5920_v58 = vsel %vm1282_vm0, %v12084_v4, %v5919_v29 }
 0xa05   : > { %v5897_v49 = vrot.slane %v5880_v44, 4  ;;  %v5928_v40 = vperm.slane %v5920_v58, %v13468_v53  ;;  %v7809_v47 = vpack.c.bf16 %v5880_v44, %v5880_v44 }
 0xa07   : > { %v5898_v51 = vsel %vm1282_vm0, 0.0, %v5897_v49  ;;  %v5941_v7 = vrot.slane %v5928_v40, 4 }
 0xa08   : > { %v7810_v48 = vpack.c.bf16 %v5898_v51, %v5898_v51 }
 0xa0b   : > { %12090 = vxpose.binary.xlu0.c.b16.start.end [1/2] (short) (narrow) %v7816_v56, %v7815_v8, 32  ;;  %v5907_v8 = vrot.slane %v16051_v33, 4  ;;  %v5917_v56 = vrot.slane %v12084_v4, 4 }
 0xa0d   : > { %v5908_v57 = vsel %vm1282_vm0, %v12089_v17, %v5907_v8  ;;  %v5918_v16 = vsel %vm1282_vm0, %v5917_v56, %v12079_v28 }
 0xa0e   : > { %v5916_v2 = vperm.slane %v5908_v57, %v13468_v53  ;;  %v5924_v33 = vperm.slane %v5918_v16, %v13468_v53 }
 0xa10   : > { %v5932_v1 = vsel %vm1282_vm0, %v5924_v33, %v5931_v24  ;;  %v5942_v23 = vsel %vm1282_vm0, %v5941_v7, %v5916_v2  ;;  %v5929_v28 = vrot.slane %v5924_v33, 4  ;;  %v5943_v8 = vrot.slane %v5916_v2, 4 }
 0xa11   : > { %v5940_v11 = vperm.slane %v5932_v1, %v13487_v6  ;;  %v5948_v55 = vperm.slane %v5942_v23, %v13487_v6 }
 0xa12   : > { %v5930_v59 = vsel %vm1282_vm0, %v5929_v28, %v5912_v32  ;;  %v5944_v16 = vsel %vm1282_vm0, %v5928_v40, %v5943_v8 }
 0xa13   : > { %v5955_v12 = vrot.slane %v5940_v11, 4  ;;  %v5957_v43 = vrot.slane %v5948_v55, 4  ;;  %v5936_v25 = vperm.slane %v5930_v59, %v13487_v6  ;;  %v5952_v7 = vperm.slane %v5944_v16, %v13487_v6 }
 0xa15   : > { %v5956_v17 = vsel %vm1282_vm0, 0.0, %v5955_v12  ;;  %v5958_v14 = vsel %vm1282_vm0, 0.0, %v5957_v43  ;;  %v5953_v4 = vrot.slane %v5936_v25, 4  ;;  %v7817_v58 = vpack.c.bf16 %v5936_v25, %v5936_v25 }
 0xa17   : > { %v5954_v41 = vsel %vm1282_vm0, 0.0, %v5953_v4 }
 0xa18   : > { %v7818_v56 = vpack.c.bf16 %v5954_v41, %v5954_v41 }
 0xa2b   : > { %12095 = vxpose.binary.xlu0.c.b16.start.end [1/2] (short) (narrow) %v7812_v10, %v7811_v45, 32  ;;  %v7819_v45 = vpack.c.bf16 %v5940_v11, %v5940_v11  ;;  %v7820_v10 = vpack.c.bf16 %v5956_v17, %v5956_v17 }
 0xa2c   : > { %12115 = vxpose.binary.xlu2.c.b16.start.end [1/2] (short) (narrow) %v7814_v37, %v7813_v13, 32  ;;  %v7821_v13 = vpack.c.bf16 %v5948_v55, %v5948_v55  ;;  %v7822_v37 = vpack.c.bf16 %v5958_v14, %v5958_v14 }
 0xa3c   : > { %12105 = vxpose.binary.xlu1.c.b16.start.end [1/2] (short) (narrow) %v7810_v48, %v7809_v47, 32  ;;  %v5959_v48 = vrot.slane %v5952_v7, 4 }
 0xa3e   : > { %v5960_v43 = vsel %vm1282_vm0, 0.0, %v5959_v48 }
 0xa4b   : > { %12100 = vxpose.binary.xlu0.c.b16.start.end [1/2] (short) (narrow) %v7820_v10, %v7819_v45, 32  ;;  %v7823_v10 = vpack.c.bf16 %v5952_v7, %v5952_v7 }
 0xa4c   : > { %12120 = vxpose.binary.xlu2.c.b16.start.end [1/2] (short) (narrow) %v7822_v37, %v7821_v13, 32  ;;  %v7824_v13 = vpack.c.bf16 %v5960_v43, %v5960_v43 }
 0xa53   : > { %v7775_v29 = vpop.xlane.xlu1 %7774 }
 0xa54   : > { %12334 = vrcp.f32 %v7775_v29 }
 0xa55   : > { %v7781_v44 = vpop.xlane.xlu0 %7780 }
 0xa56   : > { %12336 = vrcp.f32 %v7781_v44 }
 0xa5a   : > { %v12335_v57 = vpop.eup %12334 }
 0xa5b   : > { %v7778_v49 = vpop.xlane.xlu2 %7777  ;;  %v7797_v51 = vmul.f32 %v12335_v57, %v16229_v42 }
 0xa5c   : > { %12338 = vrcp.f32 %v7778_v49  ;;  %12110 = vxpose.binary.xlu1.c.b16.start.end [1/2] (short) (narrow) %v7818_v56, %v7817_v58, 32  ;;  %v12337_v32 = vpop.eup %12336 }
 0xa5d   : > { %v7784_v24 = vpop.xlane.xlu1 %7783  ;;  %v7799_v33 = vmul.f32 %v12337_v32, %v16233_v54  ;;  %v7805_v1 = vpack.c.bf16 %v7797_v51, %v7797_v51 }
 0xa5e   : > { %12340 = vrcp.f32 %v7784_v24 }
 0xa5f   : > { %v7807_v40 = vpack.c.bf16 %v7799_v33, %v7799_v33  ;;  %v9421_v17 = vunpack.c.l.b16 %v7805_v1 }
 0xa61   : > { %v9454_v45 = vunpack.c.l.b16 %v7807_v40 }
 0xa62   : > { %v12339_v47 = vpop.eup %12338 }
 0xa63   : > { %v7798_v2 = vmul.f32 %v12339_v47, %v16237_v15 }
 0xa64   : > { %v12341_v23 = vpop.eup %12340 }
 0xa65   : > { %v7800_v11 = vmul.f32 %v12341_v23, %v16241_v22  ;;  %v7763_v55 = vpop.xlane.xlu1 %7762  ;;  %v7806_v12 = vpack.c.bf16 %v7798_v2, %v7798_v2 }
 0xa66   : > { %12342 = vrcp.f32 %v7763_v55 }
 0xa67   : > { %v9422_v14 = vunpack.c.l.b16 %v7806_v12  ;;  %v7808_v42 = vpack.c.bf16 %v7800_v11, %v7800_v11 }
 0xa69   : > { %v9423_v28 = vpack.c.b16 %v9422_v14, %v9421_v17  ;;  %v9455_v54 = vunpack.c.l.b16 %v7808_v42 }
 0xa6b   : > { %v9431_v15 = vsel %vm3412_vm2, %v9423_v28, 0  ;;  %v9456_v37 = vpack.c.b16 %v9455_v54, %v9454_v45 }
 0xa6c   : > { %12125 = vxpose.binary.xlu2.c.b16.start.end [1/2] (short) (narrow) %v7824_v13, %v7823_v10, 32  ;;  %v12343_v25 = vpop.eup %12342 }
 0xa6d   : > { %9440 = vmatpush.bf16.xpose.msrb.mxu2 %v9431_v15  ;;  %v7766_v22 = vpop.xlane.xlu1 %7765  ;;  %v9464_v59 = vsel %vm3412_vm2, %v9456_v37, 0  ;;  %v7793_v29 = vmul.f32 %v12343_v25, %v16248_v19 }
 0xa6e   : > { %12344 = vrcp.f32 %v7766_v22  ;;  %9473 = vmatpush.bf16.xpose.msra.mxu3 %v9464_v59 }
 0xa6f   : > { %v7801_v58 = vpack.c.bf16 %v7793_v29, %v7793_v29 }
 0xa71   : > { %v9355_v49 = vunpack.c.l.b16 %v7801_v58 }
 0xa74   : > { %v12345_v4 = vpop.eup %12344 }
 0xa75   : > { %v7794_v44 = vmul.f32 %v12345_v4, %v16256_v5  ;;  %v7769_v41 = vpop.xlane.xlu1 %7768  ;;  %v7772_v8 = vpop.xlane.xlu2 %7771 }
 0xa76   : > { %12346 = vrcp.f32 %v7769_v41 }
 0xa77   : > { %12348 = vrcp.f32 %v7772_v8  ;;  %v7802_v56 = vpack.c.bf16 %v7794_v44, %v7794_v44 }
 0xa79   : > { %v9356_v57 = vunpack.c.l.b16 %v7802_v56 }
 0xa7b   : > { %v9357_v16 = vpack.c.b16 %v9356_v57, %v9355_v49 }
 0xa7c   : > { %v12347_v24 = vpop.eup %12346 }
 0xa7d   : > { %v12349_v32 = vpop.eup %12348  ;;  %v7795_v51 = vmul.f32 %v12347_v24, %v16262_v30  ;;  %v9365_v7 = vsel %vm3412_vm2, %v9357_v16, 0 }
 0xa7e   : > { %v7796_v19 = vmul.f32 %v12349_v32, %v16265_v52  ;;  %9374 = vmatpush.bf16.xpose.msrb.mxu0 %v9365_v7 }
 0xa7f   : > { %v7803_v33 = vpack.c.bf16 %v7795_v51, %v7795_v51 }
 0xa80   : > { %v7804_v5 = vpack.c.bf16 %v7796_v19, %v7796_v19 }
 0xa81   : > { %v9388_v47 = vunpack.c.l.b16 %v7803_v33 }
 0xa82   : > { %v9389_v2 = vunpack.c.l.b16 %v7804_v5 }
 0xa84   : > { %v9390_v48 = vpack.c.b16 %v9389_v2, %v9388_v47 }
 0xa86   : > { %v9398_v1 = vsel %vm3412_vm2, %v9390_v48, 0 }
 0xa87   : > { %9407 = vmatpush.bf16.xpose.msra.mxu1 %v9398_v1 }
 0xab7   : > { %v12091_v23 = vpop.trf.xlu0 }
 0xab8   : > { %v8093_v14 = vrot.slane %v12091_v23, 4 }
 0xabf   : > { %v16323_v11 = vpop.trf.xlu0 }
 0xac7   : > { %v12093_v55 = vpop.trf.xlu0 }
 0xac8   : > { %v8317_v48 = vrot.slane %v12093_v55, 4 }
 0xacd   : > { %v12116_v12 = vpop.trf.xlu2 }
 0xace   : > { %v8081_v13 = vrot.slane %v12116_v12, 4 }
 0xacf   : > { %v16325_v40 = vpop.trf.xlu0 }
 0xad5   : > { %v12117_v30 = vpop.trf.xlu2 }
 0xad7   : > { %v12096_v43 = vpop.trf.xlu0 }
 0xad8   : > { %v8095_v42 = vrot.slane %v12096_v43, 4  ;;  %v8094_v28 = vsel %vm1282_vm0, %v8093_v14, %v12096_v43 }
 0xad9   : > { %v8100_v10 = vperm.slane %v8094_v28, %v13468_v53 }
 0xada   : > { %v8096_v45 = vsel %vm1282_vm0, %v12091_v23, %v8095_v42 }
 0xadb   : > { %v8104_v37 = vperm.slane %v8096_v45, %v13468_v53  ;;  %v8129_v44 = vrot.slane %v8100_v10, 4 }
 0xadd   : > { %v12118_v17 = vpop.trf.xlu2  ;;  %v8141_v56 = vrot.slane %v8104_v37, 4 }
 0xadf   : > { %v12097_v52 = vpop.trf.xlu0 }
 0xae0   : > { %v8207_v25 = vrot.slane %v12097_v52, 4 }
 0xae2   : > { %v8208_v24 = vsel %vm1282_vm0, %v16323_v11, %v8207_v25 }
 0xae3   : > { %v8216_v5 = vperm.slane %v8208_v24, %v13468_v53 }
 0xae5   : > { %v16329_v54 = vpop.trf.xlu2  ;;  %v8253_v43 = vrot.slane %v8216_v5, 4 }
 0xae7   : > { %v12098_v15 = vpop.trf.xlu0 }
 0xae8   : > { %v12106_v22 = vpop.trf.xlu1  ;;  %v8319_v59 = vrot.slane %v12098_v15, 4  ;;  %v8318_v23 = vsel %vm1282_vm0, %v8317_v48, %v12098_v15 }
 0xae9   : > { %v8082_v29 = vsel %vm1282_vm0, %v8081_v13, %v12106_v22  ;;  %v8083_v4 = vrot.slane %v12106_v22, 4  ;;  %v8324_v28 = vperm.slane %v8318_v23, %v13468_v53  ;;  %v8305_v13 = vrot.slane %v12118_v17, 4 }
 0xaea   : > { %v8088_v41 = vperm.slane %v8082_v29, %v13468_v53  ;;  %v8320_v8 = vsel %vm1282_vm0, %v12093_v55, %v8319_v59  ;;  %v8205_v55 = vrot.slane %v16323_v11, 4  ;;  %v8193_v22 = vrot.slane %v12117_v30, 4 }
 0xaeb   : > { %v8084_v58 = vsel %vm1282_vm0, %v12116_v12, %v8083_v4  ;;  %v8328_v15 = vperm.slane %v8320_v8, %v13468_v53  ;;  %v8429_v29 = vrot.slane %v16325_v40, 4 }
 0xaec   : > { %v8092_v49 = vperm.slane %v8084_v58, %v13468_v53  ;;  %v16339_v57 = vsel %vm1282_vm0, %v8129_v44, %v8088_v41  ;;  %v8131_v16 = vrot.slane %v8088_v41, 4  ;;  %v8353_v58 = vrot.slane %v8324_v28, 4 }
 0xaed   : > { %v16343_v32 = vpop.trf.xlu2  ;;  %v8206_v11 = vsel %vm1282_vm0, %v8205_v55, %v12097_v52 }
 0xaee   : > { %v16346_v51 = vsel %vm1282_vm0, %v8100_v10, %v8131_v16  ;;  %v16349_v7 = vsel %vm1282_vm0, %v8141_v56, %v8092_v49  ;;  %v8143_v19 = vrot.slane %v8092_v49, 4  ;;  %v8365_v16 = vrot.slane %v8328_v15, 4 }
 0xaef   : > { %v12099_v33 = vpop.trf.xlu0 }
 0xaf0   : > { %v16353_v47 = vsel %vm1282_vm0, %v8104_v37, %v8143_v19  ;;  %v12107_v2 = vpop.trf.xlu1  ;;  %v8431_v4 = vrot.slane %v12099_v33, 4 }
 0xaf1   : > { %v8195_v1 = vrot.slane %v12107_v2, 4  ;;  %v8194_v56 = vsel %vm1282_vm0, %v8193_v22, %v12107_v2 }
 0xaf2   : > { %v8200_v48 = vperm.slane %v8194_v56, %v13468_v53 }
 0xaf3   : > { %v8196_v12 = vsel %vm1282_vm0, %v12117_v30, %v8195_v1  ;;  %v8430_v30 = vsel %vm1282_vm0, %v8429_v29, %v12099_v33  ;;  %v8432_v1 = vsel %vm1282_vm0, %v16325_v40, %v8431_v4 }
 0xaf4   : > { %v8204_v14 = vperm.slane %v8196_v12, %v13468_v53  ;;  %v8436_v23 = vperm.slane %v8430_v30, %v13468_v53  ;;  %v8212_v12 = vperm.slane %v8206_v11, %v13468_v53 }
 0xaf5   : > { %v16358_v42 = vpop.trf.xlu2 }
 0xaf6   : > { %v16362_v45 = vsel %vm1282_vm0, %v8253_v43, %v8204_v14  ;;  %v8255_v10 = vrot.slane %v8204_v14, 4  ;;  %v8417_v43 = vrot.slane %v16329_v54, 4  ;;  %v8440_v14 = vperm.slane %v8432_v1, %v13468_v53 }
 0xaf7   : > { %v16364_v37 = vpop.trf.xlu0  ;;  %v8465_v29 = vrot.slane %v8436_v23, 4  ;;  %v8241_v4 = vrot.slane %v8212_v12, 4 }
 0xaf8   : > { %v16369_v59 = vsel %vm1282_vm0, %v8216_v5, %v8255_v10  ;;  %v12108_v25 = vpop.trf.xlu1 }
 0xaf9   : > { %v8306_v44 = vsel %vm1282_vm0, %v8305_v13, %v12108_v25  ;;  %v8307_v41 = vrot.slane %v12108_v25, 4  ;;  %v8243_v25 = vrot.slane %v8200_v48, 4 }
 0xafa   : > { %v8312_v49 = vperm.slane %v8306_v44, %v13468_v53 }
 0xafb   : > { %v8308_v8 = vsel %vm1282_vm0, %v12118_v17, %v8307_v41  ;;  %v8477_v41 = vrot.slane %v8440_v14, 4  ;;  %v8244_v30 = vsel %vm1282_vm0, %v8212_v12, %v8243_v25 }
 0xafc   : > { %v8316_v24 = vperm.slane %v8308_v8, %v13468_v53  ;;  %v8354_v19 = vsel %vm1282_vm0, %v8353_v58, %v8312_v49  ;;  %v8355_v5 = vrot.slane %v8312_v49, 4  ;;  %v8242_v49 = vsel %vm1282_vm0, %v8241_v4, %v8200_v48 }
 0xafd   : > { %v16383_v2 = vpop.trf.xlu2  ;;  %v8105_v48 = vrot.slane %v16343_v32, 4  ;;  %v16419_v12 = vperm.slane %v8242_v49, %v13487_v6  ;;  %v16438_v25 = vperm.slane %v8354_v19, %v13487_v6  ;;  %v8217_v4 = vrot.slane %v16358_v42, 4 }
 0xafe   : > { %v8356_v52 = vsel %vm1282_vm0, %v8324_v28, %v8355_v5  ;;  %v8366_v33 = vsel %vm1282_vm0, %v8365_v16, %v8316_v24  ;;  %v8367_v17 = vrot.slane %v8316_v24, 4  ;;  %v16414_v5 = vperm.slane %v16346_v51, %v13487_v6 }
 0xaff   : > { %v16392_v55 = vpop.trf.xlu0  ;;  %v8119_v51 = vrot.slane %v16364_v37, 4 }
 0xb00   : > { %v8368_v10 = vsel %vm1282_vm0, %v8328_v15, %v8367_v17  ;;  %v12109_v13 = vpop.trf.xlu1 }
 0xb01   : > { %v8418_v40 = vsel %vm1282_vm0, %v8417_v43, %v12109_v13  ;;  %v8419_v22 = vrot.slane %v12109_v13, 4 }
 0xb02   : > { %v8424_v28 = vperm.slane %v8418_v40, %v13468_v53 }
 0xb03   : > { %v8420_v44 = vsel %vm1282_vm0, %v16329_v54, %v8419_v22  ;;  %v16410_v54 = vperm.slane %v16339_v57, %v13487_v6  ;;  %v16426_v57 = vperm.slane %v16349_v7, %v13487_v6  ;;  %v8183_v7 = vrot.slane %v16414_v5, 4 }
 0xb04   : > { %v8428_v58 = vperm.slane %v8420_v44, %v13468_v53  ;;  %v8466_v56 = vsel %vm1282_vm0, %v8465_v29, %v8424_v28  ;;  %v8467_v15 = vrot.slane %v8424_v28, 4  ;;  %v16445_v28 = vperm.slane %v16362_v45, %v13487_v6 }
 0xb05   : > { %v16401_v11 = vpop.trf.xlu2 }
 0xb06   : > { %v8468_v8 = vsel %vm1282_vm0, %v8436_v23, %v8467_v15  ;;  %v16406_v16 = vsel %vm1282_vm0, %v8477_v41, %v8428_v58  ;;  %v8479_v24 = vrot.slane %v8428_v58, 4  ;;  %v16422_v23 = vperm.slane %v8244_v30, %v13487_v6 }
 0xb07   : > { %v16430_v40 = vpop.trf.xlu0  ;;  %v16457_v15 = vperm.slane %v8356_v52, %v13487_v6  ;;  %v17626_v46 = vrot.slane %v16445_v28, 4 }
 0xb08   : > { %v8480_v1 = vsel %vm1282_vm0, %v8440_v14, %v8479_v24  ;;  %v12111_v17 = vpop.trf.xlu1  ;;  %v16434_v14 = vperm.slane %v16353_v47, %v13487_v6  ;;  %v16451_v47 = vperm.slane %v16369_v59, %v13487_v6  ;;  %v16461_v24 = vperm.slane %v8366_v33, %v13487_v6 }
 0xb09   : > { %v8107_v43 = vrot.slane %v12111_v17, 4  ;;  %v8106_v13 = vsel %vm1282_vm0, %v8105_v48, %v12111_v17  ;;  %v8329_v48 = vrot.slane %v16383_v2, 4  ;;  %v8343_v59 = vrot.slane %v16430_v40, 4 }
 0xb0b   : > { %v8108_v29 = vsel %vm1282_vm0, %v16343_v32, %v8107_v43  ;;  %v8112_v32 = vperm.slane %v8106_v13, %v13468_v53  ;;  %v16467_v43 = vperm.slane %v8368_v10, %v13487_v6  ;;  %v16470_v13 = vperm.slane %v8468_v8, %v13487_v6 }
 0xb0c   : > { %v8116_v44 = vperm.slane %v8108_v29, %v13468_v53  ;;  %v16479_v10 = vperm.slane %v8466_v56, %v13487_v6 }
 0xb0d   : > { %v12126_v58 = vpop.trf.xlu2  ;;  %v8155_v33 = vrot.slane %v8112_v32, 4 }
 0xb0e   : > { %v8167_v45 = vrot.slane %v8116_v44, 4  ;;  %v8117_v49 = vrot.slane %v12126_v58, 4  ;;  %v8120_v30 = vsel %vm1282_vm0, %v12126_v58, %v8119_v51  ;;  %v8231_v51 = vrot.slane %v16392_v55, 4 }
 0xb0f   : > { %v8128_v17 = vperm.slane %v8120_v30, %v13468_v53 }
 0xb10   : > { %v8118_v52 = vsel %vm1282_vm0, %v8117_v49, %v16364_v37  ;;  %v12112_v29 = vpop.trf.xlu1 }
 0xb11   : > { %v8124_v58 = vperm.slane %v8118_v52, %v13468_v53  ;;  %v8165_v26 = vrot.slane %v8128_v17, 4  ;;  %v8168_v36 = vsel %vm1282_vm0, %v8128_v17, %v8167_v45  ;;  %v8218_v8 = vsel %vm1282_vm0, %v8217_v4, %v12112_v29  ;;  %v16492_v17 = vpop.trf.xlu0 }
 0xb12   : > { %v8219_v61 = vrot.slane %v12112_v29, 4  ;;  %v16488_v45 = vperm.slane %v8168_v36, %v13487_v6  ;;  %v16495_v4 = vperm.slane %v8480_v1, %v13487_v6  ;;  %v8191_v29 = vrot.slane %v16434_v14, 4 }
 0xb13   : > { %v8156_v37 = vsel %vm1282_vm0, %v8124_v58, %v8155_v33  ;;  %v8166_v49 = vsel %vm1282_vm0, %v8165_v26, %v8116_v44  ;;  %v8153_v52 = vrot.slane %v8124_v58, 4  ;;  %v8224_v26 = vperm.slane %v8218_v8, %v13468_v53 }
 0xb14   : > { %v8164_v19 = vperm.slane %v8156_v37, %v13487_v6  ;;  %v8220_v56 = vsel %vm1282_vm0, %v16358_v42, %v8219_v61  ;;  %v16501_v58 = vperm.slane %v8166_v49, %v13487_v6  ;;  %v8187_v61 = vrot.slane %v16426_v57, 4 }
 0xb15   : > { %v8228_v44 = vperm.slane %v8220_v56, %v13468_v53  ;;  %v12127_v33 = vpop.trf.xlu2  ;;  %v8154_v8 = vsel %vm1282_vm0, %v8153_v52, %v8112_v32 }
 0xb16   : > { %v8229_v36 = vrot.slane %v12127_v33, 4  ;;  %v8232_v37 = vsel %vm1282_vm0, %v12127_v33, %v8231_v51  ;;  %v8184_v1 = vsel %vm1282_vm0, %v8164_v19, %v8183_v7  ;;  %v8267_v33 = vrot.slane %v8224_v26, 4 }
 0xb17   : > { %v8240_v60 = vperm.slane %v8232_v37, %v13468_v53  ;;  %v8279_v22 = vrot.slane %v8228_v44, 4  ;;  %v16517_v7 = vsel %vm1282_vm0, %v16488_v45, %v8191_v29  ;;  %v8557_v56 = vshrl.u32 %v8184_v1, 16 }
 0xb18   : > { %v8230_v49 = vsel %vm1282_vm0, %v8229_v36, %v16392_v55  ;;  %v12113_v51 = vpop.trf.xlu1  ;;  %v8181_v36 = vrot.slane %v8164_v19, 4  ;;  %v16523_v37 = vperm.slane %v8154_v8, %v13487_v6  ;;  %v16530_v30 = vsel %vm1282_vm0, %v16501_v58, %v8187_v61 }
 0xb19   : > { %v8236_v42 = vperm.slane %v8230_v49, %v13468_v53  ;;  %v8330_v32 = vsel %vm1282_vm0, %v8329_v48, %v12113_v51  ;;  %v8331_v52 = vrot.slane %v12113_v51, 4  ;;  %v8277_v49 = vrot.slane %v8240_v60, 4 }
 0xb1a   : > { %v8280_v48 = vsel %vm1282_vm0, %v8240_v60, %v8279_v22  ;;  %v16534_v51 = vperm.slane %v8330_v32, %v13468_v53  ;;  %v8303_v8 = vrot.slane %v16451_v47, 4 }
 0xb1b   : > { %v8265_v41 = vrot.slane %v8236_v42, 4  ;;  %v8268_v55 = vsel %vm1282_vm0, %v8236_v42, %v8267_v33  ;;  %v8332_v29 = vsel %vm1282_vm0, %v16383_v2, %v8331_v52  ;;  %v17621_v52 = vrot.slane %v16422_v23, 4 }
 0xb1c   : > { %v8276_v50 = vperm.slane %v8268_v55, %v13487_v6  ;;  %v16537_v19 = vperm.slane %v8332_v29, %v13468_v53  ;;  %v8182_v29 = vsel %vm1282_vm0, %v8181_v36, %v16414_v5  ;;  %v8278_v31 = vsel %vm1282_vm0, %v8277_v49, %v8228_v44 }
 0xb1d   : > { %v12128_v42 = vpop.trf.xlu2  ;;  %v8266_v33 = vsel %vm1282_vm0, %v8265_v41, %v8224_v26  ;;  %v16568_v49 = vperm.slane %v8280_v48, %v13487_v6 }
 0xb1e   : > { %v8341_v55 = vrot.slane %v12128_v42, 4  ;;  %v8344_v2 = vsel %vm1282_vm0, %v12128_v42, %v8343_v59  ;;  %v8296_v61 = vsel %vm1282_vm0, %v8276_v50, %v17621_v52  ;;  %v8391_v60 = vrot.slane %v16537_v19, 4 }
 0xb1f   : > { %v8352_v22 = vperm.slane %v8344_v2, %v13468_v53  ;;  %v8558_v32 = vshrl.u32 %v8296_v61, 16  ;;  %v8293_v34 = vrot.slane %v8276_v50, 4  ;;  %v17622_v59 = vrot.slane %v16410_v54, 4 }
 0xb20   : > { %v8342_v41 = vsel %vm1282_vm0, %v8341_v55, %v16430_v40  ;;  %v12114_v26 = vpop.trf.xlu1  ;;  %v17623_v2 = vrot.slane %v16401_v11, 4  ;;  %v8555_v21 = vpack.i.b16 %v8296_v61, %v8184_v1  ;;  %v16561_v5 = vperm.slane %v8266_v33, %v13487_v6 }
 0xb21   : > { %v8180_v42 = vsel %vm1282_vm0, %v16523_v37, %v17622_v59  ;;  %v8348_v52 = vperm.slane %v8342_v41, %v13468_v53  ;;  %v8392_v44 = vsel %vm1282_vm0, %v8352_v22, %v8391_v60  ;;  %v8443_v40 = vrot.slane %v12114_v26, 4 }
 0xb22   : > { %v8442_v63 = vsel %vm1282_vm0, %v17623_v2, %v12114_v26  ;;  %v8559_v36 = vpack.i.b16 %v8558_v32, %v8557_v56  ;;  %v8379_v55 = vrot.slane %v16534_v51, 4  ;;  %v8294_v41 = vsel %vm1282_vm0, %v8293_v34, %v16422_v23 }
 0xb23   : > { %v16565_v50 = vperm.slane %v8442_v63, %v13468_v53  ;;  %v8549_v59 = vshrl.u32 %v8182_v29, 16  ;;  %v16574_v1 = vperm.slane %v8278_v31, %v13487_v6  ;;  %v8389_v33 = vrot.slane %v8352_v22, 4 }
 0xb24   : > { %v8444_v61 = vsel %vm1282_vm0, %v16401_v11, %v8443_v40  ;;  %12130 = vxpose.binary.xlu1.c.b16.start.end [1/2] (short) (narrow) %v8559_v36, %v8555_v21, 16  ;;  %v8541_v63 = vshrl.u32 %v8180_v42, 16  ;;  %v8377_v60 = vrot.slane %v8348_v52, 4  ;;  %v8380_v56 = vsel %vm1282_vm0, %v8348_v52, %v8379_v55 }
 0xb25   : > { %v16580_v48 = vperm.slane %v8392_v44, %v13487_v6  ;;  %v16583_v32 = vperm.slane %v8444_v61, %v13468_v53  ;;  %v12129_v34 = vpop.trf.xlu2  ;;  %v8491_v23 = vrot.slane %v16565_v50, 4  ;;  %v8550_v31 = vshrl.u32 %v8294_v41, 16 }
 0xb26   : > { %v17624_v22 = vrot.slane %v16419_v12, 4  ;;  %v8453_v21 = vrot.slane %v12129_v34, 4  ;;  %v8547_v2 = vpack.i.b16 %v8294_v41, %v8182_v29  ;;  %v17625_v44 = vrot.slane %v16492_v17, 4 }
 0xb27   : > { %v8503_v26 = vrot.slane %v16583_v32, 4  ;;  %v8551_v36 = vpack.i.b16 %v8550_v31, %v8549_v59  ;;  %v8300_v35 = vsel %vm1282_vm0, %v16574_v1, %v17626_v46  ;;  %v8297_v46 = vrot.slane %v16574_v1, 4 }
 0xb28   : > { %v8292_v11 = vsel %vm1282_vm0, %v16561_v5, %v17624_v22  ;;  %v8456_v40 = vsel %vm1282_vm0, %v12129_v34, %v17625_v44  ;;  %v8454_v61 = vsel %vm1282_vm0, %v8453_v21, %v16492_v17  ;;  %v8571_v41 = vpack.i.b16 %v8300_v35, %v16530_v30 }
 0xb29   : > { %v8542_v52 = vshrl.u32 %v8292_v11, 16  ;;  %v8539_v55 = vpack.i.b16 %v8292_v11, %v8180_v42  ;;  %v8460_v27 = vperm.slane %v8454_v61, %v13468_v53  ;;  %v16602_v29 = vperm.slane %v8456_v40, %v13468_v53  ;;  %12136 = vxpose.binary.xlu2.c.b16.start.end [1/2] (short) (narrow) %v8551_v36, %v8547_v2, 16 }
 0xb2a   : > { %v8388_v34 = vperm.slane %v8380_v56, %v13487_v6  ;;  %v8573_v42 = vshrl.u32 %v16530_v30, 16  ;;  %v8574_v59 = vshrl.u32 %v8300_v35, 16  ;;  %v16609_v17 = vsel %vm1282_vm0, %v16568_v49, %v8303_v8 }
 0xb2b   : > { %v8543_v22 = vpack.i.b16 %v8542_v52, %v8541_v63  ;;  %v8301_v63 = vrot.slane %v16568_v49, 4  ;;  %v8492_v31 = vsel %vm1282_vm0, %v8460_v27, %v8491_v23  ;;  %v8587_v11 = vpack.i.b16 %v16609_v17, %v16517_v7 }
 0xb2c   : > { %v8390_v56 = vsel %vm1282_vm0, %v8389_v33, %v16537_v19  ;;  %v8413_v30 = vrot.slane %v16580_v48, 4  ;;  %v8500_v35 = vperm.slane %v8492_v31, %v13487_v6  ;;  %v8575_v21 = vpack.i.b16 %v8574_v59, %v8573_v42 }
 0xb2d   : > { %12133 = vxpose.binary.xlu0.c.b16.start.end [1/2] (short) (narrow) %v8543_v22, %v8539_v55, 16  ;;  %v8378_v8 = vsel %vm1282_vm0, %v8377_v60, %v16534_v51  ;;  %v8504_v49 = vsel %vm1282_vm0, %v16602_v29, %v8503_v26  ;;  %v8589_v1 = vshrl.u32 %v16517_v7, 16  ;;  %v8590_v23 = vshrl.u32 %v16609_v17, 16 }
 0xb2e   : > { %v8177_v2 = vrot.slane %v16523_v37, 4  ;;  %v8289_v52 = vrot.slane %v16561_v5, 4  ;;  %v17627_v19 = vrot.slane %v16457_v15, 4  ;;  %v17628_v44 = vrot.slane %v16470_v13, 4 }
 0xb2f   : > { %v8501_v60 = vrot.slane %v16602_v29, 4  ;;  %v8591_v26 = vpack.i.b16 %v8590_v23, %v8589_v1  ;;  %v17629_v61 = vrot.slane %v16488_v45, 4  ;;  %v8489_v29 = vrot.slane %v8460_v27, 4 }
 0xb30   : > { %v16631_v33 = vsel %vm1282_vm0, %v8388_v34, %v17627_v19  ;;  %v16636_v51 = vsel %vm1282_vm0, %v8500_v35, %v17628_v44  ;;  %v8178_v5 = vsel %vm1282_vm0, %v8177_v2, %v16410_v54  ;;  %v8290_v36 = vsel %vm1282_vm0, %v8289_v52, %v16419_v12 }
 0xb31   : > { %v8619_v40 = vpack.i.b16 %v16636_v51, %v16631_v33  ;;  %v8621_v37 = vshrl.u32 %v16631_v33, 16  ;;  %v8622_v55 = vshrl.u32 %v16636_v51, 16  ;;  %v16651_v22 = vsel %vm1282_vm0, %v17629_v61, %v16434_v14 }
 0xb32   : > { %v8512_v42 = vperm.slane %v8504_v49, %v13487_v6  ;;  %v8533_v59 = vshrl.u32 %v8178_v5, 16  ;;  %v16656_v31 = vsel %vm1282_vm0, %v8301_v63, %v16451_v47  ;;  %v8581_v1 = vshrl.u32 %v16651_v22, 16 }
 0xb33   : > { %v8623_v54 = vpack.i.b16 %v8622_v55, %v8621_v37  ;;  %v8579_v12 = vpack.i.b16 %v16656_v31, %v16651_v22  ;;  %v8582_v23 = vshrl.u32 %v16656_v31, 16  ;;  %v8534_v45 = vshrl.u32 %v8290_v36, 16 }
 0xb34   : > { %v17630_v14 = vrot.slane %v16501_v58, 4  ;;  %v8298_v49 = vsel %vm1282_vm0, %v8297_v46, %v16445_v28  ;;  %v8415_v47 = vrot.slane %v16467_v43, 4  ;;  %12145 = vxpose.binary.xlu1.c.b16.start.end [1/2] (short) (narrow) %v8575_v21, %v8571_v41, 16  ;;  %v8527_v58 = vrot.slane %v16495_v4, 4 }
 0xb35   : > { %v8583_v63 = vpack.i.b16 %v8582_v23, %v8581_v1  ;;  %v8566_v19 = vshrl.u32 %v8298_v49, 16  ;;  %v8517_v37 = vrot.slane %v8500_v35, 4  ;;  %v8490_v28 = vsel %vm1282_vm0, %v8489_v29, %v16565_v50 }
 0xb36   : > { %v16666_v27 = vsel %vm1282_vm0, %v17630_v14, %v16426_v57  ;;  %v16675_v44 = vsel %vm1282_vm0, %v16580_v48, %v8415_v47  ;;  %v8405_v57 = vrot.slane %v8388_v34, 4  ;;  %v8525_v46 = vrot.slane %v8512_v42, 4 }
 0xb37   : > { %v8563_v2 = vpack.i.b16 %v8298_v49, %v16666_v27  ;;  %v8565_v52 = vshrl.u32 %v16666_v27, 16  ;;  %v8531_v55 = vpack.i.b16 %v8290_v36, %v8178_v5  ;;  %v8535_v21 = vpack.i.b16 %v8534_v45, %v8533_v59 }
 0xb38   : > { %v8528_v61 = vsel %vm1282_vm0, %v8512_v42, %v8527_v58  ;;  %v8406_v1 = vsel %vm1282_vm0, %v8405_v57, %v16457_v15  ;;  %v8518_v23 = vsel %vm1282_vm0, %v8517_v37, %v16470_v13  ;;  %v8653_v34 = vshrl.u32 %v16675_v44, 16 }
 0xb39   : > { %v8567_v41 = vpack.i.b16 %v8566_v19, %v8565_v52  ;;  %v8651_v14 = vpack.i.b16 %v8528_v61, %v16675_v44  ;;  %v8654_v35 = vshrl.u32 %v8528_v61, 16  ;;  %v8611_v27 = vpack.i.b16 %v8518_v23, %v8406_v1  ;;  %12142 = vxpose.binary.xlu2.c.b16.start.end [1/2] (short) (narrow) %v8535_v21, %v8531_v55, 16 }
 0xb3a   : > { %v8396_v50 = vperm.slane %v8390_v56, %v13487_v6  ;;  %v8502_v5 = vsel %vm1282_vm0, %v8501_v60, %v16583_v32  ;;  %v8613_v36 = vshrl.u32 %v8406_v1, 16  ;;  %v8614_v29 = vshrl.u32 %v8518_v23, 16 }
 0xb3b   : > { %v8515_v42 = vrot.slane %v16479_v10, 4  ;;  %v8655_v15 = vpack.i.b16 %v8654_v35, %v8653_v34  ;;  %v8384_v59 = vperm.slane %v8378_v8, %v13487_v6  ;;  %v8496_v13 = vperm.slane %v8490_v28, %v13487_v6 }
 0xb3c   : > { %v8615_v45 = vpack.i.b16 %v8614_v29, %v8613_v36  ;;  %v8414_v32 = vsel %vm1282_vm0, %v8413_v30, %v16467_v43  ;;  %v8526_v56 = vsel %vm1282_vm0, %v8525_v46, %v16495_v4  ;;  %v17631_v60 = vrot.slane %v16438_v25, 4  ;;  %v17640_v36 = vld [vmem:[#allocation71_spill] sm:$0xff]  ;;  %v17641_v29 = vld [vmem:[#allocation44_spill] sm:$0xff] }
 0xb3d   : > { %12139 = vxpose.binary.xlu0.c.b16.start.end [1/2] (short) (narrow) %v8591_v26, %v8587_v11, 16  ;;  %v8516_v8 = vsel %vm1282_vm0, %v8496_v13, %v8515_v42  ;;  %v8643_v47 = vpack.i.b16 %v8526_v56, %v8414_v32  ;;  %v8645_v52 = vshrl.u32 %v8414_v32, 16  ;;  %v8646_v11 = vshrl.u32 %v8526_v56, 16  ;;  %v17644_v42 = vld [vmem:[#allocation70_spill] sm:$0xff] }
 0xb3e   : > { %v8404_v49 = vsel %vm1282_vm0, %v8384_v59, %v17631_v60  ;;  %v8606_v17 = vshrl.u32 %v8516_v8, 16  ;;  %v8484_v48 = vperm.slane %v16406_v16, %v13487_v6  ;;  %v8409_v26 = vrot.slane %v8396_v50, 4 }
 0xb3f   : > { %v8603_v19 = vpack.i.b16 %v8516_v8, %v8404_v49  ;;  %v8605_v7 = vshrl.u32 %v8404_v49, 16  ;;  %v8647_v30 = vpack.i.b16 %v8646_v11, %v8645_v52  ;;  %v8411_v4 = vrot.slane %v16461_v24, 4 }
 0xb40   : > { %v8508_v44 = vperm.slane %v8502_v5, %v13487_v6  ;;  %v8523_v57 = vrot.slane %v8484_v48, 4  ;;  %v8410_v37 = vsel %vm1282_vm0, %v8409_v26, %v16461_v24  ;;  %v8401_v21 = vrot.slane %v8384_v59, 4 }
 0xb41   : > { %v8607_v43 = vpack.i.b16 %v8606_v17, %v8605_v7  ;;  %v8412_v58 = vsel %vm1282_vm0, %v8396_v50, %v8411_v4  ;;  %v8513_v34 = vrot.slane %v8496_v13, 4  ;;  %v17634_v22 = vpack.i.bf16 %v15968_v18, %v15966_v0 }
 0xb42   : > { %v8524_v28 = vsel %vm1282_vm0, %v8508_v44, %v8523_v57  ;;  %v8637_v46 = vshrl.u32 %v8412_v58, 16  ;;  %v8521_v61 = vrot.slane %v8508_v44, 4  ;;  %v8402_v23 = vsel %vm1282_vm0, %v8401_v21, %v16438_v25 }
 0xb43   : > { %v8635_v16 = vpack.i.b16 %v8524_v28, %v8412_v58  ;;  %v8638_v55 = vshrl.u32 %v8524_v28, 16  ;;  %v8514_v33 = vsel %vm1282_vm0, %v8513_v34, %v16479_v10  ;;  %v8597_v50 = vshrl.u32 %v8402_v23, 16 }
 0xb44   : > { %12154 = vxpose.binary.xlu1.c.b16.start.end [1/2] (short) (narrow) %v8623_v54, %v8619_v40, 16  ;;  %v8522_v24 = vsel %vm1282_vm0, %v8521_v61, %v8484_v48  ;;  %v8629_v40 = vshrl.u32 %v8410_v37, 16  ;;  %v8595_v35 = vpack.i.b16 %v8514_v33, %v8402_v23  ;;  %v8598_v5 = vshrl.u32 %v8514_v33, 16 }
 0xb45   : > { %v8639_v1 = vpack.i.b16 %v8638_v55, %v8637_v46  ;;  %v8627_v51 = vpack.i.b16 %v8522_v24, %v8410_v37  ;;  %v8630_v54 = vshrl.u32 %v8522_v24, 16  ;;  %v17632_v25 = vpack.i.bf16 %v15944_v38, %v15937_v3  ;;  %v17639_v3 = vld [vmem:[#allocation62_spill] sm:$0xff] }
 0xb46   : > { %v17633_v10 = vpack.i.bf16 %v15913_v39, %v15915_v20  ;;  %v12180_v31 = vpack.i.bf16 %v16213_v9, %v15984_v62  ;;  %v17642_v39 = vpack.i.bf16 %v17640_v36, %v17641_v29  ;;  %v17643_v20 = vld [vmem:[#allocation59_spill] sm:$0xff] }
 0xb47   : > { %v12184_v0 = vpack.i.bf16 %v17644_v42, %v17643_v20 }
 0xb49   : > { %12151 = vxpose.binary.xlu2.c.b16.start.end [1/2] (short) (narrow) %v8567_v41, %v8563_v2, 16  ;;  %v8631_v2 = vpack.i.b16 %v8630_v54, %v8629_v40  ;;  %v8599_v41 = vpack.i.b16 %v8598_v5, %v8597_v50 }
 0xb4d   : > { %12148 = vxpose.binary.xlu0.c.b16.start.end [1/2] (short) (narrow) %v8583_v63, %v8579_v12, 16  ;;  %v17635_v12 = vld [vmem:[#allocation58_spill] sm:$0xff]  ;;  %v17636_v63 = vld [vmem:[#allocation57_spill] sm:$0xff] }
 0xb54   : > { %12163 = vxpose.binary.xlu1.c.b16.start.end [1/2] (short) (narrow) %v8655_v15, %v8651_v14, 16  ;;  %v17637_v14 = vpack.i.bf16 %v17635_v12, %v17636_v63 }
 0xb59   : > { %12160 = vxpose.binary.xlu2.c.b16.start.end [1/2] (short) (narrow) %v8615_v45, %v8611_v27, 16  ;;  %v17638_v27 = vld [vmem:[#allocation63_spill] sm:$0xff] }
 0xb5a   : > { %v12202_v38 = vpack.i.bf16 %v17639_v3, %v17638_v27 }
 0xb5d   : > { %12157 = vxpose.binary.xlu0.c.b16.start.end [1/2] (short) (narrow) %v8607_v43, %v8603_v19, 16 }
 0xb64   : > { %12172 = vxpose.binary.xlu1.c.b16.start.end [1/2] (short) (narrow) %v8647_v30, %v8643_v47, 16 }
 0xb69   : > { %12169 = vxpose.binary.xlu2.c.b16.start.end [1/2] (short) (narrow) %v8639_v1, %v8635_v16, 16 }
 0xb6d   : > { %12166 = vxpose.binary.xlu0.c.b16.start.end [1/2] (short) (narrow) %v8599_v41, %v8595_v35, 16 }
 0xb74   : > { %12197 = vxpose.xlu1.b32.start [1/4] (short) (narrow) %v17632_v25, 16 }
 0xb79   : > { %12179 = vxpose.xlu2.b32.start [1/4] (short) (narrow) %v17633_v10, 16 }
 0xb7c   : > { %12199 = vxpose.xlu1.b32.cont [2/4] (short) (narrow) %v17634_v22, 16 }
 0xb7d   : > { %12175 = vxpose.binary.xlu0.c.b16.start.end [1/2] (short) (narrow) %v8631_v2, %v8627_v51, 16 }
 0xb81   : > { %12181 = vxpose.xlu2.b32.cont [2/4] (short) (narrow) %v12180_v31, 16 }
 0xb84   : > { %12201 = vxpose.xlu1.b32.cont [3/4] (short) (narrow) %v17637_v14, 16 }
 0xb89   : > { %12183 = vxpose.xlu2.b32.cont [3/4] (short) (narrow) %v17642_v39, 16 }
 0xb8c   : > { %12203 = vxpose.xlu1.b32.end [4/4] (short) (narrow) %v12202_v38, 16 }
 0xb91   : > { %12185 = vxpose.xlu2.b32.end [4/4] (short) (narrow) %v12184_v0, 16 }
 0xbca   : > { %v12137_v18 = vpop.trf.xlu2 }
 0xbcb   : > { %v9169_v19 = vrot.slane %v12137_v18, 4 }
 0xbd0   : > { %v12131_v15 = vpop.trf.xlu1 }
 0xbd1   : > { %v9175_v47 = vrot.slane %v12131_v15, 4 }
 0xbd2   : > { %v12138_v9 = vpop.trf.xlu2 }
 0xbd3   : > { %v9209_v17 = vrot.slane %v12138_v9, 4 }
 0xbd8   : > { %v12132_v59 = vpop.trf.xlu1 }
 0xbd9   : > { %v12134_v62 = vpop.trf.xlu0  ;;  %v9215_v7 = vrot.slane %v12132_v59, 4 }
 0xbda   : > { %v12143_v45 = vpop.trf.xlu2  ;;  %v9176_v11 = vsel %vm1282_vm0, %v9175_v47, %v12134_v62 }
 0xbdb   : > { %v9170_v43 = vsel %vm1282_vm0, %v9169_v19, %v12143_v45  ;;  %v9180_v4 = vperm.slane %v9176_v11, %v13468_v53 }
 0xbdc   : > { %v9174_v46 = vperm.slane %v9170_v43, %v13468_v53 }
 0xbdd   : > { %v9193_v61 = vrot.slane %v9180_v4, 4 }
 0xbdf   : > { %v9194_v33 = vsel %vm1282_vm0, %v9193_v61, %v9174_v46 }
 0xbe0   : > { %v12146_v32 = vpop.trf.xlu1  ;;  %v9198_v2 = vperm.slane %v9194_v33, %v13487_v6 }
 0xbe1   : > { %v12135_v13 = vpop.trf.xlu0 }
 0xbe2   : > { %v12144_v60 = vpop.trf.xlu2  ;;  %v9216_v30 = vsel %vm1282_vm0, %v9215_v7, %v12135_v13  ;;  %v9207_v14 = vrot.slane %v9198_v2, 4 }
 0xbe3   : > { %v9210_v37 = vsel %vm1282_vm0, %v9209_v17, %v12144_v60  ;;  %v9220_v55 = vperm.slane %v9216_v30, %v13468_v53 }
 0xbe4   : > { %v9214_v1 = vperm.slane %v9210_v37, %v13468_v53 }
 0xbe5   : > { %v9233_v51 = vrot.slane %v9220_v55, 4 }
 0xbe7   : > { %v9234_v54 = vsel %vm1282_vm0, %v9233_v51, %v9214_v1 }
 0xbe8   : > { %v12147_v8 = vpop.trf.xlu1  ;;  %v9238_v22 = vperm.slane %v9234_v54, %v13487_v6 }
 0xbe9   : > { %v12140_v56 = vpop.trf.xlu0 }
 0xbea   : > { %v9187_v52 = vrot.slane %v12140_v56, 4  ;;  %v12152_v26 = vpop.trf.xlu2  ;;  %v9247_v38 = vrot.slane %v9238_v22, 4 }
 0xbec   : > { %v9188_v48 = vsel %vm1282_vm0, %v9187_v52, %v12146_v32 }
 0xbed   : > { %v9192_v44 = vperm.slane %v9188_v48, %v13468_v53 }
 0xbef   : > { %v9199_v23 = vrot.slane %v9192_v44, 4 }
 0xbf0   : > { %v16752_v57 = vpop.trf.xlu1 }
 0xbf1   : > { %v12141_v49 = vpop.trf.xlu0  ;;  %v9255_v17 = vrot.slane %v16752_v57, 4 }
 0xbf2   : > { %v9227_v28 = vrot.slane %v12141_v49, 4  ;;  %v12153_v5 = vpop.trf.xlu2 }
 0xbf4   : > { %v9228_v24 = vsel %vm1282_vm0, %v9227_v28, %v12147_v8 }
 0xbf5   : > { %v9232_v35 = vperm.slane %v9228_v24, %v13468_v53 }
 0xbf7   : > { %v9239_v12 = vrot.slane %v9232_v35, 4 }
 0xbf8   : > { %v12156_v10 = vpop.trf.xlu1 }
 0xbf9   : > { %v12149_v58 = vpop.trf.xlu0  ;;  %v9295_v43 = vrot.slane %v12156_v10, 4 }
 0xbfa   : > { %v9181_v16 = vrot.slane %v12149_v58, 4  ;;  %v12161_v9 = vpop.trf.xlu2 }
 0xbfb   : > { %v9249_v30 = vrot.slane %v12161_v9, 4 }
 0xbfc   : > { %v9182_v21 = vsel %vm1282_vm0, %v9181_v16, %v12152_v26 }
 0xbfd   : > { %v9186_v34 = vperm.slane %v9182_v21, %v13468_v53 }
 0xbff   : > { %v9200_v40 = vsel %vm1282_vm0, %v9199_v23, %v9186_v34 }
 0xc00   : > { %v9204_v41 = vperm.slane %v9200_v40, %v13487_v6  ;;  %v12164_v60 = vpop.trf.xlu1 }
 0xc01   : > { %v12150_v50 = vpop.trf.xlu0  ;;  %v9267_v11 = vrot.slane %v12164_v60, 4 }
 0xc02   : > { %v9221_v25 = vrot.slane %v12150_v50, 4  ;;  %v9205_v27 = vrot.slane %v9204_v41, 4  ;;  %v9208_v36 = vsel %vm1282_vm0, %v9204_v41, %v9207_v14  ;;  %v12162_v47 = vpop.trf.xlu2 }
 0xc03   : > { %v9338_v18 = vshrl.u32 %v9208_v36, 16  ;;  %v9289_v44 = vrot.slane %v12162_v47, 4 }
 0xc04   : > { %v9222_v31 = vsel %vm1282_vm0, %v9221_v25, %v12153_v5  ;;  %v9206_v0 = vsel %vm1282_vm0, %v9205_v27, %v9198_v2 }
 0xc05   : > { %v9226_v63 = vperm.slane %v9222_v31, %v13468_v53  ;;  %v9332_v32 = vshrl.u32 %v9206_v0, 16 }
 0xc07   : > { %v9240_v3 = vsel %vm1282_vm0, %v9239_v12, %v9226_v63 }
 0xc08   : > { %v9244_v29 = vperm.slane %v9240_v3, %v13487_v6  ;;  %v12165_v52 = vpop.trf.xlu1 }
 0xc09   : > { %v12158_v39 = vpop.trf.xlu0  ;;  %v9307_v57 = vrot.slane %v12165_v52, 4 }
 0xc0a   : > { %v9245_v20 = vrot.slane %v9244_v29, 4  ;;  %v9248_v42 = vsel %vm1282_vm0, %v9244_v29, %v9247_v38  ;;  %v12170_v7 = vpop.trf.xlu2  ;;  %v9256_v4 = vsel %vm1282_vm0, %v9255_v17, %v12158_v39 }
 0xc0b   : > { %v9339_v15 = vshrl.u32 %v9248_v42, 16  ;;  %v9337_v62 = vpack.i.b16 %v9248_v42, %v9208_v36  ;;  %v9268_v58 = vsel %vm1282_vm0, %v9267_v11, %v12170_v7  ;;  %v9260_v46 = vperm.slane %v9256_v4, %v13468_v53 }
 0xc0c   : > { %v9246_v59 = vsel %vm1282_vm0, %v9245_v20, %v9238_v22  ;;  %v9272_v55 = vperm.slane %v9268_v58, %v13468_v53 }
 0xc0d   : > { %11205 = vmatmul.msk.bf16.vlgmr.msrb.gmra.mxu2 %vm3412_vm2, %v9337_v62  ;;  %v9331_v13 = vpack.i.b16 %v9246_v59, %v9206_v0  ;;  %v9340_v45 = vpack.i.b16 %v9339_v15, %v9338_v18  ;;  %v9333_v56 = vshrl.u32 %v9246_v59, 16  ;;  %v9273_v33 = vrot.slane %v9260_v46, 4 }
 0xc0e   : > { %v9279_v40 = vrot.slane %v9272_v55, 4 }
 0xc0f   : > { %11201 = vmatmul.msk.bf16.vlgmr.msrb.gmra.mxu0 %vm3412_vm2, %v9331_v13  ;;  %11207 = vmatmul.msk.bf16.vlgmr.msra.gmra.mxu3 %vm3412_vm2, %v9340_v45  ;;  %v9334_v49 = vpack.i.b16 %v9333_v56, %v9332_v32 }
 0xc10   : > { %v12173_v26 = vpop.trf.xlu1 }
 0xc11   : > { %v12159_v8 = vpop.trf.xlu0  ;;  %11203 = vmatmul.msk.bf16.vlgmr.msra.gmra.mxu1 %vm3412_vm2, %v9334_v49  ;;  %v9261_v16 = vrot.slane %v12173_v26, 4 }
 0xc12   : > { %v9296_v37 = vsel %vm1282_vm0, %v9295_v43, %v12159_v8  ;;  %v12171_v34 = vpop.trf.xlu2 }
 0xc13   : > { %v9300_v61 = vperm.slane %v9296_v37, %v13468_v53  ;;  %v9308_v50 = vsel %vm1282_vm0, %v9307_v57, %v12171_v34 }
 0xc14   : > { %v9312_v22 = vperm.slane %v9308_v50, %v13468_v53 }
 0xc15   : > { %v9313_v5 = vrot.slane %v9300_v61, 4 }
 0xc16   : > { %v9319_v3 = vrot.slane %v9312_v22, 4 }
 0xc18   : > { %v12174_v35 = vpop.trf.xlu1 }
 0xc19   : > { %v12167_v19 = vpop.trf.xlu0  ;;  %v9301_v25 = vrot.slane %v12174_v35, 4 }
 0xc1a   : > { %v9250_v28 = vsel %vm1282_vm0, %v9249_v30, %v12167_v19  ;;  %v12186_v58 = vpop.trf.xlu2 }
 0xc1b   : > { %v9254_v1 = vperm.slane %v9250_v28, %v13468_v53  ;;  %v12190_v37 = vunpack.i.h.bf16 %v12186_v58  ;;  %v12187_v28 = vunpack.i.l.bf16 %v12186_v58 }
 0xc1d   : > { %v9274_v2 = vsel %vm1282_vm0, %v9273_v33, %v9254_v1  ;;  %v5315_v57 = vrot.slane %v12190_v37, 4 }
 0xc1e   : > { %v9278_v31 = vperm.slane %v9274_v2, %v13487_v6 }
 0xc1f   : > { %v5316_v34 = vsel %vm1282_vm0, %v12187_v28, %v5315_v57 }
 0xc20   : > { %v9287_v36 = vrot.slane %v9278_v31, 4  ;;  %v5324_v33 = vperm.slane %v5316_v34, %v13468_v53 }
 0xc21   : > { %v12168_v48 = vpop.trf.xlu0 }
 0xc22   : > { %v9290_v21 = vsel %vm1282_vm0, %v9289_v44, %v12168_v48  ;;  %v12191_v2 = vpop.trf.xlu2 }
 0xc23   : > { %v9294_v51 = vperm.slane %v9290_v21, %v13468_v53  ;;  %v5313_v21 = vrot.slane %v12187_v28, 4 }
 0xc25   : > { %v9314_v10 = vsel %vm1282_vm0, %v9313_v5, %v9294_v51  ;;  %v5351_v5 = vrot.slane %v5324_v33, 4 }
 0xc26   : > { %v9318_v14 = vperm.slane %v9314_v10, %v13487_v6  ;;  %v12195_v10 = vunpack.i.h.bf16 %v12191_v2 }
 0xc28   : > { %v9327_v0 = vrot.slane %v9318_v14, 4 }
 0xc29   : > { %v12176_v23 = vpop.trf.xlu0 }
 0xc2a   : > { %v9262_v24 = vsel %vm1282_vm0, %v9261_v16, %v12176_v23  ;;  %v12204_v16 = vpop.trf.xlu1  ;;  %v5314_v23 = vsel %vm1282_vm0, %v5313_v21, %v12190_v37 }
 0xc2b   : > { %v9266_v54 = vperm.slane %v9262_v24, %v13468_v53  ;;  %v12208_v46 = vunpack.i.h.bf16 %v12204_v16  ;;  %v12205_v55 = vunpack.i.l.bf16 %v12204_v16  ;;  %v5320_v24 = vperm.slane %v5314_v23, %v13468_v53 }
 0xc2d   : > { %v9280_v41 = vsel %vm1282_vm0, %v9279_v40, %v9266_v54  ;;  %v5327_v61 = vrot.slane %v12208_v46, 4  ;;  %v5325_v1 = vrot.slane %v12205_v55, 4  ;;  %v5339_v50 = vrot.slane %v5320_v24, 4 }
 0xc2e   : > { %v9284_v12 = vperm.slane %v9280_v41, %v13487_v6 }
 0xc2f   : > { %v5326_v51 = vsel %vm1282_vm0, %v5325_v1, %v12208_v46  ;;  %v5328_v40 = vsel %vm1282_vm0, %v12205_v55, %v5327_v61 }
 0xc30   : > { %v9285_v29 = vrot.slane %v9284_v12, 4  ;;  %v9288_v42 = vsel %vm1282_vm0, %v9284_v12, %v9287_v36  ;;  %v5332_v54 = vperm.slane %v5326_v51, %v13468_v53  ;;  %v5336_v35 = vperm.slane %v5328_v40, %v13468_v53 }
 0xc31   : > { %v12177_v63 = vpop.trf.xlu0  ;;  %v9350_v59 = vshrl.u32 %v9288_v42, 16  ;;  %v12192_v12 = vunpack.i.l.bf16 %v12191_v2 }
 0xc32   : > { %v9302_v27 = vsel %vm1282_vm0, %v9301_v25, %v12177_v63  ;;  %v9286_v15 = vsel %vm1282_vm0, %v9285_v29, %v9278_v31  ;;  %v5337_v41 = vrot.slane %v5332_v54, 4  ;;  %v5349_v25 = vrot.slane %v5336_v35, 4 }
 0xc33   : > { %v9306_v38 = vperm.slane %v9302_v27, %v13468_v53  ;;  %v9344_v60 = vshrl.u32 %v9286_v15, 16  ;;  %v5340_v22 = vsel %vm1282_vm0, %v5332_v54, %v5339_v50  ;;  %v5352_v31 = vsel %vm1282_vm0, %v5336_v35, %v5351_v5 }
 0xc34   : > { %v5338_v63 = vsel %vm1282_vm0, %v5337_v41, %v5320_v24  ;;  %v5350_v27 = vsel %vm1282_vm0, %v5349_v25, %v5324_v33  ;;  %v5371_v29 = vrot.slane %v12195_v10, 4 }
 0xc35   : > { %v9320_v39 = vsel %vm1282_vm0, %v9319_v3, %v9306_v38  ;;  %v5360_v3 = vperm.slane %v5352_v31, %v13487_v6  ;;  %v5344_v38 = vperm.slane %v5338_v63, %v13487_v6  ;;  %v5356_v36 = vperm.slane %v5350_v27, %v13487_v6 }
 0xc36   : > { %v9324_v20 = vperm.slane %v9320_v39, %v13487_v6  ;;  %v5369_v39 = vrot.slane %v12192_v12, 4 }
 0xc38   : > { %v9328_v18 = vsel %vm1282_vm0, %v9324_v20, %v9327_v0  ;;  %v9325_v62 = vrot.slane %v9324_v20, 4  ;;  %v12209_v20 = vpop.trf.xlu1  ;;  %v5367_v0 = vrot.slane %v5360_v3, 4 }
 0xc39   : > { %v9349_v9 = vpack.i.b16 %v9328_v18, %v9288_v42  ;;  %v9351_v13 = vshrl.u32 %v9328_v18, 16  ;;  %v12213_v18 = vunpack.i.h.bf16 %v12209_v20 }
 0xc3a   : > { %v9326_v45 = vsel %vm1282_vm0, %v9325_v62, %v9318_v14  ;;  %v5348_v14 = vperm.slane %v5340_v22, %v13487_v6  ;;  %v5365_v62 = vrot.slane %v5356_v36, 4 }
 0xc3b   : > { %11206 = vmatmul.msk.bf16.gmra.mxu2 %vm3412_vm2, %v9349_v9  ;;  %v9343_v32 = vpack.i.b16 %v9326_v45, %v9286_v15  ;;  %v9352_v56 = vpack.i.b16 %v9351_v13, %v9350_v59  ;;  %v9345_v49 = vshrl.u32 %v9326_v45, 16  ;;  %v5361_v15 = vrot.slane %v5344_v38, 4 }
 0xc3c   : > { %v5363_v42 = vrot.slane %v5348_v14, 4  ;;  %v5370_v9 = vsel %vm1282_vm0, %v5369_v39, %v12195_v10  ;;  %v5372_v59 = vsel %vm1282_vm0, %v12192_v12, %v5371_v29  ;;  %v5368_v45 = vsel %vm1282_vm0, 0.0, %v5367_v0 }
 0xc3d   : > { %11202 = vmatmul.msk.bf16.gmra.mxu0 %vm3412_vm2, %v9343_v32  ;;  %11208 = vmatmul.msk.bf16.gmra.mxu3 %vm3412_vm2, %v9352_v56  ;;  %v9346_v8 = vpack.i.b16 %v9345_v49, %v9344_v60  ;;  %v5380_v32 = vperm.slane %v5372_v59, %v13468_v53  ;;  %v5362_v56 = vsel %vm1282_vm0, 0.0, %v5361_v15  ;;  %v5376_v49 = vperm.slane %v5370_v9, %v13468_v53 }
 0xc3e   : > { %v5364_v13 = vsel %vm1282_vm0, 0.0, %v5363_v42 }
 0xc3f   : > { %11204 = vmatmul.msk.bf16.gmra.mxu1 %vm3412_vm2, %v9346_v8  ;;  %v5430_v60 = vrot.slane %v5364_v13, 4  ;;  %v5366_v8 = vsel %vm1282_vm0, 0.0, %v5365_v62  ;;  %v5395_v28 = vrot.slane %v5376_v49, 4 }
 0xc8c   : > { %v9376_v47 = vpop.f32.mrf.mxu0 }
 0xc8e   : > { %v9409_v52 = vpop.f32.mrf.mxu1 }
 0xc90   : > { %v9442_v19 = vpop.f32.mrf.mxu2 }
 0xc91   : > { %v12214_v7 = vpack.i.bf16 %v9376_v47, %v9442_v19  ;;  %v5441_v47 = vrot.slane %v5368_v45, 4  ;;  %v12210_v19 = vunpack.i.l.bf16 %v12209_v20 }
 0xc92   : > { %v9475_v17 = vpop.f32.mrf.mxu3 }
 0xc93   : > { %v12232_v11 = vpack.i.bf16 %v9409_v52, %v9475_v17  ;;  %12215 = vxpose.xlu0.b32.start [1/4] (short) (narrow) %v12214_v7, 16  ;;  %v5383_v52 = vrot.slane %v12213_v18, 4  ;;  %v5425_v7 = vsel %vm1282_vm0, %v5363_v42, %v5344_v38  ;;  %v5431_v17 = vsel %vm1282_vm0, %v5430_v60, %v5362_v56 }
 0xc94   : > { %v9378_v48 = vpop.f32.mrf.mxu0  ;;  %v5442_v55 = vsel %vm1282_vm0, %v5441_v47, %v5366_v8 }
 0xc95   : > { %12233 = vxpose.xlu2.b32.start [1/4] (short) (narrow) %v12232_v11, 16  ;;  %v5436_v11 = vsel %vm1282_vm0, %v5367_v0, %v5356_v36  ;;  %v5446_v2 = vperm.slane %v5442_v55, %v13468_v53 }
 0xc96   : > { %v9411_v30 = vpop.f32.mrf.mxu1  ;;  %v5440_v46 = vperm.slane %v5436_v11, %v13468_v53 }
 0xc97   : > { %v5459_v42 = vrot.slane %v5446_v2, 4 }
 0xc98   : > { %v9444_v26 = vpop.f32.mrf.mxu2  ;;  %v5461_v51 = vrot.slane %v5440_v46, 4 }
 0xc99   : > { %v12216_v43 = vpack.i.bf16 %v9378_v48, %v9444_v26  ;;  %v5407_v26 = vrot.slane %v5380_v32, 4 }
 0xc9a   : > { %v9477_v4 = vpop.f32.mrf.mxu3  ;;  %v5462_v63 = vsel %vm1282_vm0, %v5446_v2, %v5461_v51 }
 0xc9b   : > { %v12234_v44 = vpack.i.bf16 %v9411_v30, %v9477_v4  ;;  %12217 = vxpose.xlu0.b32.cont [2/4] (short) (narrow) %v12216_v43, 16  ;;  %v5435_v43 = vperm.slane %v5431_v17, %v13468_v53  ;;  %v5381_v30 = vrot.slane %v12210_v19, 4  ;;  %v5384_v4 = vsel %vm1282_vm0, %v12210_v19, %v5383_v52 }
 0xc9c   : > { %v5392_v16 = vperm.slane %v5384_v4, %v13468_v53  ;;  %v5470_v17 = vperm.slane %v5462_v63, %v13487_v6 }
 0xc9d   : > { %12235 = vxpose.xlu2.b32.cont [2/4] (short) (narrow) %v12234_v44, 16  ;;  %v5429_v44 = vperm.slane %v5425_v7, %v13468_v53  ;;  %v5382_v21 = vsel %vm1282_vm0, %v5381_v30, %v12213_v18  ;;  %v5447_v61 = vrot.slane %v5435_v43, 4 }
 0xc9e   : > { %v5388_v34 = vperm.slane %v5382_v21, %v13468_v53  ;;  %v5405_v24 = vrot.slane %v5392_v16, 4  ;;  %v5408_v33 = vsel %vm1282_vm0, %v5392_v16, %v5407_v26  ;;  %v5475_v4 = vrot.slane %v5470_v17, 4 }
 0xc9f   : > { %v5449_v1 = vrot.slane %v5429_v44, 4  ;;  %v5416_v54 = vperm.slane %v5408_v33, %v13487_v6  ;;  %v5448_v22 = vsel %vm1282_vm0, %v5447_v61, %v5429_v44 }
 0xca0   : > { %v5393_v35 = vrot.slane %v5388_v34, 4  ;;  %v5396_v50 = vsel %vm1282_vm0, %v5388_v34, %v5395_v28  ;;  %v5406_v5 = vsel %vm1282_vm0, %v5405_v24, %v5380_v32  ;;  %v16862_v20 = vperm.slane %v5448_v22, %v13487_v6 }
 0xca1   : > { %v5404_v41 = vperm.slane %v5396_v50, %v13487_v6  ;;  %v5412_v25 = vperm.slane %v5406_v5, %v13487_v6  ;;  %v5423_v10 = vrot.slane %v5416_v54, 4  ;;  %v5450_v12 = vsel %vm1282_vm0, %v5435_v43, %v5449_v1 }
 0xca2   : > { %v5394_v31 = vsel %vm1282_vm0, %v5393_v35, %v5376_v49  ;;  %v5458_v7 = vperm.slane %v5450_v12, %v13487_v6 }
 0xca3   : > { %v5400_v14 = vperm.slane %v5394_v31, %v13487_v6  ;;  %v5419_v27 = vrot.slane %v5404_v41, 4  ;;  %v5421_v3 = vrot.slane %v5412_v25, 4  ;;  %v5424_v38 = vsel %vm1282_vm0, 0.0, %v5423_v10 }
 0xca4   : > { %v5495_v39 = vrot.slane %v5424_v38, 4  ;;  %v5490_v0 = vsel %vm1282_vm0, %v5423_v10, %v5412_v25  ;;  %v5477_v50 = vrot.slane %v5458_v7, 4 }
 0xca5   : > { %v5417_v15 = vrot.slane %v5400_v14, 4  ;;  %v5420_v62 = vsel %vm1282_vm0, 0.0, %v5419_v27  ;;  %v5422_v9 = vsel %vm1282_vm0, 0.0, %v5421_v3  ;;  %v5479_v32 = vsel %vm1282_vm0, %v5419_v27, %v5400_v14 }
 0xca6   : > { %v5484_v45 = vrot.slane %v5420_v62, 4  ;;  %v5494_v56 = vperm.slane %v5490_v0, %v13468_v53  ;;  %v5496_v60 = vsel %vm1282_vm0, %v5495_v39, %v5422_v9  ;;  %v5483_v47 = vperm.slane %v5479_v32, %v13468_v53 }
 0xca7   : > { %v5418_v8 = vsel %vm1282_vm0, 0.0, %v5417_v15  ;;  %v5500_v52 = vperm.slane %v5496_v60, %v13468_v53  ;;  %v5478_v2 = vsel %vm1282_vm0, %v5470_v17, %v5477_v50 }
 0xca8   : > { %v5485_v19 = vsel %vm1282_vm0, %v5484_v45, %v5418_v8  ;;  %v5515_v11 = vrot.slane %v5494_v56, 4  ;;  %v5503_v30 = vrot.slane %v5483_v47, 4 }
 0xca9   : > { %v5489_v26 = vperm.slane %v5485_v19, %v13468_v53  ;;  %v5513_v43 = vrot.slane %v5500_v52, 4 }
 0xcaa   : > { %v5516_v44 = vsel %vm1282_vm0, %v5500_v52, %v5515_v11 }
 0xcab   : > { %v5504_v28 = vsel %vm1282_vm0, %v5489_v26, %v5503_v30  ;;  %v5524_v16 = vperm.slane %v5516_v44, %v13487_v6 }
 0xcac   : > { %v5512_v21 = vperm.slane %v5504_v28, %v13487_v6 }
 0xcad   : > { %v5529_v1 = vrot.slane %v5524_v16, 4 }
 0xcae   : > { %v5531_v5 = vrot.slane %v5512_v21, 4 }
 0xcaf   : > { %v5530_v24 = vsel %vm1282_vm0, %v5529_v1, %v5512_v21 }
 0xcb0   : > { %v5532_v41 = vsel %vm1282_vm0, %v5524_v16, %v5531_v5 }
 0xcb1   : > { %v12260_v25 = vpack.i.bf16 %v5532_v41, %v5478_v2 }
 0xcba   : > { %v9381_v48 = vpop.f32.mrf.mxu0 }
 0xcbc   : > { %v9414_v58 = vpop.f32.mrf.mxu1 }
 0xcbe   : > { %v9447_v37 = vpop.f32.mrf.mxu2 }
 0xcbf   : > { %v12218_v57 = vpack.i.bf16 %v9381_v48, %v9447_v37  ;;  %v5460_v48 = vsel %vm1282_vm0, %v5459_v42, %v5440_v46  ;;  %v5514_v37 = vsel %vm1282_vm0, %v5513_v43, %v5494_v56  ;;  %v5476_v46 = vsel %vm1282_vm0, %v5475_v4, %v5458_v7 }
 0xcc0   : > { %v9480_v23 = vpop.f32.mrf.mxu3  ;;  %v16883_v55 = vperm.slane %v5460_v48, %v13487_v6  ;;  %v16893_v34 = vperm.slane %v5514_v37, %v13487_v6 }
 0xcc1   : > { %v12236_v40 = vpack.i.bf16 %v9414_v58, %v9480_v23  ;;  %12219 = vxpose.xlu0.b32.cont [3/4] (short) (narrow) %v12218_v57, 16  ;;  %v5501_v58 = vrot.slane %v5489_v26, 4  ;;  %v5473_v57 = vrot.slane %v16862_v20, 4 }
 0xcc2   : > { %v9383_v36 = vpop.f32.mrf.mxu0 }
 0xcc3   : > { %12237 = vxpose.xlu2.b32.cont [3/4] (short) (narrow) %v12236_v40, 16  ;;  %v5502_v61 = vsel %vm1282_vm0, %v5501_v58, %v5483_v47  ;;  %v5474_v33 = vsel %vm1282_vm0, %v16883_v55, %v5473_v57  ;;  %v12255_v40 = vpack.i.bf16 %v5530_v24, %v5476_v46 }
 0xcc4   : > { %v9416_v59 = vpop.f32.mrf.mxu1  ;;  %v16890_v23 = vperm.slane %v5502_v61, %v13487_v6 }
 0xcc6   : > { %v9449_v29 = vpop.f32.mrf.mxu2  ;;  %v5527_v51 = vrot.slane %v16890_v23, 4 }
 0xcc7   : > { %v12220_v18 = vpack.i.bf16 %v9383_v36, %v9449_v29 }
 0xcc8   : > { %v9482_v13 = vpop.f32.mrf.mxu3  ;;  %v5528_v54 = vsel %vm1282_vm0, %v16893_v34, %v5527_v51 }
 0xcc9   : > { %v12238_v49 = vpack.i.bf16 %v9416_v59, %v9482_v13  ;;  %12221 = vxpose.xlu0.b32.end [4/4] (short) (narrow) %v12220_v18, 16  ;;  %v12250_v35 = vpack.i.bf16 %v5528_v54, %v5474_v33 }
 0xccb   : > { %12239 = vxpose.xlu2.b32.end [4/4] (short) (narrow) %v12238_v49, 16  ;;  %12251 = vrot.lane.b32.xlu1 %v12250_v35, %s12894_s30 }
 0xd34   : > { %12261 = vrot.lane.b32.xlu2 %v12260_v25, %s12895_s21 }
 0xd37   : > { %12256 = vrot.lane.b32.xlu0 %v12255_v40, %s12896_s29 }
 0xd4c   : > { %v12240_v10 = vpop.trf.xlu2 }
 0xd4d   : > { %v12244_v22 = vunpack.i.h.bf16 %v12240_v10  ;;  %v12241_v31 = vunpack.i.l.bf16 %v12240_v10 }
 0xd4f   : > { %v9627_v12 = vrot.slane %v12244_v22, 4  ;;  %v9625_v63 = vrot.slane %v12241_v31, 4 }
 0xd51   : > { %v9626_v14 = vsel %vm1282_vm0, %v9625_v63, %v12244_v22  ;;  %v9628_v27 = vsel %vm1282_vm0, %v12241_v31, %v9627_v12 }
 0xd52   : > { %v9632_v3 = vperm.slane %v9626_v14, %v13468_v53  ;;  %v9636_v38 = vperm.slane %v9628_v27, %v13468_v53 }
 0xd54   : > { %v12245_v36 = vpop.trf.xlu2  ;;  %v9637_v13 = vrot.slane %v9632_v3, 4  ;;  %v9649_v60 = vrot.slane %v9636_v38, 4 }
 0xd55   : > { %v12222_v29 = vpop.trf.xlu0  ;;  %v12249_v39 = vunpack.i.h.bf16 %v12245_v36  ;;  %v12246_v42 = vunpack.i.l.bf16 %v12245_v36 }
 0xd56   : > { %v12226_v0 = vunpack.i.h.bf16 %v12222_v29  ;;  %v12223_v18 = vunpack.i.l.bf16 %v12222_v29 }
 0xd57   : > { %v9683_v15 = vrot.slane %v12249_v39, 4  ;;  %v9681_v62 = vrot.slane %v12246_v42, 4 }
 0xd58   : > { %v9615_v9 = vrot.slane %v12226_v0, 4  ;;  %v9613_v59 = vrot.slane %v12223_v18, 4 }
 0xd59   : > { %v9682_v45 = vsel %vm1282_vm0, %v9681_v62, %v12249_v39  ;;  %v9684_v49 = vsel %vm1282_vm0, %v12246_v42, %v9683_v15 }
 0xd5a   : > { %v9614_v32 = vsel %vm1282_vm0, %v9613_v59, %v12226_v0  ;;  %v9616_v56 = vsel %vm1282_vm0, %v12223_v18, %v9615_v9  ;;  %v9688_v52 = vperm.slane %v9682_v45, %v13468_v53  ;;  %v9692_v48 = vperm.slane %v9684_v49, %v13468_v53 }
 0xd5b   : > { %v9620_v8 = vperm.slane %v9614_v32, %v13468_v53  ;;  %v9624_v47 = vperm.slane %v9616_v56, %v13468_v53 }
 0xd5c   : > { %v9693_v24 = vrot.slane %v9688_v52, 4  ;;  %v9705_v33 = vrot.slane %v9692_v48, 4 }
 0xd5d   : > { %v9639_v19 = vrot.slane %v9620_v8, 4  ;;  %v9651_v7 = vrot.slane %v9624_v47, 4  ;;  %v9638_v17 = vsel %vm1282_vm0, %v9637_v13, %v9620_v8  ;;  %v12227_v11 = vpop.trf.xlu0  ;;  %v9650_v43 = vsel %vm1282_vm0, %v9649_v60, %v9624_v47  ;;  %v11455_v47 = vld [vmem:[%s13306_s0 + $0x38] sm:$0xff] }
 0xd5e   : > { %v9644_v26 = vperm.slane %v9638_v17, %v13487_v6  ;;  %v12231_v30 = vunpack.i.h.bf16 %v12227_v11  ;;  %v12228_v58 = vunpack.i.l.bf16 %v12227_v11  ;;  %v9656_v16 = vperm.slane %v9650_v43, %v13487_v6  ;;  %9933 = vmatpush.bf16.msra.mxu0 %v11455_v47  ;;  %v11454_v43 = vld [vmem:[%s13306_s0 + $0x30] sm:$0xff] }
 0xd5f   : > { %v9640_v4 = vsel %vm1282_vm0, %v9632_v3, %v9639_v19  ;;  %v9652_v44 = vsel %vm1282_vm0, %v9636_v38, %v9651_v7 }
 0xd60   : > { %v9648_v37 = vperm.slane %v9640_v4, %v13487_v6  ;;  %v9660_v28 = vperm.slane %v9652_v44, %v13487_v6  ;;  %v9661_v57 = vrot.slane %v9644_v26, 4  ;;  %v9671_v46 = vrot.slane %v12231_v30, 4 }
 0xd61   : > { %v9669_v21 = vrot.slane %v12228_v58, 4  ;;  %v9665_v41 = vrot.slane %v9656_v16, 4 }
 0xd62   : > { %v9663_v61 = vrot.slane %v9648_v37, 4  ;;  %v9667_v1 = vrot.slane %v9660_v28, 4  ;;  %v9672_v40 = vsel %vm1282_vm0, %v12228_v58, %v9671_v46  ;;  %v9662_v2 = vsel %vm1282_vm0, 0.0, %v9661_v57  ;;  %9934 = vmatpush.bf16.msra.mxu0 %v11454_v43 }
 0xd63   : > { %v9670_v51 = vsel %vm1282_vm0, %v9669_v21, %v12231_v30  ;;  %v9680_v5 = vperm.slane %v9672_v40, %v13468_v53  ;;  %v9666_v39 = vsel %vm1282_vm0, 0.0, %v9665_v41  ;;  %v11452_v41 = vld [vmem:[%s13306_s0 + $0x20] sm:$0xff] }
 0xd64   : > { %v9664_v54 = vsel %vm1282_vm0, 0.0, %v9663_v61  ;;  %v9668_v35 = vsel %vm1282_vm0, 0.0, %v9667_v1  ;;  %v9676_v50 = vperm.slane %v9670_v51, %v13468_v53  ;;  %v9725_v15 = vsel %vm1282_vm0, %v9663_v61, %v9644_v26 }
 0xd65   : > { %v9730_v25 = vrot.slane %v9664_v54, 4  ;;  %v9741_v10 = vrot.slane %v9668_v35, 4  ;;  %v9707_v31 = vrot.slane %v9680_v5, 4  ;;  %v9706_v63 = vsel %vm1282_vm0, %v9705_v33, %v9680_v5  ;;  %v11453_v33 = vld [vmem:[%s13306_s0 + $0x28] sm:$0xff] }
 0xd66   : > { %v9695_v22 = vrot.slane %v9676_v50, 4  ;;  %v9694_v12 = vsel %vm1282_vm0, %v9693_v24, %v9676_v50  ;;  %v9712_v27 = vperm.slane %v9706_v63, %v13487_v6  ;;  %v9736_v62 = vsel %vm1282_vm0, %v9667_v1, %v9656_v16  ;;  %9935 = vmatpush.bf16.msra.mxu0 %v11453_v33 }
 0xd67   : > { %v9700_v14 = vperm.slane %v9694_v12, %v13487_v6  ;;  %v9731_v3 = vsel %vm1282_vm0, %v9730_v25, %v9662_v2  ;;  %v9708_v36 = vsel %vm1282_vm0, %v9692_v48, %v9707_v31  ;;  %v9742_v9 = vsel %vm1282_vm0, %v9741_v10, %v9666_v39 }
 0xd68   : > { %v9696_v38 = vsel %vm1282_vm0, %v9688_v52, %v9695_v22  ;;  %v16941_v29 = vperm.slane %v9731_v3, %v13468_v53  ;;  %v9716_v0 = vperm.slane %v9708_v36, %v13487_v6  ;;  %v9721_v13 = vrot.slane %v9712_v27, 4  ;;  %v11451_v36 = vld [vmem:[%s13306_s0 + $0x18] sm:$0xff] }
 0xd69   : > { %v9704_v42 = vperm.slane %v9696_v38, %v13487_v6  ;;  %v9717_v18 = vrot.slane %v9700_v14, 4  ;;  %v9729_v49 = vperm.slane %v9725_v15, %v13468_v53  ;;  %v9746_v8 = vperm.slane %v9742_v9, %v13468_v53  ;;  %v11450_v15 = vld [vmem:[%s13306_s0 + $0x10] sm:$0xff] }
 0xd6a   : > { %v9723_v45 = vrot.slane %v9716_v0, 4  ;;  %v9747_v32 = vrot.slane %v16941_v29, 4  ;;  %v9740_v7 = vperm.slane %v9736_v62, %v13468_v53  ;;  %v9722_v11 = vsel %vm1282_vm0, 0.0, %v9721_v13  ;;  %9936 = vmatpush.bf16.msra.mxu0 %v11452_v41 }
 0xd6b   : > { %v9719_v59 = vrot.slane %v9704_v42, 4  ;;  %v9718_v17 = vsel %vm1282_vm0, 0.0, %v9717_v18  ;;  %v9759_v37 = vrot.slane %v9746_v8, 4  ;;  %v9749_v12 = vrot.slane %v9729_v49, 4 }
 0xd6c   : > { %v9724_v60 = vsel %vm1282_vm0, 0.0, %v9723_v45  ;;  %v9748_v48 = vsel %vm1282_vm0, %v9747_v32, %v9729_v49  ;;  %v9790_v26 = vsel %vm1282_vm0, %v9723_v45, %v9712_v27  ;;  %v9761_v24 = vrot.slane %v9740_v7, 4  ;;  %v11449_v45 = vld [vmem:[%s13306_s0 + $0x8] sm:$0xff] }
 0xd6d   : > { %v9720_v56 = vsel %vm1282_vm0, 0.0, %v9719_v59  ;;  %v9795_v19 = vrot.slane %v9724_v60, 4  ;;  %v9779_v30 = vsel %vm1282_vm0, %v9719_v59, %v9700_v14  ;;  %v9794_v44 = vperm.slane %v9790_v26, %v13468_v53 }
 0xd6e   : > { %v9784_v52 = vrot.slane %v9720_v56, 4  ;;  %v9754_v57 = vperm.slane %v9748_v48, %v13487_v6  ;;  %v9783_v21 = vperm.slane %v9779_v30, %v13468_v53  ;;  %v9760_v51 = vsel %vm1282_vm0, %v9759_v37, %v9740_v7  ;;  %9937 = vmatpush.bf16.msra.mxu0 %v11451_v36 }
 0xd6f   : > { %v9796_v58 = vsel %vm1282_vm0, %v9795_v19, %v9722_v11  ;;  %v9815_v46 = vrot.slane %v9794_v44, 4  ;;  %v9762_v2 = vsel %vm1282_vm0, %v9746_v8, %v9761_v24  ;;  %v9766_v25 = vperm.slane %v9760_v51, %v13487_v6  ;;  %v12252_v11 = vpop.permute.xlu1 %12251 }
 0xd70   : > { %v9785_v4 = vsel %vm1282_vm0, %v9784_v52, %v9718_v17  ;;  %v9800_v16 = vperm.slane %v9796_v58, %v13468_v53  ;;  %v9773_v50 = vrot.slane %v9754_v57, 4  ;;  %v9770_v27 = vperm.slane %v9762_v2, %v13487_v6  ;;  %v11448_v52 = vld [vmem:[%s13306_s0] sm:$0xff] }
 0xd71   : > { %v9789_v28 = vperm.slane %v9785_v4, %v13468_v53  ;;  %v9803_v53 = vrot.slane %v9783_v21, 4  ;;  %v9750_v42 = vsel %vm1282_vm0, %v16941_v29, %v9749_v12  ;;  %v9771_v56 = vrot.slane %v9766_v25, 4  ;;  %v12280_v12 = vld [vmem:[%s825_s9] ss:$0 sm:$0xff] }
 0xd72   : > { %v9813_v1 = vrot.slane %v9800_v16, 4  ;;  %v9816_v35 = vsel %vm1282_vm0, %v9800_v16, %v9815_v46  ;;  %v9774_v63 = vsel %vm1282_vm0, %v9766_v25, %v9773_v50  ;;  %v9775_v0 = vrot.slane %v9770_v27, 4  ;;  %9938 = vmatpush.bf16.msra.mxu0 %v11450_v15 }
 0xd73   : > { %v9801_v61 = vrot.slane %v9789_v28, 4  ;;  %v9824_v31 = vperm.slane %v9816_v35, %v13487_v6  ;;  %v9804_v38 = vsel %vm1282_vm0, %v9789_v28, %v9803_v53  ;;  %v9758_v62 = vperm.slane %v9750_v42, %v13487_v6 }
 0xd74   : > { %v9814_v54 = vsel %vm1282_vm0, %v9813_v1, %v9794_v44  ;;  %v9812_v18 = vperm.slane %v9804_v38, %v13487_v6  ;;  %v9772_v60 = vsel %vm1282_vm0, %v9771_v56, %v9754_v57  ;;  %v5471_v7 = vrot.slane %v16883_v55, 4 }
 0xd75   : > { %v9802_v40 = vsel %vm1282_vm0, %v9801_v61, %v9783_v21  ;;  %v9820_v10 = vperm.slane %v9814_v54, %v13487_v6  ;;  %v9829_v39 = vrot.slane %v9824_v31, 4  ;;  %v9776_v59 = vsel %vm1282_vm0, %v9775_v0, %v9758_v62  ;;  %v1018_v0 = vld [vmem:[#allocation2 + $0x8] sm:$0xff]  }
 0xd76   : > { %v9808_v5 = vperm.slane %v9802_v40, %v13487_v6  ;;  %v9831_v32 = vrot.slane %v9812_v18, 4  ;;  %v9777_v29 = vrot.slane %v9758_v62, 4  ;;  %9939 = vmatpush.bf16.msra.mxu0 %v11449_v45  ;;  %v5525_v17 = vrot.slane %v16893_v34, 4 }
 0xd77   : > { %v9830_v9 = vsel %vm1282_vm0, %v9829_v39, %v9812_v18  ;;  %v9825_v47 = vrot.slane %v9820_v10, 4  ;;  %v12254_v26 = vunpack.i.h.bf16 %v12252_v11  ;;  %v12253_v43 = vunpack.i.l.bf16 %v12252_v11 }
 0xd78   : > { %v9827_v22 = vrot.slane %v9808_v5, 4  ;;  %v12270_v13 = vpack.i.bf16 %v9830_v9, %v9776_v59  ;;  %v9832_v49 = vsel %vm1282_vm0, %v9824_v31, %v9831_v32  ;;  %v9778_v6 = vsel %vm1282_vm0, %v9770_v27, %v9777_v29  ;;  %v1016_v31 = vld [vmem:[#allocation2] sm:$0xff]  }
 0xd79   : > { %v12275_v8 = vpack.i.bf16 %v9832_v49, %v9778_v6  ;;  %v9826_v19 = vsel %vm1282_vm0, %v9825_v47, %v9808_v5  ;;  %v5526_v30 = vsel %vm1282_vm0, %v5525_v17, %v16890_v23  ;;  %v5472_v4 = vsel %vm1282_vm0, %v5471_v7, %v16862_v20 }
 0xd7a   : > { %v9828_v14 = vsel %vm1282_vm0, %v9820_v10, %v9827_v22  ;;  %9940 = vmatpush.bf16.msra.mxu0 %v11448_v52  ;;  %v5558_v55 = vsel %vm3334_vm1, %v5526_v30, %v12254_v26  ;;  %v5557_v34 = vsel %vm3334_vm1, %v5472_v4, %v12253_v43  ;;  %v1021_v38 = vunpack.c.h.bf16 %v1016_v31 }
 0xd7b   : > { %v12265_v3 = vpack.i.bf16 %v9828_v14, %v9774_v63  ;;  %v1020_v63 = vunpack.c.l.bf16 %v1016_v31  ;;  %v1022_v18 = vunpack.c.l.bf16 %v1018_v0  ;;  %v1023_v59 = vunpack.c.h.bf16 %v1018_v0  ;;  %v11465_v31 = vld [vmem:[%s13322_s27 + $0x44] sm:$0xf0] }
 0xd7c   : > { %v12899_v45 = vmov 128.0  }
 0xd7d   : > { %12266 = vrot.lane.b32.xlu1 %v12265_v3, %s12894_s30  ;;  %12350 = vrcp.f32 %v12899_v45 }
 0xd83   : > { %v12351_v29 = vpop.eup %12350 }
 0xd84   : > { %vm9971_vm5 = vweird.f32 %v12351_v29 }
 0xd85   : > { %12271 = vrot.lane.b32.xlu1 %v12270_v13, %s12896_s29 }
 0xd8d   : > { %12276 = vrot.lane.b32.xlu1 %v12275_v8, %s12895_s21 }
 0xd8e   : > { %v12262_v48 = vpop.permute.xlu2 %12261 }
 0xd8f   : > { %v12264_v58 = vunpack.i.h.bf16 %v12262_v48  ;;  %v12263_v37 = vunpack.i.l.bf16 %v12262_v48 }
 0xda9   : > { %v12257_v44 = vpop.permute.xlu0 %12256 }
 0xdaa   : > { %v12259_v28 = vunpack.i.h.bf16 %v12257_v44  ;;  %v12258_v16 = vunpack.i.l.bf16 %v12257_v44 }
 0xdac   : > { %v5560_v57 = vsel %vm5559_vm3, %v5557_v34, %v12258_v16  ;;  %v5561_v46 = vsel %vm5559_vm3, %v5558_v55, %v12259_v28  ;;  %v11299_v34 = vld [vmem:[%s13322_s27 + $0x70] sm:$0xf] }
 0xdad   : > { %v5563_v23 = vsel %vm5562_vm4, %v5560_v57, %v12263_v37  ;;  %v5564_v21 = vsel %vm5562_vm4, %v5561_v46, %v12264_v58  ;;  %v11471_v57 = vld [vmem:[%s13322_s27 + $0x74] sm:$0xf0]  ;;  %v11470_v46 = vld [vmem:[%s13322_s27 + $0x74] sm:$0xf] }
 0xdae   : > { %v9863_v20 = vpack.c.bf16 %v5564_v21, %v5563_v23  ;;  %v11300_v23 = vor.u32 %v11471_v57, %v11299_v34  ;;  %v11301_v21 = vld [vmem:[%s13322_s27 + $0x78] sm:$0xf0]  ;;  %v11245_v34 = vld [vmem:[%s13322_s27 + $0x8] sm:$0xf0] }
 0xdb0   : > { %9941 = vmatmul.bf16.vlgmr.msra.gmra.mxu0 %v9863_v20  ;;  %v11304_v20 = vor.u32 %v11470_v46, %v11301_v21  ;;  %10163 = vmatpush.bf16.msrb.mxu1 %v11300_v23 }
 0xdb2   : > { %10182 = vmatpush.bf16.msra.mxu2 %v11304_v20 }
 0xdef   : > { %v12267_v61 = vpop.permute.xlu1 %12266 }
 0xdf0   : > { %v12269_v24 = vunpack.i.h.bf16 %v12267_v61  ;;  %v12268_v33 = vunpack.i.l.bf16 %v12267_v61  ;;  %v11291_v61 = vld [vmem:[%s13322_s27 + $0x60] sm:$0xf] }
 0xdf2   : > { %v9858_v35 = vsel %vm3334_vm1, %v9826_v19, %v12269_v24  ;;  %v9857_v50 = vsel %vm3334_vm1, %v9772_v60, %v12268_v33  ;;  %v9967_v60 = vmul.f32 128.0, %v12351_v29  ;;  %v11468_v24 = vld [vmem:[%s13322_s27 + $0x64] sm:$0xf] }
 0xdf4   : > { %v9968_v49 = vsub.f32 1.0, %v9967_v60 }
 0xdf6   : > { %v9969_v6 = vmul.f32 %v12351_v29, %v9968_v49 }
 0xdf7   : > { %v12272_v1 = vpop.permute.xlu1 %12271 }
 0xdf8   : > { %v12274_v51 = vunpack.i.h.bf16 %v12272_v1  ;;  %v12273_v40 = vunpack.i.l.bf16 %v12272_v1  ;;  %v9970_v8 = vadd.f32 %v12351_v29, %v9969_v6  ;;  %v11469_v1 = vld [vmem:[%s13322_s27 + $0x64] sm:$0xf0]  ;;  %v11251_v6 = vld [vmem:[%s13322_s27 + $0x10] sm:$0xf] }
 0xdfa   : > { %v9859_v53 = vsel %vm5559_vm3, %v9857_v50, %v12273_v40  ;;  %v9860_v41 = vsel %vm5559_vm3, %v9858_v35, %v12274_v51  ;;  %v17021_v47 = vsel %vm9971_vm5, %v12351_v29, %v9970_v8  ;;  %v11292_v51 = vor.u32 %v11469_v1, %v11291_v61  ;;  %v11293_v40 = vld [vmem:[%s13322_s27 + $0x68] sm:$0xf0]  ;;  %v11467_v35 = vld [vmem:[%s13322_s27 + $0x54] sm:$0xf0] }
 0xdfb   : > { %v11459_v8 = vld [vmem:[%s13322_s27 + $0x14] sm:$0xf0] }
 0xdfc   : > { %10164 = vmatpush.bf16.msrb.mxu1 %v11292_v51 }
 0xdff   : > { %v12277_v54 = vpop.permute.xlu1 %12276 }
 0xe00   : > { %v12279_v5 = vunpack.i.h.bf16 %v12277_v54  ;;  %v12278_v2 = vunpack.i.l.bf16 %v12277_v54  ;;  %v11283_v54 = vld [vmem:[%s13322_s27 + $0x50] sm:$0xf] }
 0xe02   : > { %v9861_v25 = vsel %vm5562_vm4, %v9859_v53, %v12278_v2  ;;  %v9862_v10 = vsel %vm5562_vm4, %v9860_v41, %v12279_v5  ;;  %v11296_v5 = vor.u32 %v11468_v24, %v11293_v40  ;;  %v11466_v2 = vld [vmem:[%s13322_s27 + $0x54] sm:$0xf]  ;;  %v11285_v53 = vld [vmem:[%s13322_s27 + $0x58] sm:$0xf0]  ;;  %v11284_v41 = vor.u32 %v11467_v35, %v11283_v54  ;;  %v12281_v24 = vld [vmem:[%s834_s19] ss:$0 sm:$0xff] }
 0xe03   : > { %v9864_v22 = vpack.c.bf16 %v9862_v10, %v9861_v25  ;;  %v11288_v10 = vor.u32 %v11466_v2, %v11285_v53  ;;  %v12282_v35 = vld [vmem:[%s843_s8] ss:$0 sm:$0xff] }
 0xe04   : > { %10183 = vmatpush.bf16.msra.mxu2 %v11296_v5  ;;  %10165 = vmatpush.bf16.msrb.mxu1 %v11284_v41 }
 0xe05   : > { %9946 = vmatmul.bf16.gmra.mxu0 %v9864_v22  ;;  %v11275_v22 = vld [vmem:[%s13322_s27 + $0x40] sm:$0xf] }
 0xe08   : > { %10184 = vmatpush.bf16.msra.mxu2 %v11288_v10  ;;  %v11487_v10 = vld [vmem:[%s13328_s10 + $0x78] sm:$0xff] }
 0xe09   : > { %10364 = vmatpush.bf16.msrb.mxu0 %v11487_v10 }
 0xe2d   : > { %v9942_v14 = vpop.f32.mrf.mxu0 }
 0xe2e   : > { %v9943_v27 = vadd.f32 %v12280_v12, %v9942_v14  ;;  %v11276_v14 = vor.u32 %v11465_v31, %v11275_v22 }
 0xe30   : > { %v9952_v3 = vadd.f32 %v9943_v27, %v1020_v63  ;;  %v11277_v63 = vld [vmem:[%s13322_s27 + $0x48] sm:$0xf0]  ;;  %10166 = vmatpush.bf16.msrb.mxu1 %v11276_v14 }
 0xe32   : > { %9958 = vadd.xlane.f32.xlu0 %v9952_v3 }
 0xe35   : > { %v9944_v36 = vpop.f32.mrf.mxu0 }
 0xe36   : > { %v9945_v39 = vadd.f32 %v12280_v12, %v9944_v36 }
 0xe38   : > { %v9953_v42 = vadd.f32 %v9945_v39, %v1021_v38  ;;  %v11463_v38 = vld [vmem:[%s13322_s27 + $0x34] sm:$0xf0]  ;;  %v11462_v39 = vld [vmem:[%s13322_s27 + $0x34] sm:$0xf] }
 0xe3a   : > { %9960 = vadd.xlane.f32.xlu1 %v9953_v42 }
 0xe82   : > { %v9947_v15 = vpop.f32.mrf.mxu0 }
 0xe83   : > { %v9948_v62 = vadd.f32 %v12280_v12, %v9947_v15 }
 0xe85   : > { %v9954_v9 = vadd.f32 %v9948_v62, %v1022_v18 }
 0xe87   : > { %9962 = vadd.xlane.f32.xlu2 %v9954_v9 }
 0xe8a   : > { %v9949_v13 = vpop.f32.mrf.mxu0 }
 0xe8b   : > { %v9950_v32 = vadd.f32 %v12280_v12, %v9949_v13  ;;  %v11464_v12 = vld [vmem:[%s13322_s27 + $0x44] sm:$0xf]  ;;  %v11461_v13 = vld [vmem:[%s13322_s27 + $0x24] sm:$0xf0] }
 0xe8c   : > { %v11280_v27 = vor.u32 %v11464_v12, %v11277_v63  ;;  %v11478_v12 = vld [vmem:[%s13328_s10 + $0x30] sm:$0xff] }
 0xe8d   : > { %v9955_v56 = vadd.f32 %v9950_v32, %v1023_v59  ;;  %v11259_v59 = vld [vmem:[%s13322_s27 + $0x20] sm:$0xf]  ;;  %v11460_v32 = vld [vmem:[%s13322_s27 + $0x24] sm:$0xf]  ;;  %v11486_v63 = vld [vmem:[%s13328_s10 + $0x70] sm:$0xff] }
 0xe8e   : > { %10185 = vmatpush.bf16.msra.mxu2 %v11280_v27  ;;  %v11260_v60 = vor.u32 %v11461_v13, %v11259_v59  ;;  %10365 = vmatpush.bf16.msrb.mxu0 %v11486_v63 }
 0xe8f   : > { %9964 = vadd.xlane.f32.xlu0 %v9955_v56 }
 0xea5   : > { %v9959_v52 = vpop.xlane.xlu0 %9958 }
 0xea6   : > { %v9973_v19 = vmul.f32 %v17021_v47, %v9959_v52 }
 0xea8   : > { %v17024_v7 = vsub.f32 %v9952_v3, %v9973_v19  ;;  %v11267_v3 = vld [vmem:[%s13322_s27 + $0x30] sm:$0xf]  ;;  %v11458_v19 = vld [vmem:[%s13322_s27 + $0x14] sm:$0xf] }
 0xea9   : > { %v11268_v18 = vor.u32 %v11463_v38, %v11267_v3  ;;  %v11477_v38 = vld [vmem:[%s13328_s10 + $0x28] sm:$0xff] }
 0xeaa   : > { %v9981_v17 = vmul.f32 %v17024_v7, %v17024_v7 }
 0xeab   : > { %10167 = vmatpush.bf16.msrb.mxu1 %v11268_v18 }
 0xeac   : > { %9985 = vadd.xlane.f32.xlu1 %v9981_v17  ;;  %v11253_v17 = vld [vmem:[%s13322_s27 + $0x18] sm:$0xf0] }
 0xead   : > { %v9961_v11 = vpop.xlane.xlu1 %9960 }
 0xeae   : > { %v9974_v48 = vmul.f32 %v17021_v47, %v9961_v11 }
 0xeaf   : > { %10168 = vmatpush.bf16.msrb.mxu1 %v11260_v60 }
 0xeb0   : > { %v17029_v26 = vsub.f32 %v9953_v42, %v9974_v48  ;;  %v11269_v42 = vld [vmem:[%s13322_s27 + $0x38] sm:$0xf0]  ;;  %v11252_v48 = vor.u32 %v11459_v8, %v11251_v6 }
 0xeb2   : > { %v9982_v43 = vmul.f32 %v17029_v26, %v17029_v26 }
 0xeb3   : > { %10169 = vmatpush.bf16.msrb.mxu1 %v11252_v48  ;;  %v11483_v48 = vld [vmem:[%s13328_s10 + $0x58] sm:$0xff] }
 0xeb4   : > { %9987 = vadd.xlane.f32.xlu0 %v9982_v43 }
 0xefa   : > { %v9963_v30 = vpop.xlane.xlu2 %9962 }
 0xefb   : > { %v9975_v4 = vmul.f32 %v17021_v47, %v9963_v30  ;;  %v11256_v30 = vor.u32 %v11458_v19, %v11253_v17  ;;  %v11475_v17 = vld [vmem:[%s13328_s10 + $0x18] sm:$0xff] }
 0xefd   : > { %v17034_v44 = vsub.f32 %v9954_v9, %v9975_v4  ;;  %v11272_v9 = vor.u32 %v11462_v39, %v11269_v42  ;;  %v11243_v4 = vld [vmem:[%s13322_s27] sm:$0xf] }
 0xeff   : > { %v9983_v58 = vmul.f32 %v17034_v44, %v17034_v44  ;;  %10186 = vmatpush.bf16.msra.mxu2 %v11272_v9 }
 0xf01   : > { %9989 = vadd.xlane.f32.xlu1 %v9983_v58  ;;  %v11457_v58 = vld [vmem:[%s13322_s27 + $0x4] sm:$0xf0] }
 0xf02   : > { %v9965_v37 = vpop.xlane.xlu0 %9964  ;;  %v11244_v46 = vor.u32 %v11457_v58, %v11243_v4  ;;  %v11472_v4 = vld [vmem:[%s13328_s10] sm:$0xff]  ;;  %v11481_v58 = vld [vmem:[%s13328_s10 + $0x48] sm:$0xff] }
 0xf03   : > { %v9976_v28 = vmul.f32 %v17021_v47, %v9965_v37 }
 0xf04   : > { %10170 = vmatpush.bf16.msrb.mxu1 %v11244_v46 }
 0xf05   : > { %v17039_v16 = vsub.f32 %v9955_v56, %v9976_v28  ;;  %v11261_v56 = vld [vmem:[%s13322_s27 + $0x28] sm:$0xf0] }
 0xf06   : > { %v11264_v49 = vor.u32 %v11460_v32, %v11261_v56 }
 0xf07   : > { %v9984_v55 = vmul.f32 %v17039_v16, %v17039_v16 }
 0xf08   : > { %10187 = vmatpush.bf16.msra.mxu2 %v11264_v49 }
 0xf09   : > { %9991 = vadd.xlane.f32.xlu2 %v9984_v55  ;;  %v11456_v55 = vld [vmem:[%s13322_s27 + $0x4] sm:$0xf]  ;;  %s17647_s27 = sld [smem:[#allocation101_spill]] (!%p11369_p11) }
 0xf0a   : > { %v11248_v23 = vor.u32 %v11456_v55, %v11245_v34 }
 0xf0c   : > { %10188 = vmatpush.bf16.msra.mxu2 %v11256_v30  ;;  %v11482_v30 = vld [vmem:[%s13328_s10 + $0x50] sm:$0xff] }
 0xf10   : > { %10189 = vmatpush.bf16.msra.mxu2 %v11248_v23 }
 0xf1f   : > { %v9986_v33 = vpop.xlane.xlu1 %9985 }
 0xf20   : > { %v9993_v50 = vmul.f32 %v9986_v33, %v17021_v47 }
 0xf22   : > { %v9997_v25 = vadd.f32 1e-05, %v9993_v50 }
 0xf24   : > { %12352 = vrsqrt.f32 %v9997_v25  ;;  %vm10007_vm7 = vweird.f32 %v9997_v25 }
 0xf27   : > { %v9988_v36 = vpop.xlane.xlu0 %9987 }
 0xf28   : > { %v9994_v0 = vmul.f32 %v9988_v36, %v17021_v47  ;;  %v11485_v36 = vld [vmem:[%s13328_s10 + $0x68] sm:$0xff] }
 0xf29   : > { %10366 = vmatpush.bf16.msrb.mxu0 %v11485_v36  ;;  %v12283_v36 = vld [vmem:[%s997_s3] ss:$0 sm:$0xff] }
 0xf2a   : > { %v12353_v15 = vpop.eup %12352  ;;  %v9998_v62 = vadd.f32 1e-05, %v9994_v0  ;;  %v11476_v0 = vld [vmem:[%s13328_s10 + $0x20] sm:$0xff] }
 0xf2b   : > { %v10002_v45 = vmul.f32 %v12353_v15, %v9997_v25  ;;  %vm10008_vm6 = vweird.f32 %v12353_v15  ;;  %v11479_v25 = vld [vmem:[%s13328_s10 + $0x38] sm:$0xff] }
 0xf2c   : > { %12354 = vrsqrt.f32 %v9998_v62  ;;  %vm10009_vm8 = vmor %vm10007_vm7, %vm10008_vm6  ;;  %vm10017_vm10 = vweird.f32 %v9998_v62  ;;  %10345 = vmatpush.bf16.msrb.mxu3 %v11479_v25 }
 0xf2d   : > { %v10003_v29 = vmul.f32 %v12353_v15, %v10002_v45 }
 0xf2f   : > { %v10004_v52 = vmul.f32 0.5, %v10003_v29 }
 0xf30   : > { %10346 = vmatpush.bf16.msrb.mxu3 %v11478_v12 }
 0xf31   : > { %v10005_v11 = vsub.f32 1.5, %v10004_v52 }
 0xf32   : > { %v12355_v43 = vpop.eup %12354 }
 0xf33   : > { %v10006_v37 = vmul.f32 %v12353_v15, %v10005_v11  ;;  %v10012_v28 = vmul.f32 %v12355_v43, %v9998_v62  ;;  %vm10018_vm9 = vweird.f32 %v12355_v43  ;;  %v11484_v11 = vld [vmem:[%s13328_s10 + $0x60] sm:$0xff] }
 0xf34   : > { %vm10019_vm11 = vmor %vm10017_vm10, %vm10018_vm9  ;;  %10347 = vmatpush.bf16.msrb.mxu3 %v11477_v38  ;;  %10367 = vmatpush.bf16.msrb.mxu0 %v11484_v11 }
 0xf35   : > { %v10013_v57 = vmul.f32 %v12355_v43, %v10012_v28  ;;  %v10010_v21 = vsel %vm10009_vm8, %v12353_v15, %v10006_v37  ;;  %v11480_v37 = vld [vmem:[%s13328_s10 + $0x40] sm:$0xff] }
 0xf36   : > { %v10041_v1 = vmul.f32 %v10010_v21, %v17024_v7  ;;  %v10077_v28 = vld [vmem:[%s13353_s7] sm:$0x3] }
 0xf37   : > { %v10014_v20 = vmul.f32 0.5, %v10013_v57  ;;  %v10079_v34 = vperm.slane %v10077_v28, 0  ;;  %v10080_v21 = vperm.slane %v10077_v28, 1 }
 0xf38   : > { %v10048_v54 = vmul.f32 %v12281_v24, %v10041_v1  ;;  %10348 = vmatpush.bf16.msrb.mxu3 %v11476_v0  ;;  %10368 = vmatpush.bf16.msrb.mxu0 %v11483_v48 }
 0xf39   : > { %v10015_v61 = vsub.f32 1.5, %v10014_v20 }
 0xf3a   : > { %v17083_v5 = vadd.f32 %v12282_v35, %v10048_v54 }
 0xf3b   : > { %v10016_v33 = vmul.f32 %v12355_v43, %v10015_v61 }
 0xf3c   : > { %10349 = vmatpush.bf16.msrb.mxu3 %v11475_v17  ;;  %10369 = vmatpush.bf16.msrb.mxu0 %v11482_v30 }
 0xf3d   : > { %v10020_v51 = vsel %vm10019_vm11, %v12355_v43, %v10016_v33  ;;  %v11473_v43 = vld [vmem:[%s13328_s10 + $0x8] sm:$0xff] }
 0xf3e   : > { %v10042_v40 = vmul.f32 %v10020_v51, %v17029_v26 }
 0xf40   : > { %v10049_v50 = vmul.f32 %v12281_v24, %v10042_v40  ;;  %10370 = vmatpush.bf16.msrb.mxu0 %v11481_v58 }
 0xf42   : > { %v17085_v7 = vadd.f32 %v12282_v35, %v10049_v50 }
 0xf44   : > { %v10059_v2 = vpack.c.bf16 %v17085_v7, %v17083_v5  ;;  %10371 = vmatpush.bf16.msrb.mxu0 %v11480_v37 }
 0xf46   : > { %10171 = vmatmul.bf16.vlgmr.msrb.gmra.mxu1 %v10059_v2  ;;  %10190 = vmatmul.bf16.vlgmr.msra.gmra.mxu2 %v10059_v2 }
 0xf74   : > { %v9990_v53 = vpop.xlane.xlu1 %9989 }
 0xf75   : > { %v9995_v41 = vmul.f32 %v9990_v53, %v17021_v47 }
 0xf77   : > { %v9999_v26 = vadd.f32 1e-05, %v9995_v41 }
 0xf79   : > { %12356 = vrsqrt.f32 %v9999_v26  ;;  %vm10027_vm13 = vweird.f32 %v9999_v26 }
 0xf7c   : > { %v9992_v22 = vpop.xlane.xlu2 %9991 }
 0xf7d   : > { %v9996_v31 = vmul.f32 %v9992_v22, %v17021_v47 }
 0xf7f   : > { %v12357_v14 = vpop.eup %12356  ;;  %v10000_v27 = vadd.f32 1e-05, %v9996_v31 }
 0xf80   : > { %v10022_v3 = vmul.f32 %v12357_v14, %v9999_v26  ;;  %vm10028_vm12 = vweird.f32 %v12357_v14 }
 0xf81   : > { %12358 = vrsqrt.f32 %v10000_v27  ;;  %vm10029_vm14 = vmor %vm10027_vm13, %vm10028_vm12  ;;  %vm10037_vm0 = vweird.f32 %v10000_v27 }
 0xf82   : > { %v10023_v39 = vmul.f32 %v12357_v14, %v10022_v3 }
 0xf84   : > { %v10024_v42 = vmul.f32 0.5, %v10023_v39 }
 0xf86   : > { %v10025_v18 = vsub.f32 1.5, %v10024_v42 }
 0xf87   : > { %v12359_v15 = vpop.eup %12358 }
 0xf88   : > { %v10026_v62 = vmul.f32 %v12357_v14, %v10025_v18  ;;  %v10032_v9 = vmul.f32 %v12359_v15, %v10000_v27  ;;  %vm10038_vm15 = vweird.f32 %v12359_v15 }
 0xf89   : > { %vm10039_vm1 = vmor %vm10037_vm0, %vm10038_vm15 }
 0xf8a   : > { %v10033_v59 = vmul.f32 %v12359_v15, %v10032_v9  ;;  %v10030_v45 = vsel %vm10029_vm14, %v12357_v14, %v10026_v62 }
 0xf8b   : > { %v10043_v56 = vmul.f32 %v10030_v45, %v17034_v44 }
 0xf8c   : > { %v10034_v13 = vmul.f32 0.5, %v10033_v59 }
 0xf8d   : > { %v10050_v6 = vmul.f32 %v12281_v24, %v10043_v56 }
 0xf8e   : > { %v10035_v32 = vsub.f32 1.5, %v10034_v13 }
 0xf8f   : > { %v17100_v52 = vadd.f32 %v12282_v35, %v10050_v6 }
 0xf90   : > { %v10036_v29 = vmul.f32 %v12359_v15, %v10035_v32 }
 0xf92   : > { %v10040_v60 = vsel %vm10039_vm1, %v12359_v15, %v10036_v29 }
 0xf93   : > { %v10044_v49 = vmul.f32 %v10040_v60, %v17039_v16  ;;  %v11474_v16 = vld [vmem:[%s13328_s10 + $0x10] sm:$0xff] }
 0xf94   : > { %10350 = vmatpush.bf16.msrb.mxu3 %v11474_v16 }
 0xf95   : > { %v10051_v8 = vmul.f32 %v12281_v24, %v10044_v49 }
 0xf97   : > { %v17102_v19 = vadd.f32 %v12282_v35, %v10051_v8 }
 0xf98   : > { %10351 = vmatpush.bf16.msrb.mxu3 %v11473_v43 }
 0xf99   : > { %v10060_v44 = vpack.c.bf16 %v17102_v19, %v17100_v52 }
 0xf9b   : > { %10176 = vmatmul.bf16.gmra.mxu1 %v10060_v44  ;;  %10195 = vmatmul.bf16.gmra.mxu2 %v10060_v44 }
 0xf9c   : > { %10352 = vmatpush.bf16.msrb.mxu3 %v11472_v4 }
 0xfc3   : > { %v10172_v55 = vpop.f32.mrf.mxu1 }
 0xfc4   : > { %v10173_v46 = vadd.f32 %v10172_v55, %v10079_v34 }
 0xfc6   : > { %v10201_v61 = vmax.f32 %v10173_v46, 0.0 }
 0xfc9   : > { %v10191_v57 = vpop.f32.mrf.mxu2 }
 0xfca   : > { %v10192_v24 = vadd.f32 %v10191_v57, %v10080_v21 }
 0xfcb   : > { %v10174_v23 = vpop.f32.mrf.mxu1 }
 0xfcc   : > { %v10175_v20 = vadd.f32 %v10174_v23, %v10079_v34  ;;  %v10202_v54 = vmax.f32 %v10192_v24, 0.0 }
 0xfce   : > { %v10203_v1 = vmax.f32 %v10175_v20, 0.0 }
 0xfd0   : > { %v10209_v33 = vpack.c.bf16 %v10203_v1, %v10201_v61 }
 0xfd1   : > { %v10193_v51 = vpop.f32.mrf.mxu2 }
 0xfd2   : > { %v10194_v40 = vadd.f32 %v10193_v51, %v10080_v21  ;;  %10353 = vmatmul.bf16.vlgmr.msrb.gmra.mxu3 %v10209_v33 }
 0xfd4   : > { %v10204_v35 = vmax.f32 %v10194_v40, 0.0 }
 0xfd6   : > { %v10210_v50 = vpack.c.bf16 %v10204_v35, %v10202_v54 }
 0xfd8   : > { %10372 = vmatmul.bf16.vlgmr.msrb.gmra.mxu0 %v10210_v50 }
0x1018   : > { %v10177_v2 = vpop.f32.mrf.mxu1 }
0x1019   : > { %v10178_v41 = vadd.f32 %v10177_v2, %v10079_v34 }
0x101b   : > { %v10205_v10 = vmax.f32 %v10178_v41, 0.0 }
0x101e   : > { %v10196_v53 = vpop.f32.mrf.mxu2 }
0x101f   : > { %v10197_v31 = vadd.f32 %v10196_v53, %v10080_v21 }
0x1020   : > { %v10179_v26 = vpop.f32.mrf.mxu1 }
0x1021   : > { %v10180_v25 = vadd.f32 %v10179_v26, %v10079_v34  ;;  %v10206_v27 = vmax.f32 %v10197_v31, 0.0 }
0x1023   : > { %v10207_v22 = vmax.f32 %v10180_v25, 0.0 }
0x1025   : > { %v10211_v12 = vpack.c.bf16 %v10207_v22, %v10205_v10  ;;  %v12284_v22 = vld [vmem:[%s872_s4] ss:$0 sm:$0xff] }
0x1026   : > { %v10198_v63 = vpop.f32.mrf.mxu2 }
0x1027   : > { %v10199_v14 = vadd.f32 %v10198_v63, %v10080_v21  ;;  %10358 = vmatmul.bf16.gmra.mxu3 %v10211_v12 }
0x1029   : > { %v10208_v3 = vmax.f32 %v10199_v14, 0.0  ;;  %v12285_v14 = vld [vmem:[%s881_s20] ss:$0 sm:$0xff] }
0x102b   : > { %v10212_v38 = vpack.c.bf16 %v10208_v3, %v10206_v27 }
0x102d   : > { %10377 = vmatmul.bf16.gmra.mxu0 %v10212_v38 }
0x1055   : > { %v10354_v39 = vpop.f32.mrf.mxu3  ;;  %v10373_v42 = vpop.f32.mrf.mxu0 }
0x1056   : > { %v10355_v0 = vadd.f32 %v12283_v36, %v10354_v39 }
0x1058   : > { %v10374_v18 = vadd.f32 %v10373_v42, %v10355_v0 }
0x105a   : > { %v10383_v15 = vadd.f32 %v10374_v18, %v17083_v5 }
0x105c   : > { %10389 = vadd.xlane.f32.xlu0 %v10383_v15 }
0x105d   : > { %v10356_v62 = vpop.f32.mrf.mxu3  ;;  %v10375_v59 = vpop.f32.mrf.mxu0 }
0x105e   : > { %v10357_v9 = vadd.f32 %v12283_v36, %v10356_v62 }
0x1060   : > { %v10376_v13 = vadd.f32 %v10375_v59, %v10357_v9 }
0x1062   : > { %v10384_v45 = vadd.f32 %v10376_v13, %v17085_v7 }
0x1064   : > { %10391 = vadd.xlane.f32.xlu1 %v10384_v45 }
0x10aa   : > { %v10359_v32 = vpop.f32.mrf.mxu3  ;;  %v10378_v56 = vpop.f32.mrf.mxu0 }
0x10ab   : > { %v10360_v29 = vadd.f32 %v12283_v36, %v10359_v32 }
0x10ad   : > { %v10379_v60 = vadd.f32 %v10378_v56, %v10360_v29 }
0x10af   : > { %v10385_v49 = vadd.f32 %v10379_v60, %v17100_v52 }
0x10b1   : > { %10393 = vadd.xlane.f32.xlu2 %v10385_v49 }
0x10b2   : > { %v10361_v6 = vpop.f32.mrf.mxu3  ;;  %v10380_v44 = vpop.f32.mrf.mxu0 }
0x10b3   : > { %v10362_v8 = vadd.f32 %v12283_v36, %v10361_v6 }
0x10b5   : > { %v10381_v17 = vadd.f32 %v10380_v44, %v10362_v8 }
0x10b7   : > { %v10386_v5 = vadd.f32 %v10381_v17, %v17102_v19 }
0x10b9   : > { %10395 = vadd.xlane.f32.xlu0 %v10386_v5 }
0x10cf   : > { %v10390_v11 = vpop.xlane.xlu0 %10389 }
0x10d0   : > { %v10397_v16 = vmul.f32 %v10390_v11, %v17021_v47 }
0x10d2   : > { %v10401_v48 = vsub.f32 %v10383_v15, %v10397_v16 }
0x10d4   : > { %v10405_v7 = vmul.f32 %v10401_v48, %v10401_v48 }
0x10d6   : > { %10409 = vadd.xlane.f32.xlu1 %v10405_v7 }
0x10d7   : > { %v10392_v43 = vpop.xlane.xlu1 %10391 }
0x10d8   : > { %v10398_v30 = vmul.f32 %v10392_v43, %v17021_v47 }
0x10da   : > { %v10402_v4 = vsub.f32 %v10384_v45, %v10398_v30 }
0x10dc   : > { %v10406_v58 = vmul.f32 %v10402_v4, %v10402_v4 }
0x10de   : > { %10411 = vadd.xlane.f32.xlu2 %v10406_v58 }
0x1124   : > { %v10394_v52 = vpop.xlane.xlu2 %10393 }
0x1125   : > { %v10399_v37 = vmul.f32 %v10394_v52, %v17021_v47 }
0x1127   : > { %v17128_v28 = vsub.f32 %v10385_v49, %v10399_v37 }
0x1129   : > { %v10407_v19 = vmul.f32 %v17128_v28, %v17128_v28 }
0x112b   : > { %10413 = vadd.xlane.f32.xlu0 %v10407_v19 }
0x112c   : > { %v10396_v55 = vpop.xlane.xlu0 %10395 }
0x112d   : > { %v10400_v34 = vmul.f32 %v10396_v55, %v17021_v47 }
0x112f   : > { %v17133_v57 = vsub.f32 %v10386_v5, %v10400_v34 }
0x1131   : > { %v10408_v46 = vmul.f32 %v17133_v57, %v17133_v57 }
0x1133   : > { %10415 = vadd.xlane.f32.xlu1 %v10408_v46 }
0x1149   : > { %v10410_v23 = vpop.xlane.xlu1 %10409 }
0x114a   : > { %v10417_v21 = vmul.f32 %v10410_v23, %v17021_v47 }
0x114c   : > { %v10421_v20 = vadd.f32 1e-05, %v10417_v21 }
0x114e   : > { %12360 = vrsqrt.f32 %v10421_v20  ;;  %vm10431_vm3 = vweird.f32 %v10421_v20 }
0x1151   : > { %v10412_v61 = vpop.xlane.xlu2 %10411 }
0x1152   : > { %v10418_v1 = vmul.f32 %v10412_v61, %v17021_v47 }
0x1154   : > { %v12361_v24 = vpop.eup %12360  ;;  %v10422_v33 = vadd.f32 1e-05, %v10418_v1 }
0x1155   : > { %v10426_v51 = vmul.f32 %v12361_v24, %v10421_v20  ;;  %vm10432_vm2 = vweird.f32 %v12361_v24 }
0x1156   : > { %12362 = vrsqrt.f32 %v10422_v33  ;;  %vm10433_vm4 = vmor %vm10431_vm3, %vm10432_vm2  ;;  %vm10441_vm6 = vweird.f32 %v10422_v33 }
0x1157   : > { %v10427_v40 = vmul.f32 %v12361_v24, %v10426_v51 }
0x1159   : > { %v10428_v54 = vmul.f32 0.5, %v10427_v40 }
0x115b   : > { %v10429_v35 = vsub.f32 1.5, %v10428_v54 }
0x115c   : > { %v12363_v50 = vpop.eup %12362 }
0x115d   : > { %v10430_v2 = vmul.f32 %v12361_v24, %v10429_v35  ;;  %v10436_v53 = vmul.f32 %v12363_v50, %v10422_v33  ;;  %vm10442_vm5 = vweird.f32 %v12363_v50 }
0x115e   : > { %vm10443_vm7 = vmor %vm10441_vm6, %vm10442_vm5 }
0x115f   : > { %v10437_v41 = vmul.f32 %v12363_v50, %v10436_v53  ;;  %v10434_v26 = vsel %vm10433_vm4, %v12361_v24, %v10430_v2 }
0x1160   : > { %v10465_v31 = vmul.f32 %v10434_v26, %v10401_v48 }
0x1161   : > { %v10438_v25 = vmul.f32 0.5, %v10437_v41 }
0x1162   : > { %v10472_v27 = vmul.f32 %v12284_v22, %v10465_v31 }
0x1163   : > { %v10439_v10 = vsub.f32 1.5, %v10438_v25 }
0x1164   : > { %v10479_v36 = vadd.f32 %v12285_v14, %v10472_v27 }
0x1165   : > { %v10440_v12 = vmul.f32 %v12363_v50, %v10439_v10 }
0x1167   : > { %v10444_v63 = vsel %vm10443_vm7, %v12363_v50, %v10440_v12 }
0x1168   : > { %v10466_v3 = vmul.f32 %v10444_v63, %v10402_v4 }
0x116a   : > { %v10473_v38 = vmul.f32 %v12284_v22, %v10466_v3 }
0x116c   : > { %v10480_v39 = vadd.f32 %v12285_v14, %v10473_v38 }
0x116e   : > { %v11513_v42 = vpack.c.bf16 %v10480_v39, %v10479_v36 }
0x1170   : > { %11514 = vst [vmem:[#allocation2] sm:$0xff] %v11513_v42  }
0x119e   : > { %v10414_v0 = vpop.xlane.xlu0 %10413 }
0x119f   : > { %v10419_v18 = vmul.f32 %v10414_v0, %v17021_v47 }
0x11a1   : > { %v10423_v15 = vadd.f32 1e-05, %v10419_v18 }
0x11a3   : > { %12364 = vrsqrt.f32 %v10423_v15  ;;  %vm10451_vm9 = vweird.f32 %v10423_v15 }
0x11a6   : > { %v10416_v62 = vpop.xlane.xlu1 %10415 }
0x11a7   : > { %v10420_v9 = vmul.f32 %v10416_v62, %v17021_v47 }
0x11a9   : > { %v12365_v59 = vpop.eup %12364  ;;  %v10424_v13 = vadd.f32 1e-05, %v10420_v9 }
0x11aa   : > { %v10446_v45 = vmul.f32 %v12365_v59, %v10423_v15  ;;  %vm10452_vm8 = vweird.f32 %v12365_v59 }
0x11ab   : > { %12366 = vrsqrt.f32 %v10424_v13  ;;  %vm10453_vm10 = vmor %vm10451_vm9, %vm10452_vm8  ;;  %vm10461_vm12 = vweird.f32 %v10424_v13 }
0x11ac   : > { %v10447_v32 = vmul.f32 %v12365_v59, %v10446_v45 }
0x11ae   : > { %v10448_v56 = vmul.f32 0.5, %v10447_v32 }
0x11b0   : > { %v10449_v29 = vsub.f32 1.5, %v10448_v56 }
0x11b1   : > { %v12367_v60 = vpop.eup %12366 }
0x11b2   : > { %v10450_v49 = vmul.f32 %v12365_v59, %v10449_v29  ;;  %v10456_v6 = vmul.f32 %v12367_v60, %v10424_v13  ;;  %vm10462_vm11 = vweird.f32 %v12367_v60 }
0x11b3   : > { %vm10463_vm13 = vmor %vm10461_vm12, %vm10462_vm11 }
0x11b4   : > { %v10457_v8 = vmul.f32 %v12367_v60, %v10456_v6  ;;  %v10454_v44 = vsel %vm10453_vm10, %v12365_v59, %v10450_v49 }
0x11b5   : > { %v10467_v11 = vmul.f32 %v10454_v44, %v17128_v28 }
0x11b6   : > { %v10458_v17 = vmul.f32 0.5, %v10457_v8 }
0x11b7   : > { %v10474_v7 = vmul.f32 %v12284_v22, %v10467_v11 }
0x11b8   : > { %v10459_v5 = vsub.f32 1.5, %v10458_v17 }
0x11b9   : > { %v10481_v4 = vadd.f32 %v12285_v14, %v10474_v7 }
0x11ba   : > { %v10460_v16 = vmul.f32 %v12367_v60, %v10459_v5 }
0x11bc   : > { %v10464_v48 = vsel %vm10463_vm13, %v12367_v60, %v10460_v16 }
0x11bd   : > { %v10468_v43 = vmul.f32 %v10464_v48, %v17133_v57 }
0x11bf   : > { %v10475_v30 = vmul.f32 %v12284_v22, %v10468_v43 }
0x11c1   : > { %v10482_v58 = vadd.f32 %v12285_v14, %v10475_v30  ;;  %10494 = sbr.rel (%p11369_p11) target bundleno = 4724 (0x1274), region = 144 }
0x11c3   : > { %v11518_v52 = vpack.c.bf16 %v10482_v58, %v10481_v4 }
0x11c5   : > { %11539 = vst [vmem:[#allocation2 + $0x8] sm:$0xff] %v11518_v52  }
0x11c6   : > { %v11497_v37 = vld [vmem:[#allocation21 + $0x38] sm:$0xff]  ;;  %v11496_v19 = vld [vmem:[#allocation21 + $0x30] sm:$0xff]  ;;  %v11495_v28 = vld [vmem:[#allocation21 + $0x28] sm:$0xff] }
0x11c7   : > { %10579 = vmatpush.bf16.msra.mxu0 %v11497_v37  ;;  %11543 = vmatpush.bf16.msra.mxu1 %v11497_v37  ;;  %v11494_v55 = vld [vmem:[#allocation21 + $0x20] sm:$0xff]  ;;  %v11493_v34 = vld [vmem:[#allocation21 + $0x18] sm:$0xff]  ;;  %v11492_v57 = vld [vmem:[#allocation21 + $0x10] sm:$0xff] }
0x11c8   : > { %v11491_v46 = vld [vmem:[#allocation21 + $0x8] sm:$0xff]  ;;  %v11490_v23 = vld [vmem:[#allocation21] sm:$0xff] }
0x11c9   : > { %v11488_v21 = vld [vmem:[#allocation2] sm:$0xff] }
0x11ca   : > { %v10495_v24 = vld [vmem:[#allocation2] sm:$0xff]  }
0x11cb   : > { %10580 = vmatpush.bf16.msra.mxu0 %v11496_v19  ;;  %11544 = vmatpush.bf16.msra.mxu1 %v11496_v19  ;;  %v12368_v33 = vld [vmem:[%s17647_s27] ss:$0 sm:$0xff]  ;;  %v10598_v40 = vunpack.c.l.bf16 %v10495_v24  ;;  %v10599_v2 = vunpack.c.h.bf16 %v10495_v24 }
0x11cc   : > { %v11489_v20 = vld [vmem:[#allocation2 + $0x8] sm:$0xff] }
0x11cd   : > { %v10497_v51 = vld [vmem:[#allocation2 + $0x8] sm:$0xff]  }
0x11ce   : > { %v10600_v54 = vunpack.c.l.bf16 %v10497_v51  ;;  %v10601_v53 = vunpack.c.h.bf16 %v10497_v51 }
0x11cf   : > { %10581 = vmatpush.bf16.msra.mxu0 %v11495_v28  ;;  %11545 = vmatpush.bf16.msra.mxu1 %v11495_v28 }
0x11d3   : > { %10582 = vmatpush.bf16.msra.mxu0 %v11494_v55  ;;  %11546 = vmatpush.bf16.msra.mxu1 %v11494_v55 }
0x11d7   : > { %10583 = vmatpush.bf16.msra.mxu0 %v11493_v34  ;;  %11547 = vmatpush.bf16.msra.mxu1 %v11493_v34 }
0x11db   : > { %10584 = vmatpush.bf16.msra.mxu0 %v11492_v57  ;;  %11548 = vmatpush.bf16.msra.mxu1 %v11492_v57 }
0x11df   : > { %10585 = vmatpush.bf16.msra.mxu0 %v11491_v46  ;;  %11549 = vmatpush.bf16.msra.mxu1 %v11491_v46 }
0x11e3   : > { %10586 = vmatpush.bf16.msra.mxu0 %v11490_v23  ;;  %11550 = vmatpush.bf16.msra.mxu1 %v11490_v23 }
0x11e6   : > { %10587 = vmatmul.bf16.vlgmr.msra.gmra.mxu0 %v11488_v21  ;;  %10592 = vmatmul.bf16.vlgmr.msra.gmra.mxu1 %v11489_v20 }
0x1263   : > { %v10588_v61 = vpop.f32.mrf.mxu0  ;;  %v10593_v1 = vpop.f32.mrf.mxu1 }
0x1264   : > { %v10589_v35 = vadd.f32 %v12368_v33, %v10588_v61  ;;  %v10594_v50 = vadd.f32 %v12368_v33, %v10593_v1 }
0x1266   : > { %v10602_v22 = vadd.f32 %v10598_v40, %v10589_v35  ;;  %v10604_v31 = vadd.f32 %v10600_v54, %v10594_v50 }
0x126b   : > { %v10590_v41 = vpop.f32.mrf.mxu0  ;;  %v10595_v26 = vpop.f32.mrf.mxu1 }
0x126c   : > { %v10591_v25 = vadd.f32 %v12368_v33, %v10590_v41  ;;  %v10596_v10 = vadd.f32 %v12368_v33, %v10595_v26 }
0x126e   : > { %v10603_v12 = vadd.f32 %v10599_v2, %v10591_v25  ;;  %v10605_v63 = vadd.f32 %v10601_v53, %v10596_v10 }
0x1270   : > { %v11523_v14 = vpack.c.bf16 %v10603_v12, %v10602_v22  ;;  %v11528_v27 = vpack.c.bf16 %v10605_v63, %v10604_v31 }
0x1272   : > { %11524 = vst [vmem:[#allocation2] sm:$0xff] %v11523_v14  }
0x1273   : > { %11540 = vst [vmem:[#allocation2 + $0x8] sm:$0xff] %v11528_v27  }
0x1274 PF: > { %s17648_s10 = sld [smem:[#allocation36_spill]] }
0x127a   : > { %p11410_p3 = scmp.ne.s32.totalorder %s17648_s10, 2 }
0x127b   : > { %s17649_s2 = sld [smem:[#allocation102_spill]] (!%p11410_p3) }
0x127c   : > { %10617 = sbr.rel (%p11410_p3) target bundleno = 5016 (0x1398), region = 148  ;;  %s17650_s14 = sld [smem:[#allocation103_spill]] (!%p11410_p3) }
0x1281   : > { %v11541_v3 = vld [vmem:[#allocation2 + $0x8] sm:$0xff]   ;;  %v11531_v38 = vld [vmem:[#allocation2] sm:$0xff]  }
0x1282   : > { %v11536_v36 = vunpack.c.l.bf16 %v11541_v3  ;;  %v11532_v39 = vunpack.c.l.bf16 %v11531_v38  ;;  %v11537_v42 = vunpack.c.h.bf16 %v11541_v3  ;;  %v11533_v0 = vunpack.c.h.bf16 %v11531_v38  ;;  %v12369_v40 = vld [vmem:[%s17649_s2] ss:$0 sm:$0xff] }
0x1283   : > { %v12370_v53 = vld [vmem:[%s17650_s14] ss:$0 sm:$0xff] }
0x1284   : > { %10632 = vadd.xlane.f32.xlu1 %v11536_v36  ;;  %10628 = vadd.xlane.f32.xlu0 %v11532_v39 }
0x128c   : > { %10634 = vadd.xlane.f32.xlu1 %v11537_v42  ;;  %10630 = vadd.xlane.f32.xlu0 %v11533_v0 }
0x12f7   : > { %v10633_v18 = vpop.xlane.xlu1 %10632  ;;  %v10629_v15 = vpop.xlane.xlu0 %10628 }
0x12f8   : > { %v10638_v62 = vmul.f32 %v10633_v18, %v17021_v47  ;;  %v10636_v9 = vmul.f32 %v10629_v15, %v17021_v47 }
0x12fa   : > { %v10642_v59 = vsub.f32 %v11536_v36, %v10638_v62  ;;  %v10640_v13 = vsub.f32 %v11532_v39, %v10636_v9 }
0x12fc   : > { %v10646_v45 = vmul.f32 %v10642_v59, %v10642_v59  ;;  %v10644_v32 = vmul.f32 %v10640_v13, %v10640_v13 }
0x12fe   : > { %10652 = vadd.xlane.f32.xlu0 %v10646_v45  ;;  %10648 = vadd.xlane.f32.xlu2 %v10644_v32 }
0x12ff   : > { %v10635_v56 = vpop.xlane.xlu1 %10634  ;;  %v10631_v29 = vpop.xlane.xlu0 %10630 }
0x1300   : > { %v10639_v60 = vmul.f32 %v10635_v56, %v17021_v47  ;;  %v10637_v49 = vmul.f32 %v10631_v29, %v17021_v47 }
0x1302   : > { %v17156_v6 = vsub.f32 %v11537_v42, %v10639_v60  ;;  %v17158_v8 = vsub.f32 %v11533_v0, %v10637_v49 }
0x1304   : > { %v10647_v44 = vmul.f32 %v17156_v6, %v17156_v6  ;;  %v10645_v17 = vmul.f32 %v17158_v8, %v17158_v8 }
0x1306   : > { %10654 = vadd.xlane.f32.xlu1 %v10647_v44  ;;  %10650 = vadd.xlane.f32.xlu2 %v10645_v17 }
0x1371   : > { %v10649_v5 = vpop.xlane.xlu2 %10648  ;;  %v10653_v11 = vpop.xlane.xlu0 %10652 }
0x1372   : > { %v10656_v16 = vmul.f32 %v10649_v5, %v17021_v47  ;;  %v10658_v48 = vmul.f32 %v10653_v11, %v17021_v47 }
0x1374   : > { %v10660_v7 = vadd.f32 1e-05, %v10656_v16  ;;  %v10662_v43 = vadd.f32 1e-05, %v10658_v48 }
0x1376   : > { %12371 = vrsqrt.f32 %v10660_v7  ;;  %vm10670_vm0 = vweird.f32 %v10660_v7  ;;  %vm10690_vm2 = vweird.f32 %v10662_v43 }
0x1377   : > { %12373 = vrsqrt.f32 %v10662_v43 }
0x1379   : > { %v10655_v30 = vpop.xlane.xlu1 %10654  ;;  %v10651_v4 = vpop.xlane.xlu2 %10650 }
0x137a   : > { %v10659_v58 = vmul.f32 %v10655_v30, %v17021_v47  ;;  %v10657_v52 = vmul.f32 %v10651_v4, %v17021_v47 }
0x137c   : > { %v12372_v37 = vpop.eup %12371  ;;  %v10663_v19 = vadd.f32 1e-05, %v10659_v58  ;;  %v10661_v28 = vadd.f32 1e-05, %v10657_v52 }
0x137d   : > { %v12374_v55 = vpop.eup %12373  ;;  %v10665_v34 = vmul.f32 %v12372_v37, %v10660_v7  ;;  %vm10671_vm14 = vweird.f32 %v12372_v37 }
0x137e   : > { %v10685_v57 = vmul.f32 %v12374_v55, %v10662_v43  ;;  %12375 = vrsqrt.f32 %v10663_v19  ;;  %vm10691_vm15 = vweird.f32 %v12374_v55  ;;  %vm10672_vm1 = vmor %vm10670_vm0, %vm10671_vm14  ;;  %vm10700_vm6 = vweird.f32 %v10663_v19 }
0x137f   : > { %v10666_v46 = vmul.f32 %v12372_v37, %v10665_v34  ;;  %12377 = vrsqrt.f32 %v10661_v28  ;;  %vm10692_vm3 = vmor %vm10690_vm2, %vm10691_vm15  ;;  %vm10680_vm8 = vweird.f32 %v10661_v28 }
0x1380   : > { %v10686_v23 = vmul.f32 %v12374_v55, %v10685_v57 }
0x1381   : > { %v10667_v21 = vmul.f32 0.5, %v10666_v46 }
0x1382   : > { %v10687_v20 = vmul.f32 0.5, %v10686_v23 }
0x1383   : > { %v10668_v61 = vsub.f32 1.5, %v10667_v21 }
0x1384   : > { %v12376_v1 = vpop.eup %12375  ;;  %v10688_v24 = vsub.f32 1.5, %v10687_v20 }
0x1385   : > { %v12378_v33 = vpop.eup %12377  ;;  %v10669_v51 = vmul.f32 %v12372_v37, %v10668_v61  ;;  %v10695_v47 = vmul.f32 %v12376_v1, %v10663_v19  ;;  %vm10701_vm4 = vweird.f32 %v12376_v1 }
0x1386   : > { %v10689_v54 = vmul.f32 %v12374_v55, %v10688_v24  ;;  %v10675_v35 = vmul.f32 %v12378_v33, %v10661_v28  ;;  %vm10681_vm5 = vweird.f32 %v12378_v33  ;;  %vm10702_vm7 = vmor %vm10700_vm6, %vm10701_vm4 }
0x1387   : > { %v10673_v50 = vsel %vm10672_vm1, %v12372_v37, %v10669_v51  ;;  %v10696_v2 = vmul.f32 %v12376_v1, %v10695_v47  ;;  %vm10682_vm9 = vmor %vm10680_vm8, %vm10681_vm5 }
0x1388   : > { %v10704_v41 = vmul.f32 %v10673_v50, %v10640_v13  ;;  %v10693_v26 = vsel %vm10692_vm3, %v12374_v55, %v10689_v54  ;;  %v10676_v25 = vmul.f32 %v12378_v33, %v10675_v35 }
0x1389   : > { %v10706_v10 = vmul.f32 %v10693_v26, %v10642_v59  ;;  %v10697_v22 = vmul.f32 0.5, %v10696_v2 }
0x138a   : > { %v10711_v31 = vmul.f32 %v12369_v40, %v10704_v41  ;;  %v10677_v12 = vmul.f32 0.5, %v10676_v25 }
0x138b   : > { %v10713_v63 = vmul.f32 %v12369_v40, %v10706_v10  ;;  %v10698_v14 = vsub.f32 1.5, %v10697_v22 }
0x138c   : > { %v10718_v27 = vadd.f32 %v12370_v53, %v10711_v31  ;;  %v10678_v3 = vsub.f32 1.5, %v10677_v12 }
0x138d   : > { %v10720_v38 = vadd.f32 %v12370_v53, %v10713_v63  ;;  %v10699_v36 = vmul.f32 %v12376_v1, %v10698_v14 }
0x138e   : > { %10722 = vst [vmem:[%s13357_s15] sm:$0xff] %v10718_v27  ;;  %v10679_v39 = vmul.f32 %v12378_v33, %v10678_v3 }
0x138f   : > { %10724 = vst [vmem:[%s13357_s15 + $0x10] sm:$0xff] %v10720_v38  ;;  %v10703_v42 = vsel %vm10702_vm7, %v12376_v1, %v10699_v36 }
0x1390   : > { %v10707_v0 = vmul.f32 %v10703_v42, %v17156_v6  ;;  %v10683_v18 = vsel %vm10682_vm9, %v12378_v33, %v10679_v39 }
0x1391   : > { %v10705_v15 = vmul.f32 %v10683_v18, %v17158_v8 }
0x1392   : > { %v10714_v62 = vmul.f32 %v12369_v40, %v10707_v0 }
0x1393   : > { %v10712_v9 = vmul.f32 %v12369_v40, %v10705_v15 }
0x1394   : > { %v10721_v59 = vadd.f32 %v12370_v53, %v10714_v62 }
0x1395   : > { %v10719_v13 = vadd.f32 %v12370_v53, %v10712_v9 }
0x1396   : > { %10725 = vst [vmem:[%s13357_s15 + $0x18] sm:$0xff] %v10721_v59 }
0x1397   : > { %10723 = vst [vmem:[%s13357_s15 + $0x8] sm:$0xff] %v10719_v13 }
0x1398 PF: > { %s17651_s23 = sld [smem:[#allocation37_spill]]  ;;  %s10740_s7 = sshll.u32 %s13357_s15, 4  ;;  %s10741_s7 = int_to_ptr.vmem [resolvable:$true] %s10740_s7 }
0x1399   : > { %s17652_s17 = sld [smem:[#allocation104_spill]]  ;;  %s10727_s21 = scalar_lea.sflag [#allocation5], %s13275_s13 }
0x139e   : > { %s11499_s11 = sshll.u32 %s17651_s23, 5 }
0x139f   : > { %s10739_s22 = scalar_lea.hbm %s17652_s17, %s11499_s11  ;;  %s12759_s6 = scalar_lea.hbm %s17652_s17, 64 }
0x13a0   : > { %s10742_s30 = sshll.u32 %s10739_s22, 4  ;;  %s10743_s30 = int_to_ptr.hbm [resolvable:$true] %s10742_s30 }
0x13a1   : > { %s12753_s29 = sshra.s32 %s10743_s30, 4  ;;  %s12754_s29 = int_to_ptr.hbm [resolvable:$true] %s12753_s29 }
0x13a2   : > { %s12755_s26 = scalar_lea.hbm %s12754_s29, 32  ;;  %p12760_p13 = scmp.lt.s32.totalorder %s12754_s29, %s17652_s17 }
0x13a3   : > { %p12756_p5 = scmp.ne.s32.totalorder %s12754_s29, %s12755_s26  ;;  %p12761_p1 = scmp.lt.s32.totalorder %s12759_s6, %s12755_s26 }
0x13a5   : > { %p12757_p8 = pnand %p12756_p5, %p13201_p0  ;;  %p12762_p6 = por %p12761_p1, %p12760_p13 }
0x13a7   : > { %p12758_p9 = pneg %p12757_p8 }
0x13a9   : > { %p12763_p2 = pnand %p12762_p6, %p12758_p9 }
0x13ab   : > { %12766 = shalt.err (!%p12763_p2)
}
0x13ac   : > { %s12900_s13 = smov 128   ;;  %s12901_s15 = smov 8  }
0x13ad   : > { %11583 = dma.vmem_to_hbm [thread:$0]  (%p13201_p0), %s10741_s7, 512, %s10743_s30, %s10727_s21, %s12900_s13, %s12900_s13, %s12901_s15  }
0x13ae PF: > { %s17653_s27 = sld [smem:[#allocation34_spill]]  ;;  %p11630_p4 = scmp.ge.s32.totalorder %s12885_s1, 2 }
0x13b0   : > { %p11624_p7 = pnand %p11630_p4, %p13213_p12 }
0x13b2   : > { %p11625_p10 = pneg %p11624_p7 }
0x13b4   : > { %s10757_s10 = sand.u32 1, %s17653_s27  }
0x13b5   : > { %s10758_s4 = scalar_lea.sflag [#allocation5], %s10757_s10 }
0x13b6   : > { %12840 = dma.done.wait (%p11625_p10), %s10758_s4, 512  }
0x13b7   : > { %12842 = vsyncadd (%p11625_p10), %s10758_s4, 4294966784  ;;  %s49_s1 = sadd.s32 1, %s12885_s1   ;;  %s17654_s24 = sld [smem:[#allocation32_spill]] }
0x13b8   : > { %p46_p11 = scmp.ge.s32.totalorder %s49_s1, 8   ;;  %s17655_s25 = sld [smem:[#allocation33_spill]] }
0x13b9   : > { %s17656_s26 = sld [smem:[#allocation42_spill]]  ;;  %s17662_s27 = smov %s12861_s28 }
0x13ba   : > { %s17657_s5 = sld [smem:[#allocation35_spill]]  ;;  %s17664_s0 = smov %s12877_s18 }
0x13bb   : > { %s17658_s29 = sld [smem:[#allocation43_spill]] }
0x13bc   : > { %s17659_s30 = sld [smem:[#allocation38_spill]] }
0x13bd   : > { %s17660_s20 = sld [smem:[#allocation40_spill]] }
0x13be   : > { %s17661_s19 = sld [smem:[#allocation41_spill]] }
0x13bf   :  { %48 = sbr.rel (!%p46_p11) target bundleno = 39 (0x27), region = 275 }
0x13c0   : > { %s17663_s28 = smov %s17657_s5 }
0x13c3   : > { %s17665_s18 = smov %s17660_s20 }
0x13c4   :  { %10764 = vsyncpa [#allocation4], 1 }
0x13c5   :  { %10766 = vsyncpa [#allocation4 + $0x1], 1 }
0x13c6   :  { %10767 = vsyncpa [#allocation7], 1 }
0x13c7   :  { %10769 = vsyncpa [#allocation7 + $0x1], 1 }
0x13c8   :  { %10770 = vsyncpa [#allocation10], 1 }
0x13c9   :  { %10772 = vsyncpa [#allocation10 + $0x1], 1 }
0x13ca   :  { %10773 = vsyncpa [#allocation13], 1 }
0x13cb   :  { %10775 = vsyncpa [#allocation13 + $0x1], 1 }
0x13cc   :  { %10776 = vsyncpa [#allocation16], 1 }
0x13cd   :  { %10778 = vsyncpa [#allocation16 + $0x1], 1 }
0x13ce   :  { %10779 = vsyncpa [#allocation19], 1 }
0x13cf   :  { %10781 = vsyncpa [#allocation19 + $0x1], 1 }
0x13d0   :  { %10782 = vsyncpa [#allocation22], 1 }
0x13d1   :  { %10783 = vsyncpa [#allocation5], 1 }
0x13d2   :  { %10785 = vsyncpa [#allocation5 + $0x1], 1 }

</bundles_post_ra>
